<compile_context>
chip_gen: v7x
topology: tpu7x:2x2x1
jax: 0.10.0
libtpu: 0.0.40
codegen_flags: <defaults>
</compile_context>

<pallas_src>
import functools

import jax
import jax.numpy as jnp
from jax.experimental import pallas as pl
from jax.experimental.pallas import tpu as pltpu


def _round_up(x, m):
    return ((x + m - 1) // m) * m


def _pad2(x, rows, cols):
    pr = rows - x.shape[0]
    pc = cols - x.shape[1]
    if pr == 0 and pc == 0:
        return x
    return jnp.pad(x, ((0, pr), (0, pc)))


# ----------------------------- Pallas kernels ------------------------------

def _fused_matmul_kernel(relu, has_res, a_ref, b_ref, s_ref, t_ref, *refs):
    """acc = sum_k a@b (bf16 in, f32 acc); epilogue: y=acc*s+t [+res] [relu]."""
    if has_res:
        r_ref, o_ref, acc_ref = refs
    else:
        o_ref, acc_ref = refs

    @pl.when(pl.program_id(2) == 0)
    def _():
        acc_ref[...] = jnp.zeros_like(acc_ref)

    acc_ref[...] += jnp.dot(a_ref[...], b_ref[...],
                            preferred_element_type=jnp.float32)

    @pl.when(pl.program_id(2) == pl.num_programs(2) - 1)
    def _():
        y = acc_ref[...] * s_ref[...] + t_ref[...]
        if has_res:
            y = y + r_ref[...]
        if relu:
            y = jnp.maximum(y, 0.0)
        o_ref[...] = y


def _maxpool_kernel(x_ref, o_ref):
    # Running max over the pooling-tap grid axis; output block stays resident.
    tap = pl.program_id(1)

    @pl.when(tap == 0)
    def _():
        o_ref[...] = x_ref[...]

    @pl.when(tap > 0)
    def _():
        o_ref[...] = jnp.maximum(o_ref[...], x_ref[...])


def _mean_pool_kernel(x_ref, o_ref):
    # x: (TB, H*W, C) -> (TB, C) global average pool
    o_ref[...] = jnp.mean(x_ref[...], axis=1)


# --------------------------- fused GEMM wrapper ------------------------------

def _choose_tk(K):
    Kp = _round_up(K, 128)
    if Kp <= 1024:
        return Kp, Kp                       # single K step, no K grid axis
    for tk in (512, 384, 256, 128):
        if Kp % tk == 0:
            return tk, Kp
    return 128, Kp


def fused_matmul(a, b, scale, shift, residual=None, relu=False):
    """y = act((a @ b) * scale + shift [+ residual]); bf16 MXU, f32 accumulate."""
    M, K = a.shape
    K2, N = b.shape
    assert K == K2
    TM = min(256, _round_up(M, 8))
    TN = min(256, _round_up(N, 128))
    TK, Kp = _choose_tk(K)
    Mp = _round_up(M, TM)
    Np = _round_up(N, TN)

    a_p = _pad2(a.astype(jnp.bfloat16), Mp, Kp)
    b_p = _pad2(b.astype(jnp.bfloat16), Kp, Np)
    s_p = _pad2(scale.astype(jnp.float32).reshape(1, N), 1, Np)
    t_p = _pad2(shift.astype(jnp.float32).reshape(1, N), 1, Np)

    inputs = [a_p, b_p, s_p, t_p]
    in_specs = [
        pl.BlockSpec((TM, TK), lambda i, j, k: (i, k)),
        pl.BlockSpec((TK, TN), lambda i, j, k: (k, j)),
        pl.BlockSpec((1, TN), lambda i, j, k: (0, j)),
        pl.BlockSpec((1, TN), lambda i, j, k: (0, j)),
    ]
    has_res = residual is not None
    if has_res:
        r_p = _pad2(residual.astype(jnp.float32), Mp, Np)
        inputs.append(r_p)
        in_specs.append(pl.BlockSpec((TM, TN), lambda i, j, k: (i, j)))

    flops = 2 * M * N * K
    bytes_accessed = ((Mp * Kp + Kp * Np) * 2            # bf16 operands
                      + Mp * Np * 4 * (2 if has_res else 1)
                      + 2 * Np * 4)

    out = pl.pallas_call(
        functools.partial(_fused_matmul_kernel, relu, has_res),
        out_shape=jax.ShapeDtypeStruct((Mp, Np), jnp.float32),
        grid_spec=pltpu.PrefetchScalarGridSpec(
            num_scalar_prefetch=0,
            grid=(Mp // TM, Np // TN, Kp // TK),
            in_specs=in_specs,
            out_specs=pl.BlockSpec((TM, TN), lambda i, j, k: (i, j)),
            scratch_shapes=[pltpu.VMEM((TM, TN), jnp.float32)]),
        compiler_params=pltpu.CompilerParams(
            dimension_semantics=("parallel", "parallel", "arbitrary")),
        cost_estimate=pl.CostEstimate(flops=flops, transcendentals=0,
                                      bytes_accessed=bytes_accessed),
    )(*inputs)
    if Mp != M or Np != N:
        out = out[:M, :N]
    return out


# ------------------------------ layer wrappers ------------------------------

def conv2d_bn_act(x_nhwc, w_oihw, scale, shift, *, stride, pad, relu,
                  residual=None):
    """Conv (im2col + fused GEMM) with folded-BN scale/shift, optional
    residual-add and ReLU applied in the GEMM epilogue."""
    N, H, W, C = x_nhwc.shape
    Cout, Cin, kh, kw = w_oihw.shape
    assert Cin == C
    Ho = (H + 2 * pad - kh) // stride + 1
    Wo = (W + 2 * pad - kw) // stride + 1

    xb = x_nhwc.astype(jnp.bfloat16)
    if pad:
        xb = jnp.pad(xb, ((0, 0), (pad, pad), (pad, pad), (0, 0)))
    # TODO(synk): stream conv taps directly via a kh*kw grid axis in the GEMM
    # (offset index_map into the padded NHWC input) instead of materializing
    # the im2col patch matrix in HBM.
    taps = []
    for i in range(kh):
        for j in range(kw):
            taps.append(xb[:, i::stride, j::stride, :][:, :Ho, :Wo, :])
    patches = jnp.stack(taps, axis=3).reshape(N * Ho * Wo, kh * kw * C)
    wmat = jnp.transpose(w_oihw, (2, 3, 1, 0)).reshape(kh * kw * Cin, Cout)
    res2 = residual.reshape(N * Ho * Wo, Cout) if residual is not None else None
    out = fused_matmul(patches, wmat, scale, shift, residual=res2, relu=relu)
    return out.reshape(N, Ho, Wo, Cout)


def maxpool2d(x_nhwc, k=3, stride=2, pad=1):
    N, H, W, C = x_nhwc.shape
    Ho = (H + 2 * pad - k) // stride + 1
    Wo = (W + 2 * pad - k) // stride + 1
    xp = jnp.pad(x_nhwc, ((0, 0), (pad, pad), (pad, pad), (0, 0)),
                 constant_values=-jnp.inf)
    taps = []
    for i in range(k):
        for j in range(k):
            taps.append(xp[:, i::stride, j::stride, :][:, :Ho, :Wo, :])
    rows = N * Ho * Wo
    stacked = jnp.stack(taps, axis=0).reshape(k * k, rows, C)

    TR = min(512, _round_up(rows, 8))
    rows_p = _round_up(rows, TR)
    if rows_p != rows:
        stacked = jnp.pad(stacked, ((0, 0), (0, rows_p - rows), (0, 0)))

    out = pl.pallas_call(
        _maxpool_kernel,
        out_shape=jax.ShapeDtypeStruct((rows_p, C), jnp.float32),
        grid_spec=pltpu.PrefetchScalarGridSpec(
            num_scalar_prefetch=0,
            grid=(rows_p // TR, k * k),
            in_specs=[pl.BlockSpec((None, TR, C), lambda r, t: (t, r, 0))],
            out_specs=pl.BlockSpec((TR, C), lambda r, t: (r, 0))),
        compiler_params=pltpu.CompilerParams(
            dimension_semantics=("parallel", "arbitrary")),
    )(stacked)
    return out[:rows].reshape(N, Ho, Wo, C)


def global_avg_pool(x_nhwc):
    N, H, W, C = x_nhwc.shape
    x3 = x_nhwc.reshape(N, H * W, C)
    TB = 8 if N % 8 == 0 else N
    return pl.pallas_call(
        _mean_pool_kernel,
        out_shape=jax.ShapeDtypeStruct((N, C), jnp.float32),
        grid_spec=pltpu.PrefetchScalarGridSpec(
            num_scalar_prefetch=0,
            grid=(N // TB,),
            in_specs=[pl.BlockSpec((TB, H * W, C), lambda b: (b, 0, 0))],
            out_specs=pl.BlockSpec((TB, C), lambda b: (b, 0))),
        compiler_params=pltpu.CompilerParams(
            dimension_semantics=("parallel",)),
    )(x3)


def linear(x, w_out_in, b):
    # Bias folded into the GEMM epilogue (scale=1, shift=b).
    ones = jnp.ones((w_out_in.shape[0],), jnp.float32)
    return fused_matmul(x, jnp.transpose(w_out_in), ones, b, relu=False)


# ------------------------------ ResNet18 model ------------------------------

def basic_block(x, p):
    stride = p['stride']
    out = conv2d_bn_act(x, p['conv1_w'], *p['bn1'],
                        stride=stride, pad=1, relu=True)
    if 'down_w' in p:
        identity = conv2d_bn_act(x, p['down_w'], *p['down_bn'],
                                 stride=stride, pad=0, relu=False)
    else:
        identity = x
    # conv2 + bn2 + residual-add + ReLU all fused into one GEMM epilogue.
    return conv2d_bn_act(out, p['conv2_w'], *p['bn2'],
                         stride=1, pad=1, relu=True, residual=identity)


def resnet18_forward(params, x_nchw):
    # PyTorch NCHW input -> NHWC for kernels
    x = jnp.transpose(x_nchw, (0, 2, 3, 1)).astype(jnp.float32)
    x = conv2d_bn_act(x, params['conv1_w'], *params['bn1'],
                      stride=2, pad=3, relu=True)
    x = maxpool2d(x, k=3, stride=2, pad=1)
    for blocks in params['layers']:
        for blk in blocks:
            x = basic_block(x, blk)
    feat = global_avg_pool(x)                       # (N, 512)
    # fc = Sequential(Dropout(0.5), Linear(512, num_classes))
    # Dropout(0.5): inference semantics (identity).
    # TODO(synk): train-mode stochastic dropout mask via pltpu.prng_random_bits.
    logits = linear(feat, params['fc_w'], params['fc_b'])
    return logits


# --------------------------- deterministic params ---------------------------

def init_params(key, num_classes=100):
    counter = [0]

    def nk():
        counter[0] += 1
        return jax.random.fold_in(key, counter[0])

    def conv_w(cout, cin, k):
        fan_in = cin * k * k
        std = (2.0 / fan_in) ** 0.5
        return std * jax.random.normal(nk(), (cout, cin, k, k), jnp.float32)

    def bn_params(c):
        # synthetic eval-mode BN: fold (gamma, beta, running_mean, running_var)
        # into (scale, shift) so the kernel computes x*scale + shift.
        eps = 1e-5
        gamma = 1.0 + 0.1 * jax.random.normal(nk(), (c,), jnp.float32)
        beta = 0.1 * jax.random.normal(nk(), (c,), jnp.float32)
        mean = 0.1 * jax.random.normal(nk(), (c,), jnp.float32)
        var = jnp.abs(1.0 + 0.1 * jax.random.normal(nk(), (c,), jnp.float32))
        scale = gamma * jax.lax.rsqrt(var + eps)
        shift = beta - mean * scale
        return (scale, shift)

    params = {'conv1_w': conv_w(64, 3, 7), 'bn1': bn_params(64)}
    layers = []
    in_c = 64
    for li, c in enumerate((64, 128, 256, 512)):
        blocks = []
        for bi in range(2):
            stride = 2 if (li > 0 and bi == 0) else 1
            blk = {
                'conv1_w': conv_w(c, in_c, 3), 'bn1': bn_params(c),
                'conv2_w': conv_w(c, c, 3), 'bn2': bn_params(c),
                'stride': stride,
            }
            if stride != 1 or in_c != c:
                blk['down_w'] = conv_w(c, in_c, 1)
                blk['down_bn'] = bn_params(c)
            blocks.append(blk)
            in_c = c
        layers.append(blocks)
    params['layers'] = layers
    bound = 1.0 / (512 ** 0.5)
    params['fc_w'] = jax.random.uniform(nk(), (num_classes, 512),
                                        jnp.float32, -bound, bound)
    params['fc_b'] = jax.random.uniform(nk(), (num_classes,),
                                        jnp.float32, -bound, bound)
    return params


# ----------------------------------- main -----------------------------------

if __name__ == "__main__":
    # smallest spatial size that survives resnet18's 5x downsampling: 32x32
    x = jax.random.normal(jax.random.PRNGKey(0), (2, 3, 32, 32), jnp.float32)
    params = init_params(jax.random.PRNGKey(42), num_classes=100)

    fwd = jax.jit(functools.partial(resnet18_forward, params))
    logits = fwd(x)
    jax.block_until_ready(logits)

    assert logits.shape == (2, 100), logits.shape
    assert bool(jnp.all(jnp.isfinite(logits)))
    print("KERNEL_OK")
</pallas_src>

<mosaic_0001>
module attributes {stable_mosaic.version = 11 : i64} {
  func.func @_fused_matmul_kernel(%arg0: i32, %arg1: i32, %arg2: i32, %arg3: memref<256x256xbf16, #tpu.memory_space<vmem>>, %arg4: memref<256x128xbf16, #tpu.memory_space<vmem>>, %arg5: memref<1x128xf32, #tpu.memory_space<vmem>>, %arg6: memref<1x128xf32, #tpu.memory_space<vmem>>, %arg7: memref<256x128xf32, #tpu.memory_space<vmem>>, %arg8: memref<256x128xf32, #tpu.memory_space<vmem>>) attributes {dimension_semantics = [#tpu.dimension_semantics<parallel>, #tpu.dimension_semantics<parallel>, #tpu.dimension_semantics<arbitrary>], iteration_bounds = array<i64: 2, 1, 1>, scalar_prefetch = 0 : i64, scratch_operands = 1 : i64, tpu.core_type = #tpu.core_type<tc>, window_params = [{transform_indices = @transform_0, window_bounds = array<i64: 256, 256>}, {transform_indices = @transform_1, window_bounds = array<i64: 256, 128>}, {transform_indices = @transform_2, window_bounds = array<i64: 1, 128>}, {transform_indices = @transform_3, window_bounds = array<i64: 1, 128>}, {transform_indices = @transform_4, window_bounds = array<i64: 256, 128>}]} {
    %c0_i32 = arith.constant 0 : i32
    %0 = arith.cmpi eq, %arg2, %c0_i32 : i32
    %1 = arith.extui %0 : i1 to i32
    %c0_i32_0 = arith.constant 0 : i32
    %2 = arith.cmpi ne, %1, %c0_i32_0 : i32
    scf.if %2 {
      %cst_10 = arith.constant 0.000000e+00 : f32
      %12 = vector.broadcast %cst_10 : f32 to vector<256x128xf32>
      %c0_11 = arith.constant 0 : index
      %c0_12 = arith.constant 0 : index
      %13 = vector.load %arg8[%c0_11, %c0_12] : memref<256x128xf32, #tpu.memory_space<vmem>>, vector<256x128xf32>
      tpu.vector_store %arg8[%c0_11, %c0_12], %12 {strides = array<i32>} : memref<256x128xf32, #tpu.memory_space<vmem>>, vector<256x128xf32>,
    } else {
    }
    %c0 = arith.constant 0 : index
    %c0_1 = arith.constant 0 : index
    %3 = vector.load %arg8[%c0, %c0_1] : memref<256x128xf32, #tpu.memory_space<vmem>>, vector<256x128xf32>
    %c0_2 = arith.constant 0 : index
    %c0_3 = arith.constant 0 : index
    %4 = vector.load %arg3[%c0_2, %c0_3] : memref<256x256xbf16, #tpu.memory_space<vmem>>, vector<256x256xbf16>
    %c0_4 = arith.constant 0 : index
    %c0_5 = arith.constant 0 : index
    %5 = vector.load %arg4[%c0_4, %c0_5] : memref<256x128xbf16, #tpu.memory_space<vmem>>, vector<256x128xbf16>
    %cst = arith.constant dense<0.000000e+00> : vector<256x128xf32>
    %6 = tpu.matmul %4, %5, %cst {dimension_numbers = #tpu.dot_dimension_numbers<[1], [0], [0], [1], [0, 0, 1, 1], [], []>} : vector<256x256xbf16>, vector<256x128xbf16>, vector<256x128xf32> -> vector<256x128xf32>
    %7 = arith.addf %3, %6 : vector<256x128xf32>
    %c0_6 = arith.constant 0 : index
    %c0_7 = arith.constant 0 : index
    %8 = vector.load %arg8[%c0_6, %c0_7] : memref<256x128xf32, #tpu.memory_space<vmem>>, vector<256x128xf32>
    tpu.vector_store %arg8[%c0_6, %c0_7], %7 {strides = array<i32>} : memref<256x128xf32, #tpu.memory_space<vmem>>, vector<256x128xf32>,
    %c0_i32_8 = arith.constant 0 : i32
    %9 = arith.cmpi eq, %arg2, %c0_i32_8 : i32
    %10 = arith.extui %9 : i1 to i32
    %c0_i32_9 = arith.constant 0 : i32
    %11 = arith.cmpi ne, %10, %c0_i32_9 : i32
    scf.if %11 {
      %c0_10 = arith.constant 0 : index
      %c0_11 = arith.constant 0 : index
      %12 = vector.load %arg8[%c0_10, %c0_11] : memref<256x128xf32, #tpu.memory_space<vmem>>, vector<256x128xf32>
      %c0_12 = arith.constant 0 : index
      %c0_13 = arith.constant 0 : index
      %13 = vector.load %arg5[%c0_12, %c0_13] : memref<1x128xf32, #tpu.memory_space<vmem>>, vector<1x128xf32>
      %14 = vector.broadcast %13 : vector<1x128xf32> to vector<256x128xf32>
      %15 = arith.mulf %12, %14 : vector<256x128xf32>
      %c0_14 = arith.constant 0 : index
      %c0_15 = arith.constant 0 : index
      %16 = vector.load %arg6[%c0_14, %c0_15] : memref<1x128xf32, #tpu.memory_space<vmem>>, vector<1x128xf32>
      %17 = vector.broadcast %16 : vector<1x128xf32> to vector<256x128xf32>
      %18 = arith.addf %15, %17 : vector<256x128xf32>
      %cst_16 = arith.constant 0.000000e+00 : f32
      %19 = vector.broadcast %cst_16 : f32 to vector<256x128xf32>
      %20 = arith.maximumf %18, %19 : vector<256x128xf32>
      %c0_17 = arith.constant 0 : index
      %c0_18 = arith.constant 0 : index
      %21 = vector.load %arg7[%c0_17, %c0_18] : memref<256x128xf32, #tpu.memory_space<vmem>>, vector<256x128xf32>
      tpu.vector_store %arg7[%c0_17, %c0_18], %20 {strides = array<i32>} : memref<256x128xf32, #tpu.memory_space<vmem>>, vector<256x128xf32>,
    } else {
    }
    return
  }
  func.func @transform_0(%arg0: i32, %arg1: i32, %arg2: i32) -> (i32, i32) {
    %c0_i32 = arith.constant 0 : i32
    return %arg0, %arg2 : i32, i32
  }
  func.func @transform_1(%arg0: i32, %arg1: i32, %arg2: i32) -> (i32, i32) {
    %c0_i32 = arith.constant 0 : i32
    return %arg2, %arg1 : i32, i32
  }
  func.func @transform_2(%arg0: i32, %arg1: i32, %arg2: i32) -> (i32, i32) {
    %c0_i32 = arith.constant 0 : i32
    %c0_i32_0 = arith.constant 0 : i32
    return %c0_i32, %arg1 : i32, i32
  }
  func.func @transform_3(%arg0: i32, %arg1: i32, %arg2: i32) -> (i32, i32) {
    %c0_i32 = arith.constant 0 : i32
    %c0_i32_0 = arith.constant 0 : i32
    return %c0_i32, %arg1 : i32, i32
  }
  func.func @transform_4(%arg0: i32, %arg1: i32, %arg2: i32) -> (i32, i32) {
    %c0_i32 = arith.constant 0 : i32
    return %arg0, %arg1 : i32, i32
  }
}

module attributes {stable_mosaic.version = 11 : i64} {
  func.func @_maxpool_kernel(%arg0: i32, %arg1: i32, %arg2: memref<1x128x64xf32, #tpu.memory_space<vmem>>, %arg3: memref<128x64xf32, #tpu.memory_space<vmem>>) attributes {dimension_semantics = [#tpu.dimension_semantics<parallel>, #tpu.dimension_semantics<arbitrary>], iteration_bounds = array<i64: 1, 9>, scalar_prefetch = 0 : i64, scratch_operands = 0 : i64, tpu.core_type = #tpu.core_type<tc>, window_params = [{transform_indices = @transform_0, window_bounds = array<i64: 1, 128, 64>}, {transform_indices = @transform_1, window_bounds = array<i64: 128, 64>}]} {
    %c0_i32 = arith.constant 0 : i32
    %0 = arith.cmpi eq, %arg1, %c0_i32 : i32
    %1 = arith.extui %0 : i1 to i32
    %c0_i32_0 = arith.constant 0 : i32
    %2 = arith.cmpi ne, %1, %c0_i32_0 : i32
    scf.if %2 {
      %c0 = arith.constant 0 : index
      %c0_3 = arith.constant 0 : index
      %c0_4 = arith.constant 0 : index
      %6 = vector.load %arg2[%c0, %c0_3, %c0_4] : memref<1x128x64xf32, #tpu.memory_space<vmem>>, vector<1x128x64xf32>
      %7 = vector.shape_cast %6 : vector<1x128x64xf32> to vector<128x64xf32>
      %c0_5 = arith.constant 0 : index
      %c0_6 = arith.constant 0 : index
      %8 = vector.load %arg3[%c0_5, %c0_6] : memref<128x64xf32, #tpu.memory_space<vmem>>, vector<128x64xf32>
      tpu.vector_store %arg3[%c0_5, %c0_6], %7 {strides = array<i32>} : memref<128x64xf32, #tpu.memory_space<vmem>>, vector<128x64xf32>,
    } else {
    }
    %c0_i32_1 = arith.constant 0 : i32
    %3 = arith.cmpi sgt, %arg1, %c0_i32_1 : i32
    %4 = arith.extui %3 : i1 to i32
    %c0_i32_2 = arith.constant 0 : i32
    %5 = arith.cmpi ne, %4, %c0_i32_2 : i32
    scf.if %5 {
      %c0 = arith.constant 0 : index
      %c0_3 = arith.constant 0 : index
      %6 = vector.load %arg3[%c0, %c0_3] : memref<128x64xf32, #tpu.memory_space<vmem>>, vector<128x64xf32>
      %c0_4 = arith.constant 0 : index
      %c0_5 = arith.constant 0 : index
      %c0_6 = arith.constant 0 : index
      %7 = vector.load %arg2[%c0_4, %c0_5, %c0_6] : memref<1x128x64xf32, #tpu.memory_space<vmem>>, vector<1x128x64xf32>
      %8 = vector.shape_cast %7 : vector<1x128x64xf32> to vector<128x64xf32>
      %9 = arith.maximumf %6, %8 : vector<128x64xf32>
      %c0_7 = arith.constant 0 : index
      %c0_8 = arith.constant 0 : index
      %10 = vector.load %arg3[%c0_7, %c0_8] : memref<128x64xf32, #tpu.memory_space<vmem>>, vector<128x64xf32>
      tpu.vector_store %arg3[%c0_7, %c0_8], %9 {strides = array<i32>} : memref<128x64xf32, #tpu.memory_space<vmem>>, vector<128x64xf32>,
    } else {
    }
    return
  }
  func.func @transform_0(%arg0: i32, %arg1: i32) -> (i32, i32, i32) {
    %c0_i32 = arith.constant 0 : i32
    %c0_i32_0 = arith.constant 0 : i32
    return %arg1, %arg0, %c0_i32 : i32, i32, i32
  }
  func.func @transform_1(%arg0: i32, %arg1: i32) -> (i32, i32) {
    %c0_i32 = arith.constant 0 : i32
    %c0_i32_0 = arith.constant 0 : i32
    return %arg0, %c0_i32 : i32, i32
  }
}

module attributes {stable_mosaic.version = 11 : i64} {
  func.func @_fused_matmul_kernel(%arg0: i32, %arg1: i32, %arg2: i32, %arg3: memref<128x640xbf16, #tpu.memory_space<vmem>>, %arg4: memref<640x128xbf16, #tpu.memory_space<vmem>>, %arg5: memref<1x128xf32, #tpu.memory_space<vmem>>, %arg6: memref<1x128xf32, #tpu.memory_space<vmem>>, %arg7: memref<128x128xf32, #tpu.memory_space<vmem>>, %arg8: memref<128x128xf32, #tpu.memory_space<vmem>>) attributes {dimension_semantics = [#tpu.dimension_semantics<parallel>, #tpu.dimension_semantics<parallel>, #tpu.dimension_semantics<arbitrary>], iteration_bounds = array<i64: 1, 1, 1>, scalar_prefetch = 0 : i64, scratch_operands = 1 : i64, tpu.core_type = #tpu.core_type<tc>, window_params = [{transform_indices = @transform_0, window_bounds = array<i64: 128, 640>}, {transform_indices = @transform_1, window_bounds = array<i64: 640, 128>}, {transform_indices = @transform_2, window_bounds = array<i64: 1, 128>}, {transform_indices = @transform_3, window_bounds = array<i64: 1, 128>}, {transform_indices = @transform_4, window_bounds = array<i64: 128, 128>}]} {
    %c0_i32 = arith.constant 0 : i32
    %0 = arith.cmpi eq, %arg2, %c0_i32 : i32
    %1 = arith.extui %0 : i1 to i32
    %c0_i32_0 = arith.constant 0 : i32
    %2 = arith.cmpi ne, %1, %c0_i32_0 : i32
    scf.if %2 {
      %cst_10 = arith.constant 0.000000e+00 : f32
      %12 = vector.broadcast %cst_10 : f32 to vector<128x128xf32>
      %c0_11 = arith.constant 0 : index
      %c0_12 = arith.constant 0 : index
      %13 = vector.load %arg8[%c0_11, %c0_12] : memref<128x128xf32, #tpu.memory_space<vmem>>, vector<128x128xf32>
      tpu.vector_store %arg8[%c0_11, %c0_12], %12 {strides = array<i32>} : memref<128x128xf32, #tpu.memory_space<vmem>>, vector<128x128xf32>,
    } else {
    }
    %c0 = arith.constant 0 : index
    %c0_1 = arith.constant 0 : index
    %3 = vector.load %arg8[%c0, %c0_1] : memref<128x128xf32, #tpu.memory_space<vmem>>, vector<128x128xf32>
    %c0_2 = arith.constant 0 : index
    %c0_3 = arith.constant 0 : index
    %4 = vector.load %arg3[%c0_2, %c0_3] : memref<128x640xbf16, #tpu.memory_space<vmem>>, vector<128x640xbf16>
    %c0_4 = arith.constant 0 : index
    %c0_5 = arith.constant 0 : index
    %5 = vector.load %arg4[%c0_4, %c0_5] : memref<640x128xbf16, #tpu.memory_space<vmem>>, vector<640x128xbf16>
    %cst = arith.constant dense<0.000000e+00> : vector<128x128xf32>
    %6 = tpu.matmul %4, %5, %cst {dimension_numbers = #tpu.dot_dimension_numbers<[1], [0], [0], [1], [0, 0, 1, 1], [], []>} : vector<128x640xbf16>, vector<640x128xbf16>, vector<128x128xf32> -> vector<128x128xf32>
    %7 = arith.addf %3, %6 : vector<128x128xf32>
    %c0_6 = arith.constant 0 : index
    %c0_7 = arith.constant 0 : index
    %8 = vector.load %arg8[%c0_6, %c0_7] : memref<128x128xf32, #tpu.memory_space<vmem>>, vector<128x128xf32>
    tpu.vector_store %arg8[%c0_6, %c0_7], %7 {strides = array<i32>} : memref<128x128xf32, #tpu.memory_space<vmem>>, vector<128x128xf32>,
    %c0_i32_8 = arith.constant 0 : i32
    %9 = arith.cmpi eq, %arg2, %c0_i32_8 : i32
    %10 = arith.extui %9 : i1 to i32
    %c0_i32_9 = arith.constant 0 : i32
    %11 = arith.cmpi ne, %10, %c0_i32_9 : i32
    scf.if %11 {
      %c0_10 = arith.constant 0 : index
      %c0_11 = arith.constant 0 : index
      %12 = vector.load %arg8[%c0_10, %c0_11] : memref<128x128xf32, #tpu.memory_space<vmem>>, vector<128x128xf32>
      %c0_12 = arith.constant 0 : index
      %c0_13 = arith.constant 0 : index
      %13 = vector.load %arg5[%c0_12, %c0_13] : memref<1x128xf32, #tpu.memory_space<vmem>>, vector<1x128xf32>
      %14 = vector.broadcast %13 : vector<1x128xf32> to vector<128x128xf32>
      %15 = arith.mulf %12, %14 : vector<128x128xf32>
      %c0_14 = arith.constant 0 : index
      %c0_15 = arith.constant 0 : index
      %16 = vector.load %arg6[%c0_14, %c0_15] : memref<1x128xf32, #tpu.memory_space<vmem>>, vector<1x128xf32>
      %17 = vector.broadcast %16 : vector<1x128xf32> to vector<128x128xf32>
      %18 = arith.addf %15, %17 : vector<128x128xf32>
      %cst_16 = arith.constant 0.000000e+00 : f32
      %19 = vector.broadcast %cst_16 : f32 to vector<128x128xf32>
      %20 = arith.maximumf %18, %19 : vector<128x128xf32>
      %c0_17 = arith.constant 0 : index
      %c0_18 = arith.constant 0 : index
      %21 = vector.load %arg7[%c0_17, %c0_18] : memref<128x128xf32, #tpu.memory_space<vmem>>, vector<128x128xf32>
      tpu.vector_store %arg7[%c0_17, %c0_18], %20 {strides = array<i32>} : memref<128x128xf32, #tpu.memory_space<vmem>>, vector<128x128xf32>,
    } else {
    }
    return
  }
  func.func @transform_0(%arg0: i32, %arg1: i32, %arg2: i32) -> (i32, i32) {
    %c0_i32 = arith.constant 0 : i32
    return %arg0, %arg2 : i32, i32
  }
  func.func @transform_1(%arg0: i32, %arg1: i32, %arg2: i32) -> (i32, i32) {
    %c0_i32 = arith.constant 0 : i32
    return %arg2, %arg1 : i32, i32
  }
  func.func @transform_2(%arg0: i32, %arg1: i32, %arg2: i32) -> (i32, i32) {
    %c0_i32 = arith.constant 0 : i32
    %c0_i32_0 = arith.constant 0 : i32
    return %c0_i32, %arg1 : i32, i32
  }
  func.func @transform_3(%arg0: i32, %arg1: i32, %arg2: i32) -> (i32, i32) {
    %c0_i32 = arith.constant 0 : i32
    %c0_i32_0 = arith.constant 0 : i32
    return %c0_i32, %arg1 : i32, i32
  }
  func.func @transform_4(%arg0: i32, %arg1: i32, %arg2: i32) -> (i32, i32) {
    %c0_i32 = arith.constant 0 : i32
    return %arg0, %arg1 : i32, i32
  }
}

module attributes {stable_mosaic.version = 11 : i64} {
  func.func @_fused_matmul_kernel(%arg0: i32, %arg1: i32, %arg2: i32, %arg3: memref<128x640xbf16, #tpu.memory_space<vmem>>, %arg4: memref<640x128xbf16, #tpu.memory_space<vmem>>, %arg5: memref<1x128xf32, #tpu.memory_space<vmem>>, %arg6: memref<1x128xf32, #tpu.memory_space<vmem>>, %arg7: memref<128x128xf32, #tpu.memory_space<vmem>>, %arg8: memref<128x128xf32, #tpu.memory_space<vmem>>, %arg9: memref<128x128xf32, #tpu.memory_space<vmem>>) attributes {dimension_semantics = [#tpu.dimension_semantics<parallel>, #tpu.dimension_semantics<parallel>, #tpu.dimension_semantics<arbitrary>], iteration_bounds = array<i64: 1, 1, 1>, scalar_prefetch = 0 : i64, scratch_operands = 1 : i64, tpu.core_type = #tpu.core_type<tc>, window_params = [{transform_indices = @transform_0, window_bounds = array<i64: 128, 640>}, {transform_indices = @transform_1, window_bounds = array<i64: 640, 128>}, {transform_indices = @transform_2, window_bounds = array<i64: 1, 128>}, {transform_indices = @transform_3, window_bounds = array<i64: 1, 128>}, {transform_indices = @transform_4, window_bounds = array<i64: 128, 128>}, {transform_indices = @transform_5, window_bounds = array<i64: 128, 128>}]} {
    %c0_i32 = arith.constant 0 : i32
    %0 = arith.cmpi eq, %arg2, %c0_i32 : i32
    %1 = arith.extui %0 : i1 to i32
    %c0_i32_0 = arith.constant 0 : i32
    %2 = arith.cmpi ne, %1, %c0_i32_0 : i32
    scf.if %2 {
      %cst_10 = arith.constant 0.000000e+00 : f32
      %12 = vector.broadcast %cst_10 : f32 to vector<128x128xf32>
      %c0_11 = arith.constant 0 : index
      %c0_12 = arith.constant 0 : index
      %13 = vector.load %arg9[%c0_11, %c0_12] : memref<128x128xf32, #tpu.memory_space<vmem>>, vector<128x128xf32>
      tpu.vector_store %arg9[%c0_11, %c0_12], %12 {strides = array<i32>} : memref<128x128xf32, #tpu.memory_space<vmem>>, vector<128x128xf32>,
    } else {
    }
    %c0 = arith.constant 0 : index
    %c0_1 = arith.constant 0 : index
    %3 = vector.load %arg9[%c0, %c0_1] : memref<128x128xf32, #tpu.memory_space<vmem>>, vector<128x128xf32>
    %c0_2 = arith.constant 0 : index
    %c0_3 = arith.constant 0 : index
    %4 = vector.load %arg3[%c0_2, %c0_3] : memref<128x640xbf16, #tpu.memory_space<vmem>>, vector<128x640xbf16>
    %c0_4 = arith.constant 0 : index
    %c0_5 = arith.constant 0 : index
    %5 = vector.load %arg4[%c0_4, %c0_5] : memref<640x128xbf16, #tpu.memory_space<vmem>>, vector<640x128xbf16>
    %cst = arith.constant dense<0.000000e+00> : vector<128x128xf32>
    %6 = tpu.matmul %4, %5, %cst {dimension_numbers = #tpu.dot_dimension_numbers<[1], [0], [0], [1], [0, 0, 1, 1], [], []>} : vector<128x640xbf16>, vector<640x128xbf16>, vector<128x128xf32> -> vector<128x128xf32>
    %7 = arith.addf %3, %6 : vector<128x128xf32>
    %c0_6 = arith.constant 0 : index
    %c0_7 = arith.constant 0 : index
    %8 = vector.load %arg9[%c0_6, %c0_7] : memref<128x128xf32, #tpu.memory_space<vmem>>, vector<128x128xf32>
    tpu.vector_store %arg9[%c0_6, %c0_7], %7 {strides = array<i32>} : memref<128x128xf32, #tpu.memory_space<vmem>>, vector<128x128xf32>,
    %c0_i32_8 = arith.constant 0 : i32
    %9 = arith.cmpi eq, %arg2, %c0_i32_8 : i32
    %10 = arith.extui %9 : i1 to i32
    %c0_i32_9 = arith.constant 0 : i32
    %11 = arith.cmpi ne, %10, %c0_i32_9 : i32
    scf.if %11 {
      %c0_10 = arith.constant 0 : index
      %c0_11 = arith.constant 0 : index
      %12 = vector.load %arg9[%c0_10, %c0_11] : memref<128x128xf32, #tpu.memory_space<vmem>>, vector<128x128xf32>
      %c0_12 = arith.constant 0 : index
      %c0_13 = arith.constant 0 : index
      %13 = vector.load %arg5[%c0_12, %c0_13] : memref<1x128xf32, #tpu.memory_space<vmem>>, vector<1x128xf32>
      %14 = vector.broadcast %13 : vector<1x128xf32> to vector<128x128xf32>
      %15 = arith.mulf %12, %14 : vector<128x128xf32>
      %c0_14 = arith.constant 0 : index
      %c0_15 = arith.constant 0 : index
      %16 = vector.load %arg6[%c0_14, %c0_15] : memref<1x128xf32, #tpu.memory_space<vmem>>, vector<1x128xf32>
      %17 = vector.broadcast %16 : vector<1x128xf32> to vector<128x128xf32>
      %18 = arith.addf %15, %17 : vector<128x128xf32>
      %c0_16 = arith.constant 0 : index
      %c0_17 = arith.constant 0 : index
      %19 = vector.load %arg7[%c0_16, %c0_17] : memref<128x128xf32, #tpu.memory_space<vmem>>, vector<128x128xf32>
      %20 = arith.addf %18, %19 : vector<128x128xf32>
      %cst_18 = arith.constant 0.000000e+00 : f32
      %21 = vector.broadcast %cst_18 : f32 to vector<128x128xf32>
      %22 = arith.maximumf %20, %21 : vector<128x128xf32>
      %c0_19 = arith.constant 0 : index
      %c0_20 = arith.constant 0 : index
      %23 = vector.load %arg8[%c0_19, %c0_20] : memref<128x128xf32, #tpu.memory_space<vmem>>, vector<128x128xf32>
      tpu.vector_store %arg8[%c0_19, %c0_20], %22 {strides = array<i32>} : memref<128x128xf32, #tpu.memory_space<vmem>>, vector<128x128xf32>,
    } else {
    }
    return
  }
  func.func @transform_0(%arg0: i32, %arg1: i32, %arg2: i32) -> (i32, i32) {
    %c0_i32 = arith.constant 0 : i32
    return %arg0, %arg2 : i32, i32
  }
  func.func @transform_1(%arg0: i32, %arg1: i32, %arg2: i32) -> (i32, i32) {
    %c0_i32 = arith.constant 0 : i32
    return %arg2, %arg1 : i32, i32
  }
  func.func @transform_2(%arg0: i32, %arg1: i32, %arg2: i32) -> (i32, i32) {
    %c0_i32 = arith.constant 0 : i32
    %c0_i32_0 = arith.constant 0 : i32
    return %c0_i32, %arg1 : i32, i32
  }
  func.func @transform_3(%arg0: i32, %arg1: i32, %arg2: i32) -> (i32, i32) {
    %c0_i32 = arith.constant 0 : i32
    %c0_i32_0 = arith.constant 0 : i32
    return %c0_i32, %arg1 : i32, i32
  }
  func.func @transform_4(%arg0: i32, %arg1: i32, %arg2: i32) -> (i32, i32) {
    %c0_i32 = arith.constant 0 : i32
    return %arg0, %arg1 : i32, i32
  }
  func.func @transform_5(%arg0: i32, %arg1: i32, %arg2: i32) -> (i32, i32) {
    %c0_i32 = arith.constant 0 : i32
    return %arg0, %arg1 : i32, i32
  }
}

module attributes {stable_mosaic.version = 11 : i64} {
  func.func @_fused_matmul_kernel(%arg0: i32, %arg1: i32, %arg2: i32, %arg3: memref<32x640xbf16, #tpu.memory_space<vmem>>, %arg4: memref<640x128xbf16, #tpu.memory_space<vmem>>, %arg5: memref<1x128xf32, #tpu.memory_space<vmem>>, %arg6: memref<1x128xf32, #tpu.memory_space<vmem>>, %arg7: memref<32x128xf32, #tpu.memory_space<vmem>>, %arg8: memref<32x128xf32, #tpu.memory_space<vmem>>) attributes {dimension_semantics = [#tpu.dimension_semantics<parallel>, #tpu.dimension_semantics<parallel>, #tpu.dimension_semantics<arbitrary>], iteration_bounds = array<i64: 1, 1, 1>, scalar_prefetch = 0 : i64, scratch_operands = 1 : i64, tpu.core_type = #tpu.core_type<tc>, window_params = [{transform_indices = @transform_0, window_bounds = array<i64: 32, 640>}, {transform_indices = @transform_1, window_bounds = array<i64: 640, 128>}, {transform_indices = @transform_2, window_bounds = array<i64: 1, 128>}, {transform_indices = @transform_3, window_bounds = array<i64: 1, 128>}, {transform_indices = @transform_4, window_bounds = array<i64: 32, 128>}]} {
    %c0_i32 = arith.constant 0 : i32
    %0 = arith.cmpi eq, %arg2, %c0_i32 : i32
    %1 = arith.extui %0 : i1 to i32
    %c0_i32_0 = arith.constant 0 : i32
    %2 = arith.cmpi ne, %1, %c0_i32_0 : i32
    scf.if %2 {
      %cst_10 = arith.constant 0.000000e+00 : f32
      %12 = vector.broadcast %cst_10 : f32 to vector<32x128xf32>
      %c0_11 = arith.constant 0 : index
      %c0_12 = arith.constant 0 : index
      %13 = vector.load %arg8[%c0_11, %c0_12] : memref<32x128xf32, #tpu.memory_space<vmem>>, vector<32x128xf32>
      tpu.vector_store %arg8[%c0_11, %c0_12], %12 {strides = array<i32>} : memref<32x128xf32, #tpu.memory_space<vmem>>, vector<32x128xf32>,
    } else {
    }
    %c0 = arith.constant 0 : index
    %c0_1 = arith.constant 0 : index
    %3 = vector.load %arg8[%c0, %c0_1] : memref<32x128xf32, #tpu.memory_space<vmem>>, vector<32x128xf32>
    %c0_2 = arith.constant 0 : index
    %c0_3 = arith.constant 0 : index
    %4 = vector.load %arg3[%c0_2, %c0_3] : memref<32x640xbf16, #tpu.memory_space<vmem>>, vector<32x640xbf16>
    %c0_4 = arith.constant 0 : index
    %c0_5 = arith.constant 0 : index
    %5 = vector.load %arg4[%c0_4, %c0_5] : memref<640x128xbf16, #tpu.memory_space<vmem>>, vector<640x128xbf16>
    %cst = arith.constant dense<0.000000e+00> : vector<32x128xf32>
    %6 = tpu.matmul %4, %5, %cst {dimension_numbers = #tpu.dot_dimension_numbers<[1], [0], [0], [1], [0, 0, 1, 1], [], []>} : vector<32x640xbf16>, vector<640x128xbf16>, vector<32x128xf32> -> vector<32x128xf32>
    %7 = arith.addf %3, %6 : vector<32x128xf32>
    %c0_6 = arith.constant 0 : index
    %c0_7 = arith.constant 0 : index
    %8 = vector.load %arg8[%c0_6, %c0_7] : memref<32x128xf32, #tpu.memory_space<vmem>>, vector<32x128xf32>
    tpu.vector_store %arg8[%c0_6, %c0_7], %7 {strides = array<i32>} : memref<32x128xf32, #tpu.memory_space<vmem>>, vector<32x128xf32>,
    %c0_i32_8 = arith.constant 0 : i32
    %9 = arith.cmpi eq, %arg2, %c0_i32_8 : i32
    %10 = arith.extui %9 : i1 to i32
    %c0_i32_9 = arith.constant 0 : i32
    %11 = arith.cmpi ne, %10, %c0_i32_9 : i32
    scf.if %11 {
      %c0_10 = arith.constant 0 : index
      %c0_11 = arith.constant 0 : index
      %12 = vector.load %arg8[%c0_10, %c0_11] : memref<32x128xf32, #tpu.memory_space<vmem>>, vector<32x128xf32>
      %c0_12 = arith.constant 0 : index
      %c0_13 = arith.constant 0 : index
      %13 = vector.load %arg5[%c0_12, %c0_13] : memref<1x128xf32, #tpu.memory_space<vmem>>, vector<1x128xf32>
      %14 = vector.broadcast %13 : vector<1x128xf32> to vector<32x128xf32>
      %15 = arith.mulf %12, %14 : vector<32x128xf32>
      %c0_14 = arith.constant 0 : index
      %c0_15 = arith.constant 0 : index
      %16 = vector.load %arg6[%c0_14, %c0_15] : memref<1x128xf32, #tpu.memory_space<vmem>>, vector<1x128xf32>
      %17 = vector.broadcast %16 : vector<1x128xf32> to vector<32x128xf32>
      %18 = arith.addf %15, %17 : vector<32x128xf32>
      %cst_16 = arith.constant 0.000000e+00 : f32
      %19 = vector.broadcast %cst_16 : f32 to vector<32x128xf32>
      %20 = arith.maximumf %18, %19 : vector<32x128xf32>
      %c0_17 = arith.constant 0 : index
      %c0_18 = arith.constant 0 : index
      %21 = vector.load %arg7[%c0_17, %c0_18] : memref<32x128xf32, #tpu.memory_space<vmem>>, vector<32x128xf32>
      tpu.vector_store %arg7[%c0_17, %c0_18], %20 {strides = array<i32>} : memref<32x128xf32, #tpu.memory_space<vmem>>, vector<32x128xf32>,
    } else {
    }
    return
  }
  func.func @transform_0(%arg0: i32, %arg1: i32, %arg2: i32) -> (i32, i32) {
    %c0_i32 = arith.constant 0 : i32
    return %arg0, %arg2 : i32, i32
  }
  func.func @transform_1(%arg0: i32, %arg1: i32, %arg2: i32) -> (i32, i32) {
    %c0_i32 = arith.constant 0 : i32
    return %arg2, %arg1 : i32, i32
  }
  func.func @transform_2(%arg0: i32, %arg1: i32, %arg2: i32) -> (i32, i32) {
    %c0_i32 = arith.constant 0 : i32
    %c0_i32_0 = arith.constant 0 : i32
    return %c0_i32, %arg1 : i32, i32
  }
  func.func @transform_3(%arg0: i32, %arg1: i32, %arg2: i32) -> (i32, i32) {
    %c0_i32 = arith.constant 0 : i32
    %c0_i32_0 = arith.constant 0 : i32
    return %c0_i32, %arg1 : i32, i32
  }
  func.func @transform_4(%arg0: i32, %arg1: i32, %arg2: i32) -> (i32, i32) {
    %c0_i32 = arith.constant 0 : i32
    return %arg0, %arg1 : i32, i32
  }
}

module attributes {stable_mosaic.version = 11 : i64} {
  func.func @_fused_matmul_kernel(%arg0: i32, %arg1: i32, %arg2: i32, %arg3: memref<32x128xbf16, #tpu.memory_space<vmem>>, %arg4: memref<128x128xbf16, #tpu.memory_space<vmem>>, %arg5: memref<1x128xf32, #tpu.memory_space<vmem>>, %arg6: memref<1x128xf32, #tpu.memory_space<vmem>>, %arg7: memref<32x128xf32, #tpu.memory_space<vmem>>, %arg8: memref<32x128xf32, #tpu.memory_space<vmem>>) attributes {dimension_semantics = [#tpu.dimension_semantics<parallel>, #tpu.dimension_semantics<parallel>, #tpu.dimension_semantics<arbitrary>], iteration_bounds = array<i64: 1, 1, 1>, scalar_prefetch = 0 : i64, scratch_operands = 1 : i64, tpu.core_type = #tpu.core_type<tc>, window_params = [{transform_indices = @transform_0, window_bounds = array<i64: 32, 128>}, {transform_indices = @transform_1, window_bounds = array<i64: 128, 128>}, {transform_indices = @transform_2, window_bounds = array<i64: 1, 128>}, {transform_indices = @transform_3, window_bounds = array<i64: 1, 128>}, {transform_indices = @transform_4, window_bounds = array<i64: 32, 128>}]} {
    %c0_i32 = arith.constant 0 : i32
    %0 = arith.cmpi eq, %arg2, %c0_i32 : i32
    %1 = arith.extui %0 : i1 to i32
    %c0_i32_0 = arith.constant 0 : i32
    %2 = arith.cmpi ne, %1, %c0_i32_0 : i32
    scf.if %2 {
      %cst_10 = arith.constant 0.000000e+00 : f32
      %12 = vector.broadcast %cst_10 : f32 to vector<32x128xf32>
      %c0_11 = arith.constant 0 : index
      %c0_12 = arith.constant 0 : index
      %13 = vector.load %arg8[%c0_11, %c0_12] : memref<32x128xf32, #tpu.memory_space<vmem>>, vector<32x128xf32>
      tpu.vector_store %arg8[%c0_11, %c0_12], %12 {strides = array<i32>} : memref<32x128xf32, #tpu.memory_space<vmem>>, vector<32x128xf32>,
    } else {
    }
    %c0 = arith.constant 0 : index
    %c0_1 = arith.constant 0 : index
    %3 = vector.load %arg8[%c0, %c0_1] : memref<32x128xf32, #tpu.memory_space<vmem>>, vector<32x128xf32>
    %c0_2 = arith.constant 0 : index
    %c0_3 = arith.constant 0 : index
    %4 = vector.load %arg3[%c0_2, %c0_3] : memref<32x128xbf16, #tpu.memory_space<vmem>>, vector<32x128xbf16>
    %c0_4 = arith.constant 0 : index
    %c0_5 = arith.constant 0 : index
    %5 = vector.load %arg4[%c0_4, %c0_5] : memref<128x128xbf16, #tpu.memory_space<vmem>>, vector<128x128xbf16>
    %cst = arith.constant dense<0.000000e+00> : vector<32x128xf32>
    %6 = tpu.matmul %4, %5, %cst {dimension_numbers = #tpu.dot_dimension_numbers<[1], [0], [0], [1], [0, 0, 1, 1], [], []>} : vector<32x128xbf16>, vector<128x128xbf16>, vector<32x128xf32> -> vector<32x128xf32>
    %7 = arith.addf %3, %6 : vector<32x128xf32>
    %c0_6 = arith.constant 0 : index
    %c0_7 = arith.constant 0 : index
    %8 = vector.load %arg8[%c0_6, %c0_7] : memref<32x128xf32, #tpu.memory_space<vmem>>, vector<32x128xf32>
    tpu.vector_store %arg8[%c0_6, %c0_7], %7 {strides = array<i32>} : memref<32x128xf32, #tpu.memory_space<vmem>>, vector<32x128xf32>,
    %c0_i32_8 = arith.constant 0 : i32
    %9 = arith.cmpi eq, %arg2, %c0_i32_8 : i32
    %10 = arith.extui %9 : i1 to i32
    %c0_i32_9 = arith.constant 0 : i32
    %11 = arith.cmpi ne, %10, %c0_i32_9 : i32
    scf.if %11 {
      %c0_10 = arith.constant 0 : index
      %c0_11 = arith.constant 0 : index
      %12 = vector.load %arg8[%c0_10, %c0_11] : memref<32x128xf32, #tpu.memory_space<vmem>>, vector<32x128xf32>
      %c0_12 = arith.constant 0 : index
      %c0_13 = arith.constant 0 : index
      %13 = vector.load %arg5[%c0_12, %c0_13] : memref<1x128xf32, #tpu.memory_space<vmem>>, vector<1x128xf32>
      %14 = vector.broadcast %13 : vector<1x128xf32> to vector<32x128xf32>
      %15 = arith.mulf %12, %14 : vector<32x128xf32>
      %c0_14 = arith.constant 0 : index
      %c0_15 = arith.constant 0 : index
      %16 = vector.load %arg6[%c0_14, %c0_15] : memref<1x128xf32, #tpu.memory_space<vmem>>, vector<1x128xf32>
      %17 = vector.broadcast %16 : vector<1x128xf32> to vector<32x128xf32>
      %18 = arith.addf %15, %17 : vector<32x128xf32>
      %c0_16 = arith.constant 0 : index
      %c0_17 = arith.constant 0 : index
      %19 = vector.load %arg7[%c0_16, %c0_17] : memref<32x128xf32, #tpu.memory_space<vmem>>, vector<32x128xf32>
      tpu.vector_store %arg7[%c0_16, %c0_17], %18 {strides = array<i32>} : memref<32x128xf32, #tpu.memory_space<vmem>>, vector<32x128xf32>,
    } else {
    }
    return
  }
  func.func @transform_0(%arg0: i32, %arg1: i32, %arg2: i32) -> (i32, i32) {
    %c0_i32 = arith.constant 0 : i32
    return %arg0, %arg2 : i32, i32
  }
  func.func @transform_1(%arg0: i32, %arg1: i32, %arg2: i32) -> (i32, i32) {
    %c0_i32 = arith.constant 0 : i32
    return %arg2, %arg1 : i32, i32
  }
  func.func @transform_2(%arg0: i32, %arg1: i32, %arg2: i32) -> (i32, i32) {
    %c0_i32 = arith.constant 0 : i32
    %c0_i32_0 = arith.constant 0 : i32
    return %c0_i32, %arg1 : i32, i32
  }
  func.func @transform_3(%arg0: i32, %arg1: i32, %arg2: i32) -> (i32, i32) {
    %c0_i32 = arith.constant 0 : i32
    %c0_i32_0 = arith.constant 0 : i32
    return %c0_i32, %arg1 : i32, i32
  }
  func.func @transform_4(%arg0: i32, %arg1: i32, %arg2: i32) -> (i32, i32) {
    %c0_i32 = arith.constant 0 : i32
    return %arg0, %arg1 : i32, i32
  }
}

module attributes {stable_mosaic.version = 11 : i64} {
  func.func @_fused_matmul_kernel(%arg0: i32, %arg1: i32, %arg2: i32, %arg3: memref<32x384xbf16, #tpu.memory_space<vmem>>, %arg4: memref<384x128xbf16, #tpu.memory_space<vmem>>, %arg5: memref<1x128xf32, #tpu.memory_space<vmem>>, %arg6: memref<1x128xf32, #tpu.memory_space<vmem>>, %arg7: memref<32x128xf32, #tpu.memory_space<vmem>>, %arg8: memref<32x128xf32, #tpu.memory_space<vmem>>) attributes {dimension_semantics = [#tpu.dimension_semantics<parallel>, #tpu.dimension_semantics<parallel>, #tpu.dimension_semantics<arbitrary>], iteration_bounds = array<i64: 1, 1, 3>, scalar_prefetch = 0 : i64, scratch_operands = 1 : i64, tpu.core_type = #tpu.core_type<tc>, window_params = [{transform_indices = @transform_0, window_bounds = array<i64: 32, 384>}, {transform_indices = @transform_1, window_bounds = array<i64: 384, 128>}, {transform_indices = @transform_2, window_bounds = array<i64: 1, 128>}, {transform_indices = @transform_3, window_bounds = array<i64: 1, 128>}, {transform_indices = @transform_4, window_bounds = array<i64: 32, 128>}]} {
    %c0_i32 = arith.constant 0 : i32
    %0 = arith.cmpi eq, %arg2, %c0_i32 : i32
    %1 = arith.extui %0 : i1 to i32
    %c0_i32_0 = arith.constant 0 : i32
    %2 = arith.cmpi ne, %1, %c0_i32_0 : i32
    scf.if %2 {
      %cst_9 = arith.constant 0.000000e+00 : f32
      %12 = vector.broadcast %cst_9 : f32 to vector<32x128xf32>
      %c0_10 = arith.constant 0 : index
      %c0_11 = arith.constant 0 : index
      %13 = vector.load %arg8[%c0_10, %c0_11] : memref<32x128xf32, #tpu.memory_space<vmem>>, vector<32x128xf32>
      tpu.vector_store %arg8[%c0_10, %c0_11], %12 {strides = array<i32>} : memref<32x128xf32, #tpu.memory_space<vmem>>, vector<32x128xf32>,
    } else {
    }
    %c0 = arith.constant 0 : index
    %c0_1 = arith.constant 0 : index
    %3 = vector.load %arg8[%c0, %c0_1] : memref<32x128xf32, #tpu.memory_space<vmem>>, vector<32x128xf32>
    %c0_2 = arith.constant 0 : index
    %c0_3 = arith.constant 0 : index
    %4 = vector.load %arg3[%c0_2, %c0_3] : memref<32x384xbf16, #tpu.memory_space<vmem>>, vector<32x384xbf16>
    %c0_4 = arith.constant 0 : index
    %c0_5 = arith.constant 0 : index
    %5 = vector.load %arg4[%c0_4, %c0_5] : memref<384x128xbf16, #tpu.memory_space<vmem>>, vector<384x128xbf16>
    %cst = arith.constant dense<0.000000e+00> : vector<32x128xf32>
    %6 = tpu.matmul %4, %5, %cst {dimension_numbers = #tpu.dot_dimension_numbers<[1], [0], [0], [1], [0, 0, 1, 1], [], []>} : vector<32x384xbf16>, vector<384x128xbf16>, vector<32x128xf32> -> vector<32x128xf32>
    %7 = arith.addf %3, %6 : vector<32x128xf32>
    %c0_6 = arith.constant 0 : index
    %c0_7 = arith.constant 0 : index
    %8 = vector.load %arg8[%c0_6, %c0_7] : memref<32x128xf32, #tpu.memory_space<vmem>>, vector<32x128xf32>
    tpu.vector_store %arg8[%c0_6, %c0_7], %7 {strides = array<i32>} : memref<32x128xf32, #tpu.memory_space<vmem>>, vector<32x128xf32>,
    %c2_i32 = arith.constant 2 : i32
    %9 = arith.cmpi eq, %arg2, %c2_i32 : i32
    %10 = arith.extui %9 : i1 to i32
    %c0_i32_8 = arith.constant 0 : i32
    %11 = arith.cmpi ne, %10, %c0_i32_8 : i32
    scf.if %11 {
      %c0_9 = arith.constant 0 : index
      %c0_10 = arith.constant 0 : index
      %12 = vector.load %arg8[%c0_9, %c0_10] : memref<32x128xf32, #tpu.memory_space<vmem>>, vector<32x128xf32>
      %c0_11 = arith.constant 0 : index
      %c0_12 = arith.constant 0 : index
      %13 = vector.load %arg5[%c0_11, %c0_12] : memref<1x128xf32, #tpu.memory_space<vmem>>, vector<1x128xf32>
      %14 = vector.broadcast %13 : vector<1x128xf32> to vector<32x128xf32>
      %15 = arith.mulf %12, %14 : vector<32x128xf32>
      %c0_13 = arith.constant 0 : index
      %c0_14 = arith.constant 0 : index
      %16 = vector.load %arg6[%c0_13, %c0_14] : memref<1x128xf32, #tpu.memory_space<vmem>>, vector<1x128xf32>
      %17 = vector.broadcast %16 : vector<1x128xf32> to vector<32x128xf32>
      %18 = arith.addf %15, %17 : vector<32x128xf32>
      %cst_15 = arith.constant 0.000000e+00 : f32
      %19 = vector.broadcast %cst_15 : f32 to vector<32x128xf32>
      %20 = arith.maximumf %18, %19 : vector<32x128xf32>
      %c0_16 = arith.constant 0 : index
      %c0_17 = arith.constant 0 : index
      %21 = vector.load %arg7[%c0_16, %c0_17] : memref<32x128xf32, #tpu.memory_space<vmem>>, vector<32x128xf32>
      tpu.vector_store %arg7[%c0_16, %c0_17], %20 {strides = array<i32>} : memref<32x128xf32, #tpu.memory_space<vmem>>, vector<32x128xf32>,
    } else {
    }
    return
  }
  func.func @transform_0(%arg0: i32, %arg1: i32, %arg2: i32) -> (i32, i32) {
    %c0_i32 = arith.constant 0 : i32
    return %arg0, %arg2 : i32, i32
  }
  func.func @transform_1(%arg0: i32, %arg1: i32, %arg2: i32) -> (i32, i32) {
    %c0_i32 = arith.constant 0 : i32
    return %arg2, %arg1 : i32, i32
  }
  func.func @transform_2(%arg0: i32, %arg1: i32, %arg2: i32) -> (i32, i32) {
    %c0_i32 = arith.constant 0 : i32
    %c0_i32_0 = arith.constant 0 : i32
    return %c0_i32, %arg1 : i32, i32
  }
  func.func @transform_3(%arg0: i32, %arg1: i32, %arg2: i32) -> (i32, i32) {
    %c0_i32 = arith.constant 0 : i32
    %c0_i32_0 = arith.constant 0 : i32
    return %c0_i32, %arg1 : i32, i32
  }
  func.func @transform_4(%arg0: i32, %arg1: i32, %arg2: i32) -> (i32, i32) {
    %c0_i32 = arith.constant 0 : i32
    return %arg0, %arg1 : i32, i32
  }
}

module attributes {stable_mosaic.version = 11 : i64} {
  func.func @_fused_matmul_kernel(%arg0: i32, %arg1: i32, %arg2: i32, %arg3: memref<32x384xbf16, #tpu.memory_space<vmem>>, %arg4: memref<384x128xbf16, #tpu.memory_space<vmem>>, %arg5: memref<1x128xf32, #tpu.memory_space<vmem>>, %arg6: memref<1x128xf32, #tpu.memory_space<vmem>>, %arg7: memref<32x128xf32, #tpu.memory_space<vmem>>, %arg8: memref<32x128xf32, #tpu.memory_space<vmem>>, %arg9: memref<32x128xf32, #tpu.memory_space<vmem>>) attributes {dimension_semantics = [#tpu.dimension_semantics<parallel>, #tpu.dimension_semantics<parallel>, #tpu.dimension_semantics<arbitrary>], iteration_bounds = array<i64: 1, 1, 3>, scalar_prefetch = 0 : i64, scratch_operands = 1 : i64, tpu.core_type = #tpu.core_type<tc>, window_params = [{transform_indices = @transform_0, window_bounds = array<i64: 32, 384>}, {transform_indices = @transform_1, window_bounds = array<i64: 384, 128>}, {transform_indices = @transform_2, window_bounds = array<i64: 1, 128>}, {transform_indices = @transform_3, window_bounds = array<i64: 1, 128>}, {transform_indices = @transform_4, window_bounds = array<i64: 32, 128>}, {transform_indices = @transform_5, window_bounds = array<i64: 32, 128>}]} {
    %c0_i32 = arith.constant 0 : i32
    %0 = arith.cmpi eq, %arg2, %c0_i32 : i32
    %1 = arith.extui %0 : i1 to i32
    %c0_i32_0 = arith.constant 0 : i32
    %2 = arith.cmpi ne, %1, %c0_i32_0 : i32
    scf.if %2 {
      %cst_9 = arith.constant 0.000000e+00 : f32
      %12 = vector.broadcast %cst_9 : f32 to vector<32x128xf32>
      %c0_10 = arith.constant 0 : index
      %c0_11 = arith.constant 0 : index
      %13 = vector.load %arg9[%c0_10, %c0_11] : memref<32x128xf32, #tpu.memory_space<vmem>>, vector<32x128xf32>
      tpu.vector_store %arg9[%c0_10, %c0_11], %12 {strides = array<i32>} : memref<32x128xf32, #tpu.memory_space<vmem>>, vector<32x128xf32>,
    } else {
    }
    %c0 = arith.constant 0 : index
    %c0_1 = arith.constant 0 : index
    %3 = vector.load %arg9[%c0, %c0_1] : memref<32x128xf32, #tpu.memory_space<vmem>>, vector<32x128xf32>
    %c0_2 = arith.constant 0 : index
    %c0_3 = arith.constant 0 : index
    %4 = vector.load %arg3[%c0_2, %c0_3] : memref<32x384xbf16, #tpu.memory_space<vmem>>, vector<32x384xbf16>
    %c0_4 = arith.constant 0 : index
    %c0_5 = arith.constant 0 : index
    %5 = vector.load %arg4[%c0_4, %c0_5] : memref<384x128xbf16, #tpu.memory_space<vmem>>, vector<384x128xbf16>
    %cst = arith.constant dense<0.000000e+00> : vector<32x128xf32>
    %6 = tpu.matmul %4, %5, %cst {dimension_numbers = #tpu.dot_dimension_numbers<[1], [0], [0], [1], [0, 0, 1, 1], [], []>} : vector<32x384xbf16>, vector<384x128xbf16>, vector<32x128xf32> -> vector<32x128xf32>
    %7 = arith.addf %3, %6 : vector<32x128xf32>
    %c0_6 = arith.constant 0 : index
    %c0_7 = arith.constant 0 : index
    %8 = vector.load %arg9[%c0_6, %c0_7] : memref<32x128xf32, #tpu.memory_space<vmem>>, vector<32x128xf32>
    tpu.vector_store %arg9[%c0_6, %c0_7], %7 {strides = array<i32>} : memref<32x128xf32, #tpu.memory_space<vmem>>, vector<32x128xf32>,
    %c2_i32 = arith.constant 2 : i32
    %9 = arith.cmpi eq, %arg2, %c2_i32 : i32
    %10 = arith.extui %9 : i1 to i32
    %c0_i32_8 = arith.constant 0 : i32
    %11 = arith.cmpi ne, %10, %c0_i32_8 : i32
    scf.if %11 {
      %c0_9 = arith.constant 0 : index
      %c0_10 = arith.constant 0 : index
      %12 = vector.load %arg9[%c0_9, %c0_10] : memref<32x128xf32, #tpu.memory_space<vmem>>, vector<32x128xf32>
      %c0_11 = arith.constant 0 : index
      %c0_12 = arith.constant 0 : index
      %13 = vector.load %arg5[%c0_11, %c0_12] : memref<1x128xf32, #tpu.memory_space<vmem>>, vector<1x128xf32>
      %14 = vector.broadcast %13 : vector<1x128xf32> to vector<32x128xf32>
      %15 = arith.mulf %12, %14 : vector<32x128xf32>
      %c0_13 = arith.constant 0 : index
      %c0_14 = arith.constant 0 : index
      %16 = vector.load %arg6[%c0_13, %c0_14] : memref<1x128xf32, #tpu.memory_space<vmem>>, vector<1x128xf32>
      %17 = vector.broadcast %16 : vector<1x128xf32> to vector<32x128xf32>
      %18 = arith.addf %15, %17 : vector<32x128xf32>
      %c0_15 = arith.constant 0 : index
      %c0_16 = arith.constant 0 : index
      %19 = vector.load %arg7[%c0_15, %c0_16] : memref<32x128xf32, #tpu.memory_space<vmem>>, vector<32x128xf32>
      %20 = arith.addf %18, %19 : vector<32x128xf32>
      %cst_17 = arith.constant 0.000000e+00 : f32
      %21 = vector.broadcast %cst_17 : f32 to vector<32x128xf32>
      %22 = arith.maximumf %20, %21 : vector<32x128xf32>
      %c0_18 = arith.constant 0 : index
      %c0_19 = arith.constant 0 : index
      %23 = vector.load %arg8[%c0_18, %c0_19] : memref<32x128xf32, #tpu.memory_space<vmem>>, vector<32x128xf32>
      tpu.vector_store %arg8[%c0_18, %c0_19], %22 {strides = array<i32>} : memref<32x128xf32, #tpu.memory_space<vmem>>, vector<32x128xf32>,
    } else {
    }
    return
  }
  func.func @transform_0(%arg0: i32, %arg1: i32, %arg2: i32) -> (i32, i32) {
    %c0_i32 = arith.constant 0 : i32
    return %arg0, %arg2 : i32, i32
  }
  func.func @transform_1(%arg0: i32, %arg1: i32, %arg2: i32) -> (i32, i32) {
    %c0_i32 = arith.constant 0 : i32
    return %arg2, %arg1 : i32, i32
  }
  func.func @transform_2(%arg0: i32, %arg1: i32, %arg2: i32) -> (i32, i32) {
    %c0_i32 = arith.constant 0 : i32
    %c0_i32_0 = arith.constant 0 : i32
    return %c0_i32, %arg1 : i32, i32
  }
  func.func @transform_3(%arg0: i32, %arg1: i32, %arg2: i32) -> (i32, i32) {
    %c0_i32 = arith.constant 0 : i32
    %c0_i32_0 = arith.constant 0 : i32
    return %c0_i32, %arg1 : i32, i32
  }
  func.func @transform_4(%arg0: i32, %arg1: i32, %arg2: i32) -> (i32, i32) {
    %c0_i32 = arith.constant 0 : i32
    return %arg0, %arg1 : i32, i32
  }
  func.func @transform_5(%arg0: i32, %arg1: i32, %arg2: i32) -> (i32, i32) {
    %c0_i32 = arith.constant 0 : i32
    return %arg0, %arg1 : i32, i32
  }
}

module attributes {stable_mosaic.version = 11 : i64} {
  func.func @_fused_matmul_kernel(%arg0: i32, %arg1: i32, %arg2: i32, %arg3: memref<8x384xbf16, #tpu.memory_space<vmem>>, %arg4: memref<384x256xbf16, #tpu.memory_space<vmem>>, %arg5: memref<1x256xf32, #tpu.memory_space<vmem>>, %arg6: memref<1x256xf32, #tpu.memory_space<vmem>>, %arg7: memref<8x256xf32, #tpu.memory_space<vmem>>, %arg8: memref<8x256xf32, #tpu.memory_space<vmem>>) attributes {dimension_semantics = [#tpu.dimension_semantics<parallel>, #tpu.dimension_semantics<parallel>, #tpu.dimension_semantics<arbitrary>], iteration_bounds = array<i64: 1, 1, 3>, scalar_prefetch = 0 : i64, scratch_operands = 1 : i64, tpu.core_type = #tpu.core_type<tc>, window_params = [{transform_indices = @transform_0, window_bounds = array<i64: 8, 384>}, {transform_indices = @transform_1, window_bounds = array<i64: 384, 256>}, {transform_indices = @transform_2, window_bounds = array<i64: 1, 256>}, {transform_indices = @transform_3, window_bounds = array<i64: 1, 256>}, {transform_indices = @transform_4, window_bounds = array<i64: 8, 256>}]} {
    %c0_i32 = arith.constant 0 : i32
    %0 = arith.cmpi eq, %arg2, %c0_i32 : i32
    %1 = arith.extui %0 : i1 to i32
    %c0_i32_0 = arith.constant 0 : i32
    %2 = arith.cmpi ne, %1, %c0_i32_0 : i32
    scf.if %2 {
      %cst_9 = arith.constant 0.000000e+00 : f32
      %12 = vector.broadcast %cst_9 : f32 to vector<8x256xf32>
      %c0_10 = arith.constant 0 : index
      %c0_11 = arith.constant 0 : index
      %13 = vector.load %arg8[%c0_10, %c0_11] : memref<8x256xf32, #tpu.memory_space<vmem>>, vector<8x256xf32>
      tpu.vector_store %arg8[%c0_10, %c0_11], %12 {strides = array<i32>} : memref<8x256xf32, #tpu.memory_space<vmem>>, vector<8x256xf32>,
    } else {
    }
    %c0 = arith.constant 0 : index
    %c0_1 = arith.constant 0 : index
    %3 = vector.load %arg8[%c0, %c0_1] : memref<8x256xf32, #tpu.memory_space<vmem>>, vector<8x256xf32>
    %c0_2 = arith.constant 0 : index
    %c0_3 = arith.constant 0 : index
    %4 = vector.load %arg3[%c0_2, %c0_3] : memref<8x384xbf16, #tpu.memory_space<vmem>>, vector<8x384xbf16>
    %c0_4 = arith.constant 0 : index
    %c0_5 = arith.constant 0 : index
    %5 = vector.load %arg4[%c0_4, %c0_5] : memref<384x256xbf16, #tpu.memory_space<vmem>>, vector<384x256xbf16>
    %cst = arith.constant dense<0.000000e+00> : vector<8x256xf32>
    %6 = tpu.matmul %4, %5, %cst {dimension_numbers = #tpu.dot_dimension_numbers<[1], [0], [0], [1], [0, 0, 1, 1], [], []>} : vector<8x384xbf16>, vector<384x256xbf16>, vector<8x256xf32> -> vector<8x256xf32>
    %7 = arith.addf %3, %6 : vector<8x256xf32>
    %c0_6 = arith.constant 0 : index
    %c0_7 = arith.constant 0 : index
    %8 = vector.load %arg8[%c0_6, %c0_7] : memref<8x256xf32, #tpu.memory_space<vmem>>, vector<8x256xf32>
    tpu.vector_store %arg8[%c0_6, %c0_7], %7 {strides = array<i32>} : memref<8x256xf32, #tpu.memory_space<vmem>>, vector<8x256xf32>,
    %c2_i32 = arith.constant 2 : i32
    %9 = arith.cmpi eq, %arg2, %c2_i32 : i32
    %10 = arith.extui %9 : i1 to i32
    %c0_i32_8 = arith.constant 0 : i32
    %11 = arith.cmpi ne, %10, %c0_i32_8 : i32
    scf.if %11 {
      %c0_9 = arith.constant 0 : index
      %c0_10 = arith.constant 0 : index
      %12 = vector.load %arg8[%c0_9, %c0_10] : memref<8x256xf32, #tpu.memory_space<vmem>>, vector<8x256xf32>
      %c0_11 = arith.constant 0 : index
      %c0_12 = arith.constant 0 : index
      %13 = vector.load %arg5[%c0_11, %c0_12] : memref<1x256xf32, #tpu.memory_space<vmem>>, vector<1x256xf32>
      %14 = vector.broadcast %13 : vector<1x256xf32> to vector<8x256xf32>
      %15 = arith.mulf %12, %14 : vector<8x256xf32>
      %c0_13 = arith.constant 0 : index
      %c0_14 = arith.constant 0 : index
      %16 = vector.load %arg6[%c0_13, %c0_14] : memref<1x256xf32, #tpu.memory_space<vmem>>, vector<1x256xf32>
      %17 = vector.broadcast %16 : vector<1x256xf32> to vector<8x256xf32>
      %18 = arith.addf %15, %17 : vector<8x256xf32>
      %cst_15 = arith.constant 0.000000e+00 : f32
      %19 = vector.broadcast %cst_15 : f32 to vector<8x256xf32>
      %20 = arith.maximumf %18, %19 : vector<8x256xf32>
      %c0_16 = arith.constant 0 : index
      %c0_17 = arith.constant 0 : index
      %21 = vector.load %arg7[%c0_16, %c0_17] : memref<8x256xf32, #tpu.memory_space<vmem>>, vector<8x256xf32>
      tpu.vector_store %arg7[%c0_16, %c0_17], %20 {strides = array<i32>} : memref<8x256xf32, #tpu.memory_space<vmem>>, vector<8x256xf32>,
    } else {
    }
    return
  }
  func.func @transform_0(%arg0: i32, %arg1: i32, %arg2: i32) -> (i32, i32) {
    %c0_i32 = arith.constant 0 : i32
    return %arg0, %arg2 : i32, i32
  }
  func.func @transform_1(%arg0: i32, %arg1: i32, %arg2: i32) -> (i32, i32) {
    %c0_i32 = arith.constant 0 : i32
    return %arg2, %arg1 : i32, i32
  }
  func.func @transform_2(%arg0: i32, %arg1: i32, %arg2: i32) -> (i32, i32) {
    %c0_i32 = arith.constant 0 : i32
    %c0_i32_0 = arith.constant 0 : i32
    return %c0_i32, %arg1 : i32, i32
  }
  func.func @transform_3(%arg0: i32, %arg1: i32, %arg2: i32) -> (i32, i32) {
    %c0_i32 = arith.constant 0 : i32
    %c0_i32_0 = arith.constant 0 : i32
    return %c0_i32, %arg1 : i32, i32
  }
  func.func @transform_4(%arg0: i32, %arg1: i32, %arg2: i32) -> (i32, i32) {
    %c0_i32 = arith.constant 0 : i32
    return %arg0, %arg1 : i32, i32
  }
}

module attributes {stable_mosaic.version = 11 : i64} {
  func.func @_fused_matmul_kernel(%arg0: i32, %arg1: i32, %arg2: i32, %arg3: memref<8x128xbf16, #tpu.memory_space<vmem>>, %arg4: memref<128x256xbf16, #tpu.memory_space<vmem>>, %arg5: memref<1x256xf32, #tpu.memory_space<vmem>>, %arg6: memref<1x256xf32, #tpu.memory_space<vmem>>, %arg7: memref<8x256xf32, #tpu.memory_space<vmem>>, %arg8: memref<8x256xf32, #tpu.memory_space<vmem>>) attributes {dimension_semantics = [#tpu.dimension_semantics<parallel>, #tpu.dimension_semantics<parallel>, #tpu.dimension_semantics<arbitrary>], iteration_bounds = array<i64: 1, 1, 1>, scalar_prefetch = 0 : i64, scratch_operands = 1 : i64, tpu.core_type = #tpu.core_type<tc>, window_params = [{transform_indices = @transform_0, window_bounds = array<i64: 8, 128>}, {transform_indices = @transform_1, window_bounds = array<i64: 128, 256>}, {transform_indices = @transform_2, window_bounds = array<i64: 1, 256>}, {transform_indices = @transform_3, window_bounds = array<i64: 1, 256>}, {transform_indices = @transform_4, window_bounds = array<i64: 8, 256>}]} {
    %c0_i32 = arith.constant 0 : i32
    %0 = arith.cmpi eq, %arg2, %c0_i32 : i32
    %1 = arith.extui %0 : i1 to i32
    %c0_i32_0 = arith.constant 0 : i32
    %2 = arith.cmpi ne, %1, %c0_i32_0 : i32
    scf.if %2 {
      %cst_10 = arith.constant 0.000000e+00 : f32
      %12 = vector.broadcast %cst_10 : f32 to vector<8x256xf32>
      %c0_11 = arith.constant 0 : index
      %c0_12 = arith.constant 0 : index
      %13 = vector.load %arg8[%c0_11, %c0_12] : memref<8x256xf32, #tpu.memory_space<vmem>>, vector<8x256xf32>
      tpu.vector_store %arg8[%c0_11, %c0_12], %12 {strides = array<i32>} : memref<8x256xf32, #tpu.memory_space<vmem>>, vector<8x256xf32>,
    } else {
    }
    %c0 = arith.constant 0 : index
    %c0_1 = arith.constant 0 : index
    %3 = vector.load %arg8[%c0, %c0_1] : memref<8x256xf32, #tpu.memory_space<vmem>>, vector<8x256xf32>
    %c0_2 = arith.constant 0 : index
    %c0_3 = arith.constant 0 : index
    %4 = vector.load %arg3[%c0_2, %c0_3] : memref<8x128xbf16, #tpu.memory_space<vmem>>, vector<8x128xbf16>
    %c0_4 = arith.constant 0 : index
    %c0_5 = arith.constant 0 : index
    %5 = vector.load %arg4[%c0_4, %c0_5] : memref<128x256xbf16, #tpu.memory_space<vmem>>, vector<128x256xbf16>
    %cst = arith.constant dense<0.000000e+00> : vector<8x256xf32>
    %6 = tpu.matmul %4, %5, %cst {dimension_numbers = #tpu.dot_dimension_numbers<[1], [0], [0], [1], [0, 0, 1, 1], [], []>} : vector<8x128xbf16>, vector<128x256xbf16>, vector<8x256xf32> -> vector<8x256xf32>
    %7 = arith.addf %3, %6 : vector<8x256xf32>
    %c0_6 = arith.constant 0 : index
    %c0_7 = arith.constant 0 : index
    %8 = vector.load %arg8[%c0_6, %c0_7] : memref<8x256xf32, #tpu.memory_space<vmem>>, vector<8x256xf32>
    tpu.vector_store %arg8[%c0_6, %c0_7], %7 {strides = array<i32>} : memref<8x256xf32, #tpu.memory_space<vmem>>, vector<8x256xf32>,
    %c0_i32_8 = arith.constant 0 : i32
    %9 = arith.cmpi eq, %arg2, %c0_i32_8 : i32
    %10 = arith.extui %9 : i1 to i32
    %c0_i32_9 = arith.constant 0 : i32
    %11 = arith.cmpi ne, %10, %c0_i32_9 : i32
    scf.if %11 {
      %c0_10 = arith.constant 0 : index
      %c0_11 = arith.constant 0 : index
      %12 = vector.load %arg8[%c0_10, %c0_11] : memref<8x256xf32, #tpu.memory_space<vmem>>, vector<8x256xf32>
      %c0_12 = arith.constant 0 : index
      %c0_13 = arith.constant 0 : index
      %13 = vector.load %arg5[%c0_12, %c0_13] : memref<1x256xf32, #tpu.memory_space<vmem>>, vector<1x256xf32>
      %14 = vector.broadcast %13 : vector<1x256xf32> to vector<8x256xf32>
      %15 = arith.mulf %12, %14 : vector<8x256xf32>
      %c0_14 = arith.constant 0 : index
      %c0_15 = arith.constant 0 : index
      %16 = vector.load %arg6[%c0_14, %c0_15] : memref<1x256xf32, #tpu.memory_space<vmem>>, vector<1x256xf32>
      %17 = vector.broadcast %16 : vector<1x256xf32> to vector<8x256xf32>
      %18 = arith.addf %15, %17 : vector<8x256xf32>
      %c0_16 = arith.constant 0 : index
      %c0_17 = arith.constant 0 : index
      %19 = vector.load %arg7[%c0_16, %c0_17] : memref<8x256xf32, #tpu.memory_space<vmem>>, vector<8x256xf32>
      tpu.vector_store %arg7[%c0_16, %c0_17], %18 {strides = array<i32>} : memref<8x256xf32, #tpu.memory_space<vmem>>, vector<8x256xf32>,
    } else {
    }
    return
  }
  func.func @transform_0(%arg0: i32, %arg1: i32, %arg2: i32) -> (i32, i32) {
    %c0_i32 = arith.constant 0 : i32
    return %arg0, %arg2 : i32, i32
  }
  func.func @transform_1(%arg0: i32, %arg1: i32, %arg2: i32) -> (i32, i32) {
    %c0_i32 = arith.constant 0 : i32
    return %arg2, %arg1 : i32, i32
  }
  func.func @transform_2(%arg0: i32, %arg1: i32, %arg2: i32) -> (i32, i32) {
    %c0_i32 = arith.constant 0 : i32
    %c0_i32_0 = arith.constant 0 : i32
    return %c0_i32, %arg1 : i32, i32
  }
  func.func @transform_3(%arg0: i32, %arg1: i32, %arg2: i32) -> (i32, i32) {
    %c0_i32 = arith.constant 0 : i32
    %c0_i32_0 = arith.constant 0 : i32
    return %c0_i32, %arg1 : i32, i32
  }
  func.func @transform_4(%arg0: i32, %arg1: i32, %arg2: i32) -> (i32, i32) {
    %c0_i32 = arith.constant 0 : i32
    return %arg0, %arg1 : i32, i32
  }
}

module attributes {stable_mosaic.version = 11 : i64} {
  func.func @_fused_matmul_kernel(%arg0: i32, %arg1: i32, %arg2: i32, %arg3: memref<8x384xbf16, #tpu.memory_space<vmem>>, %arg4: memref<384x256xbf16, #tpu.memory_space<vmem>>, %arg5: memref<1x256xf32, #tpu.memory_space<vmem>>, %arg6: memref<1x256xf32, #tpu.memory_space<vmem>>, %arg7: memref<8x256xf32, #tpu.memory_space<vmem>>, %arg8: memref<8x256xf32, #tpu.memory_space<vmem>>, %arg9: memref<8x256xf32, #tpu.memory_space<vmem>>) attributes {dimension_semantics = [#tpu.dimension_semantics<parallel>, #tpu.dimension_semantics<parallel>, #tpu.dimension_semantics<arbitrary>], iteration_bounds = array<i64: 1, 1, 6>, scalar_prefetch = 0 : i64, scratch_operands = 1 : i64, tpu.core_type = #tpu.core_type<tc>, window_params = [{transform_indices = @transform_0, window_bounds = array<i64: 8, 384>}, {transform_indices = @transform_1, window_bounds = array<i64: 384, 256>}, {transform_indices = @transform_2, window_bounds = array<i64: 1, 256>}, {transform_indices = @transform_3, window_bounds = array<i64: 1, 256>}, {transform_indices = @transform_4, window_bounds = array<i64: 8, 256>}, {transform_indices = @transform_5, window_bounds = array<i64: 8, 256>}]} {
    %c0_i32 = arith.constant 0 : i32
    %0 = arith.cmpi eq, %arg2, %c0_i32 : i32
    %1 = arith.extui %0 : i1 to i32
    %c0_i32_0 = arith.constant 0 : i32
    %2 = arith.cmpi ne, %1, %c0_i32_0 : i32
    scf.if %2 {
      %cst_9 = arith.constant 0.000000e+00 : f32
      %12 = vector.broadcast %cst_9 : f32 to vector<8x256xf32>
      %c0_10 = arith.constant 0 : index
      %c0_11 = arith.constant 0 : index
      %13 = vector.load %arg9[%c0_10, %c0_11] : memref<8x256xf32, #tpu.memory_space<vmem>>, vector<8x256xf32>
      tpu.vector_store %arg9[%c0_10, %c0_11], %12 {strides = array<i32>} : memref<8x256xf32, #tpu.memory_space<vmem>>, vector<8x256xf32>,
    } else {
    }
    %c0 = arith.constant 0 : index
    %c0_1 = arith.constant 0 : index
    %3 = vector.load %arg9[%c0, %c0_1] : memref<8x256xf32, #tpu.memory_space<vmem>>, vector<8x256xf32>
    %c0_2 = arith.constant 0 : index
    %c0_3 = arith.constant 0 : index
    %4 = vector.load %arg3[%c0_2, %c0_3] : memref<8x384xbf16, #tpu.memory_space<vmem>>, vector<8x384xbf16>
    %c0_4 = arith.constant 0 : index
    %c0_5 = arith.constant 0 : index
    %5 = vector.load %arg4[%c0_4, %c0_5] : memref<384x256xbf16, #tpu.memory_space<vmem>>, vector<384x256xbf16>
    %cst = arith.constant dense<0.000000e+00> : vector<8x256xf32>
    %6 = tpu.matmul %4, %5, %cst {dimension_numbers = #tpu.dot_dimension_numbers<[1], [0], [0], [1], [0, 0, 1, 1], [], []>} : vector<8x384xbf16>, vector<384x256xbf16>, vector<8x256xf32> -> vector<8x256xf32>
    %7 = arith.addf %3, %6 : vector<8x256xf32>
    %c0_6 = arith.constant 0 : index
    %c0_7 = arith.constant 0 : index
    %8 = vector.load %arg9[%c0_6, %c0_7] : memref<8x256xf32, #tpu.memory_space<vmem>>, vector<8x256xf32>
    tpu.vector_store %arg9[%c0_6, %c0_7], %7 {strides = array<i32>} : memref<8x256xf32, #tpu.memory_space<vmem>>, vector<8x256xf32>,
    %c5_i32 = arith.constant 5 : i32
    %9 = arith.cmpi eq, %arg2, %c5_i32 : i32
    %10 = arith.extui %9 : i1 to i32
    %c0_i32_8 = arith.constant 0 : i32
    %11 = arith.cmpi ne, %10, %c0_i32_8 : i32
    scf.if %11 {
      %c0_9 = arith.constant 0 : index
      %c0_10 = arith.constant 0 : index
      %12 = vector.load %arg9[%c0_9, %c0_10] : memref<8x256xf32, #tpu.memory_space<vmem>>, vector<8x256xf32>
      %c0_11 = arith.constant 0 : index
      %c0_12 = arith.constant 0 : index
      %13 = vector.load %arg5[%c0_11, %c0_12] : memref<1x256xf32, #tpu.memory_space<vmem>>, vector<1x256xf32>
      %14 = vector.broadcast %13 : vector<1x256xf32> to vector<8x256xf32>
      %15 = arith.mulf %12, %14 : vector<8x256xf32>
      %c0_13 = arith.constant 0 : index
      %c0_14 = arith.constant 0 : index
      %16 = vector.load %arg6[%c0_13, %c0_14] : memref<1x256xf32, #tpu.memory_space<vmem>>, vector<1x256xf32>
      %17 = vector.broadcast %16 : vector<1x256xf32> to vector<8x256xf32>
      %18 = arith.addf %15, %17 : vector<8x256xf32>
      %c0_15 = arith.constant 0 : index
      %c0_16 = arith.constant 0 : index
      %19 = vector.load %arg7[%c0_15, %c0_16] : memref<8x256xf32, #tpu.memory_space<vmem>>, vector<8x256xf32>
      %20 = arith.addf %18, %19 : vector<8x256xf32>
      %cst_17 = arith.constant 0.000000e+00 : f32
      %21 = vector.broadcast %cst_17 : f32 to vector<8x256xf32>
      %22 = arith.maximumf %20, %21 : vector<8x256xf32>
      %c0_18 = arith.constant 0 : index
      %c0_19 = arith.constant 0 : index
      %23 = vector.load %arg8[%c0_18, %c0_19] : memref<8x256xf32, #tpu.memory_space<vmem>>, vector<8x256xf32>
      tpu.vector_store %arg8[%c0_18, %c0_19], %22 {strides = array<i32>} : memref<8x256xf32, #tpu.memory_space<vmem>>, vector<8x256xf32>,
    } else {
    }
    return
  }
  func.func @transform_0(%arg0: i32, %arg1: i32, %arg2: i32) -> (i32, i32) {
    %c0_i32 = arith.constant 0 : i32
    return %arg0, %arg2 : i32, i32
  }
  func.func @transform_1(%arg0: i32, %arg1: i32, %arg2: i32) -> (i32, i32) {
    %c0_i32 = arith.constant 0 : i32
    return %arg2, %arg1 : i32, i32
  }
  func.func @transform_2(%arg0: i32, %arg1: i32, %arg2: i32) -> (i32, i32) {
    %c0_i32 = arith.constant 0 : i32
    %c0_i32_0 = arith.constant 0 : i32
    return %c0_i32, %arg1 : i32, i32
  }
  func.func @transform_3(%arg0: i32, %arg1: i32, %arg2: i32) -> (i32, i32) {
    %c0_i32 = arith.constant 0 : i32
    %c0_i32_0 = arith.constant 0 : i32
    return %c0_i32, %arg1 : i32, i32
  }
  func.func @transform_4(%arg0: i32, %arg1: i32, %arg2: i32) -> (i32, i32) {
    %c0_i32 = arith.constant 0 : i32
    return %arg0, %arg1 : i32, i32
  }
  func.func @transform_5(%arg0: i32, %arg1: i32, %arg2: i32) -> (i32, i32) {
    %c0_i32 = arith.constant 0 : i32
    return %arg0, %arg1 : i32, i32
  }
}

module attributes {stable_mosaic.version = 11 : i64} {
  func.func @_fused_matmul_kernel(%arg0: i32, %arg1: i32, %arg2: i32, %arg3: memref<8x384xbf16, #tpu.memory_space<vmem>>, %arg4: memref<384x256xbf16, #tpu.memory_space<vmem>>, %arg5: memref<1x256xf32, #tpu.memory_space<vmem>>, %arg6: memref<1x256xf32, #tpu.memory_space<vmem>>, %arg7: memref<8x256xf32, #tpu.memory_space<vmem>>, %arg8: memref<8x256xf32, #tpu.memory_space<vmem>>) attributes {dimension_semantics = [#tpu.dimension_semantics<parallel>, #tpu.dimension_semantics<parallel>, #tpu.dimension_semantics<arbitrary>], iteration_bounds = array<i64: 1, 1, 6>, scalar_prefetch = 0 : i64, scratch_operands = 1 : i64, tpu.core_type = #tpu.core_type<tc>, window_params = [{transform_indices = @transform_0, window_bounds = array<i64: 8, 384>}, {transform_indices = @transform_1, window_bounds = array<i64: 384, 256>}, {transform_indices = @transform_2, window_bounds = array<i64: 1, 256>}, {transform_indices = @transform_3, window_bounds = array<i64: 1, 256>}, {transform_indices = @transform_4, window_bounds = array<i64: 8, 256>}]} {
    %c0_i32 = arith.constant 0 : i32
    %0 = arith.cmpi eq, %arg2, %c0_i32 : i32
    %1 = arith.extui %0 : i1 to i32
    %c0_i32_0 = arith.constant 0 : i32
    %2 = arith.cmpi ne, %1, %c0_i32_0 : i32
    scf.if %2 {
      %cst_9 = arith.constant 0.000000e+00 : f32
      %12 = vector.broadcast %cst_9 : f32 to vector<8x256xf32>
      %c0_10 = arith.constant 0 : index
      %c0_11 = arith.constant 0 : index
      %13 = vector.load %arg8[%c0_10, %c0_11] : memref<8x256xf32, #tpu.memory_space<vmem>>, vector<8x256xf32>
      tpu.vector_store %arg8[%c0_10, %c0_11], %12 {strides = array<i32>} : memref<8x256xf32, #tpu.memory_space<vmem>>, vector<8x256xf32>,
    } else {
    }
    %c0 = arith.constant 0 : index
    %c0_1 = arith.constant 0 : index
    %3 = vector.load %arg8[%c0, %c0_1] : memref<8x256xf32, #tpu.memory_space<vmem>>, vector<8x256xf32>
    %c0_2 = arith.constant 0 : index
    %c0_3 = arith.constant 0 : index
    %4 = vector.load %arg3[%c0_2, %c0_3] : memref<8x384xbf16, #tpu.memory_space<vmem>>, vector<8x384xbf16>
    %c0_4 = arith.constant 0 : index
    %c0_5 = arith.constant 0 : index
    %5 = vector.load %arg4[%c0_4, %c0_5] : memref<384x256xbf16, #tpu.memory_space<vmem>>, vector<384x256xbf16>
    %cst = arith.constant dense<0.000000e+00> : vector<8x256xf32>
    %6 = tpu.matmul %4, %5, %cst {dimension_numbers = #tpu.dot_dimension_numbers<[1], [0], [0], [1], [0, 0, 1, 1], [], []>} : vector<8x384xbf16>, vector<384x256xbf16>, vector<8x256xf32> -> vector<8x256xf32>
    %7 = arith.addf %3, %6 : vector<8x256xf32>
    %c0_6 = arith.constant 0 : index
    %c0_7 = arith.constant 0 : index
    %8 = vector.load %arg8[%c0_6, %c0_7] : memref<8x256xf32, #tpu.memory_space<vmem>>, vector<8x256xf32>
    tpu.vector_store %arg8[%c0_6, %c0_7], %7 {strides = array<i32>} : memref<8x256xf32, #tpu.memory_space<vmem>>, vector<8x256xf32>,
    %c5_i32 = arith.constant 5 : i32
    %9 = arith.cmpi eq, %arg2, %c5_i32 : i32
    %10 = arith.extui %9 : i1 to i32
    %c0_i32_8 = arith.constant 0 : i32
    %11 = arith.cmpi ne, %10, %c0_i32_8 : i32
    scf.if %11 {
      %c0_9 = arith.constant 0 : index
      %c0_10 = arith.constant 0 : index
      %12 = vector.load %arg8[%c0_9, %c0_10] : memref<8x256xf32, #tpu.memory_space<vmem>>, vector<8x256xf32>
      %c0_11 = arith.constant 0 : index
      %c0_12 = arith.constant 0 : index
      %13 = vector.load %arg5[%c0_11, %c0_12] : memref<1x256xf32, #tpu.memory_space<vmem>>, vector<1x256xf32>
      %14 = vector.broadcast %13 : vector<1x256xf32> to vector<8x256xf32>
      %15 = arith.mulf %12, %14 : vector<8x256xf32>
      %c0_13 = arith.constant 0 : index
      %c0_14 = arith.constant 0 : index
      %16 = vector.load %arg6[%c0_13, %c0_14] : memref<1x256xf32, #tpu.memory_space<vmem>>, vector<1x256xf32>
      %17 = vector.broadcast %16 : vector<1x256xf32> to vector<8x256xf32>
      %18 = arith.addf %15, %17 : vector<8x256xf32>
      %cst_15 = arith.constant 0.000000e+00 : f32
      %19 = vector.broadcast %cst_15 : f32 to vector<8x256xf32>
      %20 = arith.maximumf %18, %19 : vector<8x256xf32>
      %c0_16 = arith.constant 0 : index
      %c0_17 = arith.constant 0 : index
      %21 = vector.load %arg7[%c0_16, %c0_17] : memref<8x256xf32, #tpu.memory_space<vmem>>, vector<8x256xf32>
      tpu.vector_store %arg7[%c0_16, %c0_17], %20 {strides = array<i32>} : memref<8x256xf32, #tpu.memory_space<vmem>>, vector<8x256xf32>,
    } else {
    }
    return
  }
  func.func @transform_0(%arg0: i32, %arg1: i32, %arg2: i32) -> (i32, i32) {
    %c0_i32 = arith.constant 0 : i32
    return %arg0, %arg2 : i32, i32
  }
  func.func @transform_1(%arg0: i32, %arg1: i32, %arg2: i32) -> (i32, i32) {
    %c0_i32 = arith.constant 0 : i32
    return %arg2, %arg1 : i32, i32
  }
  func.func @transform_2(%arg0: i32, %arg1: i32, %arg2: i32) -> (i32, i32) {
    %c0_i32 = arith.constant 0 : i32
    %c0_i32_0 = arith.constant 0 : i32
    return %c0_i32, %arg1 : i32, i32
  }
  func.func @transform_3(%arg0: i32, %arg1: i32, %arg2: i32) -> (i32, i32) {
    %c0_i32 = arith.constant 0 : i32
    %c0_i32_0 = arith.constant 0 : i32
    return %c0_i32, %arg1 : i32, i32
  }
  func.func @transform_4(%arg0: i32, %arg1: i32, %arg2: i32) -> (i32, i32) {
    %c0_i32 = arith.constant 0 : i32
    return %arg0, %arg1 : i32, i32
  }
}

module attributes {stable_mosaic.version = 11 : i64} {
  func.func @_fused_matmul_kernel(%arg0: i32, %arg1: i32, %arg2: i32, %arg3: memref<8x384xbf16, #tpu.memory_space<vmem>>, %arg4: memref<384x256xbf16, #tpu.memory_space<vmem>>, %arg5: memref<1x256xf32, #tpu.memory_space<vmem>>, %arg6: memref<1x256xf32, #tpu.memory_space<vmem>>, %arg7: memref<8x256xf32, #tpu.memory_space<vmem>>, %arg8: memref<8x256xf32, #tpu.memory_space<vmem>>) attributes {dimension_semantics = [#tpu.dimension_semantics<parallel>, #tpu.dimension_semantics<parallel>, #tpu.dimension_semantics<arbitrary>], iteration_bounds = array<i64: 1, 2, 6>, scalar_prefetch = 0 : i64, scratch_operands = 1 : i64, tpu.core_type = #tpu.core_type<tc>, window_params = [{transform_indices = @transform_0, window_bounds = array<i64: 8, 384>}, {transform_indices = @transform_1, window_bounds = array<i64: 384, 256>}, {transform_indices = @transform_2, window_bounds = array<i64: 1, 256>}, {transform_indices = @transform_3, window_bounds = array<i64: 1, 256>}, {transform_indices = @transform_4, window_bounds = array<i64: 8, 256>}]} {
    %c0_i32 = arith.constant 0 : i32
    %0 = arith.cmpi eq, %arg2, %c0_i32 : i32
    %1 = arith.extui %0 : i1 to i32
    %c0_i32_0 = arith.constant 0 : i32
    %2 = arith.cmpi ne, %1, %c0_i32_0 : i32
    scf.if %2 {
      %cst_9 = arith.constant 0.000000e+00 : f32
      %12 = vector.broadcast %cst_9 : f32 to vector<8x256xf32>
      %c0_10 = arith.constant 0 : index
      %c0_11 = arith.constant 0 : index
      %13 = vector.load %arg8[%c0_10, %c0_11] : memref<8x256xf32, #tpu.memory_space<vmem>>, vector<8x256xf32>
      tpu.vector_store %arg8[%c0_10, %c0_11], %12 {strides = array<i32>} : memref<8x256xf32, #tpu.memory_space<vmem>>, vector<8x256xf32>,
    } else {
    }
    %c0 = arith.constant 0 : index
    %c0_1 = arith.constant 0 : index
    %3 = vector.load %arg8[%c0, %c0_1] : memref<8x256xf32, #tpu.memory_space<vmem>>, vector<8x256xf32>
    %c0_2 = arith.constant 0 : index
    %c0_3 = arith.constant 0 : index
    %4 = vector.load %arg3[%c0_2, %c0_3] : memref<8x384xbf16, #tpu.memory_space<vmem>>, vector<8x384xbf16>
    %c0_4 = arith.constant 0 : index
    %c0_5 = arith.constant 0 : index
    %5 = vector.load %arg4[%c0_4, %c0_5] : memref<384x256xbf16, #tpu.memory_space<vmem>>, vector<384x256xbf16>
    %cst = arith.constant dense<0.000000e+00> : vector<8x256xf32>
    %6 = tpu.matmul %4, %5, %cst {dimension_numbers = #tpu.dot_dimension_numbers<[1], [0], [0], [1], [0, 0, 1, 1], [], []>} : vector<8x384xbf16>, vector<384x256xbf16>, vector<8x256xf32> -> vector<8x256xf32>
    %7 = arith.addf %3, %6 : vector<8x256xf32>
    %c0_6 = arith.constant 0 : index
    %c0_7 = arith.constant 0 : index
    %8 = vector.load %arg8[%c0_6, %c0_7] : memref<8x256xf32, #tpu.memory_space<vmem>>, vector<8x256xf32>
    tpu.vector_store %arg8[%c0_6, %c0_7], %7 {strides = array<i32>} : memref<8x256xf32, #tpu.memory_space<vmem>>, vector<8x256xf32>,
    %c5_i32 = arith.constant 5 : i32
    %9 = arith.cmpi eq, %arg2, %c5_i32 : i32
    %10 = arith.extui %9 : i1 to i32
    %c0_i32_8 = arith.constant 0 : i32
    %11 = arith.cmpi ne, %10, %c0_i32_8 : i32
    scf.if %11 {
      %c0_9 = arith.constant 0 : index
      %c0_10 = arith.constant 0 : index
      %12 = vector.load %arg8[%c0_9, %c0_10] : memref<8x256xf32, #tpu.memory_space<vmem>>, vector<8x256xf32>
      %c0_11 = arith.constant 0 : index
      %c0_12 = arith.constant 0 : index
      %13 = vector.load %arg5[%c0_11, %c0_12] : memref<1x256xf32, #tpu.memory_space<vmem>>, vector<1x256xf32>
      %14 = vector.broadcast %13 : vector<1x256xf32> to vector<8x256xf32>
      %15 = arith.mulf %12, %14 : vector<8x256xf32>
      %c0_13 = arith.constant 0 : index
      %c0_14 = arith.constant 0 : index
      %16 = vector.load %arg6[%c0_13, %c0_14] : memref<1x256xf32, #tpu.memory_space<vmem>>, vector<1x256xf32>
      %17 = vector.broadcast %16 : vector<1x256xf32> to vector<8x256xf32>
      %18 = arith.addf %15, %17 : vector<8x256xf32>
      %cst_15 = arith.constant 0.000000e+00 : f32
      %19 = vector.broadcast %cst_15 : f32 to vector<8x256xf32>
      %20 = arith.maximumf %18, %19 : vector<8x256xf32>
      %c0_16 = arith.constant 0 : index
      %c0_17 = arith.constant 0 : index
      %21 = vector.load %arg7[%c0_16, %c0_17] : memref<8x256xf32, #tpu.memory_space<vmem>>, vector<8x256xf32>
      tpu.vector_store %arg7[%c0_16, %c0_17], %20 {strides = array<i32>} : memref<8x256xf32, #tpu.memory_space<vmem>>, vector<8x256xf32>,
    } else {
    }
    return
  }
  func.func @transform_0(%arg0: i32, %arg1: i32, %arg2: i32) -> (i32, i32) {
    %c0_i32 = arith.constant 0 : i32
    return %arg0, %arg2 : i32, i32
  }
  func.func @transform_1(%arg0: i32, %arg1: i32, %arg2: i32) -> (i32, i32) {
    %c0_i32 = arith.constant 0 : i32
    return %arg2, %arg1 : i32, i32
  }
  func.func @transform_2(%arg0: i32, %arg1: i32, %arg2: i32) -> (i32, i32) {
    %c0_i32 = arith.constant 0 : i32
    %c0_i32_0 = arith.constant 0 : i32
    return %c0_i32, %arg1 : i32, i32
  }
  func.func @transform_3(%arg0: i32, %arg1: i32, %arg2: i32) -> (i32, i32) {
    %c0_i32 = arith.constant 0 : i32
    %c0_i32_0 = arith.constant 0 : i32
    return %c0_i32, %arg1 : i32, i32
  }
  func.func @transform_4(%arg0: i32, %arg1: i32, %arg2: i32) -> (i32, i32) {
    %c0_i32 = arith.constant 0 : i32
    return %arg0, %arg1 : i32, i32
  }
}

module attributes {stable_mosaic.version = 11 : i64} {
  func.func @_fused_matmul_kernel(%arg0: i32, %arg1: i32, %arg2: i32, %arg3: memref<8x256xbf16, #tpu.memory_space<vmem>>, %arg4: memref<256x256xbf16, #tpu.memory_space<vmem>>, %arg5: memref<1x256xf32, #tpu.memory_space<vmem>>, %arg6: memref<1x256xf32, #tpu.memory_space<vmem>>, %arg7: memref<8x256xf32, #tpu.memory_space<vmem>>, %arg8: memref<8x256xf32, #tpu.memory_space<vmem>>) attributes {dimension_semantics = [#tpu.dimension_semantics<parallel>, #tpu.dimension_semantics<parallel>, #tpu.dimension_semantics<arbitrary>], iteration_bounds = array<i64: 1, 2, 1>, scalar_prefetch = 0 : i64, scratch_operands = 1 : i64, tpu.core_type = #tpu.core_type<tc>, window_params = [{transform_indices = @transform_0, window_bounds = array<i64: 8, 256>}, {transform_indices = @transform_1, window_bounds = array<i64: 256, 256>}, {transform_indices = @transform_2, window_bounds = array<i64: 1, 256>}, {transform_indices = @transform_3, window_bounds = array<i64: 1, 256>}, {transform_indices = @transform_4, window_bounds = array<i64: 8, 256>}]} {
    %c0_i32 = arith.constant 0 : i32
    %0 = arith.cmpi eq, %arg2, %c0_i32 : i32
    %1 = arith.extui %0 : i1 to i32
    %c0_i32_0 = arith.constant 0 : i32
    %2 = arith.cmpi ne, %1, %c0_i32_0 : i32
    scf.if %2 {
      %cst_10 = arith.constant 0.000000e+00 : f32
      %12 = vector.broadcast %cst_10 : f32 to vector<8x256xf32>
      %c0_11 = arith.constant 0 : index
      %c0_12 = arith.constant 0 : index
      %13 = vector.load %arg8[%c0_11, %c0_12] : memref<8x256xf32, #tpu.memory_space<vmem>>, vector<8x256xf32>
      tpu.vector_store %arg8[%c0_11, %c0_12], %12 {strides = array<i32>} : memref<8x256xf32, #tpu.memory_space<vmem>>, vector<8x256xf32>,
    } else {
    }
    %c0 = arith.constant 0 : index
    %c0_1 = arith.constant 0 : index
    %3 = vector.load %arg8[%c0, %c0_1] : memref<8x256xf32, #tpu.memory_space<vmem>>, vector<8x256xf32>
    %c0_2 = arith.constant 0 : index
    %c0_3 = arith.constant 0 : index
    %4 = vector.load %arg3[%c0_2, %c0_3] : memref<8x256xbf16, #tpu.memory_space<vmem>>, vector<8x256xbf16>
    %c0_4 = arith.constant 0 : index
    %c0_5 = arith.constant 0 : index
    %5 = vector.load %arg4[%c0_4, %c0_5] : memref<256x256xbf16, #tpu.memory_space<vmem>>, vector<256x256xbf16>
    %cst = arith.constant dense<0.000000e+00> : vector<8x256xf32>
    %6 = tpu.matmul %4, %5, %cst {dimension_numbers = #tpu.dot_dimension_numbers<[1], [0], [0], [1], [0, 0, 1, 1], [], []>} : vector<8x256xbf16>, vector<256x256xbf16>, vector<8x256xf32> -> vector<8x256xf32>
    %7 = arith.addf %3, %6 : vector<8x256xf32>
    %c0_6 = arith.constant 0 : index
    %c0_7 = arith.constant 0 : index
    %8 = vector.load %arg8[%c0_6, %c0_7] : memref<8x256xf32, #tpu.memory_space<vmem>>, vector<8x256xf32>
    tpu.vector_store %arg8[%c0_6, %c0_7], %7 {strides = array<i32>} : memref<8x256xf32, #tpu.memory_space<vmem>>, vector<8x256xf32>,
    %c0_i32_8 = arith.constant 0 : i32
    %9 = arith.cmpi eq, %arg2, %c0_i32_8 : i32
    %10 = arith.extui %9 : i1 to i32
    %c0_i32_9 = arith.constant 0 : i32
    %11 = arith.cmpi ne, %10, %c0_i32_9 : i32
    scf.if %11 {
      %c0_10 = arith.constant 0 : index
      %c0_11 = arith.constant 0 : index
      %12 = vector.load %arg8[%c0_10, %c0_11] : memref<8x256xf32, #tpu.memory_space<vmem>>, vector<8x256xf32>
      %c0_12 = arith.constant 0 : index
      %c0_13 = arith.constant 0 : index
      %13 = vector.load %arg5[%c0_12, %c0_13] : memref<1x256xf32, #tpu.memory_space<vmem>>, vector<1x256xf32>
      %14 = vector.broadcast %13 : vector<1x256xf32> to vector<8x256xf32>
      %15 = arith.mulf %12, %14 : vector<8x256xf32>
      %c0_14 = arith.constant 0 : index
      %c0_15 = arith.constant 0 : index
      %16 = vector.load %arg6[%c0_14, %c0_15] : memref<1x256xf32, #tpu.memory_space<vmem>>, vector<1x256xf32>
      %17 = vector.broadcast %16 : vector<1x256xf32> to vector<8x256xf32>
      %18 = arith.addf %15, %17 : vector<8x256xf32>
      %c0_16 = arith.constant 0 : index
      %c0_17 = arith.constant 0 : index
      %19 = vector.load %arg7[%c0_16, %c0_17] : memref<8x256xf32, #tpu.memory_space<vmem>>, vector<8x256xf32>
      tpu.vector_store %arg7[%c0_16, %c0_17], %18 {strides = array<i32>} : memref<8x256xf32, #tpu.memory_space<vmem>>, vector<8x256xf32>,
    } else {
    }
    return
  }
  func.func @transform_0(%arg0: i32, %arg1: i32, %arg2: i32) -> (i32, i32) {
    %c0_i32 = arith.constant 0 : i32
    return %arg0, %arg2 : i32, i32
  }
  func.func @transform_1(%arg0: i32, %arg1: i32, %arg2: i32) -> (i32, i32) {
    %c0_i32 = arith.constant 0 : i32
    return %arg2, %arg1 : i32, i32
  }
  func.func @transform_2(%arg0: i32, %arg1: i32, %arg2: i32) -> (i32, i32) {
    %c0_i32 = arith.constant 0 : i32
    %c0_i32_0 = arith.constant 0 : i32
    return %c0_i32, %arg1 : i32, i32
  }
  func.func @transform_3(%arg0: i32, %arg1: i32, %arg2: i32) -> (i32, i32) {
    %c0_i32 = arith.constant 0 : i32
    %c0_i32_0 = arith.constant 0 : i32
    return %c0_i32, %arg1 : i32, i32
  }
  func.func @transform_4(%arg0: i32, %arg1: i32, %arg2: i32) -> (i32, i32) {
    %c0_i32 = arith.constant 0 : i32
    return %arg0, %arg1 : i32, i32
  }
}

module attributes {stable_mosaic.version = 11 : i64} {
  func.func @_fused_matmul_kernel(%arg0: i32, %arg1: i32, %arg2: i32, %arg3: memref<8x512xbf16, #tpu.memory_space<vmem>>, %arg4: memref<512x256xbf16, #tpu.memory_space<vmem>>, %arg5: memref<1x256xf32, #tpu.memory_space<vmem>>, %arg6: memref<1x256xf32, #tpu.memory_space<vmem>>, %arg7: memref<8x256xf32, #tpu.memory_space<vmem>>, %arg8: memref<8x256xf32, #tpu.memory_space<vmem>>, %arg9: memref<8x256xf32, #tpu.memory_space<vmem>>) attributes {dimension_semantics = [#tpu.dimension_semantics<parallel>, #tpu.dimension_semantics<parallel>, #tpu.dimension_semantics<arbitrary>], iteration_bounds = array<i64: 1, 2, 9>, scalar_prefetch = 0 : i64, scratch_operands = 1 : i64, tpu.core_type = #tpu.core_type<tc>, window_params = [{transform_indices = @transform_0, window_bounds = array<i64: 8, 512>}, {transform_indices = @transform_1, window_bounds = array<i64: 512, 256>}, {transform_indices = @transform_2, window_bounds = array<i64: 1, 256>}, {transform_indices = @transform_3, window_bounds = array<i64: 1, 256>}, {transform_indices = @transform_4, window_bounds = array<i64: 8, 256>}, {transform_indices = @transform_5, window_bounds = array<i64: 8, 256>}]} {
    %c0_i32 = arith.constant 0 : i32
    %0 = arith.cmpi eq, %arg2, %c0_i32 : i32
    %1 = arith.extui %0 : i1 to i32
    %c0_i32_0 = arith.constant 0 : i32
    %2 = arith.cmpi ne, %1, %c0_i32_0 : i32
    scf.if %2 {
      %cst_9 = arith.constant 0.000000e+00 : f32
      %12 = vector.broadcast %cst_9 : f32 to vector<8x256xf32>
      %c0_10 = arith.constant 0 : index
      %c0_11 = arith.constant 0 : index
      %13 = vector.load %arg9[%c0_10, %c0_11] : memref<8x256xf32, #tpu.memory_space<vmem>>, vector<8x256xf32>
      tpu.vector_store %arg9[%c0_10, %c0_11], %12 {strides = array<i32>} : memref<8x256xf32, #tpu.memory_space<vmem>>, vector<8x256xf32>,
    } else {
    }
    %c0 = arith.constant 0 : index
    %c0_1 = arith.constant 0 : index
    %3 = vector.load %arg9[%c0, %c0_1] : memref<8x256xf32, #tpu.memory_space<vmem>>, vector<8x256xf32>
    %c0_2 = arith.constant 0 : index
    %c0_3 = arith.constant 0 : index
    %4 = vector.load %arg3[%c0_2, %c0_3] : memref<8x512xbf16, #tpu.memory_space<vmem>>, vector<8x512xbf16>
    %c0_4 = arith.constant 0 : index
    %c0_5 = arith.constant 0 : index
    %5 = vector.load %arg4[%c0_4, %c0_5] : memref<512x256xbf16, #tpu.memory_space<vmem>>, vector<512x256xbf16>
    %cst = arith.constant dense<0.000000e+00> : vector<8x256xf32>
    %6 = tpu.matmul %4, %5, %cst {dimension_numbers = #tpu.dot_dimension_numbers<[1], [0], [0], [1], [0, 0, 1, 1], [], []>} : vector<8x512xbf16>, vector<512x256xbf16>, vector<8x256xf32> -> vector<8x256xf32>
    %7 = arith.addf %3, %6 : vector<8x256xf32>
    %c0_6 = arith.constant 0 : index
    %c0_7 = arith.constant 0 : index
    %8 = vector.load %arg9[%c0_6, %c0_7] : memref<8x256xf32, #tpu.memory_space<vmem>>, vector<8x256xf32>
    tpu.vector_store %arg9[%c0_6, %c0_7], %7 {strides = array<i32>} : memref<8x256xf32, #tpu.memory_space<vmem>>, vector<8x256xf32>,
    %c8_i32 = arith.constant 8 : i32
    %9 = arith.cmpi eq, %arg2, %c8_i32 : i32
    %10 = arith.extui %9 : i1 to i32
    %c0_i32_8 = arith.constant 0 : i32
    %11 = arith.cmpi ne, %10, %c0_i32_8 : i32
    scf.if %11 {
      %c0_9 = arith.constant 0 : index
      %c0_10 = arith.constant 0 : index
      %12 = vector.load %arg9[%c0_9, %c0_10] : memref<8x256xf32, #tpu.memory_space<vmem>>, vector<8x256xf32>
      %c0_11 = arith.constant 0 : index
      %c0_12 = arith.constant 0 : index
      %13 = vector.load %arg5[%c0_11, %c0_12] : memref<1x256xf32, #tpu.memory_space<vmem>>, vector<1x256xf32>
      %14 = vector.broadcast %13 : vector<1x256xf32> to vector<8x256xf32>
      %15 = arith.mulf %12, %14 : vector<8x256xf32>
      %c0_13 = arith.constant 0 : index
      %c0_14 = arith.constant 0 : index
      %16 = vector.load %arg6[%c0_13, %c0_14] : memref<1x256xf32, #tpu.memory_space<vmem>>, vector<1x256xf32>
      %17 = vector.broadcast %16 : vector<1x256xf32> to vector<8x256xf32>
      %18 = arith.addf %15, %17 : vector<8x256xf32>
      %c0_15 = arith.constant 0 : index
      %c0_16 = arith.constant 0 : index
      %19 = vector.load %arg7[%c0_15, %c0_16] : memref<8x256xf32, #tpu.memory_space<vmem>>, vector<8x256xf32>
      %20 = arith.addf %18, %19 : vector<8x256xf32>
      %cst_17 = arith.constant 0.000000e+00 : f32
      %21 = vector.broadcast %cst_17 : f32 to vector<8x256xf32>
      %22 = arith.maximumf %20, %21 : vector<8x256xf32>
      %c0_18 = arith.constant 0 : index
      %c0_19 = arith.constant 0 : index
      %23 = vector.load %arg8[%c0_18, %c0_19] : memref<8x256xf32, #tpu.memory_space<vmem>>, vector<8x256xf32>
      tpu.vector_store %arg8[%c0_18, %c0_19], %22 {strides = array<i32>} : memref<8x256xf32, #tpu.memory_space<vmem>>, vector<8x256xf32>,
    } else {
    }
    return
  }
  func.func @transform_0(%arg0: i32, %arg1: i32, %arg2: i32) -> (i32, i32) {
    %c0_i32 = arith.constant 0 : i32
    return %arg0, %arg2 : i32, i32
  }
  func.func @transform_1(%arg0: i32, %arg1: i32, %arg2: i32) -> (i32, i32) {
    %c0_i32 = arith.constant 0 : i32
    return %arg2, %arg1 : i32, i32
  }
  func.func @transform_2(%arg0: i32, %arg1: i32, %arg2: i32) -> (i32, i32) {
    %c0_i32 = arith.constant 0 : i32
    %c0_i32_0 = arith.constant 0 : i32
    return %c0_i32, %arg1 : i32, i32
  }
  func.func @transform_3(%arg0: i32, %arg1: i32, %arg2: i32) -> (i32, i32) {
    %c0_i32 = arith.constant 0 : i32
    %c0_i32_0 = arith.constant 0 : i32
    return %c0_i32, %arg1 : i32, i32
  }
  func.func @transform_4(%arg0: i32, %arg1: i32, %arg2: i32) -> (i32, i32) {
    %c0_i32 = arith.constant 0 : i32
    return %arg0, %arg1 : i32, i32
  }
  func.func @transform_5(%arg0: i32, %arg1: i32, %arg2: i32) -> (i32, i32) {
    %c0_i32 = arith.constant 0 : i32
    return %arg0, %arg1 : i32, i32
  }
}

module attributes {stable_mosaic.version = 11 : i64} {
  func.func @_fused_matmul_kernel(%arg0: i32, %arg1: i32, %arg2: i32, %arg3: memref<8x512xbf16, #tpu.memory_space<vmem>>, %arg4: memref<512x256xbf16, #tpu.memory_space<vmem>>, %arg5: memref<1x256xf32, #tpu.memory_space<vmem>>, %arg6: memref<1x256xf32, #tpu.memory_space<vmem>>, %arg7: memref<8x256xf32, #tpu.memory_space<vmem>>, %arg8: memref<8x256xf32, #tpu.memory_space<vmem>>) attributes {dimension_semantics = [#tpu.dimension_semantics<parallel>, #tpu.dimension_semantics<parallel>, #tpu.dimension_semantics<arbitrary>], iteration_bounds = array<i64: 1, 2, 9>, scalar_prefetch = 0 : i64, scratch_operands = 1 : i64, tpu.core_type = #tpu.core_type<tc>, window_params = [{transform_indices = @transform_0, window_bounds = array<i64: 8, 512>}, {transform_indices = @transform_1, window_bounds = array<i64: 512, 256>}, {transform_indices = @transform_2, window_bounds = array<i64: 1, 256>}, {transform_indices = @transform_3, window_bounds = array<i64: 1, 256>}, {transform_indices = @transform_4, window_bounds = array<i64: 8, 256>}]} {
    %c0_i32 = arith.constant 0 : i32
    %0 = arith.cmpi eq, %arg2, %c0_i32 : i32
    %1 = arith.extui %0 : i1 to i32
    %c0_i32_0 = arith.constant 0 : i32
    %2 = arith.cmpi ne, %1, %c0_i32_0 : i32
    scf.if %2 {
      %cst_9 = arith.constant 0.000000e+00 : f32
      %12 = vector.broadcast %cst_9 : f32 to vector<8x256xf32>
      %c0_10 = arith.constant 0 : index
      %c0_11 = arith.constant 0 : index
      %13 = vector.load %arg8[%c0_10, %c0_11] : memref<8x256xf32, #tpu.memory_space<vmem>>, vector<8x256xf32>
      tpu.vector_store %arg8[%c0_10, %c0_11], %12 {strides = array<i32>} : memref<8x256xf32, #tpu.memory_space<vmem>>, vector<8x256xf32>,
    } else {
    }
    %c0 = arith.constant 0 : index
    %c0_1 = arith.constant 0 : index
    %3 = vector.load %arg8[%c0, %c0_1] : memref<8x256xf32, #tpu.memory_space<vmem>>, vector<8x256xf32>
    %c0_2 = arith.constant 0 : index
    %c0_3 = arith.constant 0 : index
    %4 = vector.load %arg3[%c0_2, %c0_3] : memref<8x512xbf16, #tpu.memory_space<vmem>>, vector<8x512xbf16>
    %c0_4 = arith.constant 0 : index
    %c0_5 = arith.constant 0 : index
    %5 = vector.load %arg4[%c0_4, %c0_5] : memref<512x256xbf16, #tpu.memory_space<vmem>>, vector<512x256xbf16>
    %cst = arith.constant dense<0.000000e+00> : vector<8x256xf32>
    %6 = tpu.matmul %4, %5, %cst {dimension_numbers = #tpu.dot_dimension_numbers<[1], [0], [0], [1], [0, 0, 1, 1], [], []>} : vector<8x512xbf16>, vector<512x256xbf16>, vector<8x256xf32> -> vector<8x256xf32>
    %7 = arith.addf %3, %6 : vector<8x256xf32>
    %c0_6 = arith.constant 0 : index
    %c0_7 = arith.constant 0 : index
    %8 = vector.load %arg8[%c0_6, %c0_7] : memref<8x256xf32, #tpu.memory_space<vmem>>, vector<8x256xf32>
    tpu.vector_store %arg8[%c0_6, %c0_7], %7 {strides = array<i32>} : memref<8x256xf32, #tpu.memory_space<vmem>>, vector<8x256xf32>,
    %c8_i32 = arith.constant 8 : i32
    %9 = arith.cmpi eq, %arg2, %c8_i32 : i32
    %10 = arith.extui %9 : i1 to i32
    %c0_i32_8 = arith.constant 0 : i32
    %11 = arith.cmpi ne, %10, %c0_i32_8 : i32
    scf.if %11 {
      %c0_9 = arith.constant 0 : index
      %c0_10 = arith.constant 0 : index
      %12 = vector.load %arg8[%c0_9, %c0_10] : memref<8x256xf32, #tpu.memory_space<vmem>>, vector<8x256xf32>
      %c0_11 = arith.constant 0 : index
      %c0_12 = arith.constant 0 : index
      %13 = vector.load %arg5[%c0_11, %c0_12] : memref<1x256xf32, #tpu.memory_space<vmem>>, vector<1x256xf32>
      %14 = vector.broadcast %13 : vector<1x256xf32> to vector<8x256xf32>
      %15 = arith.mulf %12, %14 : vector<8x256xf32>
      %c0_13 = arith.constant 0 : index
      %c0_14 = arith.constant 0 : index
      %16 = vector.load %arg6[%c0_13, %c0_14] : memref<1x256xf32, #tpu.memory_space<vmem>>, vector<1x256xf32>
      %17 = vector.broadcast %16 : vector<1x256xf32> to vector<8x256xf32>
      %18 = arith.addf %15, %17 : vector<8x256xf32>
      %cst_15 = arith.constant 0.000000e+00 : f32
      %19 = vector.broadcast %cst_15 : f32 to vector<8x256xf32>
      %20 = arith.maximumf %18, %19 : vector<8x256xf32>
      %c0_16 = arith.constant 0 : index
      %c0_17 = arith.constant 0 : index
      %21 = vector.load %arg7[%c0_16, %c0_17] : memref<8x256xf32, #tpu.memory_space<vmem>>, vector<8x256xf32>
      tpu.vector_store %arg7[%c0_16, %c0_17], %20 {strides = array<i32>} : memref<8x256xf32, #tpu.memory_space<vmem>>, vector<8x256xf32>,
    } else {
    }
    return
  }
  func.func @transform_0(%arg0: i32, %arg1: i32, %arg2: i32) -> (i32, i32) {
    %c0_i32 = arith.constant 0 : i32
    return %arg0, %arg2 : i32, i32
  }
  func.func @transform_1(%arg0: i32, %arg1: i32, %arg2: i32) -> (i32, i32) {
    %c0_i32 = arith.constant 0 : i32
    return %arg2, %arg1 : i32, i32
  }
  func.func @transform_2(%arg0: i32, %arg1: i32, %arg2: i32) -> (i32, i32) {
    %c0_i32 = arith.constant 0 : i32
    %c0_i32_0 = arith.constant 0 : i32
    return %c0_i32, %arg1 : i32, i32
  }
  func.func @transform_3(%arg0: i32, %arg1: i32, %arg2: i32) -> (i32, i32) {
    %c0_i32 = arith.constant 0 : i32
    %c0_i32_0 = arith.constant 0 : i32
    return %c0_i32, %arg1 : i32, i32
  }
  func.func @transform_4(%arg0: i32, %arg1: i32, %arg2: i32) -> (i32, i32) {
    %c0_i32 = arith.constant 0 : i32
    return %arg0, %arg1 : i32, i32
  }
}

module attributes {stable_mosaic.version = 11 : i64} {
  func.func @_mean_pool_kernel(%arg0: i32, %arg1: memref<2x1x512xf32, #tpu.memory_space<vmem>>, %arg2: memref<2x512xf32, #tpu.memory_space<vmem>>) attributes {dimension_semantics = [#tpu.dimension_semantics<parallel>], iteration_bounds = array<i64: 1>, scalar_prefetch = 0 : i64, scratch_operands = 0 : i64, tpu.core_type = #tpu.core_type<tc>, window_params = [{transform_indices = @transform_0, window_bounds = array<i64: 2, 1, 512>}, {transform_indices = @transform_1, window_bounds = array<i64: 2, 512>}]} {
    %c0 = arith.constant 0 : index
    %c0_0 = arith.constant 0 : index
    %c0_1 = arith.constant 0 : index
    %0 = vector.load %arg1[%c0, %c0_0, %c0_1] : memref<2x1x512xf32, #tpu.memory_space<vmem>>, vector<2x1x512xf32>
    %cst = arith.constant dense<0.000000e+00> : vector<2x512xf32>
    %1 = vector.multi_reduction <add>, %0, %cst [1] : vector<2x1x512xf32> to vector<2x512xf32>
    %cst_2 = arith.constant 1.000000e+00 : f32
    %2 = vector.broadcast %cst_2 : f32 to vector<2x512xf32>
    %3 = arith.divf %1, %2 : vector<2x512xf32>
    %c0_3 = arith.constant 0 : index
    %c0_4 = arith.constant 0 : index
    %4 = vector.load %arg2[%c0_3, %c0_4] : memref<2x512xf32, #tpu.memory_space<vmem>>, vector<2x512xf32>
    tpu.vector_store %arg2[%c0_3, %c0_4], %3 {strides = array<i32>} : memref<2x512xf32, #tpu.memory_space<vmem>>, vector<2x512xf32>,
    return
  }
  func.func @transform_0(%arg0: i32) -> (i32, i32, i32) {
    %c0_i32 = arith.constant 0 : i32
    %c0_i32_0 = arith.constant 0 : i32
    %c0_i32_1 = arith.constant 0 : i32
    return %arg0, %c0_i32, %c0_i32_0 : i32, i32, i32
  }
  func.func @transform_1(%arg0: i32) -> (i32, i32) {
    %c0_i32 = arith.constant 0 : i32
    %c0_i32_0 = arith.constant 0 : i32
    return %arg0, %c0_i32 : i32, i32
  }
}

module attributes {stable_mosaic.version = 11 : i64} {
  func.func @_fused_matmul_kernel(%arg0: i32, %arg1: i32, %arg2: i32, %arg3: memref<8x512xbf16, #tpu.memory_space<vmem>>, %arg4: memref<512x128xbf16, #tpu.memory_space<vmem>>, %arg5: memref<1x128xf32, #tpu.memory_space<vmem>>, %arg6: memref<1x128xf32, #tpu.memory_space<vmem>>, %arg7: memref<8x128xf32, #tpu.memory_space<vmem>>, %arg8: memref<8x128xf32, #tpu.memory_space<vmem>>) attributes {dimension_semantics = [#tpu.dimension_semantics<parallel>, #tpu.dimension_semantics<parallel>, #tpu.dimension_semantics<arbitrary>], iteration_bounds = array<i64: 1, 1, 1>, scalar_prefetch = 0 : i64, scratch_operands = 1 : i64, tpu.core_type = #tpu.core_type<tc>, window_params = [{transform_indices = @transform_0, window_bounds = array<i64: 8, 512>}, {transform_indices = @transform_1, window_bounds = array<i64: 512, 128>}, {transform_indices = @transform_2, window_bounds = array<i64: 1, 128>}, {transform_indices = @transform_3, window_bounds = array<i64: 1, 128>}, {transform_indices = @transform_4, window_bounds = array<i64: 8, 128>}]} {
    %c0_i32 = arith.constant 0 : i32
    %0 = arith.cmpi eq, %arg2, %c0_i32 : i32
    %1 = arith.extui %0 : i1 to i32
    %c0_i32_0 = arith.constant 0 : i32
    %2 = arith.cmpi ne, %1, %c0_i32_0 : i32
    scf.if %2 {
      %cst_10 = arith.constant 0.000000e+00 : f32
      %12 = vector.broadcast %cst_10 : f32 to vector<8x128xf32>
      %c0_11 = arith.constant 0 : index
      %c0_12 = arith.constant 0 : index
      %13 = vector.load %arg8[%c0_11, %c0_12] : memref<8x128xf32, #tpu.memory_space<vmem>>, vector<8x128xf32>
      tpu.vector_store %arg8[%c0_11, %c0_12], %12 {strides = array<i32>} : memref<8x128xf32, #tpu.memory_space<vmem>>, vector<8x128xf32>,
    } else {
    }
    %c0 = arith.constant 0 : index
    %c0_1 = arith.constant 0 : index
    %3 = vector.load %arg8[%c0, %c0_1] : memref<8x128xf32, #tpu.memory_space<vmem>>, vector<8x128xf32>
    %c0_2 = arith.constant 0 : index
    %c0_3 = arith.constant 0 : index
    %4 = vector.load %arg3[%c0_2, %c0_3] : memref<8x512xbf16, #tpu.memory_space<vmem>>, vector<8x512xbf16>
    %c0_4 = arith.constant 0 : index
    %c0_5 = arith.constant 0 : index
    %5 = vector.load %arg4[%c0_4, %c0_5] : memref<512x128xbf16, #tpu.memory_space<vmem>>, vector<512x128xbf16>
    %cst = arith.constant dense<0.000000e+00> : vector<8x128xf32>
    %6 = tpu.matmul %4, %5, %cst {dimension_numbers = #tpu.dot_dimension_numbers<[1], [0], [0], [1], [0, 0, 1, 1], [], []>} : vector<8x512xbf16>, vector<512x128xbf16>, vector<8x128xf32> -> vector<8x128xf32>
    %7 = arith.addf %3, %6 : vector<8x128xf32>
    %c0_6 = arith.constant 0 : index
    %c0_7 = arith.constant 0 : index
    %8 = vector.load %arg8[%c0_6, %c0_7] : memref<8x128xf32, #tpu.memory_space<vmem>>, vector<8x128xf32>
    tpu.vector_store %arg8[%c0_6, %c0_7], %7 {strides = array<i32>} : memref<8x128xf32, #tpu.memory_space<vmem>>, vector<8x128xf32>,
    %c0_i32_8 = arith.constant 0 : i32
    %9 = arith.cmpi eq, %arg2, %c0_i32_8 : i32
    %10 = arith.extui %9 : i1 to i32
    %c0_i32_9 = arith.constant 0 : i32
    %11 = arith.cmpi ne, %10, %c0_i32_9 : i32
    scf.if %11 {
      %c0_10 = arith.constant 0 : index
      %c0_11 = arith.constant 0 : index
      %12 = vector.load %arg8[%c0_10, %c0_11] : memref<8x128xf32, #tpu.memory_space<vmem>>, vector<8x128xf32>
      %c0_12 = arith.constant 0 : index
      %c0_13 = arith.constant 0 : index
      %13 = vector.load %arg5[%c0_12, %c0_13] : memref<1x128xf32, #tpu.memory_space<vmem>>, vector<1x128xf32>
      %14 = vector.broadcast %13 : vector<1x128xf32> to vector<8x128xf32>
      %15 = arith.mulf %12, %14 : vector<8x128xf32>
      %c0_14 = arith.constant 0 : index
      %c0_15 = arith.constant 0 : index
      %16 = vector.load %arg6[%c0_14, %c0_15] : memref<1x128xf32, #tpu.memory_space<vmem>>, vector<1x128xf32>
      %17 = vector.broadcast %16 : vector<1x128xf32> to vector<8x128xf32>
      %18 = arith.addf %15, %17 : vector<8x128xf32>
      %c0_16 = arith.constant 0 : index
      %c0_17 = arith.constant 0 : index
      %19 = vector.load %arg7[%c0_16, %c0_17] : memref<8x128xf32, #tpu.memory_space<vmem>>, vector<8x128xf32>
      tpu.vector_store %arg7[%c0_16, %c0_17], %18 {strides = array<i32>} : memref<8x128xf32, #tpu.memory_space<vmem>>, vector<8x128xf32>,
    } else {
    }
    return
  }
  func.func @transform_0(%arg0: i32, %arg1: i32, %arg2: i32) -> (i32, i32) {
    %c0_i32 = arith.constant 0 : i32
    return %arg0, %arg2 : i32, i32
  }
  func.func @transform_1(%arg0: i32, %arg1: i32, %arg2: i32) -> (i32, i32) {
    %c0_i32 = arith.constant 0 : i32
    return %arg2, %arg1 : i32, i32
  }
  func.func @transform_2(%arg0: i32, %arg1: i32, %arg2: i32) -> (i32, i32) {
    %c0_i32 = arith.constant 0 : i32
    %c0_i32_0 = arith.constant 0 : i32
    return %c0_i32, %arg1 : i32, i32
  }
  func.func @transform_3(%arg0: i32, %arg1: i32, %arg2: i32) -> (i32, i32) {
    %c0_i32 = arith.constant 0 : i32
    %c0_i32_0 = arith.constant 0 : i32
    return %c0_i32, %arg1 : i32, i32
  }
  func.func @transform_4(%arg0: i32, %arg1: i32, %arg2: i32) -> (i32, i32) {
    %c0_i32 = arith.constant 0 : i32
    return %arg0, %arg1 : i32, i32
  }
}

</mosaic_0001>

<bundles_post_ra>
// kernel: resnet18_forward.23
= control target key start
LH: loop header
LB: loop body
LE: loop exit
PB: predicated region body
PF: predicated region fallthrough
CT: control target
= control target key end

     0   :  { %s1556_s15 = smov 0   ;;  %s1558_s16 = smov 0   ;;  %s1786_s0 = inlined_call_operand.vmem [shape: bf16[512,256], index: 0, kind: input, shape index: {}]   ;;  %s1787_s1 = inlined_call_operand.vmem [shape: bf16[256,128], index: 1, kind: input, shape index: {}]   ;;  %s1788_s2 = inlined_call_operand.vmem [shape: f32[1,128], index: 2, kind: input, shape index: {}]   ;;  %s1789_s3 = inlined_call_operand.vmem [shape: f32[1,128], index: 3, kind: input, shape index: {}]   ;;  %s1790_s4 = inlined_call_operand.vmem [shape: f32[512,128], index: 4, kind: output, shape index: {}]  }
   0x1   :  { %s1560_s17 = smov 0  }
   0x2 LB: > { %s33_s18 = sadd.s32 1, %s1525_s16  ;;  %p1232_p0 = scmp.ge.s32.totalorder %s1529_s17, 1  ;;  %s1529_s17 = sphi %s1560_s17, %s14_s17   ;;  %s1525_s16 = sphi %s1558_s16, %s1792_s16   ;;  %s1521_s15 = sphi %s1556_s15, %s1791_s15  }
   0x3   : > { %p35_p1 = scmp.ge.s32.totalorder %s33_s18, 2  ;;  %p224_p2 = scmp.lt.s32.totalorder %s1529_s17, 3 }
   0x5   : > { %s1794_s18 = smov (%p35_p1, %s33_s18), 0  ;;  %p225_p3 = pnand %p1232_p0, %p224_p2 }
   0x6   : > { %v1443_v0 = vld [vmem:[%s1787_s1 + $0x40] sm:$0xff] (!%p225_p3)   ;;  %s1233_s21 = sshll.u32 (!%p225_p3), %s1521_s15, 5  ;;  %v1445_v2 = vld [vmem:[%s1787_s1 + $0x48] sm:$0xff] (!%p225_p3)   ;;  %v1447_v4 = vld [vmem:[%s1787_s1 + $0x50] sm:$0xff] (!%p225_p3)  }
   0x7   : > { %228 = sbr.rel (%p225_p3) target bundleno = 320 (0x140), region = 36  ;;  %v1444_v1 = vld [vmem:[%s1787_s1] sm:$0xff] (!%p225_p3)   ;;  %1291 = vmatprep.subr.bf16.mxu0 (!%p225_p3), %v1443_v0  ;;  %1403 = vmatprep.subr.bf16.mxu1 (!%p225_p3), %v1443_v0  ;;  %v1446_v3 = vld [vmem:[%s1787_s1 + $0x8] sm:$0xff] (!%p225_p3)   ;;  %p274_p4 = scmp.lt.s32.totalorder (!%p225_p3), %s1233_s21, 63  ;;  %v1448_v5 = vld [vmem:[%s1787_s1 + $0x10] sm:$0xff] (!%p225_p3)  }
   0x8   : > { %1292 = vmatpush3.bf16.msra.mxu0 (!%p225_p3), %v1444_v1  ;;  %1411 = vmatpush3.bf16.msra.mxu1 (!%p225_p3), %v1444_v1  ;;  %v1449_v6 = vld [vmem:[%s1787_s1 + $0x58] sm:$0xff] (!%p225_p3)   ;;  %v1451_v8 = vld [vmem:[%s1787_s1 + $0x60] sm:$0xff] (!%p225_p3)   ;;  %v1453_v10 = vld [vmem:[%s1787_s1 + $0x68] sm:$0xff] (!%p225_p3)  }
   0x9   : > { %1293 = vmatprep.subr.bf16.mxu0 (!%p225_p3), %v1445_v2  ;;  %1404 = vmatprep.subr.bf16.mxu1 (!%p225_p3), %v1445_v2  ;;  %v1450_v7 = vld [vmem:[%s1787_s1 + $0x18] sm:$0xff] (!%p225_p3)   ;;  %v1452_v9 = vld [vmem:[%s1787_s1 + $0x20] sm:$0xff] (!%p225_p3)   ;;  %v1454_v13 = vld [vmem:[%s1787_s1 + $0x28] sm:$0xff] (!%p225_p3)  }
   0xa   : > { %v1455_v14 = vld [vmem:[%s1787_s1 + $0x70] sm:$0xff] (!%p225_p3)   ;;  %v1457_v16 = vld [vmem:[%s1787_s1 + $0x78] sm:$0xff] (!%p225_p3)   ;;  %v1667_v51 = vld [vmem:[%s1788_s2] ss:$0 sm:$0xff] (!%p225_p3) }
   0xb   : > { %v1456_v15 = vld [vmem:[%s1787_s1 + $0x30] sm:$0xff] (!%p225_p3)   ;;  %v1458_v17 = vld [vmem:[%s1787_s1 + $0x38] sm:$0xff] (!%p225_p3)   ;;  %v1672_v57 = vld [vmem:[%s1789_s3] ss:$0 sm:$0xff] (!%p225_p3) }
   0xc   : > { %1294 = vmatpush3.bf16.msra.mxu0 (!%p225_p3), %v1446_v3  ;;  %1412 = vmatpush3.bf16.msra.mxu1 (!%p225_p3), %v1446_v3 }
   0xd   : > { %1295 = vmatprep.subr.bf16.mxu0 (!%p225_p3), %v1447_v4  ;;  %1405 = vmatprep.subr.bf16.mxu1 (!%p225_p3), %v1447_v4 }
   0xe   : > { %s1796_s21 = smov (!%p274_p4, %s1233_s21), 63 }
   0xf   : > { %s1290_s10 = sshll.u32 %s1796_s21, 3 }
  0x10   : > { %1296 = vmatpush3.bf16.msra.mxu0 %v1448_v5  ;;  %1413 = vmatpush3.bf16.msra.mxu1 %v1448_v5  ;;  %s1609_s15 = scalar_lea.vmem %s1786_s0, %s1290_s10 }
  0x11   : > { %1297 = vmatprep.subr.bf16.mxu0 %v1449_v6  ;;  %1406 = vmatprep.subr.bf16.mxu1 %v1449_v6  ;;  %v1461_v11 = vld [vmem:[%s1609_s15 + $0x4] ss:$8 sps:$4 sm:$0xff]   ;;  %v1459_v18 = vld [vmem:[%s1609_s15] ss:$8 sps:$4 sm:$0xff]   ;;  %v1465_v20 = vld [vmem:[%s1609_s15 + $0x14] ss:$8 sps:$4 sm:$0xff]  }
  0x12   : > { %v1464_v12 = vld [vmem:[%s1609_s15 + $0x84] ss:$8 sps:$4 sm:$0xff]   ;;  %729 = vmatprep.mubr.bf16.mxu0 %v1461_v11  ;;  %v1462_v19 = vld [vmem:[%s1609_s15 + $0x80] ss:$8 sps:$4 sm:$0xff]   ;;  %v1467_v21 = vld [vmem:[%s1609_s15 + $0x94] ss:$8 sps:$4 sm:$0xff]  }
  0x13   : > { %793 = vmatprep.mubr.bf16.mxu1 %v1464_v12  ;;  %v1469_v22 = vld [vmem:[%s1609_s15 + $0x10] ss:$8 sps:$4 sm:$0xff]   ;;  %v1471_v24 = vld [vmem:[%s1609_s15 + $0x24] ss:$8 sps:$4 sm:$0xff]   ;;  %v1475_v26 = vld [vmem:[%s1609_s15 + $0x20] ss:$8 sps:$4 sm:$0xff]  }
  0x14   : > { %1298 = vmatpush3.bf16.msra.mxu0 %v1450_v7  ;;  %1414 = vmatpush3.bf16.msra.mxu1 %v1450_v7  ;;  %v1470_v23 = vld [vmem:[%s1609_s15 + $0x90] ss:$8 sps:$4 sm:$0xff]   ;;  %v1473_v25 = vld [vmem:[%s1609_s15 + $0xa4] ss:$8 sps:$4 sm:$0xff]   ;;  %v1476_v27 = vld [vmem:[%s1609_s15 + $0xa0] ss:$8 sps:$4 sm:$0xff]  }
  0x15   : > { %1299 = vmatprep.subr.bf16.mxu0 %v1451_v8  ;;  %1407 = vmatprep.subr.bf16.mxu1 %v1451_v8  ;;  %v1477_v28 = vld [vmem:[%s1609_s15 + $0x34] ss:$8 sps:$4 sm:$0xff]   ;;  %v1481_v30 = vld [vmem:[%s1609_s15 + $0x30] ss:$8 sps:$4 sm:$0xff]   ;;  %v1483_v32 = vld [vmem:[%s1609_s15 + $0x44] ss:$8 sps:$4 sm:$0xff]  }
  0x16   : > { %v1479_v29 = vld [vmem:[%s1609_s15 + $0xb4] ss:$8 sps:$4 sm:$0xff]   ;;  %v1482_v31 = vld [vmem:[%s1609_s15 + $0xb0] ss:$8 sps:$4 sm:$0xff]   ;;  %v1485_v33 = vld [vmem:[%s1609_s15 + $0xc4] ss:$8 sps:$4 sm:$0xff]  }
  0x17   : > { %v1487_v34 = vld [vmem:[%s1609_s15 + $0x40] ss:$8 sps:$4 sm:$0xff]   ;;  %v1489_v36 = vld [vmem:[%s1609_s15 + $0x54] ss:$8 sps:$4 sm:$0xff]   ;;  %v1493_v38 = vld [vmem:[%s1609_s15 + $0x50] ss:$8 sps:$4 sm:$0xff]  }
  0x18   : > { %1300 = vmatpush3.bf16.msra.mxu0 %v1452_v9  ;;  %1415 = vmatpush3.bf16.msra.mxu1 %v1452_v9  ;;  %v1488_v35 = vld [vmem:[%s1609_s15 + $0xc0] ss:$8 sps:$4 sm:$0xff]   ;;  %v1491_v37 = vld [vmem:[%s1609_s15 + $0xd4] ss:$8 sps:$4 sm:$0xff]   ;;  %v1494_v39 = vld [vmem:[%s1609_s15 + $0xd0] ss:$8 sps:$4 sm:$0xff]  }
  0x19   : > { %1301 = vmatprep.subr.bf16.mxu0 %v1453_v10  ;;  %1408 = vmatprep.subr.bf16.mxu1 %v1453_v10  ;;  %v1495_v40 = vld [vmem:[%s1609_s15 + $0x64] ss:$8 sps:$4 sm:$0xff]   ;;  %v1499_v42 = vld [vmem:[%s1609_s15 + $0x60] ss:$8 sps:$4 sm:$0xff]   ;;  %v1501_v44 = vld [vmem:[%s1609_s15 + $0x74] ss:$8 sps:$4 sm:$0xff]  }
  0x1a   : > { %v1497_v41 = vld [vmem:[%s1609_s15 + $0xe4] ss:$8 sps:$4 sm:$0xff]   ;;  %v1500_v43 = vld [vmem:[%s1609_s15 + $0xe0] ss:$8 sps:$4 sm:$0xff]   ;;  %v1503_v45 = vld [vmem:[%s1609_s15 + $0xf4] ss:$8 sps:$4 sm:$0xff]  }
  0x1b   : > { %v1505_v46 = vld [vmem:[%s1609_s15 + $0x70] ss:$8 sps:$4 sm:$0xff]  }
  0x1c   : > { %1302 = vmatpush3.bf16.msra.mxu0 %v1454_v13  ;;  %1416 = vmatpush3.bf16.msra.mxu1 %v1454_v13  ;;  %v1506_v47 = vld [vmem:[%s1609_s15 + $0xf0] ss:$8 sps:$4 sm:$0xff]   ;;  %s1685_s15 = scalar_lea.vmem %s1790_s4, %s1290_s10 }
  0x1d   : > { %1303 = vmatprep.subr.bf16.mxu0 %v1455_v14  ;;  %1409 = vmatprep.subr.bf16.mxu1 %v1455_v14 }
  0x20   : > { %1304 = vmatpush3.bf16.msra.mxu0 %v1456_v15  ;;  %1417 = vmatpush3.bf16.msra.mxu1 %v1456_v15 }
  0x21   : > { %1305 = vmatprep.subr.bf16.mxu0 %v1457_v16  ;;  %1410 = vmatprep.subr.bf16.mxu1 %v1457_v16 }
  0x24   : > { %1306 = vmatpush3.bf16.msra.mxu0 %v1458_v17  ;;  %1418 = vmatpush3.bf16.msra.mxu1 %v1458_v17 }
  0x27   : > { %730 = vmatmul.mubr.bf16.vlgmr.msra.gmra.mrb[0].mxu0 %v1459_v18  ;;  %794 = vmatmul.mubr.bf16.vlgmr.msra.gmra.mrb[0].mxu1 %v1462_v19 }
  0x28   : > { %737 = vmatprep.mubr.bf16.mxu0 %v1465_v20  ;;  %801 = vmatprep.mubr.bf16.mxu1 %v1467_v21 }
  0x2f   : > { %738 = vmatmul.mubr.bf16.gmra.mrb[4].mxu0 %v1469_v22  ;;  %802 = vmatmul.mubr.bf16.gmra.mrb[4].mxu1 %v1470_v23 }
  0x30   : > { %745 = vmatprep.mubr.bf16.mxu0 %v1471_v24  ;;  %809 = vmatprep.mubr.bf16.mxu1 %v1473_v25 }
  0x37   : > { %746 = vmatmul.mubr.bf16.gmra.mrb[8].mxu0 %v1475_v26  ;;  %810 = vmatmul.mubr.bf16.gmra.mrb[8].mxu1 %v1476_v27 }
  0x38   : > { %753 = vmatprep.mubr.bf16.mxu0 %v1477_v28  ;;  %817 = vmatprep.mubr.bf16.mxu1 %v1479_v29 }
  0x3f   : > { %754 = vmatmul.mubr.bf16.gmra.mrb[12].mxu0 %v1481_v30  ;;  %818 = vmatmul.mubr.bf16.gmra.mrb[12].mxu1 %v1482_v31 }
  0x40   : > { %761 = vmatprep.mubr.bf16.mxu0 %v1483_v32  ;;  %825 = vmatprep.mubr.bf16.mxu1 %v1485_v33 }
  0x47   : > { %762 = vmatmul.mubr.bf16.gmra.mrb[16].mxu0 %v1487_v34  ;;  %826 = vmatmul.mubr.bf16.gmra.mrb[16].mxu1 %v1488_v35 }
  0x48   : > { %769 = vmatprep.mubr.bf16.mxu0 %v1489_v36  ;;  %833 = vmatprep.mubr.bf16.mxu1 %v1491_v37 }
  0x4f   : > { %770 = vmatmul.mubr.bf16.gmra.mrb[20].mxu0 %v1493_v38  ;;  %834 = vmatmul.mubr.bf16.gmra.mrb[20].mxu1 %v1494_v39 }
  0x50   : > { %777 = vmatprep.mubr.bf16.mxu0 %v1495_v40  ;;  %841 = vmatprep.mubr.bf16.mxu1 %v1497_v41 }
  0x57   : > { %778 = vmatmul.mubr.bf16.gmra.mrb[24].mxu0 %v1499_v42  ;;  %842 = vmatmul.mubr.bf16.gmra.mrb[24].mxu1 %v1500_v43 }
  0x58   : > { %785 = vmatprep.mubr.bf16.mxu0 %v1501_v44  ;;  %849 = vmatprep.mubr.bf16.mxu1 %v1503_v45 }
  0x5f   : > { %786 = vmatmul.mubr.bf16.gmra.mrb[28].mxu0 %v1505_v46  ;;  %850 = vmatmul.mubr.bf16.gmra.mrb[28].mxu1 %v1506_v47 }
  0xfa   : > { %v1307_v48 = vpop.f32.mrb[0].mxu0  ;;  %v1355_v49 = vpop.f32.mrb[0].mxu1 }
  0xfb   : > { %v1308_v50 = vpop.f32.mrb[1].mxu0  ;;  %v1356_v52 = vpop.f32.mrb[1].mxu1 }
  0xfc   : > { %v1309_v53 = vadd.f32 %v1308_v50, %v1307_v48  ;;  %v1357_v54 = vadd.f32 %v1356_v52, %v1355_v49  ;;  %v1310_v55 = vpop.f32.mrb[2].mxu0  ;;  %v1358_v56 = vpop.f32.mrb[2].mxu1 }
  0xfd   : > { %v1311_v58 = vpop.f32.mrb[3].mxu0  ;;  %v1359_v59 = vpop.f32.mrb[3].mxu1 }
  0xfe   : > { %v964_v60 = vmul.f32 %v1309_v53, %v1667_v51  ;;  %v980_v61 = vmul.f32 %v1357_v54, %v1667_v51  ;;  %v1312_v62 = vadd.f32 %v1311_v58, %v1310_v55  ;;  %v1360_v63 = vadd.f32 %v1359_v59, %v1358_v56 }
 0x100   : > { %v1003_v0 = vadd.f32 %v1672_v57, %v964_v60  ;;  %v1019_v1 = vadd.f32 %v1672_v57, %v980_v61  ;;  %v965_v2 = vmul.f32 %v1312_v62, %v1667_v51  ;;  %v981_v3 = vmul.f32 %v1360_v63, %v1667_v51 }
 0x102   : > { %v1035_v4 = vmax.f32 %v1003_v0, 0.0  ;;  %v1051_v5 = vmax.f32 %v1019_v1, 0.0  ;;  %v1004_v6 = vadd.f32 %v1672_v57, %v965_v2  ;;  %v1020_v7 = vadd.f32 %v1672_v57, %v981_v3  ;;  %v1313_v8 = vpop.f32.mrb[4].mxu0  ;;  %v1361_v9 = vpop.f32.mrb[4].mxu1 }
 0x103   : > { %v1314_v10 = vpop.f32.mrb[5].mxu0  ;;  %v1362_v11 = vpop.f32.mrb[5].mxu1 }
 0x104   : > { %1067 = vst [vmem:[%s1685_s15] sm:$0xff] %v1035_v4  ;;  %1083 = vst [vmem:[%s1685_s15 + $0x80] sm:$0xff] %v1051_v5  ;;  %v1036_v12 = vmax.f32 %v1004_v6, 0.0  ;;  %v1052_v13 = vmax.f32 %v1020_v7, 0.0  ;;  %v1315_v14 = vadd.f32 %v1314_v10, %v1313_v8  ;;  %v1363_v15 = vadd.f32 %v1362_v11, %v1361_v9  ;;  %v1316_v16 = vpop.f32.mrb[6].mxu0  ;;  %v1364_v17 = vpop.f32.mrb[6].mxu1 }
 0x105   : > { %v1317_v18 = vpop.f32.mrb[7].mxu0  ;;  %v1365_v19 = vpop.f32.mrb[7].mxu1 }
 0x106   : > { %1068 = vst [vmem:[%s1685_s15 + $0x8] sm:$0xff] %v1036_v12  ;;  %1084 = vst [vmem:[%s1685_s15 + $0x88] sm:$0xff] %v1052_v13  ;;  %v966_v20 = vmul.f32 %v1315_v14, %v1667_v51  ;;  %v982_v21 = vmul.f32 %v1363_v15, %v1667_v51  ;;  %v1318_v22 = vadd.f32 %v1317_v18, %v1316_v16 }
 0x107   : > { %v1366_v23 = vadd.f32 %v1365_v19, %v1364_v17 }
 0x108   : > { %v1005_v24 = vadd.f32 %v1672_v57, %v966_v20  ;;  %v1021_v25 = vadd.f32 %v1672_v57, %v982_v21  ;;  %v967_v26 = vmul.f32 %v1318_v22, %v1667_v51 }
 0x109   : > { %v983_v27 = vmul.f32 %v1366_v23, %v1667_v51 }
 0x10a   : > { %v1037_v28 = vmax.f32 %v1005_v24, 0.0  ;;  %v1053_v29 = vmax.f32 %v1021_v25, 0.0  ;;  %v1006_v30 = vadd.f32 %v1672_v57, %v967_v26  ;;  %v1319_v32 = vpop.f32.mrb[8].mxu0  ;;  %v1367_v33 = vpop.f32.mrb[8].mxu1 }
 0x10b   : > { %v1022_v31 = vadd.f32 %v1672_v57, %v983_v27  ;;  %v1320_v34 = vpop.f32.mrb[9].mxu0  ;;  %v1368_v35 = vpop.f32.mrb[9].mxu1 }
 0x10c   : > { %1069 = vst [vmem:[%s1685_s15 + $0x10] sm:$0xff] %v1037_v28  ;;  %1085 = vst [vmem:[%s1685_s15 + $0x90] sm:$0xff] %v1053_v29  ;;  %v1038_v36 = vmax.f32 %v1006_v30, 0.0  ;;  %v1321_v38 = vadd.f32 %v1320_v34, %v1319_v32  ;;  %v1369_v39 = vadd.f32 %v1368_v35, %v1367_v33  ;;  %v1322_v40 = vpop.f32.mrb[10].mxu0  ;;  %v1370_v41 = vpop.f32.mrb[10].mxu1 }
 0x10d   : > { %v1054_v37 = vmax.f32 %v1022_v31, 0.0  ;;  %v1323_v42 = vpop.f32.mrb[11].mxu0  ;;  %v1371_v43 = vpop.f32.mrb[11].mxu1 }
 0x10e   : > { %1070 = vst [vmem:[%s1685_s15 + $0x18] sm:$0xff] %v1038_v36  ;;  %v968_v44 = vmul.f32 %v1321_v38, %v1667_v51  ;;  %v984_v45 = vmul.f32 %v1369_v39, %v1667_v51  ;;  %v1324_v46 = vadd.f32 %v1323_v42, %v1322_v40  ;;  %v1372_v47 = vadd.f32 %v1371_v43, %v1370_v41 }
 0x10f   : > { %1086 = vst [vmem:[%s1685_s15 + $0x98] sm:$0xff] %v1054_v37 }
 0x110   : > { %v1007_v48 = vadd.f32 %v1672_v57, %v968_v44  ;;  %v1023_v49 = vadd.f32 %v1672_v57, %v984_v45  ;;  %v969_v50 = vmul.f32 %v1324_v46, %v1667_v51  ;;  %v985_v52 = vmul.f32 %v1372_v47, %v1667_v51 }
 0x112   : > { %v1039_v53 = vmax.f32 %v1007_v48, 0.0  ;;  %v1055_v54 = vmax.f32 %v1023_v49, 0.0  ;;  %v1008_v55 = vadd.f32 %v1672_v57, %v969_v50  ;;  %v1024_v56 = vadd.f32 %v1672_v57, %v985_v52  ;;  %v1325_v58 = vpop.f32.mrb[12].mxu0  ;;  %v1373_v59 = vpop.f32.mrb[12].mxu1 }
 0x113   : > { %v1326_v60 = vpop.f32.mrb[13].mxu0  ;;  %v1374_v61 = vpop.f32.mrb[13].mxu1 }
 0x114   : > { %1071 = vst [vmem:[%s1685_s15 + $0x20] sm:$0xff] %v1039_v53  ;;  %1087 = vst [vmem:[%s1685_s15 + $0xa0] sm:$0xff] %v1055_v54  ;;  %v1040_v62 = vmax.f32 %v1008_v55, 0.0  ;;  %v1056_v63 = vmax.f32 %v1024_v56, 0.0  ;;  %v1327_v0 = vadd.f32 %v1326_v60, %v1325_v58  ;;  %v1375_v1 = vadd.f32 %v1374_v61, %v1373_v59  ;;  %v1328_v2 = vpop.f32.mrb[14].mxu0  ;;  %v1376_v3 = vpop.f32.mrb[14].mxu1 }
 0x115   : > { %v1329_v4 = vpop.f32.mrb[15].mxu0  ;;  %v1377_v5 = vpop.f32.mrb[15].mxu1 }
 0x116   : > { %1072 = vst [vmem:[%s1685_s15 + $0x28] sm:$0xff] %v1040_v62  ;;  %1088 = vst [vmem:[%s1685_s15 + $0xa8] sm:$0xff] %v1056_v63  ;;  %v970_v6 = vmul.f32 %v1327_v0, %v1667_v51  ;;  %v986_v7 = vmul.f32 %v1375_v1, %v1667_v51  ;;  %v1330_v8 = vadd.f32 %v1329_v4, %v1328_v2 }
 0x117   : > { %v1378_v9 = vadd.f32 %v1377_v5, %v1376_v3 }
 0x118   : > { %v1009_v10 = vadd.f32 %v1672_v57, %v970_v6  ;;  %v1025_v11 = vadd.f32 %v1672_v57, %v986_v7  ;;  %v971_v12 = vmul.f32 %v1330_v8, %v1667_v51 }
 0x119   : > { %v987_v13 = vmul.f32 %v1378_v9, %v1667_v51 }
 0x11a   : > { %v1041_v14 = vmax.f32 %v1009_v10, 0.0  ;;  %v1057_v15 = vmax.f32 %v1025_v11, 0.0  ;;  %v1010_v16 = vadd.f32 %v1672_v57, %v971_v12  ;;  %v1331_v18 = vpop.f32.mrb[16].mxu0  ;;  %v1379_v19 = vpop.f32.mrb[16].mxu1 }
 0x11b   : > { %v1026_v17 = vadd.f32 %v1672_v57, %v987_v13  ;;  %v1332_v20 = vpop.f32.mrb[17].mxu0  ;;  %v1380_v21 = vpop.f32.mrb[17].mxu1 }
 0x11c   : > { %1073 = vst [vmem:[%s1685_s15 + $0x30] sm:$0xff] %v1041_v14  ;;  %1089 = vst [vmem:[%s1685_s15 + $0xb0] sm:$0xff] %v1057_v15  ;;  %v1042_v22 = vmax.f32 %v1010_v16, 0.0  ;;  %v1333_v24 = vadd.f32 %v1332_v20, %v1331_v18  ;;  %v1381_v25 = vadd.f32 %v1380_v21, %v1379_v19  ;;  %v1334_v26 = vpop.f32.mrb[18].mxu0  ;;  %v1382_v27 = vpop.f32.mrb[18].mxu1 }
 0x11d   : > { %v1058_v23 = vmax.f32 %v1026_v17, 0.0  ;;  %v1335_v28 = vpop.f32.mrb[19].mxu0  ;;  %v1383_v29 = vpop.f32.mrb[19].mxu1 }
 0x11e   : > { %1074 = vst [vmem:[%s1685_s15 + $0x38] sm:$0xff] %v1042_v22  ;;  %v972_v30 = vmul.f32 %v1333_v24, %v1667_v51  ;;  %v988_v31 = vmul.f32 %v1381_v25, %v1667_v51  ;;  %v1336_v32 = vadd.f32 %v1335_v28, %v1334_v26  ;;  %v1384_v33 = vadd.f32 %v1383_v29, %v1382_v27 }
 0x11f   : > { %1090 = vst [vmem:[%s1685_s15 + $0xb8] sm:$0xff] %v1058_v23 }
 0x120   : > { %v1011_v34 = vadd.f32 %v1672_v57, %v972_v30  ;;  %v1027_v35 = vadd.f32 %v1672_v57, %v988_v31  ;;  %v973_v36 = vmul.f32 %v1336_v32, %v1667_v51  ;;  %v989_v37 = vmul.f32 %v1384_v33, %v1667_v51 }
 0x122   : > { %v1043_v38 = vmax.f32 %v1011_v34, 0.0  ;;  %v1059_v39 = vmax.f32 %v1027_v35, 0.0  ;;  %v1012_v40 = vadd.f32 %v1672_v57, %v973_v36  ;;  %v1028_v41 = vadd.f32 %v1672_v57, %v989_v37  ;;  %v1337_v42 = vpop.f32.mrb[20].mxu0  ;;  %v1385_v43 = vpop.f32.mrb[20].mxu1 }
 0x123   : > { %v1338_v44 = vpop.f32.mrb[21].mxu0  ;;  %v1386_v45 = vpop.f32.mrb[21].mxu1 }
 0x124   : > { %1075 = vst [vmem:[%s1685_s15 + $0x40] sm:$0xff] %v1043_v38  ;;  %1091 = vst [vmem:[%s1685_s15 + $0xc0] sm:$0xff] %v1059_v39  ;;  %v1044_v46 = vmax.f32 %v1012_v40, 0.0  ;;  %v1060_v47 = vmax.f32 %v1028_v41, 0.0  ;;  %v1339_v48 = vadd.f32 %v1338_v44, %v1337_v42  ;;  %v1387_v49 = vadd.f32 %v1386_v45, %v1385_v43  ;;  %v1340_v50 = vpop.f32.mrb[22].mxu0  ;;  %v1388_v52 = vpop.f32.mrb[22].mxu1 }
 0x125   : > { %v1341_v53 = vpop.f32.mrb[23].mxu0  ;;  %v1389_v54 = vpop.f32.mrb[23].mxu1 }
 0x126   : > { %1076 = vst [vmem:[%s1685_s15 + $0x48] sm:$0xff] %v1044_v46  ;;  %1092 = vst [vmem:[%s1685_s15 + $0xc8] sm:$0xff] %v1060_v47  ;;  %v974_v55 = vmul.f32 %v1339_v48, %v1667_v51  ;;  %v990_v56 = vmul.f32 %v1387_v49, %v1667_v51  ;;  %v1342_v58 = vadd.f32 %v1341_v53, %v1340_v50 }
 0x127   : > { %v1390_v59 = vadd.f32 %v1389_v54, %v1388_v52 }
 0x128   : > { %v1013_v60 = vadd.f32 %v1672_v57, %v974_v55  ;;  %v1029_v61 = vadd.f32 %v1672_v57, %v990_v56  ;;  %v975_v62 = vmul.f32 %v1342_v58, %v1667_v51 }
 0x129   : > { %v991_v63 = vmul.f32 %v1390_v59, %v1667_v51 }
 0x12a   : > { %v1045_v0 = vmax.f32 %v1013_v60, 0.0  ;;  %v1061_v1 = vmax.f32 %v1029_v61, 0.0  ;;  %v1014_v2 = vadd.f32 %v1672_v57, %v975_v62  ;;  %v1343_v4 = vpop.f32.mrb[24].mxu0  ;;  %v1391_v5 = vpop.f32.mrb[24].mxu1 }
 0x12b   : > { %v1030_v3 = vadd.f32 %v1672_v57, %v991_v63  ;;  %v1344_v6 = vpop.f32.mrb[25].mxu0  ;;  %v1392_v7 = vpop.f32.mrb[25].mxu1 }
 0x12c   : > { %1077 = vst [vmem:[%s1685_s15 + $0x50] sm:$0xff] %v1045_v0  ;;  %1093 = vst [vmem:[%s1685_s15 + $0xd0] sm:$0xff] %v1061_v1  ;;  %v1046_v8 = vmax.f32 %v1014_v2, 0.0  ;;  %v1345_v10 = vadd.f32 %v1344_v6, %v1343_v4  ;;  %v1393_v11 = vadd.f32 %v1392_v7, %v1391_v5  ;;  %v1346_v12 = vpop.f32.mrb[26].mxu0  ;;  %v1394_v13 = vpop.f32.mrb[26].mxu1 }
 0x12d   : > { %v1062_v9 = vmax.f32 %v1030_v3, 0.0  ;;  %v1347_v14 = vpop.f32.mrb[27].mxu0  ;;  %v1395_v15 = vpop.f32.mrb[27].mxu1 }
 0x12e   : > { %1078 = vst [vmem:[%s1685_s15 + $0x58] sm:$0xff] %v1046_v8  ;;  %v976_v16 = vmul.f32 %v1345_v10, %v1667_v51  ;;  %v992_v17 = vmul.f32 %v1393_v11, %v1667_v51  ;;  %v1348_v18 = vadd.f32 %v1347_v14, %v1346_v12  ;;  %v1396_v19 = vadd.f32 %v1395_v15, %v1394_v13 }
 0x12f   : > { %1094 = vst [vmem:[%s1685_s15 + $0xd8] sm:$0xff] %v1062_v9 }
 0x130   : > { %v1015_v20 = vadd.f32 %v1672_v57, %v976_v16  ;;  %v1031_v21 = vadd.f32 %v1672_v57, %v992_v17  ;;  %v977_v22 = vmul.f32 %v1348_v18, %v1667_v51  ;;  %v993_v23 = vmul.f32 %v1396_v19, %v1667_v51 }
 0x132   : > { %v1047_v24 = vmax.f32 %v1015_v20, 0.0  ;;  %v1063_v25 = vmax.f32 %v1031_v21, 0.0  ;;  %v1016_v26 = vadd.f32 %v1672_v57, %v977_v22  ;;  %v1032_v27 = vadd.f32 %v1672_v57, %v993_v23  ;;  %v1349_v28 = vpop.f32.mrb[28].mxu0  ;;  %v1397_v29 = vpop.f32.mrb[28].mxu1 }
 0x133   : > { %v1350_v30 = vpop.f32.mrb[29].mxu0  ;;  %v1398_v31 = vpop.f32.mrb[29].mxu1 }
 0x134   : > { %1079 = vst [vmem:[%s1685_s15 + $0x60] sm:$0xff] %v1047_v24  ;;  %1095 = vst [vmem:[%s1685_s15 + $0xe0] sm:$0xff] %v1063_v25  ;;  %v1048_v32 = vmax.f32 %v1016_v26, 0.0  ;;  %v1064_v33 = vmax.f32 %v1032_v27, 0.0  ;;  %v1351_v34 = vadd.f32 %v1350_v30, %v1349_v28  ;;  %v1399_v35 = vadd.f32 %v1398_v31, %v1397_v29  ;;  %v1352_v36 = vpop.f32.mrb[30].mxu0  ;;  %v1400_v37 = vpop.f32.mrb[30].mxu1 }
 0x135   : > { %v1353_v38 = vpop.f32.mrb[31].mxu0  ;;  %v1401_v39 = vpop.f32.mrb[31].mxu1 }
 0x136   : > { %1080 = vst [vmem:[%s1685_s15 + $0x68] sm:$0xff] %v1048_v32  ;;  %1096 = vst [vmem:[%s1685_s15 + $0xe8] sm:$0xff] %v1064_v33  ;;  %v978_v40 = vmul.f32 %v1351_v34, %v1667_v51  ;;  %v994_v41 = vmul.f32 %v1399_v35, %v1667_v51  ;;  %v1354_v42 = vadd.f32 %v1353_v38, %v1352_v36 }
 0x137   : > { %v1402_v43 = vadd.f32 %v1401_v39, %v1400_v37 }
 0x138   : > { %v1017_v44 = vadd.f32 %v1672_v57, %v978_v40  ;;  %v1033_v45 = vadd.f32 %v1672_v57, %v994_v41  ;;  %v979_v46 = vmul.f32 %v1354_v42, %v1667_v51 }
 0x139   : > { %v995_v47 = vmul.f32 %v1402_v43, %v1667_v51 }
 0x13a   : > { %v1049_v48 = vmax.f32 %v1017_v44, 0.0  ;;  %v1065_v49 = vmax.f32 %v1033_v45, 0.0  ;;  %v1018_v50 = vadd.f32 %v1672_v57, %v979_v46 }
 0x13b   : > { %v1034_v52 = vadd.f32 %v1672_v57, %v995_v47 }
 0x13c   : > { %1081 = vst [vmem:[%s1685_s15 + $0x70] sm:$0xff] %v1049_v48  ;;  %1097 = vst [vmem:[%s1685_s15 + $0xf0] sm:$0xff] %v1065_v49  ;;  %v1050_v53 = vmax.f32 %v1018_v50, 0.0 }
 0x13d   : > { %v1066_v54 = vmax.f32 %v1034_v52, 0.0 }
 0x13e   : > { %1082 = vst [vmem:[%s1685_s15 + $0x78] sm:$0xff] %v1050_v53 }
 0x13f   : > { %1098 = vst [vmem:[%s1685_s15 + $0xf8] sm:$0xff] %v1066_v54 }
 0x140 PF: > { %s14_s17 = sadd.s32 1, %s1529_s17   ;;  %s1791_s15 = smov %s1525_s16 }
 0x141   : > { %p11_p5 = scmp.ge.s32.totalorder %s14_s17, 4   ;;  %s1792_s16 = smov %s1794_s18 }
 0x143   :  { %13 = sbr.rel (!%p11_p5) target bundleno = 2 (0x2), region = 83 }

// kernel: resnet18_forward.24
= control target key start
LH: loop header
LB: loop body
LE: loop exit
PB: predicated region body
PF: predicated region fallthrough
CT: control target
= control target key end

     0   :  { %s391_s6 = smov 0   ;;  %s393_s7 = smov 0   ;;  %s637_s0 = inlined_call_operand.vmem [shape: f32[9,128,64], index: 0, kind: input, shape index: {}]   ;;  %s638_s1 = inlined_call_operand.vmem [shape: f32[128,64], index: 1, kind: output, shape index: {}]  }
   0x1   :  { %s395_s8 = smov 0  }
   0x2 LB: > { %s20_s9 = sadd.s32 1, %s375_s7  ;;  %p323_p0 = scmp.ge.s32.totalorder %s379_s8, 1  ;;  %s379_s8 = sphi %s395_s8, %s11_s8   ;;  %s375_s7 = sphi %s393_s7, %s640_s7   ;;  %s371_s6 = sphi %s391_s6, %s639_s6  }
   0x3   : > { %p21_p1 = scmp.ge.s32.totalorder %s20_s9, 9  ;;  %p106_p2 = scmp.lt.s32.totalorder %s379_s8, 10 }
   0x5   : > { %s642_s9 = smov (%p21_p1, %s20_s9), 0  ;;  %p107_p3 = pnand %p323_p0, %p106_p2 }
   0x6   : > { %p131_p4 = scmp.lt.s32.totalorder (!%p107_p3), %s371_s6, 8  ;;  %p326_p5 = scmp.ne.s32.totalorder (!%p107_p3), %s371_s6, 0 }
   0x7   : > { %110 = sbr.rel (%p107_p3) target bundleno = 44 (0x2c), region = 24 }
   0xe   : > { %s132_s10 = scalar_select %p131_p4, %s371_s6, 8 }
   0xf   : > { %149 = sbr.rel (%p326_p5) target bundleno = 27 (0x1b), region = 28  ;;  %vm166_vm0 = vcmask (!%p326_p5), 523264  }
  0x10   : > { %s332_s11 = sshll.u32 %s132_s10, 7 }
  0x11   : > { %s416_s14 = scalar_lea.vmem %s637_s0, %s332_s11 }
  0x12   : > { %v150_v0 = vld [vmem:[%s416_s14] sm:$0xff] (!%p326_p5)  ;;  %v151_v1 = vld [vmem:[%s416_s14 + $0x8] sm:$0xff] (!%p326_p5)  ;;  %v152_v2 = vld [vmem:[%s416_s14 + $0x10] sm:$0xff] (!%p326_p5) }
  0x13   : > { %167 = vst.msk [vmem:[%s638_s1] sm:$0xff] (!%p326_p5), %vm166_vm0, %v150_v0  ;;  %168 = vst.msk [vmem:[%s638_s1 + $0x8] sm:$0xff] (!%p326_p5), %vm166_vm0, %v151_v1  ;;  %v153_v3 = vld [vmem:[%s416_s14 + $0x18] sm:$0xff] (!%p326_p5)  ;;  %v154_v4 = vld [vmem:[%s416_s14 + $0x20] sm:$0xff] (!%p326_p5) }
  0x14   : > { %169 = vst.msk [vmem:[%s638_s1 + $0x10] sm:$0xff] (!%p326_p5), %vm166_vm0, %v152_v2  ;;  %v155_v5 = vld [vmem:[%s416_s14 + $0x28] sm:$0xff] (!%p326_p5)  ;;  %170 = vst.msk [vmem:[%s638_s1 + $0x18] sm:$0xff] (!%p326_p5), %vm166_vm0, %v153_v3  ;;  %v156_v6 = vld [vmem:[%s416_s14 + $0x30] sm:$0xff] (!%p326_p5) }
  0x15   : > { %171 = vst.msk [vmem:[%s638_s1 + $0x20] sm:$0xff] (!%p326_p5), %vm166_vm0, %v154_v4  ;;  %172 = vst.msk [vmem:[%s638_s1 + $0x28] sm:$0xff] (!%p326_p5), %vm166_vm0, %v155_v5  ;;  %v157_v7 = vld [vmem:[%s416_s14 + $0x38] sm:$0xff] (!%p326_p5)  ;;  %v158_v8 = vld [vmem:[%s416_s14 + $0x40] sm:$0xff] (!%p326_p5) }
  0x16   : > { %173 = vst.msk [vmem:[%s638_s1 + $0x30] sm:$0xff] %vm166_vm0, %v156_v6  ;;  %174 = vst.msk [vmem:[%s638_s1 + $0x38] sm:$0xff] %vm166_vm0, %v157_v7  ;;  %v159_v9 = vld [vmem:[%s416_s14 + $0x48] sm:$0xff]  ;;  %v160_v10 = vld [vmem:[%s416_s14 + $0x50] sm:$0xff] }
  0x17   : > { %175 = vst.msk [vmem:[%s638_s1 + $0x40] sm:$0xff] %vm166_vm0, %v158_v8  ;;  %v161_v11 = vld [vmem:[%s416_s14 + $0x58] sm:$0xff]  ;;  %176 = vst.msk [vmem:[%s638_s1 + $0x48] sm:$0xff] %vm166_vm0, %v159_v9  ;;  %v162_v12 = vld [vmem:[%s416_s14 + $0x60] sm:$0xff] }
  0x18   : > { %177 = vst.msk [vmem:[%s638_s1 + $0x50] sm:$0xff] %vm166_vm0, %v160_v10  ;;  %178 = vst.msk [vmem:[%s638_s1 + $0x58] sm:$0xff] %vm166_vm0, %v161_v11  ;;  %v163_v13 = vld [vmem:[%s416_s14 + $0x68] sm:$0xff]  ;;  %v164_v14 = vld [vmem:[%s416_s14 + $0x70] sm:$0xff] }
  0x19   : > { %179 = vst.msk [vmem:[%s638_s1 + $0x60] sm:$0xff] %vm166_vm0, %v162_v12  ;;  %180 = vst.msk [vmem:[%s638_s1 + $0x68] sm:$0xff] %vm166_vm0, %v163_v13  ;;  %v165_v15 = vld [vmem:[%s416_s14 + $0x78] sm:$0xff] }
  0x1a   : > { %181 = vst.msk [vmem:[%s638_s1 + $0x70] sm:$0xff] %vm166_vm0, %v164_v14  ;;  %182 = vst.msk [vmem:[%s638_s1 + $0x78] sm:$0xff] %vm166_vm0, %v165_v15 }
  0x1b PF: > { %p327_p6 = scmp.le.s32.totalorder %s371_s6, 0 }
  0x1c   : > { %v203_v17 = vld [vmem:[%s416_s14] sm:$0xff] (!%p327_p6)  ;;  %vm235_vm1 = vcmask (!%p327_p6), 523264   ;;  %v204_v20 = vld [vmem:[%s416_s14 + $0x8] sm:$0xff] (!%p327_p6)  ;;  %v205_v22 = vld [vmem:[%s416_s14 + $0x10] sm:$0xff] (!%p327_p6) }
  0x1d   : > { %186 = sbr.rel (%p327_p6) target bundleno = 44 (0x2c), region = 32  ;;  %v206_v26 = vld [vmem:[%s416_s14 + $0x18] sm:$0xff] (!%p327_p6)  ;;  %v207_v29 = vld [vmem:[%s416_s14 + $0x20] sm:$0xff] (!%p327_p6)  ;;  %v208_v31 = vld [vmem:[%s416_s14 + $0x28] sm:$0xff] (!%p327_p6) }
  0x1e   : > { %v209_v35 = vld [vmem:[%s416_s14 + $0x30] sm:$0xff] (!%p327_p6)  ;;  %v210_v38 = vld [vmem:[%s416_s14 + $0x38] sm:$0xff] (!%p327_p6)  ;;  %v195_v39 = vld [vmem:[%s638_s1 + $0x40] sm:$0xff] (!%p327_p6) }
  0x1f   : > { %v187_v16 = vld [vmem:[%s638_s1] sm:$0xff] (!%p327_p6)  ;;  %v188_v18 = vld [vmem:[%s638_s1 + $0x8] sm:$0xff] (!%p327_p6)  ;;  %v197_v45 = vld [vmem:[%s638_s1 + $0x50] sm:$0xff] (!%p327_p6) }
  0x20   : > { %v219_v19 = vmax.f32 (!%p327_p6), %v187_v16, %v203_v17  ;;  %v189_v21 = vld [vmem:[%s638_s1 + $0x10] sm:$0xff] (!%p327_p6)  ;;  %v220_v23 = vmax.f32 (!%p327_p6), %v188_v18, %v204_v20  ;;  %v190_v25 = vld [vmem:[%s638_s1 + $0x18] sm:$0xff] (!%p327_p6)  ;;  %v211_v40 = vld [vmem:[%s416_s14 + $0x40] sm:$0xff] (!%p327_p6) }
  0x21   : > { %v221_v24 = vmax.f32 (!%p327_p6), %v189_v21, %v205_v22  ;;  %v191_v27 = vld [vmem:[%s638_s1 + $0x20] sm:$0xff] (!%p327_p6)  ;;  %v222_v28 = vmax.f32 (!%p327_p6), %v190_v25, %v206_v26  ;;  %v192_v30 = vld [vmem:[%s638_s1 + $0x28] sm:$0xff] (!%p327_p6)  ;;  %v227_v42 = vmax.f32 (!%p327_p6), %v195_v39, %v211_v40  ;;  %v213_v47 = vld [vmem:[%s416_s14 + $0x50] sm:$0xff] (!%p327_p6) }
  0x22   : > { %236 = vst.msk [vmem:[%s638_s1] sm:$0xff] (!%p327_p6), %vm235_vm1, %v219_v19  ;;  %237 = vst.msk [vmem:[%s638_s1 + $0x8] sm:$0xff] (!%p327_p6), %vm235_vm1, %v220_v23  ;;  %v223_v32 = vmax.f32 (!%p327_p6), %v191_v27, %v207_v29  ;;  %v224_v33 = vmax.f32 (!%p327_p6), %v192_v30, %v208_v31  ;;  %v193_v34 = vld [vmem:[%s638_s1 + $0x30] sm:$0xff] (!%p327_p6)  ;;  %v194_v36 = vld [vmem:[%s638_s1 + $0x38] sm:$0xff] (!%p327_p6)  ;;  %v229_v50 = vmax.f32 (!%p327_p6), %v197_v45, %v213_v47 }
  0x23   : > { %238 = vst.msk [vmem:[%s638_s1 + $0x10] sm:$0xff] (!%p327_p6), %vm235_vm1, %v221_v24  ;;  %239 = vst.msk [vmem:[%s638_s1 + $0x18] sm:$0xff] (!%p327_p6), %vm235_vm1, %v222_v28  ;;  %v225_v37 = vmax.f32 (!%p327_p6), %v193_v34, %v209_v35  ;;  %v226_v41 = vmax.f32 (!%p327_p6), %v194_v36, %v210_v38  ;;  %v196_v43 = vld [vmem:[%s638_s1 + $0x48] sm:$0xff] (!%p327_p6)  ;;  %v198_v48 = vld [vmem:[%s638_s1 + $0x58] sm:$0xff] (!%p327_p6) }
  0x24   : > { %240 = vst.msk [vmem:[%s638_s1 + $0x20] sm:$0xff] %vm235_vm1, %v223_v32  ;;  %241 = vst.msk [vmem:[%s638_s1 + $0x28] sm:$0xff] %vm235_vm1, %v224_v33  ;;  %v212_v44 = vld [vmem:[%s416_s14 + $0x48] sm:$0xff]  ;;  %v214_v49 = vld [vmem:[%s416_s14 + $0x58] sm:$0xff] }
  0x25   : > { %242 = vst.msk [vmem:[%s638_s1 + $0x30] sm:$0xff] %vm235_vm1, %v225_v37  ;;  %v228_v46 = vmax.f32 %v196_v43, %v212_v44  ;;  %243 = vst.msk [vmem:[%s638_s1 + $0x38] sm:$0xff] %vm235_vm1, %v226_v41  ;;  %v230_v51 = vmax.f32 %v198_v48, %v214_v49  ;;  %v199_v52 = vld [vmem:[%s638_s1 + $0x60] sm:$0xff]  ;;  %v200_v54 = vld [vmem:[%s638_s1 + $0x68] sm:$0xff] }
  0x26   : > { %244 = vst.msk [vmem:[%s638_s1 + $0x40] sm:$0xff] %vm235_vm1, %v227_v42  ;;  %v215_v53 = vld [vmem:[%s416_s14 + $0x60] sm:$0xff]  ;;  %v216_v56 = vld [vmem:[%s416_s14 + $0x68] sm:$0xff]  ;;  %v201_v57 = vld [vmem:[%s638_s1 + $0x70] sm:$0xff] }
  0x27   : > { %245 = vst.msk [vmem:[%s638_s1 + $0x48] sm:$0xff] %vm235_vm1, %v228_v46  ;;  %v231_v55 = vmax.f32 %v199_v52, %v215_v53  ;;  %v217_v58 = vld [vmem:[%s416_s14 + $0x70] sm:$0xff]  ;;  %246 = vst.msk [vmem:[%s638_s1 + $0x50] sm:$0xff] %vm235_vm1, %v229_v50  ;;  %v232_v59 = vmax.f32 %v200_v54, %v216_v56  ;;  %v202_v61 = vld [vmem:[%s638_s1 + $0x78] sm:$0xff] }
  0x28   : > { %247 = vst.msk [vmem:[%s638_s1 + $0x58] sm:$0xff] %vm235_vm1, %v230_v51  ;;  %v233_v60 = vmax.f32 %v201_v57, %v217_v58  ;;  %v218_v62 = vld [vmem:[%s416_s14 + $0x78] sm:$0xff] }
  0x29   : > { %248 = vst.msk [vmem:[%s638_s1 + $0x60] sm:$0xff] %vm235_vm1, %v231_v55  ;;  %v234_v63 = vmax.f32 %v202_v61, %v218_v62  ;;  %249 = vst.msk [vmem:[%s638_s1 + $0x68] sm:$0xff] %vm235_vm1, %v232_v59 }
  0x2a   : > { %250 = vst.msk [vmem:[%s638_s1 + $0x70] sm:$0xff] %vm235_vm1, %v233_v60 }
  0x2b   : > { %251 = vst.msk [vmem:[%s638_s1 + $0x78] sm:$0xff] %vm235_vm1, %v234_v63 }
  0x2c PF: > { %s11_s8 = sadd.s32 1, %s379_s8   ;;  %s639_s6 = smov %s375_s7 }
  0x2d   : > { %p8_p7 = scmp.ge.s32.totalorder %s11_s8, 11   ;;  %s640_s7 = smov %s642_s9 }
  0x2f   :  { %10 = sbr.rel (!%p8_p7) target bundleno = 2 (0x2), region = 62 }

// kernel: resnet18_forward.25
= control target key start
LH: loop header
LB: loop body
LE: loop exit
PB: predicated region body
PF: predicated region fallthrough
CT: control target
= control target key end

     0   :  { %s1815_s1 = inlined_call_operand.vmem [shape: bf16[640,128], index: 1, kind: input, shape index: {}]   ;;  %s1816_s0 = inlined_call_operand.vmem [shape: bf16[128,640], index: 0, kind: input, shape index: {}]   ;;  %s1817_s2 = inlined_call_operand.vmem [shape: f32[1,128], index: 2, kind: input, shape index: {}]   ;;  %s1818_s3 = inlined_call_operand.vmem [shape: f32[1,128], index: 3, kind: input, shape index: {}]   ;;  %s1819_s4 = inlined_call_operand.vmem [shape: f32[128,128], index: 4, kind: output, shape index: {}]  }
   0x1   :  { %v1328_v0 = vld [vmem:[%s1815_s1 + $0x40] sm:$0xff]   ;;  %v1332_v4 = vld [vmem:[%s1815_s1 + $0x48] sm:$0xff]   ;;  %v1336_v8 = vld [vmem:[%s1815_s1 + $0x50] sm:$0xff]  }
   0x2   :  { %v1329_v1 = vld [vmem:[%s1815_s1 + $0xc0] sm:$0xff]   ;;  %1136 = vmatprep.subr.bf16.mxu0 %v1328_v0  ;;  %v1333_v5 = vld [vmem:[%s1815_s1 + $0xc8] sm:$0xff]   ;;  %v1337_v9 = vld [vmem:[%s1815_s1 + $0xd0] sm:$0xff]  }
   0x3   :  { %v1330_v2 = vld [vmem:[%s1815_s1] sm:$0xff]   ;;  %1200 = vmatprep.subr.bf16.mxu1 %v1329_v1  ;;  %v1334_v6 = vld [vmem:[%s1815_s1 + $0x8] sm:$0xff]   ;;  %v1338_v10 = vld [vmem:[%s1815_s1 + $0x10] sm:$0xff]  }
   0x4   :  { %v1331_v3 = vld [vmem:[%s1815_s1 + $0x80] sm:$0xff]   ;;  %1137 = vmatpush3.bf16.msra.mxu0 %v1330_v2  ;;  %v1335_v7 = vld [vmem:[%s1815_s1 + $0x88] sm:$0xff]   ;;  %v1339_v11 = vld [vmem:[%s1815_s1 + $0x90] sm:$0xff]  }
   0x5   :  { %1201 = vmatpush3.bf16.msra.mxu1 %v1331_v3  ;;  %1138 = vmatprep.subr.bf16.mxu0 %v1332_v4  ;;  %v1340_v12 = vld [vmem:[%s1815_s1 + $0x58] sm:$0xff]   ;;  %v1344_v16 = vld [vmem:[%s1815_s1 + $0x60] sm:$0xff]   ;;  %v1348_v20 = vld [vmem:[%s1815_s1 + $0x68] sm:$0xff]  }
   0x6   :  { %1202 = vmatprep.subr.bf16.mxu1 %v1333_v5  ;;  %v1341_v13 = vld [vmem:[%s1815_s1 + $0xd8] sm:$0xff]   ;;  %v1345_v17 = vld [vmem:[%s1815_s1 + $0xe0] sm:$0xff]   ;;  %v1349_v21 = vld [vmem:[%s1815_s1 + $0xe8] sm:$0xff]  }
   0x7   :  { %v1342_v14 = vld [vmem:[%s1815_s1 + $0x18] sm:$0xff]   ;;  %v1346_v18 = vld [vmem:[%s1815_s1 + $0x20] sm:$0xff]   ;;  %v1350_v22 = vld [vmem:[%s1815_s1 + $0x28] sm:$0xff]  }
   0x8   :  { %1139 = vmatpush3.bf16.msra.mxu0 %v1334_v6  ;;  %v1343_v15 = vld [vmem:[%s1815_s1 + $0x98] sm:$0xff]   ;;  %v1347_v19 = vld [vmem:[%s1815_s1 + $0xa0] sm:$0xff]   ;;  %v1351_v23 = vld [vmem:[%s1815_s1 + $0xa8] sm:$0xff]  }
   0x9   :  { %1203 = vmatpush3.bf16.msra.mxu1 %v1335_v7  ;;  %1140 = vmatprep.subr.bf16.mxu0 %v1336_v8  ;;  %v1352_v24 = vld [vmem:[%s1815_s1 + $0x70] sm:$0xff]   ;;  %v1356_v28 = vld [vmem:[%s1815_s1 + $0x78] sm:$0xff]   ;;  %v1365_v35 = vld [vmem:[%s1816_s0 + $0xc] ss:$20 sps:$4 sm:$0xff]  }
   0xa   :  { %1204 = vmatprep.subr.bf16.mxu1 %v1337_v9  ;;  %v1353_v25 = vld [vmem:[%s1815_s1 + $0xf0] sm:$0xff]   ;;  %v1357_v29 = vld [vmem:[%s1815_s1 + $0xf8] sm:$0xff]   ;;  %v1366_v36 = vld [vmem:[%s1815_s1 + $0x100] sm:$0xff]   ;;  %759 = vmatprep.mubr.bf16.mxu1 %v1365_v35 }
   0xb   :  { %v1354_v26 = vld [vmem:[%s1815_s1 + $0x30] sm:$0xff]   ;;  %v1358_v30 = vld [vmem:[%s1815_s1 + $0x38] sm:$0xff]   ;;  %v1367_v37 = vld [vmem:[%s1816_s0 + $0x2c] ss:$20 sps:$4 sm:$0xff]  }
   0xc   :  { %1141 = vmatpush3.bf16.msra.mxu0 %v1338_v10  ;;  %v1355_v27 = vld [vmem:[%s1815_s1 + $0xb0] sm:$0xff]   ;;  %v1359_v31 = vld [vmem:[%s1815_s1 + $0xb8] sm:$0xff]   ;;  %v1373_v39 = vld [vmem:[%s1815_s1 + $0x108] sm:$0xff]  }
   0xd   :  { %1205 = vmatpush3.bf16.msra.mxu1 %v1339_v11  ;;  %1142 = vmatprep.subr.bf16.mxu0 %v1340_v12  ;;  %v1360_v32 = vld [vmem:[%s1816_s0] ss:$20 sps:$4 sm:$0xff]   ;;  %v1362_v33 = vld [vmem:[%s1816_s0 + $0x4] ss:$20 sps:$4 sm:$0xff]   ;;  %v1363_v34 = vld [vmem:[%s1816_s0 + $0x8] ss:$20 sps:$4 sm:$0xff]  }
   0xe   :  { %1206 = vmatprep.subr.bf16.mxu1 %v1341_v13  ;;  %662 = vmatprep.mubr.bf16.mxu0 %v1362_v33  ;;  %v1369_v38 = vld [vmem:[%s1816_s0 + $0x34] ss:$20 sps:$4 sm:$0xff]   ;;  %v1372_v41 = vld [vmem:[%s1816_s0 + $0x30] ss:$20 sps:$4 sm:$0xff]   ;;  %v1387_v45 = vld [vmem:[%s1815_s1 + $0x118] sm:$0xff]  }
   0xf   :  { %v1371_v40 = vld [vmem:[%s1816_s0 + $0x28] ss:$20 sps:$4 sm:$0xff]   ;;  %v1380_v44 = vld [vmem:[%s1815_s1 + $0x110] sm:$0xff]   ;;  %v1379_v47 = vld [vmem:[%s1816_s0 + $0x58] ss:$20 sps:$4 sm:$0xff]  }
  0x10   :  { %1143 = vmatpush3.bf16.msra.mxu0 %v1342_v14  ;;  %v1374_v42 = vld [vmem:[%s1816_s0 + $0x54] ss:$20 sps:$4 sm:$0xff]   ;;  %v1376_v43 = vld [vmem:[%s1816_s0 + $0x5c] ss:$20 sps:$4 sm:$0xff]   ;;  %v1383_v49 = vld [vmem:[%s1816_s0 + $0x84] ss:$20 sps:$4 sm:$0xff]  }
  0x11   :  { %1207 = vmatpush3.bf16.msra.mxu1 %v1343_v15  ;;  %1144 = vmatprep.subr.bf16.mxu0 %v1344_v16  ;;  %v1378_v46 = vld [vmem:[%s1816_s0 + $0x50] ss:$20 sps:$4 sm:$0xff]   ;;  %v1401_v51 = vld [vmem:[%s1815_s1 + $0x128] sm:$0xff]   ;;  %v1386_v53 = vld [vmem:[%s1816_s0 + $0x80] ss:$20 sps:$4 sm:$0xff]  }
  0x12   :  { %1208 = vmatprep.subr.bf16.mxu1 %v1345_v17  ;;  %v1381_v48 = vld [vmem:[%s1816_s0 + $0x7c] ss:$20 sps:$4 sm:$0xff]   ;;  %v1394_v50 = vld [vmem:[%s1815_s1 + $0x120] sm:$0xff]   ;;  %v1385_v52 = vld [vmem:[%s1816_s0 + $0x78] ss:$20 sps:$4 sm:$0xff]  }
  0x13   :  { %v1388_v54 = vld [vmem:[%s1816_s0 + $0xa4] ss:$20 sps:$4 sm:$0xff]   ;;  %v1408_v55 = vld [vmem:[%s1815_s1 + $0x130] sm:$0xff]   ;;  %v1390_v56 = vld [vmem:[%s1816_s0 + $0xac] ss:$20 sps:$4 sm:$0xff]  }
  0x14   :  { %1145 = vmatpush3.bf16.msra.mxu0 %v1346_v18  ;;  %v1415_v57 = vld [vmem:[%s1815_s1 + $0x138] sm:$0xff]   ;;  %v1392_v58 = vld [vmem:[%s1816_s0 + $0xa0] ss:$20 sps:$4 sm:$0xff]   ;;  %v1400_v63 = vld [vmem:[%s1816_s0 + $0xd0] ss:$20 sps:$4 sm:$0xff]  }
  0x15   :  { %1209 = vmatpush3.bf16.msra.mxu1 %v1347_v19  ;;  %1146 = vmatprep.subr.bf16.mxu0 %v1348_v20  ;;  %v1393_v59 = vld [vmem:[%s1816_s0 + $0xa8] ss:$20 sps:$4 sm:$0xff]   ;;  %v1395_v60 = vld [vmem:[%s1816_s0 + $0xcc] ss:$20 sps:$4 sm:$0xff]   ;;  %v1406_v2 = vld [vmem:[%s1816_s0 + $0xf0] ss:$20 sps:$4 sm:$0xff]  }
  0x16   :  { %1210 = vmatprep.subr.bf16.mxu1 %v1349_v21  ;;  %v1397_v61 = vld [vmem:[%s1816_s0 + $0xd4] ss:$20 sps:$4 sm:$0xff]   ;;  %v1404_v1 = vld [vmem:[%s1816_s0 + $0xfc] ss:$20 sps:$4 sm:$0xff]   ;;  %v1407_v3 = vld [vmem:[%s1816_s0 + $0xf8] ss:$20 sps:$4 sm:$0xff]  }
  0x17   :  { %v1399_v62 = vld [vmem:[%s1816_s0 + $0xc8] ss:$20 sps:$4 sm:$0xff]   ;;  %v1411_v5 = vld [vmem:[%s1816_s0 + $0x124] ss:$20 sps:$4 sm:$0xff]   ;;  %v1414_v7 = vld [vmem:[%s1816_s0 + $0x120] ss:$20 sps:$4 sm:$0xff]  }
  0x18   :  { %1147 = vmatpush3.bf16.msra.mxu0 %v1350_v22  ;;  %v1402_v0 = vld [vmem:[%s1816_s0 + $0xf4] ss:$20 sps:$4 sm:$0xff]   ;;  %v1409_v4 = vld [vmem:[%s1816_s0 + $0x11c] ss:$20 sps:$4 sm:$0xff]   ;;  %v1413_v6 = vld [vmem:[%s1816_s0 + $0x118] ss:$20 sps:$4 sm:$0xff]  }
  0x19   :  { %1211 = vmatpush3.bf16.msra.mxu1 %v1351_v23  ;;  %1148 = vmatprep.subr.bf16.mxu0 %v1352_v24  ;;  %v1416_v8 = vld [vmem:[%s1816_s0 + $0x10] ss:$20 sps:$4 sm:$0xff]   ;;  %v1418_v10 = vld [vmem:[%s1816_s0 + $0x38] ss:$20 sps:$4 sm:$0xff]   ;;  %v1420_v12 = vld [vmem:[%s1816_s0 + $0x60] ss:$20 sps:$4 sm:$0xff]  }
  0x1a   :  { %1212 = vmatprep.subr.bf16.mxu1 %v1353_v25  ;;  %v1417_v9 = vld [vmem:[%s1816_s0 + $0xb0] ss:$20 sps:$4 sm:$0xff]   ;;  %v1419_v11 = vld [vmem:[%s1816_s0 + $0xd8] ss:$20 sps:$4 sm:$0xff]   ;;  %v1421_v13 = vld [vmem:[%s1816_s0 + $0x100] ss:$20 sps:$4 sm:$0xff]  }
  0x1b   :  { %v1422_v14 = vld [vmem:[%s1816_s0 + $0x88] ss:$20 sps:$4 sm:$0xff]  }
  0x1c   :  { %1149 = vmatpush3.bf16.msra.mxu0 %v1354_v26  ;;  %v1423_v15 = vld [vmem:[%s1816_s0 + $0x128] ss:$20 sps:$4 sm:$0xff]  }
  0x1d   :  { %1213 = vmatpush3.bf16.msra.mxu1 %v1355_v27  ;;  %1150 = vmatprep.subr.bf16.mxu0 %v1356_v28 }
  0x1e   :  { %1214 = vmatprep.subr.bf16.mxu1 %v1357_v29 }
  0x20   :  { %1151 = vmatpush3.bf16.msra.mxu0 %v1358_v30 }
  0x21   :  { %1215 = vmatpush3.bf16.msra.mxu1 %v1359_v31  ;;  %1280 = vmatprep.subr.bf16.mxu0 %v1366_v36 }
  0x22   :  { %1312 = vmatprep.subr.bf16.mxu1 %v1366_v36 }
  0x23   :  { %663 = vmatmul.mubr.bf16.vlgmr.msra.gmra.mrb[0].mxu0 %v1360_v32 }
  0x24   :  { %760 = vmatmul.mubr.bf16.vlgmr.msra.gmra.mrb[0].mxu1 %v1363_v34  ;;  %1281 = vmatpush3.bf16.msra.mxu0 %v1366_v36 }
  0x25   :  { %1320 = vmatpush3.bf16.msra.mxu1 %v1366_v36  ;;  %670 = vmatprep.mubr.bf16.mxu0 %v1367_v37 }
  0x26   :  { %767 = vmatprep.mubr.bf16.mxu1 %v1369_v38  ;;  %1282 = vmatprep.subr.bf16.mxu0 %v1373_v39 }
  0x27   :  { %1313 = vmatprep.subr.bf16.mxu1 %v1373_v39 }
  0x28   :  { %1283 = vmatpush3.bf16.msra.mxu0 %v1373_v39 }
  0x29   :  { %1321 = vmatpush3.bf16.msra.mxu1 %v1373_v39  ;;  %1284 = vmatprep.subr.bf16.mxu0 %v1380_v44 }
  0x2a   :  { %1314 = vmatprep.subr.bf16.mxu1 %v1380_v44 }
  0x2b   :  { %671 = vmatmul.mubr.bf16.gmra.mrb[4].mxu0 %v1371_v40 }
  0x2c   :  { %768 = vmatmul.mubr.bf16.gmra.mrb[4].mxu1 %v1372_v41  ;;  %678 = vmatprep.mubr.bf16.mxu0 %v1374_v42 }
  0x2d   :  { %775 = vmatprep.mubr.bf16.mxu1 %v1376_v43  ;;  %1285 = vmatpush3.bf16.msra.mxu0 %v1380_v44 }
  0x2e   :  { %1322 = vmatpush3.bf16.msra.mxu1 %v1380_v44  ;;  %1286 = vmatprep.subr.bf16.mxu0 %v1387_v45 }
  0x2f   :  { %1315 = vmatprep.subr.bf16.mxu1 %v1387_v45 }
  0x31   :  { %1287 = vmatpush3.bf16.msra.mxu0 %v1387_v45 }
  0x32   :  { %1323 = vmatpush3.bf16.msra.mxu1 %v1387_v45  ;;  %1288 = vmatprep.subr.bf16.mxu0 %v1394_v50 }
  0x33   :  { %679 = vmatmul.mubr.bf16.gmra.mrb[8].mxu0 %v1378_v46  ;;  %1316 = vmatprep.subr.bf16.mxu1 %v1394_v50 }
  0x34   :  { %776 = vmatmul.mubr.bf16.gmra.mrb[8].mxu1 %v1379_v47  ;;  %686 = vmatprep.mubr.bf16.mxu0 %v1381_v48 }
  0x35   :  { %783 = vmatprep.mubr.bf16.mxu1 %v1383_v49  ;;  %1289 = vmatpush3.bf16.msra.mxu0 %v1394_v50 }
  0x36   :  { %1324 = vmatpush3.bf16.msra.mxu1 %v1394_v50  ;;  %1290 = vmatprep.subr.bf16.mxu0 %v1401_v51 }
  0x37   :  { %1317 = vmatprep.subr.bf16.mxu1 %v1401_v51 }
  0x39   :  { %1291 = vmatpush3.bf16.msra.mxu0 %v1401_v51 }
  0x3a   :  { %1325 = vmatpush3.bf16.msra.mxu1 %v1401_v51  ;;  %1292 = vmatprep.subr.bf16.mxu0 %v1408_v55 }
  0x3b   :  { %687 = vmatmul.mubr.bf16.gmra.mrb[12].mxu0 %v1385_v52  ;;  %1318 = vmatprep.subr.bf16.mxu1 %v1408_v55 }
  0x3c   :  { %784 = vmatmul.mubr.bf16.gmra.mrb[12].mxu1 %v1386_v53  ;;  %694 = vmatprep.mubr.bf16.mxu0 %v1388_v54 }
  0x3d   :  { %791 = vmatprep.mubr.bf16.mxu1 %v1390_v56  ;;  %1293 = vmatpush3.bf16.msra.mxu0 %v1408_v55 }
  0x3e   :  { %1326 = vmatpush3.bf16.msra.mxu1 %v1408_v55  ;;  %1294 = vmatprep.subr.bf16.mxu0 %v1415_v57 }
  0x3f   :  { %1319 = vmatprep.subr.bf16.mxu1 %v1415_v57 }
  0x41   :  { %1295 = vmatpush3.bf16.msra.mxu0 %v1415_v57 }
  0x42   :  { %1327 = vmatpush3.bf16.msra.mxu1 %v1415_v57 }
  0x43   :  { %695 = vmatmul.mubr.bf16.gmra.mrb[16].mxu0 %v1392_v58 }
  0x44   :  { %792 = vmatmul.mubr.bf16.gmra.mrb[16].mxu1 %v1393_v59  ;;  %702 = vmatprep.mubr.bf16.mxu0 %v1395_v60 }
  0x45   :  { %799 = vmatprep.mubr.bf16.mxu1 %v1397_v61 }
  0x4b   :  { %703 = vmatmul.mubr.bf16.gmra.mrb[20].mxu0 %v1399_v62 }
  0x4c   :  { %800 = vmatmul.mubr.bf16.gmra.mrb[20].mxu1 %v1400_v63  ;;  %710 = vmatprep.mubr.bf16.mxu0 %v1402_v0 }
  0x4d   :  { %807 = vmatprep.mubr.bf16.mxu1 %v1404_v1 }
  0x53   :  { %711 = vmatmul.mubr.bf16.gmra.mrb[24].mxu0 %v1406_v2 }
  0x54   :  { %808 = vmatmul.mubr.bf16.gmra.mrb[24].mxu1 %v1407_v3  ;;  %718 = vmatprep.mubr.bf16.mxu0 %v1409_v4 }
  0x55   :  { %815 = vmatprep.mubr.bf16.mxu1 %v1411_v5 }
  0x5b   :  { %719 = vmatmul.mubr.bf16.gmra.mrb[28].mxu0 %v1413_v6 }
  0x5c   :  { %816 = vmatmul.mubr.bf16.gmra.mrb[28].mxu1 %v1414_v7  ;;  %1296 = vmatprep.mubr.bf16.mxu0 %v1416_v8 }
  0x5d   :  { %1304 = vmatprep.mubr.bf16.mxu1 %v1417_v9 }
  0x63   :  { %1297 = vmatmul.mubr.bf16.vlgmr.msra.gmra.mrb[32].mxu0 %v1418_v10 }
  0x64   :  { %1305 = vmatmul.mubr.bf16.vlgmr.msra.gmra.mrb[32].mxu1 %v1419_v11  ;;  %1300 = vmatprep.mubr.bf16.mxu0 %v1420_v12 }
  0x65   :  { %1308 = vmatprep.mubr.bf16.mxu1 %v1421_v13 }
  0x6b   :  { %1301 = vmatmul.mubr.bf16.gmra.mrb[36].mxu0 %v1422_v14 }
  0x6c   :  { %1309 = vmatmul.mubr.bf16.gmra.mrb[36].mxu1 %v1423_v15 }
  0xf6   :  { %v1152_v16 = vpop.f32.mrb[0].mxu0 }
  0xf7   :  { %v1216_v17 = vpop.f32.mrb[0].mxu1  ;;  %v1153_v18 = vpop.f32.mrb[1].mxu0 }
  0xf8   :  { %v1154_v19 = vadd.f32 %v1153_v18, %v1152_v16  ;;  %v1217_v20 = vpop.f32.mrb[1].mxu1  ;;  %v1155_v21 = vpop.f32.mrb[2].mxu0 }
  0xf9   :  { %v1218_v22 = vadd.f32 %v1217_v20, %v1216_v17  ;;  %v1219_v23 = vpop.f32.mrb[2].mxu1  ;;  %v1156_v24 = vpop.f32.mrb[3].mxu0 }
  0xfa   :  { %v1157_v25 = vadd.f32 %v1156_v24, %v1155_v21  ;;  %v1220_v26 = vpop.f32.mrb[3].mxu1 }
  0xfb   :  { %v1221_v27 = vadd.f32 %v1220_v26, %v1219_v23  ;;  %v1689_v28 = vadd.f32 %v1218_v22, %v1154_v19 }
  0xfd   :  { %v1691_v29 = vadd.f32 %v1221_v27, %v1157_v25 }
  0xfe   :  { %v1158_v30 = vpop.f32.mrb[4].mxu0 }
  0xff   :  { %v1222_v31 = vpop.f32.mrb[4].mxu1  ;;  %v1159_v32 = vpop.f32.mrb[5].mxu0 }
 0x100   :  { %v1160_v33 = vadd.f32 %v1159_v32, %v1158_v30  ;;  %v1223_v34 = vpop.f32.mrb[5].mxu1  ;;  %v1161_v35 = vpop.f32.mrb[6].mxu0 }
 0x101   :  { %v1224_v36 = vadd.f32 %v1223_v34, %v1222_v31  ;;  %v1225_v37 = vpop.f32.mrb[6].mxu1  ;;  %v1162_v38 = vpop.f32.mrb[7].mxu0 }
 0x102   :  { %v1163_v39 = vadd.f32 %v1162_v38, %v1161_v35  ;;  %v1226_v40 = vpop.f32.mrb[7].mxu1 }
 0x103   :  { %v1227_v41 = vadd.f32 %v1226_v40, %v1225_v37  ;;  %v1693_v42 = vadd.f32 %v1224_v36, %v1160_v33 }
 0x105   :  { %v1695_v43 = vadd.f32 %v1227_v41, %v1163_v39 }
 0x106   :  { %v1164_v44 = vpop.f32.mrb[8].mxu0 }
 0x107   :  { %v1228_v45 = vpop.f32.mrb[8].mxu1  ;;  %v1165_v46 = vpop.f32.mrb[9].mxu0 }
 0x108   :  { %v1166_v47 = vadd.f32 %v1165_v46, %v1164_v44  ;;  %v1229_v48 = vpop.f32.mrb[9].mxu1  ;;  %v1167_v49 = vpop.f32.mrb[10].mxu0 }
 0x109   :  { %v1230_v50 = vadd.f32 %v1229_v48, %v1228_v45  ;;  %v1231_v51 = vpop.f32.mrb[10].mxu1  ;;  %v1168_v52 = vpop.f32.mrb[11].mxu0 }
 0x10a   :  { %v1169_v53 = vadd.f32 %v1168_v52, %v1167_v49  ;;  %v1232_v54 = vpop.f32.mrb[11].mxu1 }
 0x10b   :  { %v1233_v55 = vadd.f32 %v1232_v54, %v1231_v51  ;;  %v1697_v56 = vadd.f32 %v1230_v50, %v1166_v47 }
 0x10d   :  { %v1699_v57 = vadd.f32 %v1233_v55, %v1169_v53 }
 0x10e   :  { %v1170_v58 = vpop.f32.mrb[12].mxu0 }
 0x10f   :  { %v1234_v59 = vpop.f32.mrb[12].mxu1  ;;  %v1171_v60 = vpop.f32.mrb[13].mxu0 }
 0x110   :  { %v1172_v61 = vadd.f32 %v1171_v60, %v1170_v58  ;;  %v1235_v62 = vpop.f32.mrb[13].mxu1  ;;  %v1173_v63 = vpop.f32.mrb[14].mxu0 }
 0x111   :  { %v1236_v0 = vadd.f32 %v1235_v62, %v1234_v59  ;;  %v1237_v1 = vpop.f32.mrb[14].mxu1  ;;  %v1174_v2 = vpop.f32.mrb[15].mxu0 }
 0x112   :  { %v1175_v3 = vadd.f32 %v1174_v2, %v1173_v63  ;;  %v1238_v4 = vpop.f32.mrb[15].mxu1 }
 0x113   :  { %v1239_v5 = vadd.f32 %v1238_v4, %v1237_v1  ;;  %v1701_v6 = vadd.f32 %v1236_v0, %v1172_v61 }
 0x115   :  { %v1703_v7 = vadd.f32 %v1239_v5, %v1175_v3 }
 0x116   :  { %v1176_v8 = vpop.f32.mrb[16].mxu0 }
 0x117   :  { %v1240_v9 = vpop.f32.mrb[16].mxu1  ;;  %v1177_v10 = vpop.f32.mrb[17].mxu0 }
 0x118   :  { %v1178_v11 = vadd.f32 %v1177_v10, %v1176_v8  ;;  %v1241_v12 = vpop.f32.mrb[17].mxu1  ;;  %v1179_v13 = vpop.f32.mrb[18].mxu0 }
 0x119   :  { %v1242_v14 = vadd.f32 %v1241_v12, %v1240_v9  ;;  %v1243_v15 = vpop.f32.mrb[18].mxu1  ;;  %v1180_v16 = vpop.f32.mrb[19].mxu0  ;;  %v1716_v9 = vld [vmem:[%s1817_s2] ss:$0 sm:$0xff] }
 0x11a   :  { %v1181_v17 = vadd.f32 %v1180_v16, %v1179_v13  ;;  %v1244_v18 = vpop.f32.mrb[19].mxu1  ;;  %v1722_v13 = vld [vmem:[%s1818_s3] ss:$0 sm:$0xff] }
 0x11b   :  { %v1245_v19 = vadd.f32 %v1244_v18, %v1243_v15  ;;  %v794_v20 = vadd.f32 %v1242_v14, %v1178_v11 }
 0x11d   :  { %v1705_v21 = vadd.f32 %v1245_v19, %v1181_v17 }
 0x11e   :  { %v1182_v22 = vpop.f32.mrb[20].mxu0 }
 0x11f   :  { %v1246_v23 = vpop.f32.mrb[20].mxu1  ;;  %v1183_v24 = vpop.f32.mrb[21].mxu0 }
 0x120   :  { %v1184_v25 = vadd.f32 %v1183_v24, %v1182_v22  ;;  %v1247_v26 = vpop.f32.mrb[21].mxu1  ;;  %v1185_v27 = vpop.f32.mrb[22].mxu0 }
 0x121   :  { %v1248_v30 = vadd.f32 %v1247_v26, %v1246_v23  ;;  %v1249_v31 = vpop.f32.mrb[22].mxu1  ;;  %v1186_v32 = vpop.f32.mrb[23].mxu0 }
 0x122   :  { %v1187_v33 = vadd.f32 %v1186_v32, %v1185_v27  ;;  %v1250_v34 = vpop.f32.mrb[23].mxu1 }
 0x123   :  { %v1251_v35 = vadd.f32 %v1250_v34, %v1249_v31  ;;  %v802_v36 = vadd.f32 %v1248_v30, %v1184_v25 }
 0x125   :  { %v805_v37 = vadd.f32 %v1251_v35, %v1187_v33 }
 0x126   :  { %v1188_v38 = vpop.f32.mrb[24].mxu0 }
 0x127   :  { %v1252_v39 = vpop.f32.mrb[24].mxu1  ;;  %v1189_v40 = vpop.f32.mrb[25].mxu0 }
 0x128   :  { %v1190_v41 = vadd.f32 %v1189_v40, %v1188_v38  ;;  %v1253_v44 = vpop.f32.mrb[25].mxu1  ;;  %v1191_v45 = vpop.f32.mrb[26].mxu0 }
 0x129   :  { %v1254_v46 = vadd.f32 %v1253_v44, %v1252_v39  ;;  %v1255_v47 = vpop.f32.mrb[26].mxu1  ;;  %v1192_v48 = vpop.f32.mrb[27].mxu0 }
 0x12a   :  { %v1193_v49 = vadd.f32 %v1192_v48, %v1191_v45  ;;  %v1256_v50 = vpop.f32.mrb[27].mxu1 }
 0x12b   :  { %v1257_v51 = vadd.f32 %v1256_v50, %v1255_v47  ;;  %v1707_v52 = vadd.f32 %v1254_v46, %v1190_v41 }
 0x12d   :  { %v1709_v53 = vadd.f32 %v1257_v51, %v1193_v49 }
 0x12e   :  { %v1194_v54 = vpop.f32.mrb[28].mxu0 }
 0x12f   :  { %v1258_v55 = vpop.f32.mrb[28].mxu1  ;;  %v1195_v58 = vpop.f32.mrb[29].mxu0 }
 0x130   :  { %v1196_v59 = vadd.f32 %v1195_v58, %v1194_v54  ;;  %v1259_v60 = vpop.f32.mrb[29].mxu1  ;;  %v1197_v61 = vpop.f32.mrb[30].mxu0 }
 0x131   :  { %v1260_v62 = vadd.f32 %v1259_v60, %v1258_v55  ;;  %v1261_v63 = vpop.f32.mrb[30].mxu1  ;;  %v1198_v0 = vpop.f32.mrb[31].mxu0 }
 0x132   :  { %v1199_v1 = vadd.f32 %v1198_v0, %v1197_v61  ;;  %v1262_v2 = vpop.f32.mrb[31].mxu1 }
 0x133   :  { %v1263_v3 = vadd.f32 %v1262_v2, %v1261_v63  ;;  %v818_v4 = vadd.f32 %v1260_v62, %v1196_v59 }
 0x135   :  { %v1711_v5 = vadd.f32 %v1263_v3, %v1199_v1 }
 0x136   :  { %v1298_v8 = vpop.f32.mrb[32].mxu0 }
 0x137   :  { %v867_v10 = vadd.f32 %v1298_v8, %v1693_v42  ;;  %v1306_v11 = vpop.f32.mrb[32].mxu1  ;;  %v858_v12 = vpop.f32.mrb[33].mxu0 }
 0x138   :  { %v899_v14 = vadd.f32 %v1306_v11, %v802_v36  ;;  %v859_v15 = vadd.f32 %v858_v12, %v1689_v28  ;;  %v890_v16 = vpop.f32.mrb[33].mxu1  ;;  %v1299_v17 = vpop.f32.mrb[34].mxu0 }
 0x139   :  { %v981_v18 = vmul.f32 %v1716_v9, %v867_v10  ;;  %v891_v19 = vadd.f32 %v890_v16, %v794_v20  ;;  %v870_v22 = vadd.f32 %v1299_v17, %v1695_v43  ;;  %v1307_v23 = vpop.f32.mrb[34].mxu1  ;;  %v861_v24 = vpop.f32.mrb[35].mxu0 }
 0x13a   :  { %v989_v42 = vmul.f32 %v1716_v9, %v899_v14  ;;  %v979_v25 = vmul.f32 %v1716_v9, %v859_v15  ;;  %v902_v26 = vadd.f32 %v1307_v23, %v805_v37  ;;  %v862_v27 = vadd.f32 %v861_v24, %v1691_v29  ;;  %v893_v30 = vpop.f32.mrb[35].mxu1 }
 0x13b   :  { %v1004_v31 = vadd.f32 %v1722_v13, %v981_v18  ;;  %v987_v28 = vmul.f32 %v1716_v9, %v891_v19  ;;  %v982_v32 = vmul.f32 %v1716_v9, %v870_v22  ;;  %v894_v20 = vadd.f32 %v893_v30, %v1705_v21 }
 0x13c   :  { %v1012_v43 = vadd.f32 %v1722_v13, %v989_v42  ;;  %v1002_v33 = vadd.f32 %v1722_v13, %v979_v25  ;;  %v990_v34 = vmul.f32 %v1716_v9, %v902_v26  ;;  %v980_v35 = vmul.f32 %v1716_v9, %v862_v27 }
 0x13d   :  { %v1020_v36 = vmax.f32 %v1004_v31, 0.0  ;;  %v1010_v29 = vadd.f32 %v1722_v13, %v987_v28  ;;  %v1005_v37 = vadd.f32 %v1722_v13, %v982_v32  ;;  %v988_v38 = vmul.f32 %v1716_v9, %v894_v20 }
 0x13e   :  { %v1028_v39 = vmax.f32 %v1012_v43, 0.0  ;;  %v1018_v40 = vmax.f32 %v1002_v33, 0.0  ;;  %v1013_v41 = vadd.f32 %v1722_v13, %v990_v34  ;;  %v1003_v21 = vadd.f32 %v1722_v13, %v980_v35  ;;  %v1302_v44 = vpop.f32.mrb[36].mxu0 }
 0x13f   :  { %1036 = vst [vmem:[%s1819_s4 + $0x10] sm:$0xff] %v1020_v36  ;;  %v1026_v45 = vmax.f32 %v1010_v29, 0.0  ;;  %v1021_v46 = vmax.f32 %v1005_v37, 0.0  ;;  %v1011_v47 = vadd.f32 %v1722_v13, %v988_v38  ;;  %v883_v48 = vadd.f32 %v1302_v44, %v1701_v6  ;;  %v1310_v49 = vpop.f32.mrb[36].mxu1  ;;  %v874_v50 = vpop.f32.mrb[37].mxu0 }
 0x140   :  { %1044 = vst [vmem:[%s1819_s4 + $0x50] sm:$0xff] %v1028_v39  ;;  %1034 = vst [vmem:[%s1819_s4] sm:$0xff] %v1018_v40  ;;  %v1029_v51 = vmax.f32 %v1013_v41, 0.0  ;;  %v1019_v54 = vmax.f32 %v1003_v21, 0.0  ;;  %v915_v55 = vadd.f32 %v1310_v49, %v818_v4  ;;  %v875_v58 = vadd.f32 %v874_v50, %v1697_v56  ;;  %v906_v59 = vpop.f32.mrb[37].mxu1  ;;  %v1303_v60 = vpop.f32.mrb[38].mxu0 }
 0x141   :  { %1042 = vst [vmem:[%s1819_s4 + $0x40] sm:$0xff] %v1026_v45  ;;  %1037 = vst [vmem:[%s1819_s4 + $0x18] sm:$0xff] %v1021_v46  ;;  %v1027_v6 = vmax.f32 %v1011_v47, 0.0  ;;  %v985_v61 = vmul.f32 %v1716_v9, %v883_v48  ;;  %v907_v62 = vadd.f32 %v906_v59, %v1707_v52  ;;  %v886_v63 = vadd.f32 %v1303_v60, %v1703_v7  ;;  %v1311_v0 = vpop.f32.mrb[38].mxu1  ;;  %v877_v1 = vpop.f32.mrb[39].mxu0 }
 0x142   :  { %1045 = vst [vmem:[%s1819_s4 + $0x58] sm:$0xff] %v1029_v51  ;;  %1035 = vst [vmem:[%s1819_s4 + $0x8] sm:$0xff] %v1019_v54  ;;  %v993_v56 = vmul.f32 %v1716_v9, %v915_v55  ;;  %v983_v2 = vmul.f32 %v1716_v9, %v875_v58  ;;  %v918_v3 = vadd.f32 %v1311_v0, %v1711_v5  ;;  %v909_v4 = vpop.f32.mrb[39].mxu1 }
 0x143   :  { %v878_v52 = vadd.f32 %v877_v1, %v1699_v57  ;;  %1043 = vst [vmem:[%s1819_s4 + $0x48] sm:$0xff] %v1027_v6  ;;  %v1008_v7 = vadd.f32 %v1722_v13, %v985_v61  ;;  %v991_v8 = vmul.f32 %v1716_v9, %v907_v62  ;;  %v986_v10 = vmul.f32 %v1716_v9, %v886_v63 }
 0x144   :  { %v910_v11 = vadd.f32 %v909_v4, %v1709_v53  ;;  %v1016_v12 = vadd.f32 %v1722_v13, %v993_v56  ;;  %v1006_v14 = vadd.f32 %v1722_v13, %v983_v2  ;;  %v994_v5 = vmul.f32 %v1716_v9, %v918_v3 }
 0x145   :  { %v984_v57 = vmul.f32 %v1716_v9, %v878_v52  ;;  %v1024_v15 = vmax.f32 %v1008_v7, 0.0  ;;  %v1014_v16 = vadd.f32 %v1722_v13, %v991_v8  ;;  %v1009_v17 = vadd.f32 %v1722_v13, %v986_v10 }
 0x146   :  { %v992_v18 = vmul.f32 %v1716_v9, %v910_v11  ;;  %v1032_v19 = vmax.f32 %v1016_v12, 0.0  ;;  %v1022_v22 = vmax.f32 %v1006_v14, 0.0  ;;  %v1017_v23 = vadd.f32 %v1722_v13, %v994_v5 }
 0x147   :  { %v1007_v53 = vadd.f32 %v1722_v13, %v984_v57  ;;  %1040 = vst [vmem:[%s1819_s4 + $0x30] sm:$0xff] %v1024_v15  ;;  %v1030_v24 = vmax.f32 %v1014_v16, 0.0  ;;  %v1025_v42 = vmax.f32 %v1009_v17, 0.0 }
 0x148   :  { %v1015_v25 = vadd.f32 %v1722_v13, %v992_v18  ;;  %1048 = vst [vmem:[%s1819_s4 + $0x70] sm:$0xff] %v1032_v19  ;;  %1038 = vst [vmem:[%s1819_s4 + $0x20] sm:$0xff] %v1022_v22  ;;  %v1033_v9 = vmax.f32 %v1017_v23, 0.0 }
 0x149   :  { %v1023_v26 = vmax.f32 %v1007_v53, 0.0  ;;  %1046 = vst [vmem:[%s1819_s4 + $0x60] sm:$0xff] %v1030_v24  ;;  %1041 = vst [vmem:[%s1819_s4 + $0x38] sm:$0xff] %v1025_v42 }
 0x14a   :  { %v1031_v27 = vmax.f32 %v1015_v25, 0.0  ;;  %1049 = vst [vmem:[%s1819_s4 + $0x78] sm:$0xff] %v1033_v9 }
 0x14b   :  { %1039 = vst [vmem:[%s1819_s4 + $0x28] sm:$0xff] %v1023_v26 }
 0x14c   :  { %1047 = vst [vmem:[%s1819_s4 + $0x68] sm:$0xff] %v1031_v27 }

// kernel: resnet18_forward.26
= control target key start
LH: loop header
LB: loop body
LE: loop exit
PB: predicated region body
PF: predicated region fallthrough
CT: control target
= control target key end

     0   :  { %s1906_s1 = inlined_call_operand.vmem [shape: bf16[640,128], index: 1, kind: input, shape index: {}]   ;;  %s1907_s0 = inlined_call_operand.vmem [shape: bf16[128,640], index: 0, kind: input, shape index: {}]   ;;  %s1908_s2 = inlined_call_operand.vmem [shape: f32[1,128], index: 2, kind: input, shape index: {}]   ;;  %s1909_s3 = inlined_call_operand.vmem [shape: f32[1,128], index: 3, kind: input, shape index: {}]   ;;  %s1910_s4 = inlined_call_operand.vmem [shape: f32[128,128], index: 4, kind: input, shape index: {}]   ;;  %s1911_s5 = inlined_call_operand.vmem [shape: f32[128,128], index: 5, kind: output, shape index: {}]  }
   0x1   :  { %v1363_v0 = vld [vmem:[%s1906_s1 + $0x40] sm:$0xff]   ;;  %v1367_v4 = vld [vmem:[%s1906_s1 + $0x48] sm:$0xff]   ;;  %v1371_v8 = vld [vmem:[%s1906_s1 + $0x50] sm:$0xff]  }
   0x2   :  { %v1364_v1 = vld [vmem:[%s1906_s1 + $0xc0] sm:$0xff]   ;;  %1171 = vmatprep.subr.bf16.mxu0 %v1363_v0  ;;  %v1368_v5 = vld [vmem:[%s1906_s1 + $0xc8] sm:$0xff]   ;;  %v1372_v9 = vld [vmem:[%s1906_s1 + $0xd0] sm:$0xff]  }
   0x3   :  { %v1365_v2 = vld [vmem:[%s1906_s1] sm:$0xff]   ;;  %1235 = vmatprep.subr.bf16.mxu1 %v1364_v1  ;;  %v1369_v6 = vld [vmem:[%s1906_s1 + $0x8] sm:$0xff]   ;;  %v1373_v10 = vld [vmem:[%s1906_s1 + $0x10] sm:$0xff]  }
   0x4   :  { %v1366_v3 = vld [vmem:[%s1906_s1 + $0x80] sm:$0xff]   ;;  %1172 = vmatpush3.bf16.msra.mxu0 %v1365_v2  ;;  %v1370_v7 = vld [vmem:[%s1906_s1 + $0x88] sm:$0xff]   ;;  %v1374_v11 = vld [vmem:[%s1906_s1 + $0x90] sm:$0xff]  }
   0x5   :  { %1236 = vmatpush3.bf16.msra.mxu1 %v1366_v3  ;;  %1173 = vmatprep.subr.bf16.mxu0 %v1367_v4  ;;  %v1375_v12 = vld [vmem:[%s1906_s1 + $0x58] sm:$0xff]   ;;  %v1379_v16 = vld [vmem:[%s1906_s1 + $0x60] sm:$0xff]   ;;  %v1383_v20 = vld [vmem:[%s1906_s1 + $0x68] sm:$0xff]  }
   0x6   :  { %1237 = vmatprep.subr.bf16.mxu1 %v1368_v5  ;;  %v1376_v13 = vld [vmem:[%s1906_s1 + $0xd8] sm:$0xff]   ;;  %v1380_v17 = vld [vmem:[%s1906_s1 + $0xe0] sm:$0xff]   ;;  %v1384_v21 = vld [vmem:[%s1906_s1 + $0xe8] sm:$0xff]  }
   0x7   :  { %v1377_v14 = vld [vmem:[%s1906_s1 + $0x18] sm:$0xff]   ;;  %v1381_v18 = vld [vmem:[%s1906_s1 + $0x20] sm:$0xff]   ;;  %v1385_v22 = vld [vmem:[%s1906_s1 + $0x28] sm:$0xff]  }
   0x8   :  { %1174 = vmatpush3.bf16.msra.mxu0 %v1369_v6  ;;  %v1378_v15 = vld [vmem:[%s1906_s1 + $0x98] sm:$0xff]   ;;  %v1382_v19 = vld [vmem:[%s1906_s1 + $0xa0] sm:$0xff]   ;;  %v1386_v23 = vld [vmem:[%s1906_s1 + $0xa8] sm:$0xff]  }
   0x9   :  { %1238 = vmatpush3.bf16.msra.mxu1 %v1370_v7  ;;  %1175 = vmatprep.subr.bf16.mxu0 %v1371_v8  ;;  %v1387_v24 = vld [vmem:[%s1906_s1 + $0x70] sm:$0xff]   ;;  %v1391_v28 = vld [vmem:[%s1906_s1 + $0x78] sm:$0xff]   ;;  %v1400_v35 = vld [vmem:[%s1907_s0 + $0xc] ss:$20 sps:$4 sm:$0xff]  }
   0xa   :  { %1239 = vmatprep.subr.bf16.mxu1 %v1372_v9  ;;  %v1388_v25 = vld [vmem:[%s1906_s1 + $0xf0] sm:$0xff]   ;;  %v1392_v29 = vld [vmem:[%s1906_s1 + $0xf8] sm:$0xff]   ;;  %v1401_v36 = vld [vmem:[%s1906_s1 + $0x100] sm:$0xff]   ;;  %762 = vmatprep.mubr.bf16.mxu1 %v1400_v35 }
   0xb   :  { %v1389_v26 = vld [vmem:[%s1906_s1 + $0x30] sm:$0xff]   ;;  %v1393_v30 = vld [vmem:[%s1906_s1 + $0x38] sm:$0xff]   ;;  %v1402_v37 = vld [vmem:[%s1907_s0 + $0x2c] ss:$20 sps:$4 sm:$0xff]  }
   0xc   :  { %1176 = vmatpush3.bf16.msra.mxu0 %v1373_v10  ;;  %v1390_v27 = vld [vmem:[%s1906_s1 + $0xb0] sm:$0xff]   ;;  %v1394_v31 = vld [vmem:[%s1906_s1 + $0xb8] sm:$0xff]   ;;  %v1408_v39 = vld [vmem:[%s1906_s1 + $0x108] sm:$0xff]  }
   0xd   :  { %1240 = vmatpush3.bf16.msra.mxu1 %v1374_v11  ;;  %1177 = vmatprep.subr.bf16.mxu0 %v1375_v12  ;;  %v1395_v32 = vld [vmem:[%s1907_s0] ss:$20 sps:$4 sm:$0xff]   ;;  %v1397_v33 = vld [vmem:[%s1907_s0 + $0x4] ss:$20 sps:$4 sm:$0xff]   ;;  %v1398_v34 = vld [vmem:[%s1907_s0 + $0x8] ss:$20 sps:$4 sm:$0xff]  }
   0xe   :  { %1241 = vmatprep.subr.bf16.mxu1 %v1376_v13  ;;  %665 = vmatprep.mubr.bf16.mxu0 %v1397_v33  ;;  %v1404_v38 = vld [vmem:[%s1907_s0 + $0x34] ss:$20 sps:$4 sm:$0xff]   ;;  %v1407_v41 = vld [vmem:[%s1907_s0 + $0x30] ss:$20 sps:$4 sm:$0xff]   ;;  %v1422_v45 = vld [vmem:[%s1906_s1 + $0x118] sm:$0xff]  }
   0xf   :  { %v1406_v40 = vld [vmem:[%s1907_s0 + $0x28] ss:$20 sps:$4 sm:$0xff]   ;;  %v1415_v44 = vld [vmem:[%s1906_s1 + $0x110] sm:$0xff]   ;;  %v1414_v47 = vld [vmem:[%s1907_s0 + $0x58] ss:$20 sps:$4 sm:$0xff]  }
  0x10   :  { %1178 = vmatpush3.bf16.msra.mxu0 %v1377_v14  ;;  %v1409_v42 = vld [vmem:[%s1907_s0 + $0x54] ss:$20 sps:$4 sm:$0xff]   ;;  %v1411_v43 = vld [vmem:[%s1907_s0 + $0x5c] ss:$20 sps:$4 sm:$0xff]   ;;  %v1418_v49 = vld [vmem:[%s1907_s0 + $0x84] ss:$20 sps:$4 sm:$0xff]  }
  0x11   :  { %1242 = vmatpush3.bf16.msra.mxu1 %v1378_v15  ;;  %1179 = vmatprep.subr.bf16.mxu0 %v1379_v16  ;;  %v1413_v46 = vld [vmem:[%s1907_s0 + $0x50] ss:$20 sps:$4 sm:$0xff]   ;;  %v1436_v51 = vld [vmem:[%s1906_s1 + $0x128] sm:$0xff]   ;;  %v1421_v53 = vld [vmem:[%s1907_s0 + $0x80] ss:$20 sps:$4 sm:$0xff]  }
  0x12   :  { %1243 = vmatprep.subr.bf16.mxu1 %v1380_v17  ;;  %v1416_v48 = vld [vmem:[%s1907_s0 + $0x7c] ss:$20 sps:$4 sm:$0xff]   ;;  %v1429_v50 = vld [vmem:[%s1906_s1 + $0x120] sm:$0xff]   ;;  %v1420_v52 = vld [vmem:[%s1907_s0 + $0x78] ss:$20 sps:$4 sm:$0xff]  }
  0x13   :  { %v1423_v54 = vld [vmem:[%s1907_s0 + $0xa4] ss:$20 sps:$4 sm:$0xff]   ;;  %v1443_v55 = vld [vmem:[%s1906_s1 + $0x130] sm:$0xff]   ;;  %v1425_v56 = vld [vmem:[%s1907_s0 + $0xac] ss:$20 sps:$4 sm:$0xff]  }
  0x14   :  { %1180 = vmatpush3.bf16.msra.mxu0 %v1381_v18  ;;  %v1450_v57 = vld [vmem:[%s1906_s1 + $0x138] sm:$0xff]   ;;  %v1427_v58 = vld [vmem:[%s1907_s0 + $0xa0] ss:$20 sps:$4 sm:$0xff]   ;;  %v1435_v63 = vld [vmem:[%s1907_s0 + $0xd0] ss:$20 sps:$4 sm:$0xff]  }
  0x15   :  { %1244 = vmatpush3.bf16.msra.mxu1 %v1382_v19  ;;  %1181 = vmatprep.subr.bf16.mxu0 %v1383_v20  ;;  %v1428_v59 = vld [vmem:[%s1907_s0 + $0xa8] ss:$20 sps:$4 sm:$0xff]   ;;  %v1430_v60 = vld [vmem:[%s1907_s0 + $0xcc] ss:$20 sps:$4 sm:$0xff]   ;;  %v1441_v2 = vld [vmem:[%s1907_s0 + $0xf0] ss:$20 sps:$4 sm:$0xff]  }
  0x16   :  { %1245 = vmatprep.subr.bf16.mxu1 %v1384_v21  ;;  %v1432_v61 = vld [vmem:[%s1907_s0 + $0xd4] ss:$20 sps:$4 sm:$0xff]   ;;  %v1439_v1 = vld [vmem:[%s1907_s0 + $0xfc] ss:$20 sps:$4 sm:$0xff]   ;;  %v1442_v3 = vld [vmem:[%s1907_s0 + $0xf8] ss:$20 sps:$4 sm:$0xff]  }
  0x17   :  { %v1434_v62 = vld [vmem:[%s1907_s0 + $0xc8] ss:$20 sps:$4 sm:$0xff]   ;;  %v1446_v5 = vld [vmem:[%s1907_s0 + $0x124] ss:$20 sps:$4 sm:$0xff]   ;;  %v1449_v7 = vld [vmem:[%s1907_s0 + $0x120] ss:$20 sps:$4 sm:$0xff]  }
  0x18   :  { %1182 = vmatpush3.bf16.msra.mxu0 %v1385_v22  ;;  %v1437_v0 = vld [vmem:[%s1907_s0 + $0xf4] ss:$20 sps:$4 sm:$0xff]   ;;  %v1444_v4 = vld [vmem:[%s1907_s0 + $0x11c] ss:$20 sps:$4 sm:$0xff]   ;;  %v1448_v6 = vld [vmem:[%s1907_s0 + $0x118] ss:$20 sps:$4 sm:$0xff]  }
  0x19   :  { %1246 = vmatpush3.bf16.msra.mxu1 %v1386_v23  ;;  %1183 = vmatprep.subr.bf16.mxu0 %v1387_v24  ;;  %v1451_v8 = vld [vmem:[%s1907_s0 + $0x10] ss:$20 sps:$4 sm:$0xff]   ;;  %v1453_v10 = vld [vmem:[%s1907_s0 + $0x38] ss:$20 sps:$4 sm:$0xff]   ;;  %v1455_v12 = vld [vmem:[%s1907_s0 + $0x60] ss:$20 sps:$4 sm:$0xff]  }
  0x1a   :  { %1247 = vmatprep.subr.bf16.mxu1 %v1388_v25  ;;  %v1452_v9 = vld [vmem:[%s1907_s0 + $0xb0] ss:$20 sps:$4 sm:$0xff]   ;;  %v1454_v11 = vld [vmem:[%s1907_s0 + $0xd8] ss:$20 sps:$4 sm:$0xff]   ;;  %v1456_v13 = vld [vmem:[%s1907_s0 + $0x100] ss:$20 sps:$4 sm:$0xff]  }
  0x1b   :  { %v1457_v14 = vld [vmem:[%s1907_s0 + $0x88] ss:$20 sps:$4 sm:$0xff]  }
  0x1c   :  { %1184 = vmatpush3.bf16.msra.mxu0 %v1389_v26  ;;  %v1458_v15 = vld [vmem:[%s1907_s0 + $0x128] ss:$20 sps:$4 sm:$0xff]  }
  0x1d   :  { %1248 = vmatpush3.bf16.msra.mxu1 %v1390_v27  ;;  %1185 = vmatprep.subr.bf16.mxu0 %v1391_v28 }
  0x1e   :  { %1249 = vmatprep.subr.bf16.mxu1 %v1392_v29 }
  0x20   :  { %1186 = vmatpush3.bf16.msra.mxu0 %v1393_v30 }
  0x21   :  { %1250 = vmatpush3.bf16.msra.mxu1 %v1394_v31  ;;  %1315 = vmatprep.subr.bf16.mxu0 %v1401_v36 }
  0x22   :  { %1347 = vmatprep.subr.bf16.mxu1 %v1401_v36 }
  0x23   :  { %666 = vmatmul.mubr.bf16.vlgmr.msra.gmra.mrb[0].mxu0 %v1395_v32 }
  0x24   :  { %763 = vmatmul.mubr.bf16.vlgmr.msra.gmra.mrb[0].mxu1 %v1398_v34  ;;  %1316 = vmatpush3.bf16.msra.mxu0 %v1401_v36 }
  0x25   :  { %1355 = vmatpush3.bf16.msra.mxu1 %v1401_v36  ;;  %673 = vmatprep.mubr.bf16.mxu0 %v1402_v37 }
  0x26   :  { %770 = vmatprep.mubr.bf16.mxu1 %v1404_v38  ;;  %1317 = vmatprep.subr.bf16.mxu0 %v1408_v39 }
  0x27   :  { %1348 = vmatprep.subr.bf16.mxu1 %v1408_v39 }
  0x28   :  { %1318 = vmatpush3.bf16.msra.mxu0 %v1408_v39 }
  0x29   :  { %1356 = vmatpush3.bf16.msra.mxu1 %v1408_v39  ;;  %1319 = vmatprep.subr.bf16.mxu0 %v1415_v44 }
  0x2a   :  { %1349 = vmatprep.subr.bf16.mxu1 %v1415_v44 }
  0x2b   :  { %674 = vmatmul.mubr.bf16.gmra.mrb[4].mxu0 %v1406_v40 }
  0x2c   :  { %771 = vmatmul.mubr.bf16.gmra.mrb[4].mxu1 %v1407_v41  ;;  %681 = vmatprep.mubr.bf16.mxu0 %v1409_v42 }
  0x2d   :  { %778 = vmatprep.mubr.bf16.mxu1 %v1411_v43  ;;  %1320 = vmatpush3.bf16.msra.mxu0 %v1415_v44 }
  0x2e   :  { %1357 = vmatpush3.bf16.msra.mxu1 %v1415_v44  ;;  %1321 = vmatprep.subr.bf16.mxu0 %v1422_v45 }
  0x2f   :  { %1350 = vmatprep.subr.bf16.mxu1 %v1422_v45 }
  0x31   :  { %1322 = vmatpush3.bf16.msra.mxu0 %v1422_v45 }
  0x32   :  { %1358 = vmatpush3.bf16.msra.mxu1 %v1422_v45  ;;  %1323 = vmatprep.subr.bf16.mxu0 %v1429_v50 }
  0x33   :  { %682 = vmatmul.mubr.bf16.gmra.mrb[8].mxu0 %v1413_v46  ;;  %1351 = vmatprep.subr.bf16.mxu1 %v1429_v50 }
  0x34   :  { %779 = vmatmul.mubr.bf16.gmra.mrb[8].mxu1 %v1414_v47  ;;  %689 = vmatprep.mubr.bf16.mxu0 %v1416_v48 }
  0x35   :  { %786 = vmatprep.mubr.bf16.mxu1 %v1418_v49  ;;  %1324 = vmatpush3.bf16.msra.mxu0 %v1429_v50 }
  0x36   :  { %1359 = vmatpush3.bf16.msra.mxu1 %v1429_v50  ;;  %1325 = vmatprep.subr.bf16.mxu0 %v1436_v51 }
  0x37   :  { %1352 = vmatprep.subr.bf16.mxu1 %v1436_v51 }
  0x39   :  { %1326 = vmatpush3.bf16.msra.mxu0 %v1436_v51 }
  0x3a   :  { %1360 = vmatpush3.bf16.msra.mxu1 %v1436_v51  ;;  %1327 = vmatprep.subr.bf16.mxu0 %v1443_v55 }
  0x3b   :  { %690 = vmatmul.mubr.bf16.gmra.mrb[12].mxu0 %v1420_v52  ;;  %1353 = vmatprep.subr.bf16.mxu1 %v1443_v55 }
  0x3c   :  { %787 = vmatmul.mubr.bf16.gmra.mrb[12].mxu1 %v1421_v53  ;;  %697 = vmatprep.mubr.bf16.mxu0 %v1423_v54 }
  0x3d   :  { %794 = vmatprep.mubr.bf16.mxu1 %v1425_v56  ;;  %1328 = vmatpush3.bf16.msra.mxu0 %v1443_v55 }
  0x3e   :  { %1361 = vmatpush3.bf16.msra.mxu1 %v1443_v55  ;;  %1329 = vmatprep.subr.bf16.mxu0 %v1450_v57 }
  0x3f   :  { %1354 = vmatprep.subr.bf16.mxu1 %v1450_v57 }
  0x41   :  { %1330 = vmatpush3.bf16.msra.mxu0 %v1450_v57 }
  0x42   :  { %1362 = vmatpush3.bf16.msra.mxu1 %v1450_v57 }
  0x43   :  { %698 = vmatmul.mubr.bf16.gmra.mrb[16].mxu0 %v1427_v58 }
  0x44   :  { %795 = vmatmul.mubr.bf16.gmra.mrb[16].mxu1 %v1428_v59  ;;  %705 = vmatprep.mubr.bf16.mxu0 %v1430_v60 }
  0x45   :  { %802 = vmatprep.mubr.bf16.mxu1 %v1432_v61 }
  0x4b   :  { %706 = vmatmul.mubr.bf16.gmra.mrb[20].mxu0 %v1434_v62 }
  0x4c   :  { %803 = vmatmul.mubr.bf16.gmra.mrb[20].mxu1 %v1435_v63  ;;  %713 = vmatprep.mubr.bf16.mxu0 %v1437_v0 }
  0x4d   :  { %810 = vmatprep.mubr.bf16.mxu1 %v1439_v1 }
  0x53   :  { %714 = vmatmul.mubr.bf16.gmra.mrb[24].mxu0 %v1441_v2 }
  0x54   :  { %811 = vmatmul.mubr.bf16.gmra.mrb[24].mxu1 %v1442_v3  ;;  %721 = vmatprep.mubr.bf16.mxu0 %v1444_v4 }
  0x55   :  { %818 = vmatprep.mubr.bf16.mxu1 %v1446_v5 }
  0x5b   :  { %722 = vmatmul.mubr.bf16.gmra.mrb[28].mxu0 %v1448_v6 }
  0x5c   :  { %819 = vmatmul.mubr.bf16.gmra.mrb[28].mxu1 %v1449_v7  ;;  %1331 = vmatprep.mubr.bf16.mxu0 %v1451_v8 }
  0x5d   :  { %1339 = vmatprep.mubr.bf16.mxu1 %v1452_v9 }
  0x63   :  { %1332 = vmatmul.mubr.bf16.vlgmr.msra.gmra.mrb[32].mxu0 %v1453_v10 }
  0x64   :  { %1340 = vmatmul.mubr.bf16.vlgmr.msra.gmra.mrb[32].mxu1 %v1454_v11  ;;  %1335 = vmatprep.mubr.bf16.mxu0 %v1455_v12 }
  0x65   :  { %1343 = vmatprep.mubr.bf16.mxu1 %v1456_v13 }
  0x6b   :  { %1336 = vmatmul.mubr.bf16.gmra.mrb[36].mxu0 %v1457_v14 }
  0x6c   :  { %1344 = vmatmul.mubr.bf16.gmra.mrb[36].mxu1 %v1458_v15 }
  0xf6   :  { %v1187_v16 = vpop.f32.mrb[0].mxu0 }
  0xf7   :  { %v1251_v17 = vpop.f32.mrb[0].mxu1  ;;  %v1188_v18 = vpop.f32.mrb[1].mxu0 }
  0xf8   :  { %v1189_v19 = vadd.f32 %v1188_v18, %v1187_v16  ;;  %v1252_v20 = vpop.f32.mrb[1].mxu1  ;;  %v1190_v21 = vpop.f32.mrb[2].mxu0 }
  0xf9   :  { %v1253_v22 = vadd.f32 %v1252_v20, %v1251_v17  ;;  %v1254_v23 = vpop.f32.mrb[2].mxu1  ;;  %v1191_v24 = vpop.f32.mrb[3].mxu0 }
  0xfa   :  { %v1192_v25 = vadd.f32 %v1191_v24, %v1190_v21  ;;  %v1255_v26 = vpop.f32.mrb[3].mxu1 }
  0xfb   :  { %v1256_v27 = vadd.f32 %v1255_v26, %v1254_v23  ;;  %v1729_v28 = vadd.f32 %v1253_v22, %v1189_v19 }
  0xfd   :  { %v1731_v29 = vadd.f32 %v1256_v27, %v1192_v25 }
  0xfe   :  { %v1193_v30 = vpop.f32.mrb[4].mxu0 }
  0xff   :  { %v1257_v31 = vpop.f32.mrb[4].mxu1  ;;  %v1194_v32 = vpop.f32.mrb[5].mxu0 }
 0x100   :  { %v1195_v33 = vadd.f32 %v1194_v32, %v1193_v30  ;;  %v1258_v34 = vpop.f32.mrb[5].mxu1  ;;  %v1196_v35 = vpop.f32.mrb[6].mxu0 }
 0x101   :  { %v1259_v36 = vadd.f32 %v1258_v34, %v1257_v31  ;;  %v1260_v37 = vpop.f32.mrb[6].mxu1  ;;  %v1197_v38 = vpop.f32.mrb[7].mxu0 }
 0x102   :  { %v1198_v39 = vadd.f32 %v1197_v38, %v1196_v35  ;;  %v1261_v40 = vpop.f32.mrb[7].mxu1 }
 0x103   :  { %v1262_v41 = vadd.f32 %v1261_v40, %v1260_v37  ;;  %v1733_v42 = vadd.f32 %v1259_v36, %v1195_v33 }
 0x105   :  { %v1735_v43 = vadd.f32 %v1262_v41, %v1198_v39 }
 0x106   :  { %v1199_v44 = vpop.f32.mrb[8].mxu0 }
 0x107   :  { %v1263_v45 = vpop.f32.mrb[8].mxu1  ;;  %v1200_v46 = vpop.f32.mrb[9].mxu0 }
 0x108   :  { %v1201_v47 = vadd.f32 %v1200_v46, %v1199_v44  ;;  %v1264_v48 = vpop.f32.mrb[9].mxu1  ;;  %v1202_v49 = vpop.f32.mrb[10].mxu0 }
 0x109   :  { %v1265_v50 = vadd.f32 %v1264_v48, %v1263_v45  ;;  %v1266_v51 = vpop.f32.mrb[10].mxu1  ;;  %v1203_v52 = vpop.f32.mrb[11].mxu0 }
 0x10a   :  { %v1204_v53 = vadd.f32 %v1203_v52, %v1202_v49  ;;  %v1267_v54 = vpop.f32.mrb[11].mxu1 }
 0x10b   :  { %v1268_v55 = vadd.f32 %v1267_v54, %v1266_v51  ;;  %v1737_v56 = vadd.f32 %v1265_v50, %v1201_v47 }
 0x10d   :  { %v1739_v57 = vadd.f32 %v1268_v55, %v1204_v53 }
 0x10e   :  { %v1205_v58 = vpop.f32.mrb[12].mxu0 }
 0x10f   :  { %v1269_v59 = vpop.f32.mrb[12].mxu1  ;;  %v1206_v60 = vpop.f32.mrb[13].mxu0 }
 0x110   :  { %v1207_v61 = vadd.f32 %v1206_v60, %v1205_v58  ;;  %v1270_v62 = vpop.f32.mrb[13].mxu1  ;;  %v1208_v63 = vpop.f32.mrb[14].mxu0 }
 0x111   :  { %v1271_v0 = vadd.f32 %v1270_v62, %v1269_v59  ;;  %v1272_v1 = vpop.f32.mrb[14].mxu1  ;;  %v1209_v2 = vpop.f32.mrb[15].mxu0 }
 0x112   :  { %v1210_v3 = vadd.f32 %v1209_v2, %v1208_v63  ;;  %v1273_v4 = vpop.f32.mrb[15].mxu1 }
 0x113   :  { %v1274_v5 = vadd.f32 %v1273_v4, %v1272_v1  ;;  %v1741_v6 = vadd.f32 %v1271_v0, %v1207_v61 }
 0x115   :  { %v1743_v7 = vadd.f32 %v1274_v5, %v1210_v3 }
 0x116   :  { %v1211_v8 = vpop.f32.mrb[16].mxu0 }
 0x117   :  { %v1275_v9 = vpop.f32.mrb[16].mxu1  ;;  %v1212_v10 = vpop.f32.mrb[17].mxu0 }
 0x118   :  { %v1213_v11 = vadd.f32 %v1212_v10, %v1211_v8  ;;  %v1276_v12 = vpop.f32.mrb[17].mxu1  ;;  %v1214_v13 = vpop.f32.mrb[18].mxu0 }
 0x119   :  { %v1277_v14 = vadd.f32 %v1276_v12, %v1275_v9  ;;  %v1278_v15 = vpop.f32.mrb[18].mxu1  ;;  %v1215_v16 = vpop.f32.mrb[19].mxu0  ;;  %v1758_v9 = vld [vmem:[%s1908_s2] ss:$0 sm:$0xff] }
 0x11a   :  { %v1216_v17 = vadd.f32 %v1215_v16, %v1214_v13  ;;  %v1279_v18 = vpop.f32.mrb[19].mxu1  ;;  %v1764_v13 = vld [vmem:[%s1909_s3] ss:$0 sm:$0xff] }
 0x11b   :  { %v1280_v19 = vadd.f32 %v1279_v18, %v1278_v15  ;;  %v797_v20 = vadd.f32 %v1277_v14, %v1213_v11 }
 0x11d   :  { %v1745_v21 = vadd.f32 %v1280_v19, %v1216_v17 }
 0x11e   :  { %v1217_v22 = vpop.f32.mrb[20].mxu0 }
 0x11f   :  { %v1281_v23 = vpop.f32.mrb[20].mxu1  ;;  %v1218_v24 = vpop.f32.mrb[21].mxu0 }
 0x120   :  { %v1219_v25 = vadd.f32 %v1218_v24, %v1217_v22  ;;  %v1282_v26 = vpop.f32.mrb[21].mxu1  ;;  %v1220_v27 = vpop.f32.mrb[22].mxu0 }
 0x121   :  { %v1283_v30 = vadd.f32 %v1282_v26, %v1281_v23  ;;  %v1284_v31 = vpop.f32.mrb[22].mxu1  ;;  %v1221_v32 = vpop.f32.mrb[23].mxu0 }
 0x122   :  { %v1222_v33 = vadd.f32 %v1221_v32, %v1220_v27  ;;  %v1285_v34 = vpop.f32.mrb[23].mxu1 }
 0x123   :  { %v1286_v35 = vadd.f32 %v1285_v34, %v1284_v31  ;;  %v805_v36 = vadd.f32 %v1283_v30, %v1219_v25 }
 0x125   :  { %v808_v37 = vadd.f32 %v1286_v35, %v1222_v33 }
 0x126   :  { %v1223_v38 = vpop.f32.mrb[24].mxu0 }
 0x127   :  { %v1287_v39 = vpop.f32.mrb[24].mxu1  ;;  %v1224_v40 = vpop.f32.mrb[25].mxu0 }
 0x128   :  { %v1225_v41 = vadd.f32 %v1224_v40, %v1223_v38  ;;  %v1288_v44 = vpop.f32.mrb[25].mxu1  ;;  %v1226_v45 = vpop.f32.mrb[26].mxu0 }
 0x129   :  { %v1289_v46 = vadd.f32 %v1288_v44, %v1287_v39  ;;  %v1290_v47 = vpop.f32.mrb[26].mxu1  ;;  %v1227_v48 = vpop.f32.mrb[27].mxu0  ;;  %v1032_v44 = vld [vmem:[%s1910_s4 + $0x58] sm:$0xff] }
 0x12a   :  { %v1228_v49 = vadd.f32 %v1227_v48, %v1226_v45  ;;  %v1291_v50 = vpop.f32.mrb[27].mxu1  ;;  %v1022_v45 = vld [vmem:[%s1910_s4 + $0x8] sm:$0xff] }
 0x12b   :  { %v1292_v51 = vadd.f32 %v1291_v50, %v1290_v47  ;;  %v1747_v52 = vadd.f32 %v1289_v46, %v1225_v41 }
 0x12d   :  { %v1749_v53 = vadd.f32 %v1292_v51, %v1228_v49  ;;  %v1030_v51 = vld [vmem:[%s1910_s4 + $0x48] sm:$0xff] }
 0x12e   :  { %v1229_v54 = vpop.f32.mrb[28].mxu0 }
 0x12f   :  { %v1293_v55 = vpop.f32.mrb[28].mxu1  ;;  %v1230_v58 = vpop.f32.mrb[29].mxu0 }
 0x130   :  { %v1231_v59 = vadd.f32 %v1230_v58, %v1229_v54  ;;  %v1294_v60 = vpop.f32.mrb[29].mxu1  ;;  %v1232_v61 = vpop.f32.mrb[30].mxu0 }
 0x131   :  { %v1295_v62 = vadd.f32 %v1294_v60, %v1293_v55  ;;  %v1296_v63 = vpop.f32.mrb[30].mxu1  ;;  %v1233_v0 = vpop.f32.mrb[31].mxu0 }
 0x132   :  { %v1234_v1 = vadd.f32 %v1233_v0, %v1232_v61  ;;  %v1297_v2 = vpop.f32.mrb[31].mxu1 }
 0x133   :  { %v1298_v3 = vadd.f32 %v1297_v2, %v1296_v63  ;;  %v1751_v4 = vadd.f32 %v1295_v62, %v1231_v59 }
 0x135   :  { %v1753_v5 = vadd.f32 %v1298_v3, %v1234_v1 }
 0x136   :  { %v1333_v8 = vpop.f32.mrb[32].mxu0 }
 0x137   :  { %v870_v10 = vadd.f32 %v1333_v8, %v1733_v42  ;;  %v1341_v11 = vpop.f32.mrb[32].mxu1  ;;  %v861_v12 = vpop.f32.mrb[33].mxu0  ;;  %v1023_v42 = vld [vmem:[%s1910_s4 + $0x10] sm:$0xff] }
 0x138   :  { %v902_v14 = vadd.f32 %v1341_v11, %v805_v36  ;;  %v862_v15 = vadd.f32 %v861_v12, %v1729_v28  ;;  %v893_v16 = vpop.f32.mrb[33].mxu1  ;;  %v1334_v17 = vpop.f32.mrb[34].mxu0  ;;  %v1029_v36 = vld [vmem:[%s1910_s4 + $0x40] sm:$0xff] }
 0x139   :  { %v984_v18 = vmul.f32 %v1758_v9, %v870_v10  ;;  %v894_v19 = vadd.f32 %v893_v16, %v797_v20  ;;  %v873_v22 = vadd.f32 %v1334_v17, %v1735_v43  ;;  %v1342_v23 = vpop.f32.mrb[34].mxu1  ;;  %v864_v24 = vpop.f32.mrb[35].mxu0  ;;  %v1031_v43 = vld [vmem:[%s1910_s4 + $0x50] sm:$0xff]  ;;  %v1021_v20 = vld [vmem:[%s1910_s4] sm:$0xff] }
 0x13a   :  { %v992_v25 = vmul.f32 %v1758_v9, %v902_v14  ;;  %v982_v26 = vmul.f32 %v1758_v9, %v862_v15  ;;  %v905_v27 = vadd.f32 %v1342_v23, %v808_v37  ;;  %v865_v28 = vadd.f32 %v864_v24, %v1731_v29  ;;  %v896_v30 = vpop.f32.mrb[35].mxu1  ;;  %v1024_v37 = vld [vmem:[%s1910_s4 + $0x18] sm:$0xff] }
 0x13b   :  { %v1007_v31 = vadd.f32 %v1764_v13, %v984_v18  ;;  %v990_v32 = vmul.f32 %v1758_v9, %v894_v19  ;;  %v985_v33 = vmul.f32 %v1758_v9, %v873_v22  ;;  %v897_v34 = vadd.f32 %v896_v30, %v1745_v21  ;;  %v1025_v30 = vld [vmem:[%s1910_s4 + $0x20] sm:$0xff] }
 0x13c   :  { %v1015_v35 = vadd.f32 %v1764_v13, %v992_v25  ;;  %v1005_v29 = vadd.f32 %v1764_v13, %v982_v26  ;;  %v993_v38 = vmul.f32 %v1758_v9, %v905_v27  ;;  %v983_v39 = vmul.f32 %v1758_v9, %v865_v28  ;;  %v1035_v28 = vld [vmem:[%s1910_s4 + $0x70] sm:$0xff] }
 0x13d   :  { %v1039_v40 = vadd.f32 %v1023_v42, %v1007_v31  ;;  %v1013_v41 = vadd.f32 %v1764_v13, %v990_v32  ;;  %v1008_v21 = vadd.f32 %v1764_v13, %v985_v33  ;;  %v991_v46 = vmul.f32 %v1758_v9, %v897_v34  ;;  %v1033_v32 = vld [vmem:[%s1910_s4 + $0x60] sm:$0xff]  ;;  %v1028_v33 = vld [vmem:[%s1910_s4 + $0x38] sm:$0xff] }
 0x13e   :  { %v1047_v47 = vadd.f32 %v1031_v43, %v1015_v35  ;;  %v1037_v48 = vadd.f32 %v1021_v20, %v1005_v29  ;;  %v1016_v49 = vadd.f32 %v1764_v13, %v993_v38  ;;  %v1006_v50 = vadd.f32 %v1764_v13, %v983_v39  ;;  %v1337_v54 = vpop.f32.mrb[36].mxu0  ;;  %v1026_v38 = vld [vmem:[%s1910_s4 + $0x28] sm:$0xff] }
 0x13f   :  { %v1055_v55 = vmax.f32 %v1039_v40, 0.0  ;;  %v1045_v58 = vadd.f32 %v1029_v36, %v1013_v41  ;;  %v1040_v59 = vadd.f32 %v1024_v37, %v1008_v21  ;;  %v1014_v60 = vadd.f32 %v1764_v13, %v991_v46  ;;  %v1345_v61 = vpop.f32.mrb[36].mxu1  ;;  %v877_v62 = vpop.f32.mrb[37].mxu0  ;;  %v1036_v37 = vld [vmem:[%s1910_s4 + $0x78] sm:$0xff] }
 0x140   :  { %v1063_v63 = vmax.f32 %v1047_v47, 0.0  ;;  %v1053_v0 = vmax.f32 %v1037_v48, 0.0  ;;  %v1048_v1 = vadd.f32 %v1032_v44, %v1016_v49  ;;  %v1038_v2 = vadd.f32 %v1022_v45, %v1006_v50  ;;  %v909_v3 = vpop.f32.mrb[37].mxu1  ;;  %v1338_v8 = vpop.f32.mrb[38].mxu0  ;;  %v1034_v45 = vld [vmem:[%s1910_s4 + $0x68] sm:$0xff] }
 0x141   :  { %1071 = vst [vmem:[%s1911_s5 + $0x10] sm:$0xff] %v1055_v55  ;;  %v1061_v10 = vmax.f32 %v1045_v58, 0.0  ;;  %v1056_v11 = vmax.f32 %v1040_v59, 0.0  ;;  %v1046_v12 = vadd.f32 %v1030_v51, %v1014_v60  ;;  %v886_v14 = vadd.f32 %v1337_v54, %v1741_v6  ;;  %v1346_v15 = vpop.f32.mrb[38].mxu1  ;;  %v880_v16 = vpop.f32.mrb[39].mxu0 }
 0x142   :  { %1079 = vst [vmem:[%s1911_s5 + $0x50] sm:$0xff] %v1063_v63  ;;  %1069 = vst [vmem:[%s1911_s5] sm:$0xff] %v1053_v0  ;;  %v1064_v17 = vmax.f32 %v1048_v1, 0.0  ;;  %v1054_v18 = vmax.f32 %v1038_v2, 0.0  ;;  %v918_v19 = vadd.f32 %v1345_v61, %v1751_v4  ;;  %v878_v22 = vadd.f32 %v877_v62, %v1737_v56  ;;  %v912_v23 = vpop.f32.mrb[39].mxu1  ;;  %v1027_v56 = vld [vmem:[%s1910_s4 + $0x30] sm:$0xff] }
 0x143   :  { %1077 = vst [vmem:[%s1911_s5 + $0x40] sm:$0xff] %v1061_v10  ;;  %1072 = vst [vmem:[%s1911_s5 + $0x18] sm:$0xff] %v1056_v11  ;;  %v1062_v6 = vmax.f32 %v1046_v12, 0.0  ;;  %v988_v24 = vmul.f32 %v1758_v9, %v886_v14  ;;  %v910_v42 = vadd.f32 %v909_v3, %v1747_v52  ;;  %v889_v25 = vadd.f32 %v1338_v8, %v1743_v7 }
 0x144   :  { %1080 = vst [vmem:[%s1911_s5 + $0x58] sm:$0xff] %v1064_v17  ;;  %1070 = vst [vmem:[%s1911_s5 + $0x8] sm:$0xff] %v1054_v18  ;;  %v996_v4 = vmul.f32 %v1758_v9, %v918_v19  ;;  %v986_v26 = vmul.f32 %v1758_v9, %v878_v22  ;;  %v921_v52 = vadd.f32 %v1346_v15, %v1753_v5 }
 0x145   :  { %v881_v7 = vadd.f32 %v880_v16, %v1739_v57  ;;  %1078 = vst [vmem:[%s1911_s5 + $0x48] sm:$0xff] %v1062_v6  ;;  %v1011_v27 = vadd.f32 %v1764_v13, %v988_v24  ;;  %v994_v31 = vmul.f32 %v1758_v9, %v910_v42  ;;  %v989_v5 = vmul.f32 %v1758_v9, %v889_v25 }
 0x146   :  { %v913_v57 = vadd.f32 %v912_v23, %v1749_v53  ;;  %v1019_v43 = vadd.f32 %v1764_v13, %v996_v4  ;;  %v1009_v20 = vadd.f32 %v1764_v13, %v986_v26  ;;  %v997_v34 = vmul.f32 %v1758_v9, %v921_v52 }
 0x147   :  { %v987_v35 = vmul.f32 %v1758_v9, %v881_v7  ;;  %v1043_v29 = vadd.f32 %v1027_v56, %v1011_v27  ;;  %v1017_v36 = vadd.f32 %v1764_v13, %v994_v31  ;;  %v1012_v53 = vadd.f32 %v1764_v13, %v989_v5 }
 0x148   :  { %v995_v39 = vmul.f32 %v1758_v9, %v913_v57  ;;  %v1051_v40 = vadd.f32 %v1035_v28, %v1019_v43  ;;  %v1041_v41 = vadd.f32 %v1025_v30, %v1009_v20  ;;  %v1020_v21 = vadd.f32 %v1764_v13, %v997_v34 }
 0x149   :  { %v1010_v44 = vadd.f32 %v1764_v13, %v987_v35  ;;  %v1059_v46 = vmax.f32 %v1043_v29, 0.0  ;;  %v1049_v47 = vadd.f32 %v1033_v32, %v1017_v36  ;;  %v1044_v48 = vadd.f32 %v1028_v33, %v1012_v53 }
 0x14a   :  { %v1018_v49 = vadd.f32 %v1764_v13, %v995_v39  ;;  %v1067_v50 = vmax.f32 %v1051_v40, 0.0  ;;  %v1057_v51 = vmax.f32 %v1041_v41, 0.0  ;;  %v1052_v54 = vadd.f32 %v1036_v37, %v1020_v21 }
 0x14b   :  { %v1042_v55 = vadd.f32 %v1026_v38, %v1010_v44  ;;  %1075 = vst [vmem:[%s1911_s5 + $0x30] sm:$0xff] %v1059_v46  ;;  %v1065_v9 = vmax.f32 %v1049_v47, 0.0  ;;  %v1060_v58 = vmax.f32 %v1044_v48, 0.0 }
 0x14c   :  { %v1050_v59 = vadd.f32 %v1034_v45, %v1018_v49  ;;  %1083 = vst [vmem:[%s1911_s5 + $0x70] sm:$0xff] %v1067_v50  ;;  %1073 = vst [vmem:[%s1911_s5 + $0x20] sm:$0xff] %v1057_v51  ;;  %v1068_v13 = vmax.f32 %v1052_v54, 0.0 }
 0x14d   :  { %v1058_v60 = vmax.f32 %v1042_v55, 0.0  ;;  %1081 = vst [vmem:[%s1911_s5 + $0x60] sm:$0xff] %v1065_v9  ;;  %1076 = vst [vmem:[%s1911_s5 + $0x38] sm:$0xff] %v1060_v58 }
 0x14e   :  { %v1066_v61 = vmax.f32 %v1050_v59, 0.0  ;;  %1084 = vst [vmem:[%s1911_s5 + $0x78] sm:$0xff] %v1068_v13 }
 0x14f   :  { %1074 = vst [vmem:[%s1911_s5 + $0x28] sm:$0xff] %v1058_v60 }
 0x150   :  { %1082 = vst [vmem:[%s1911_s5 + $0x68] sm:$0xff] %v1066_v61 }

// kernel: resnet18_forward.29
= control target key start
LH: loop header
LB: loop body
LE: loop exit
PB: predicated region body
PF: predicated region fallthrough
CT: control target
= control target key end

     0   :  { %s995_s1 = inlined_call_operand.vmem [shape: bf16[640,128], index: 1, kind: input, shape index: {}]   ;;  %s996_s0 = inlined_call_operand.vmem [shape: bf16[32,640], index: 0, kind: input, shape index: {}]   ;;  %s997_s2 = inlined_call_operand.vmem [shape: f32[1,128], index: 2, kind: input, shape index: {}]   ;;  %s998_s3 = inlined_call_operand.vmem [shape: f32[1,128], index: 3, kind: input, shape index: {}]   ;;  %s999_s4 = inlined_call_operand.vmem [shape: f32[32,128], index: 4, kind: output, shape index: {}]  }
   0x1   :  { %v748_v0 = vld [vmem:[%s995_s1 + $0x40] sm:$0xff]   ;;  %v752_v4 = vld [vmem:[%s995_s1 + $0x48] sm:$0xff]   ;;  %v756_v8 = vld [vmem:[%s995_s1 + $0x50] sm:$0xff]  }
   0x2   :  { %v749_v1 = vld [vmem:[%s995_s1 + $0xc0] sm:$0xff]   ;;  %662 = vmatprep.subr.bf16.mxu0 %v748_v0  ;;  %v753_v5 = vld [vmem:[%s995_s1 + $0xc8] sm:$0xff]   ;;  %v757_v9 = vld [vmem:[%s995_s1 + $0xd0] sm:$0xff]  }
   0x3   :  { %v750_v2 = vld [vmem:[%s995_s1] sm:$0xff]   ;;  %690 = vmatprep.subr.bf16.mxu1 %v749_v1  ;;  %v754_v6 = vld [vmem:[%s995_s1 + $0x8] sm:$0xff]   ;;  %v758_v10 = vld [vmem:[%s995_s1 + $0x10] sm:$0xff]  }
   0x4   :  { %v751_v3 = vld [vmem:[%s995_s1 + $0x80] sm:$0xff]   ;;  %663 = vmatpush3.bf16.msra.mxu0 %v750_v2  ;;  %v755_v7 = vld [vmem:[%s995_s1 + $0x88] sm:$0xff]   ;;  %v759_v11 = vld [vmem:[%s995_s1 + $0x90] sm:$0xff]  }
   0x5   :  { %691 = vmatpush3.bf16.msra.mxu1 %v751_v3  ;;  %664 = vmatprep.subr.bf16.mxu0 %v752_v4  ;;  %v760_v12 = vld [vmem:[%s995_s1 + $0x58] sm:$0xff]   ;;  %v764_v16 = vld [vmem:[%s995_s1 + $0x60] sm:$0xff]   ;;  %v768_v20 = vld [vmem:[%s995_s1 + $0x68] sm:$0xff]  }
   0x6   :  { %692 = vmatprep.subr.bf16.mxu1 %v753_v5  ;;  %v761_v13 = vld [vmem:[%s995_s1 + $0xd8] sm:$0xff]   ;;  %v765_v17 = vld [vmem:[%s995_s1 + $0xe0] sm:$0xff]   ;;  %v769_v21 = vld [vmem:[%s995_s1 + $0xe8] sm:$0xff]  }
   0x7   :  { %v762_v14 = vld [vmem:[%s995_s1 + $0x18] sm:$0xff]   ;;  %v766_v18 = vld [vmem:[%s995_s1 + $0x20] sm:$0xff]   ;;  %v770_v22 = vld [vmem:[%s995_s1 + $0x28] sm:$0xff]  }
   0x8   :  { %665 = vmatpush3.bf16.msra.mxu0 %v754_v6  ;;  %v763_v15 = vld [vmem:[%s995_s1 + $0x98] sm:$0xff]   ;;  %v767_v19 = vld [vmem:[%s995_s1 + $0xa0] sm:$0xff]   ;;  %v771_v23 = vld [vmem:[%s995_s1 + $0xa8] sm:$0xff]  }
   0x9   :  { %693 = vmatpush3.bf16.msra.mxu1 %v755_v7  ;;  %666 = vmatprep.subr.bf16.mxu0 %v756_v8  ;;  %v772_v24 = vld [vmem:[%s995_s1 + $0x70] sm:$0xff]   ;;  %v776_v28 = vld [vmem:[%s995_s1 + $0x78] sm:$0xff]   ;;  %v785_v35 = vld [vmem:[%s996_s0 + $0xc] ss:$20 sps:$4 sm:$0xff]  }
   0xa   :  { %694 = vmatprep.subr.bf16.mxu1 %v757_v9  ;;  %v773_v25 = vld [vmem:[%s995_s1 + $0xf0] sm:$0xff]   ;;  %v777_v29 = vld [vmem:[%s995_s1 + $0xf8] sm:$0xff]   ;;  %v786_v36 = vld [vmem:[%s995_s1 + $0x100] sm:$0xff]   ;;  %495 = vmatprep.mubr.bf16.mxu1 %v785_v35 }
   0xb   :  { %v774_v26 = vld [vmem:[%s995_s1 + $0x30] sm:$0xff]   ;;  %v778_v30 = vld [vmem:[%s995_s1 + $0x38] sm:$0xff]   ;;  %v787_v37 = vld [vmem:[%s995_s1 + $0x108] sm:$0xff]  }
   0xc   :  { %667 = vmatpush3.bf16.msra.mxu0 %v758_v10  ;;  %v775_v27 = vld [vmem:[%s995_s1 + $0xb0] sm:$0xff]   ;;  %v779_v31 = vld [vmem:[%s995_s1 + $0xb8] sm:$0xff]   ;;  %v791_v39 = vld [vmem:[%s996_s0 + $0x2c] ss:$20 sps:$4 sm:$0xff]  }
   0xd   :  { %695 = vmatpush3.bf16.msra.mxu1 %v759_v11  ;;  %668 = vmatprep.subr.bf16.mxu0 %v760_v12  ;;  %v780_v32 = vld [vmem:[%s996_s0] ss:$20 sps:$4 sm:$0xff]   ;;  %v782_v33 = vld [vmem:[%s996_s0 + $0x4] ss:$20 sps:$4 sm:$0xff]   ;;  %v783_v34 = vld [vmem:[%s996_s0 + $0x8] ss:$20 sps:$4 sm:$0xff]  }
   0xe   :  { %696 = vmatprep.subr.bf16.mxu1 %v761_v13  ;;  %446 = vmatprep.mubr.bf16.mxu0 %v782_v33  ;;  %v788_v38 = vld [vmem:[%s995_s1 + $0x110] sm:$0xff]   ;;  %v789_v41 = vld [vmem:[%s995_s1 + $0x118] sm:$0xff]   ;;  %v790_v45 = vld [vmem:[%s995_s1 + $0x120] sm:$0xff]  }
   0xf   :  { %v793_v40 = vld [vmem:[%s996_s0 + $0x34] ss:$20 sps:$4 sm:$0xff]   ;;  %v797_v43 = vld [vmem:[%s996_s0 + $0x30] ss:$20 sps:$4 sm:$0xff]   ;;  %v799_v48 = vld [vmem:[%s995_s1 + $0x138] sm:$0xff]  }
  0x10   :  { %669 = vmatpush3.bf16.msra.mxu0 %v762_v14  ;;  %v796_v42 = vld [vmem:[%s996_s0 + $0x28] ss:$20 sps:$4 sm:$0xff]   ;;  %v800_v44 = vld [vmem:[%s996_s0 + $0x10] ss:$20 sps:$4 sm:$0xff]   ;;  %v801_v49 = vld [vmem:[%s996_s0 + $0x38] ss:$20 sps:$4 sm:$0xff]  }
  0x11   :  { %697 = vmatpush3.bf16.msra.mxu1 %v763_v15  ;;  %670 = vmatprep.subr.bf16.mxu0 %v764_v16  ;;  %v795_v46 = vld [vmem:[%s995_s1 + $0x128] sm:$0xff]   ;;  %v798_v47 = vld [vmem:[%s995_s1 + $0x130] sm:$0xff]   ;;  %v660_v15 = vld [vmem:[%s997_s2] ss:$0 sm:$0xff] }
  0x12   :  { %698 = vmatprep.subr.bf16.mxu1 %v765_v17 }
  0x14   :  { %671 = vmatpush3.bf16.msra.mxu0 %v766_v18  ;;  %v661_v18 = vld [vmem:[%s998_s3] ss:$0 sm:$0xff] }
  0x15   :  { %699 = vmatpush3.bf16.msra.mxu1 %v767_v19  ;;  %672 = vmatprep.subr.bf16.mxu0 %v768_v20 }
  0x16   :  { %700 = vmatprep.subr.bf16.mxu1 %v769_v21 }
  0x18   :  { %673 = vmatpush3.bf16.msra.mxu0 %v770_v22 }
  0x19   :  { %701 = vmatpush3.bf16.msra.mxu1 %v771_v23  ;;  %674 = vmatprep.subr.bf16.mxu0 %v772_v24 }
  0x1a   :  { %702 = vmatprep.subr.bf16.mxu1 %v773_v25 }
  0x1c   :  { %675 = vmatpush3.bf16.msra.mxu0 %v774_v26 }
  0x1d   :  { %703 = vmatpush3.bf16.msra.mxu1 %v775_v27  ;;  %676 = vmatprep.subr.bf16.mxu0 %v776_v28 }
  0x1e   :  { %704 = vmatprep.subr.bf16.mxu1 %v777_v29 }
  0x20   :  { %677 = vmatpush3.bf16.msra.mxu0 %v778_v30 }
  0x21   :  { %705 = vmatpush3.bf16.msra.mxu1 %v779_v31  ;;  %728 = vmatprep.subr.bf16.mxu0 %v786_v36 }
  0x23   :  { %447 = vmatmul.mubr.bf16.vlgmr.msra.gmra.mrb[0].mxu0 %v780_v32 }
  0x24   :  { %496 = vmatmul.mubr.bf16.vlgmr.msra.gmra.mrb[0].mxu1 %v783_v34  ;;  %729 = vmatpush3.bf16.msra.mxu0 %v786_v36 }
  0x25   :  { %730 = vmatprep.subr.bf16.mxu0 %v787_v37  ;;  %454 = vmatprep.mubr.bf16.mxu0 %v791_v39 }
  0x26   :  { %503 = vmatprep.mubr.bf16.mxu1 %v793_v40 }
  0x28   :  { %731 = vmatpush3.bf16.msra.mxu0 %v787_v37 }
  0x29   :  { %732 = vmatprep.subr.bf16.mxu0 %v788_v38 }
  0x2b   :  { %455 = vmatmul.mubr.bf16.gmra.mrb[4].mxu0 %v796_v42 }
  0x2c   :  { %504 = vmatmul.mubr.bf16.gmra.mrb[4].mxu1 %v797_v43  ;;  %733 = vmatpush3.bf16.msra.mxu0 %v788_v38 }
  0x2d   :  { %734 = vmatprep.subr.bf16.mxu0 %v789_v41  ;;  %744 = vmatprep.mubr.bf16.mxu0 %v800_v44 }
  0x30   :  { %735 = vmatpush3.bf16.msra.mxu0 %v789_v41 }
  0x31   :  { %736 = vmatprep.subr.bf16.mxu0 %v790_v45 }
  0x34   :  { %737 = vmatpush3.bf16.msra.mxu0 %v790_v45 }
  0x35   :  { %738 = vmatprep.subr.bf16.mxu0 %v795_v46 }
  0x38   :  { %739 = vmatpush3.bf16.msra.mxu0 %v795_v46 }
  0x39   :  { %740 = vmatprep.subr.bf16.mxu0 %v798_v47 }
  0x3c   :  { %741 = vmatpush3.bf16.msra.mxu0 %v798_v47 }
  0x3d   :  { %742 = vmatprep.subr.bf16.mxu0 %v799_v48 }
  0x40   :  { %743 = vmatpush3.bf16.msra.mxu0 %v799_v48 }
  0x43   :  { %745 = vmatmul.mubr.bf16.vlgmr.msra.gmra.mrb[8].mxu0 %v801_v49 }
  0xf6   :  { %v678_v50 = vpop.f32.mrb[0].mxu0 }
  0xf7   :  { %v706_v51 = vpop.f32.mrb[0].mxu1  ;;  %v679_v52 = vpop.f32.mrb[1].mxu0 }
  0xf8   :  { %v680_v53 = vadd.f32 %v679_v52, %v678_v50  ;;  %v707_v54 = vpop.f32.mrb[1].mxu1  ;;  %v681_v55 = vpop.f32.mrb[2].mxu0 }
  0xf9   :  { %v708_v56 = vadd.f32 %v707_v54, %v706_v51  ;;  %v709_v57 = vpop.f32.mrb[2].mxu1  ;;  %v682_v58 = vpop.f32.mrb[3].mxu0 }
  0xfa   :  { %v683_v59 = vadd.f32 %v682_v58, %v681_v55  ;;  %v710_v60 = vpop.f32.mrb[3].mxu1 }
  0xfb   :  { %v711_v61 = vadd.f32 %v710_v60, %v709_v57  ;;  %v498_v62 = vadd.f32 %v708_v56, %v680_v53 }
  0xfd   :  { %v501_v63 = vadd.f32 %v711_v61, %v683_v59 }
  0xfe   :  { %v684_v0 = vpop.f32.mrb[4].mxu0 }
  0xff   :  { %v712_v1 = vpop.f32.mrb[4].mxu1  ;;  %v685_v2 = vpop.f32.mrb[5].mxu0 }
 0x100   :  { %v686_v3 = vadd.f32 %v685_v2, %v684_v0  ;;  %v713_v4 = vpop.f32.mrb[5].mxu1  ;;  %v687_v5 = vpop.f32.mrb[6].mxu0 }
 0x101   :  { %v714_v6 = vadd.f32 %v713_v4, %v712_v1  ;;  %v715_v7 = vpop.f32.mrb[6].mxu1  ;;  %v688_v8 = vpop.f32.mrb[7].mxu0 }
 0x102   :  { %v689_v9 = vadd.f32 %v688_v8, %v687_v5  ;;  %v716_v10 = vpop.f32.mrb[7].mxu1 }
 0x103   :  { %v717_v11 = vadd.f32 %v716_v10, %v715_v7  ;;  %v506_v12 = vadd.f32 %v714_v6, %v686_v3 }
 0x105   :  { %v509_v13 = vadd.f32 %v717_v11, %v689_v9 }
 0x116   :  { %v746_v14 = vpop.f32.mrb[8].mxu0 }
 0x117   :  { %v555_v16 = vadd.f32 %v746_v14, %v506_v12  ;;  %v546_v17 = vpop.f32.mrb[9].mxu0 }
 0x118   :  { %v547_v19 = vadd.f32 %v546_v17, %v498_v62  ;;  %v747_v20 = vpop.f32.mrb[10].mxu0 }
 0x119   :  { %v585_v21 = vmul.f32 %v660_v15, %v555_v16  ;;  %v558_v22 = vadd.f32 %v747_v20, %v509_v13  ;;  %v549_v23 = vpop.f32.mrb[11].mxu0 }
 0x11a   :  { %v583_v24 = vmul.f32 %v660_v15, %v547_v19  ;;  %v550_v25 = vadd.f32 %v549_v23, %v501_v63 }
 0x11b   :  { %v596_v26 = vadd.f32 %v661_v18, %v585_v21  ;;  %v586_v27 = vmul.f32 %v660_v15, %v558_v22 }
 0x11c   :  { %v594_v28 = vadd.f32 %v661_v18, %v583_v24  ;;  %v584_v29 = vmul.f32 %v660_v15, %v550_v25 }
 0x11d   :  { %v600_v30 = vmax.f32 %v596_v26, 0.0  ;;  %v597_v31 = vadd.f32 %v661_v18, %v586_v27 }
 0x11e   :  { %v598_v32 = vmax.f32 %v594_v28, 0.0  ;;  %v595_v33 = vadd.f32 %v661_v18, %v584_v29 }
 0x11f   :  { %604 = vst [vmem:[%s999_s4 + $0x10] sm:$0xff] %v600_v30  ;;  %v601_v34 = vmax.f32 %v597_v31, 0.0 }
 0x120   :  { %602 = vst [vmem:[%s999_s4] sm:$0xff] %v598_v32  ;;  %v599_v35 = vmax.f32 %v595_v33, 0.0 }
 0x121   :  { %605 = vst [vmem:[%s999_s4 + $0x18] sm:$0xff] %v601_v34 }
 0x122   :  { %603 = vst [vmem:[%s999_s4 + $0x8] sm:$0xff] %v599_v35 }

// kernel: resnet18_forward.30
= control target key start
LH: loop header
LB: loop body
LE: loop exit
PB: predicated region body
PF: predicated region fallthrough
CT: control target
= control target key end

     0   :  { %s329_s1 = inlined_call_operand.vmem [shape: bf16[128,128], index: 1, kind: input, shape index: {}]   ;;  %s330_s0 = inlined_call_operand.vmem [shape: bf16[32,128], index: 0, kind: input, shape index: {}]   ;;  %s331_s2 = inlined_call_operand.vmem [shape: f32[1,128], index: 2, kind: input, shape index: {}]   ;;  %s332_s3 = inlined_call_operand.vmem [shape: f32[1,128], index: 3, kind: input, shape index: {}]   ;;  %s333_s4 = inlined_call_operand.vmem [shape: f32[32,128], index: 4, kind: output, shape index: {}]  }
   0x1   :  { %v246_v0 = vld [vmem:[%s329_s1] sm:$0xff]   ;;  %v247_v1 = vld [vmem:[%s329_s1 + $0x8] sm:$0xff]   ;;  %v248_v2 = vld [vmem:[%s329_s1 + $0x10] sm:$0xff]  }
   0x2   :  { %226 = vmatprep.subr.bf16.mxu0 %v246_v0  ;;  %v249_v3 = vld [vmem:[%s329_s1 + $0x18] sm:$0xff]   ;;  %v254_v4 = vld [vmem:[%s330_s0] sm:$0xff]   ;;  %v251_v6 = vld [vmem:[%s329_s1 + $0x28] sm:$0xff]  }
   0x3   :  { %227 = vmatpush3.bf16.msra.mxu0 %v246_v0  ;;  %242 = vmatprep.mubr.bf16.mxu0 %v254_v4  ;;  %v250_v5 = vld [vmem:[%s329_s1 + $0x20] sm:$0xff]   ;;  %v252_v7 = vld [vmem:[%s329_s1 + $0x30] sm:$0xff]   ;;  %v253_v8 = vld [vmem:[%s329_s1 + $0x38] sm:$0xff]  }
   0x4   :  { %228 = vmatprep.subr.bf16.mxu0 %v247_v1  ;;  %v255_v9 = vld [vmem:[%s330_s0 + $0x8] sm:$0xff]   ;;  %v214_v10 = vld [vmem:[%s331_s2] ss:$0 sm:$0xff] }
   0x5   :  { %v215_v12 = vld [vmem:[%s332_s3] ss:$0 sm:$0xff] }
   0x7   :  { %229 = vmatpush3.bf16.msra.mxu0 %v247_v1 }
   0x8   :  { %230 = vmatprep.subr.bf16.mxu0 %v248_v2 }
   0xb   :  { %231 = vmatpush3.bf16.msra.mxu0 %v248_v2 }
   0xc   :  { %232 = vmatprep.subr.bf16.mxu0 %v249_v3 }
   0xf   :  { %233 = vmatpush3.bf16.msra.mxu0 %v249_v3 }
  0x10   :  { %234 = vmatprep.subr.bf16.mxu0 %v250_v5 }
  0x13   :  { %235 = vmatpush3.bf16.msra.mxu0 %v250_v5 }
  0x14   :  { %236 = vmatprep.subr.bf16.mxu0 %v251_v6 }
  0x17   :  { %237 = vmatpush3.bf16.msra.mxu0 %v251_v6 }
  0x18   :  { %238 = vmatprep.subr.bf16.mxu0 %v252_v7 }
  0x1b   :  { %239 = vmatpush3.bf16.msra.mxu0 %v252_v7 }
  0x1c   :  { %240 = vmatprep.subr.bf16.mxu0 %v253_v8 }
  0x1f   :  { %241 = vmatpush3.bf16.msra.mxu0 %v253_v8 }
  0x22   :  { %243 = vmatmul.mubr.bf16.vlgmr.msra.gmra.mrb[0].mxu0 %v255_v9 }
  0xf5   :  { %v244_v11 = vpop.f32.mrb[0].mxu0 }
  0xf6   :  { %v183_v13 = vmul.f32 %v244_v11, %v214_v10  ;;  %v144_v14 = vpop.f32.mrb[1].mxu0 }
  0xf7   :  { %v181_v15 = vmul.f32 %v214_v10, %v144_v14  ;;  %v245_v16 = vpop.f32.mrb[2].mxu0 }
  0xf8   :  { %v194_v17 = vadd.f32 %v215_v12, %v183_v13  ;;  %v184_v18 = vmul.f32 %v245_v16, %v214_v10  ;;  %v147_v19 = vpop.f32.mrb[3].mxu0 }
  0xf9   :  { %v192_v20 = vadd.f32 %v215_v12, %v181_v15  ;;  %v182_v21 = vmul.f32 %v214_v10, %v147_v19 }
  0xfa   :  { %198 = vst [vmem:[%s333_s4 + $0x10] sm:$0xff] %v194_v17  ;;  %v195_v22 = vadd.f32 %v215_v12, %v184_v18 }
  0xfb   :  { %196 = vst [vmem:[%s333_s4] sm:$0xff] %v192_v20  ;;  %v193_v23 = vadd.f32 %v215_v12, %v182_v21 }
  0xfc   :  { %199 = vst [vmem:[%s333_s4 + $0x18] sm:$0xff] %v195_v22 }
  0xfd   :  { %197 = vst [vmem:[%s333_s4 + $0x8] sm:$0xff] %v193_v23 }

// kernel: resnet18_forward.32
= control target key start
LH: loop header
LB: loop body
LE: loop exit
PB: predicated region body
PF: predicated region fallthrough
CT: control target
= control target key end

     0   :  { %s1107_s15 = smov 0   ;;  %s1109_s16 = smov 0   ;;  %s1226_s0 = inlined_call_operand.vmem [shape: bf16[32,1152], index: 0, kind: input, shape index: {}]   ;;  %s1227_s1 = inlined_call_operand.vmem [shape: bf16[1152,128], index: 1, kind: input, shape index: {}]   ;;  %s1228_s2 = inlined_call_operand.vmem [shape: f32[1,128], index: 2, kind: input, shape index: {}]   ;;  %s1229_s3 = inlined_call_operand.vmem [shape: f32[1,128], index: 3, kind: input, shape index: {}]   ;;  %s1230_s4 = inlined_call_operand.vmem [shape: f32[32,128], index: 4, kind: output, shape index: {}]  }
   0x1   :  { %s1111_s17 = smov 0   ;;  %s1113_s18 = smov 0  }
   0x2   :  { %s1115_s19 = smov 0  }
   0x3 LB: > { %s26_s20 = sadd.s32 1, %s1075_s18  ;;  %p49_p1 = scmp.ne.s32.totalorder %s1067_s16, %s1063_s15  ;;  %s1079_s19 = sphi %s1115_s19, %s14_s19   ;;  %s1075_s18 = sphi %s1113_s18, %s1234_s18   ;;  %s1071_s17 = sphi %s1111_s17, %s1233_s17   ;;  %s1067_s16 = sphi %s1109_s16, %s1232_s16   ;;  %s1063_s15 = sphi %s1107_s15, %s1231_s15  }
   0x4   : > { %p27_p0 = scmp.ge.s32.totalorder %s26_s20, 3  ;;  %p50_p2 = scmp.eq.s32.totalorder %s1079_s19, 0 }
   0x5   : > { %s42_s22 = sadd.s32 1, %s1067_s16  ;;  %p857_p5 = scmp.ge.s32.totalorder %s1079_s19, 3 }
   0x6   : > { %s1236_s20 = smov (%p27_p0, %s26_s20), 0  ;;  %p51_p3 = por %p50_p2, %p49_p1 }
   0x7   : > { %s38_s21 = ssub.s32 %s1075_s18, %s1236_s20  ;;  %195 = sbr.rel (%p857_p5) target bundleno = 23 (0x17), region = 24 }
   0x8   : > { %p40_p4 = scmp.eq.s32.totalorder %s38_s21, 0 }
   0xa   : > { %s1142_s23 = scalar_select %p40_p4, %s1067_s16, %s42_s22  }
   0xe   : > { %198 = sbr.rel (!%p51_p3) target bundleno = 23 (0x17), region = 28  ;;  %s200_s24 = sand.u32 (%p51_p3), 1, %s1067_s16  }
   0xf   : > { %s907_s25 = smul.u32 (%p51_p3), 12, %s1075_s18 }
  0x10   : > { %s966_s26 = smul.u32 (%p51_p3), 48, %s200_s24 }
  0x11   : > { %s208_s29 = scalar_lea.vmem (%p51_p3), %s1226_s0, %s907_s25 }
  0x12   : > { %v223_v0 = vld [vmem:[%s208_s29] sm:$0xff] (%p51_p3)  ;;  %v227_v2 = vld [vmem:[%s208_s29 + $0x48] sm:$0xff] (%p51_p3)  ;;  %s202_s30 = scalar_lea.vmem (%p51_p3), [#allocation3], %s966_s26  ;;  %v863_v6 = vld [vmem:[%s208_s29 + $0x50] sm:$0xf] (%p51_p3) }
  0x13   : > { %v225_v1 = vld [vmem:[%s208_s29 + $0x24] sm:$0xff] (%p51_p3)  ;;  %224 = vst [vmem:[%s202_s30] sm:$0xff] (%p51_p3), %v223_v0  ;;  %228 = vst [vmem:[%s202_s30 + $0x18] sm:$0xff] (%p51_p3), %v227_v2  ;;  %v229_v3 = vld [vmem:[%s208_s29 + $0x6c] sm:$0xff] (%p51_p3) }
  0x14   : > { %226 = vst [vmem:[%s202_s30 + $0xc] sm:$0xff] (%p51_p3), %v225_v1  ;;  %v859_v4 = vld [vmem:[%s208_s29 + $0x8] sm:$0xf] (%p51_p3)  ;;  %v861_v5 = vld [vmem:[%s208_s29 + $0x2c] sm:$0xf] (%p51_p3)  ;;  %230 = vst [vmem:[%s202_s30 + $0x24] sm:$0xff] (%p51_p3), %v229_v3 }
  0x15   : > { %860 = vst [vmem:[%s202_s30 + $0x8] sm:$0xf] %v859_v4  ;;  %862 = vst [vmem:[%s202_s30 + $0x14] sm:$0xf] %v861_v5  ;;  %v865_v7 = vld [vmem:[%s208_s29 + $0x74] sm:$0xf] }
  0x16   : > { %864 = vst [vmem:[%s202_s30 + $0x20] sm:$0xf] %v863_v6  ;;  %866 = vst [vmem:[%s202_s30 + $0x2c] sm:$0xf] %v865_v7 }
  0x17 PF: > { %p867_p6 = scmp.ge.s32.totalorder %s1079_s19, 1  ;;  %p262_p7 = scmp.lt.s32.totalorder %s1079_s19, 4 }
  0x19   : > { %p263_p8 = pnand %p867_p6, %p262_p7 }
  0x1a   : > { %s269_s5 = sand.u32 (!%p263_p8), 1, %s1063_s15   ;;  %s313_s6 = smul.u32 (!%p263_p8), 48, %s1071_s17 }
  0x1b   : > { %266 = sbr.rel (%p263_p8) target bundleno = 318 (0x13e), region = 58  ;;  %p869_p10 = scmp.ne.s32.totalorder (!%p263_p8), %s1071_s17, 0 }
  0x1c   : > { %s967_s7 = smul.u32 (!%p263_p8), 48, %s269_s5  ;;  %p314_p9 = scmp.lt.s32.totalorder (!%p263_p8), %s313_s6, 143 }
  0x1e   : > { %s1159_s12 = scalar_lea.vmem (!%p263_p8), [#allocation3], %s967_s7 }
  0x22   : > { %s1238_s6 = smov (!%p314_p9, %s313_s6), 143  ;;  %341 = sbr.rel (%p869_p10) target bundleno = 41 (0x29), region = 66 }
  0x23   : > { %s868_s8 = sshll.u32 %s1238_s6, 2  ;;  %v1081_v8 = vmov (!%p869_p10), 0.0  }
  0x24   : > { %s1157_s11 = scalar_lea.vmem %s1227_s1, %s868_s8  ;;  %342 = vst [vmem:[#allocation2] sm:$0xff] (!%p869_p10), %v1081_v8  ;;  %343 = vst [vmem:[#allocation2 + $0x8] sm:$0xff] (!%p869_p10), %v1081_v8 }
  0x25   : > { %344 = vst [vmem:[#allocation2 + $0x10] sm:$0xff] (!%p869_p10), %v1081_v8  ;;  %345 = vst [vmem:[#allocation2 + $0x18] sm:$0xff] (!%p869_p10), %v1081_v8 }
  0x29 PF: > { %v1009_v9 = vld [vmem:[%s1157_s11 + $0x40] sm:$0xff]   ;;  %v1012_v12 = vld [vmem:[%s1157_s11 + $0x48] sm:$0xff]   ;;  %v1015_v15 = vld [vmem:[%s1157_s11 + $0x50] sm:$0xff]   ;;  %p900_p11 = scmp.ne.s32.totalorder %s1071_s17, 2 }
  0x2a   : > { %v1010_v10 = vld [vmem:[%s1157_s11] sm:$0xff]   ;;  %908 = vmatprep.subr.bf16.mxu0 %v1009_v9  ;;  %v1013_v13 = vld [vmem:[%s1157_s11 + $0x8] sm:$0xff]   ;;  %v1016_v16 = vld [vmem:[%s1157_s11 + $0x10] sm:$0xff]  }
  0x2b   : > { %v1011_v11 = vld [vmem:[%s1157_s11 + $0x80] sm:$0xff]   ;;  %909 = vmatpush3.bf16.msra.mxu0 %v1010_v10  ;;  %v1014_v14 = vld [vmem:[%s1157_s11 + $0x88] sm:$0xff]   ;;  %v1017_v17 = vld [vmem:[%s1157_s11 + $0x90] sm:$0xff]  }
  0x2c   : > { %946 = vmatprep.subr.bf16.mxu1 %v1011_v11  ;;  %910 = vmatprep.subr.bf16.mxu0 %v1012_v12  ;;  %v1018_v18 = vld [vmem:[%s1157_s11 + $0x58] sm:$0xff]   ;;  %v1021_v21 = vld [vmem:[%s1157_s11 + $0x60] sm:$0xff]   ;;  %v1024_v24 = vld [vmem:[%s1157_s11 + $0x68] sm:$0xff]  }
  0x2d   : > { %947 = vmatpush3.bf16.msra.mxu1 %v1011_v11  ;;  %v1019_v19 = vld [vmem:[%s1157_s11 + $0x18] sm:$0xff]   ;;  %v1023_v22 = vld [vmem:[%s1157_s11 + $0xa0] sm:$0xff]   ;;  %v1026_v25 = vld [vmem:[%s1157_s11 + $0xa8] sm:$0xff]  }
  0x2e   : > { %948 = vmatprep.subr.bf16.mxu1 %v1014_v14  ;;  %v1020_v20 = vld [vmem:[%s1157_s11 + $0x98] sm:$0xff]   ;;  %v1022_v23 = vld [vmem:[%s1157_s11 + $0x20] sm:$0xff]   ;;  %v1025_v26 = vld [vmem:[%s1157_s11 + $0x28] sm:$0xff]  }
  0x2f   : > { %911 = vmatpush3.bf16.msra.mxu0 %v1013_v13  ;;  %v1027_v27 = vld [vmem:[%s1157_s11 + $0x70] sm:$0xff]   ;;  %v1030_v30 = vld [vmem:[%s1157_s11 + $0x78] sm:$0xff]   ;;  %v346_v45 = vld [vmem:[#allocation2] sm:$0xff] }
  0x30   : > { %912 = vmatprep.subr.bf16.mxu0 %v1015_v15  ;;  %v1028_v28 = vld [vmem:[%s1157_s11 + $0x30] sm:$0xff]   ;;  %v1032_v31 = vld [vmem:[%s1157_s11 + $0xb8] sm:$0xff]   ;;  %v347_v50 = vld [vmem:[#allocation2 + $0x8] sm:$0xff] }
  0x31   : > { %949 = vmatpush3.bf16.msra.mxu1 %v1014_v14  ;;  %v1029_v29 = vld [vmem:[%s1157_s11 + $0xb0] sm:$0xff]   ;;  %v1031_v34 = vld [vmem:[%s1157_s11 + $0x38] sm:$0xff]   ;;  %v901_v4 = vld [vmem:[%s1228_s2] ss:$0 sm:$0xff] (!%p900_p11) }
  0x32   : > { %950 = vmatprep.subr.bf16.mxu1 %v1017_v17  ;;  %v1035_v32 = vld [vmem:[%s1159_s12 + $0x4] ss:$12 sps:$4 sm:$0xff]   ;;  %v1036_v33 = vld [vmem:[%s1159_s12 + $0x8] ss:$12 sps:$4 sm:$0xff]   ;;  %v1033_v35 = vld [vmem:[%s1159_s12] ss:$12 sps:$4 sm:$0xff]  }
  0x33   : > { %913 = vmatpush3.bf16.msra.mxu0 %v1016_v16  ;;  %614 = vmatprep.mubr.bf16.mxu0 %v1035_v32  ;;  %v1038_v36 = vld [vmem:[%s1159_s12 + $0x1c] ss:$12 sps:$4 sm:$0xff]   ;;  %v1037_v37 = vld [vmem:[%s1159_s12 + $0x20] ss:$12 sps:$4 sm:$0xff]   ;;  %v1040_v38 = vld [vmem:[%s1159_s12 + $0x18] ss:$12 sps:$4 sm:$0xff]  }
  0x34   : > { %914 = vmatprep.subr.bf16.mxu0 %v1018_v18  ;;  %962 = vmatprep.mubr.bf16.mxu1 %v1036_v33  ;;  %v348_v59 = vld [vmem:[#allocation2 + $0x10] sm:$0xff]  ;;  %v349_v63 = vld [vmem:[#allocation2 + $0x18] sm:$0xff]  ;;  %v902_v5 = vld [vmem:[%s1229_s3] ss:$0 sm:$0xff] (!%p900_p11) }
  0x35   : > { %951 = vmatpush3.bf16.msra.mxu1 %v1017_v17 }
  0x36   : > { %952 = vmatprep.subr.bf16.mxu1 %v1020_v20 }
  0x37   : > { %915 = vmatpush3.bf16.msra.mxu0 %v1019_v19 }
  0x38   : > { %916 = vmatprep.subr.bf16.mxu0 %v1021_v21 }
  0x39   : > { %953 = vmatpush3.bf16.msra.mxu1 %v1020_v20 }
  0x3a   : > { %954 = vmatprep.subr.bf16.mxu1 %v1023_v22 }
  0x3b   : > { %917 = vmatpush3.bf16.msra.mxu0 %v1022_v23 }
  0x3c   : > { %918 = vmatprep.subr.bf16.mxu0 %v1024_v24 }
  0x3d   : > { %955 = vmatpush3.bf16.msra.mxu1 %v1023_v22 }
  0x3e   : > { %956 = vmatprep.subr.bf16.mxu1 %v1026_v25 }
  0x3f   : > { %919 = vmatpush3.bf16.msra.mxu0 %v1025_v26 }
  0x40   : > { %920 = vmatprep.subr.bf16.mxu0 %v1027_v27 }
  0x41   : > { %957 = vmatpush3.bf16.msra.mxu1 %v1026_v25 }
  0x42   : > { %958 = vmatprep.subr.bf16.mxu1 %v1029_v29 }
  0x43   : > { %921 = vmatpush3.bf16.msra.mxu0 %v1028_v28 }
  0x44   : > { %922 = vmatprep.subr.bf16.mxu0 %v1030_v30 }
  0x45   : > { %959 = vmatpush3.bf16.msra.mxu1 %v1029_v29 }
  0x46   : > { %960 = vmatprep.subr.bf16.mxu1 %v1032_v31 }
  0x47   : > { %923 = vmatpush3.bf16.msra.mxu0 %v1031_v34 }
  0x49   : > { %961 = vmatpush3.bf16.msra.mxu1 %v1032_v31 }
  0x4a   : > { %615 = vmatmul.mubr.bf16.vlgmr.msra.gmra.mrb[0].mxu0 %v1033_v35 }
  0x4b   : > { %622 = vmatprep.mubr.bf16.mxu0 %v1038_v36 }
  0x4c   : > { %963 = vmatmul.mubr.bf16.vlgmr.msra.gmra.mrb[0].mxu1 %v1037_v37 }
  0x52   : > { %623 = vmatmul.mubr.bf16.gmra.mrb[4].mxu0 %v1040_v38 }
 0x11d   : > { %v924_v39 = vpop.f32.mrb[0].mxu0 }
 0x11e   : > { %v925_v40 = vpop.f32.mrb[1].mxu0 }
 0x11f   : > { %v926_v41 = vadd.f32 %v925_v40, %v924_v39  ;;  %v927_v42 = vpop.f32.mrb[2].mxu0  ;;  %v964_v43 = vpop.f32.mrb[0].mxu1 }
 0x120   : > { %v928_v44 = vpop.f32.mrb[3].mxu0  ;;  %v665_v46 = vpop.f32.mrb[1].mxu1 }
 0x121   : > { %v929_v47 = vadd.f32 %v928_v44, %v927_v42  ;;  %v666_v48 = vadd.f32 %v926_v41, %v665_v46  ;;  %v965_v49 = vpop.f32.mrb[2].mxu1 }
 0x122   : > { %v668_v51 = vpop.f32.mrb[3].mxu1 }
 0x123   : > { %v680_v52 = vadd.f32 %v666_v48, %v346_v45  ;;  %v669_v53 = vadd.f32 %v929_v47, %v668_v51 }
 0x125   : > { %684 = vst [vmem:[#allocation2] sm:$0xff] %v680_v52  ;;  %v681_v54 = vadd.f32 %v669_v53, %v347_v50  ;;  %v930_v55 = vpop.f32.mrb[4].mxu0 }
 0x126   : > { %v931_v56 = vpop.f32.mrb[5].mxu0 }
 0x127   : > { %685 = vst [vmem:[#allocation2 + $0x8] sm:$0xff] %v681_v54  ;;  %v932_v57 = vadd.f32 %v931_v56, %v930_v55  ;;  %v933_v58 = vpop.f32.mrb[6].mxu0 }
 0x128   : > { %v934_v60 = vpop.f32.mrb[7].mxu0 }
 0x129   : > { %v674_v61 = vadd.f32 %v964_v43, %v932_v57  ;;  %v935_v62 = vadd.f32 %v934_v60, %v933_v58  ;;  %691 = sbr.rel (%p900_p11) target bundleno = 318 (0x13e), region = 70 }
 0x12b   : > { %v682_v0 = vadd.f32 %v674_v61, %v348_v59  ;;  %v677_v1 = vadd.f32 %v965_v49, %v935_v62 }
 0x12c   : > { %v692_v3 = vld [vmem:[#allocation2] sm:$0xff] (!%p900_p11) }
 0x12d   : > { %686 = vst [vmem:[#allocation2 + $0x10] sm:$0xff] %v682_v0  ;;  %v683_v2 = vadd.f32 %v677_v1, %v349_v63  ;;  %v703_v6 = vmul.f32 (!%p900_p11), %v901_v4, %v692_v3 }
 0x12e   : > { %v693_v7 = vld [vmem:[#allocation2 + $0x8] sm:$0xff] (!%p900_p11) }
 0x12f   : > { %687 = vst [vmem:[#allocation2 + $0x18] sm:$0xff] %v683_v2  ;;  %v704_v10 = vmul.f32 (!%p900_p11), %v901_v4, %v693_v7  ;;  %v714_v13 = vadd.f32 (!%p900_p11), %v902_v5, %v703_v6 }
 0x131   : > { %v715_v14 = vadd.f32 %v902_v5, %v704_v10  ;;  %v718_v17 = vmax.f32 %v714_v13, 0.0 }
 0x133   : > { %v719_v18 = vmax.f32 %v715_v14, 0.0  ;;  %722 = vst [vmem:[%s1230_s4] sm:$0xff] %v718_v17 }
 0x134   : > { %v694_v8 = vld [vmem:[#allocation2 + $0x10] sm:$0xff] }
 0x135   : > { %v705_v11 = vmul.f32 %v901_v4, %v694_v8  ;;  %723 = vst [vmem:[%s1230_s4 + $0x8] sm:$0xff] %v719_v18 }
 0x136   : > { %v695_v9 = vld [vmem:[#allocation2 + $0x18] sm:$0xff] }
 0x137   : > { %v706_v12 = vmul.f32 %v901_v4, %v695_v9  ;;  %v716_v15 = vadd.f32 %v902_v5, %v705_v11 }
 0x139   : > { %v717_v16 = vadd.f32 %v902_v5, %v706_v12  ;;  %v720_v19 = vmax.f32 %v716_v15, 0.0 }
 0x13b   : > { %v721_v20 = vmax.f32 %v717_v16, 0.0  ;;  %724 = vst [vmem:[%s1230_s4 + $0x10] sm:$0xff] %v720_v19 }
 0x13d   : > { %725 = vst [vmem:[%s1230_s4 + $0x18] sm:$0xff] %v721_v20 }
 0x13e PF: > { %s14_s19 = sadd.s32 1, %s1079_s19   ;;  %s1231_s15 = smov %s1067_s16 }
 0x13f   : > { %p11_p12 = scmp.ge.s32.totalorder %s14_s19, 5   ;;  %s1232_s16 = smov %s1142_s23 }
 0x140   : > { %s1233_s17 = smov %s1075_s18  ;;  %s1234_s18 = smov %s1236_s20 }
 0x141   :  { %13 = sbr.rel (!%p11_p12) target bundleno = 3 (0x3), region = 120 }

// kernel: resnet18_forward.31
= control target key start
LH: loop header
LB: loop body
LE: loop exit
PB: predicated region body
PF: predicated region fallthrough
CT: control target
= control target key end

     0   :  { %s1199_s18 = smov 0   ;;  %s1201_s19 = smov 0   ;;  %s1330_s0 = inlined_call_operand.vmem [shape: bf16[32,1152], index: 0, kind: input, shape index: {}]   ;;  %s1331_s1 = inlined_call_operand.vmem [shape: bf16[1152,128], index: 1, kind: input, shape index: {}]   ;;  %s1332_s2 = inlined_call_operand.vmem [shape: f32[1,128], index: 2, kind: input, shape index: {}]   ;;  %s1333_s3 = inlined_call_operand.vmem [shape: f32[1,128], index: 3, kind: input, shape index: {}]   ;;  %s1334_s4 = inlined_call_operand.vmem [shape: f32[32,128], index: 4, kind: input, shape index: {}]   ;;  %s1335_s5 = inlined_call_operand.vmem [shape: f32[32,128], index: 5, kind: output, shape index: {}]  }
   0x1   :  { %s1203_s20 = smov 0   ;;  %s1205_s21 = smov 0  }
   0x2   :  { %s1207_s22 = smov 0  }
   0x3 LB: > { %s27_s23 = sadd.s32 1, %s1162_s21  ;;  %p50_p1 = scmp.ne.s32.totalorder %s1154_s19, %s1150_s18  ;;  %s1166_s22 = sphi %s1207_s22, %s15_s22   ;;  %s1162_s21 = sphi %s1205_s21, %s1339_s21   ;;  %s1158_s20 = sphi %s1203_s20, %s1338_s20   ;;  %s1154_s19 = sphi %s1201_s19, %s1337_s19   ;;  %s1150_s18 = sphi %s1199_s18, %s1336_s18  }
   0x4   : > { %p28_p0 = scmp.ge.s32.totalorder %s27_s23, 3  ;;  %p51_p2 = scmp.eq.s32.totalorder %s1166_s22, 0 }
   0x5   : > { %s43_s25 = sadd.s32 1, %s1154_s19  ;;  %p944_p5 = scmp.ge.s32.totalorder %s1166_s22, 3 }
   0x6   : > { %s1341_s23 = smov (%p28_p0, %s27_s23), 0  ;;  %p52_p3 = por %p51_p2, %p50_p1 }
   0x7   : > { %s39_s24 = ssub.s32 %s1162_s21, %s1341_s23  ;;  %236 = sbr.rel (%p944_p5) target bundleno = 23 (0x17), region = 28 }
   0x8   : > { %p41_p4 = scmp.eq.s32.totalorder %s39_s24, 0 }
   0xa   : > { %s1234_s26 = scalar_select %p41_p4, %s1154_s19, %s43_s25  }
   0xe   : > { %239 = sbr.rel (!%p52_p3) target bundleno = 23 (0x17), region = 32  ;;  %s241_s27 = sand.u32 (%p52_p3), 1, %s1154_s19  }
   0xf   : > { %s994_s28 = smul.u32 (%p52_p3), 12, %s1162_s21 }
  0x10   : > { %s1053_s29 = smul.u32 (%p52_p3), 48, %s241_s27 }
  0x11   : > { %s249_s7 = scalar_lea.vmem (%p52_p3), %s1330_s0, %s994_s28 }
  0x12   : > { %v264_v0 = vld [vmem:[%s249_s7] sm:$0xff] (%p52_p3)  ;;  %v268_v2 = vld [vmem:[%s249_s7 + $0x48] sm:$0xff] (%p52_p3)  ;;  %s243_s8 = scalar_lea.vmem (%p52_p3), [#allocation3], %s1053_s29  ;;  %v950_v6 = vld [vmem:[%s249_s7 + $0x50] sm:$0xf] (%p52_p3) }
  0x13   : > { %v266_v1 = vld [vmem:[%s249_s7 + $0x24] sm:$0xff] (%p52_p3)  ;;  %265 = vst [vmem:[%s243_s8] sm:$0xff] (%p52_p3), %v264_v0  ;;  %269 = vst [vmem:[%s243_s8 + $0x18] sm:$0xff] (%p52_p3), %v268_v2  ;;  %v270_v3 = vld [vmem:[%s249_s7 + $0x6c] sm:$0xff] (%p52_p3) }
  0x14   : > { %267 = vst [vmem:[%s243_s8 + $0xc] sm:$0xff] (%p52_p3), %v266_v1  ;;  %v946_v4 = vld [vmem:[%s249_s7 + $0x8] sm:$0xf] (%p52_p3)  ;;  %v948_v5 = vld [vmem:[%s249_s7 + $0x2c] sm:$0xf] (%p52_p3)  ;;  %271 = vst [vmem:[%s243_s8 + $0x24] sm:$0xff] (%p52_p3), %v270_v3 }
  0x15   : > { %947 = vst [vmem:[%s243_s8 + $0x8] sm:$0xf] %v946_v4  ;;  %949 = vst [vmem:[%s243_s8 + $0x14] sm:$0xf] %v948_v5  ;;  %v952_v7 = vld [vmem:[%s249_s7 + $0x74] sm:$0xf] }
  0x16   : > { %951 = vst [vmem:[%s243_s8 + $0x20] sm:$0xf] %v950_v6  ;;  %953 = vst [vmem:[%s243_s8 + $0x2c] sm:$0xf] %v952_v7 }
  0x17 PF: > { %p954_p6 = scmp.ge.s32.totalorder %s1166_s22, 1  ;;  %p303_p7 = scmp.lt.s32.totalorder %s1166_s22, 4 }
  0x19   : > { %p304_p8 = pnand %p954_p6, %p303_p7 }
  0x1a   : > { %s310_s9 = sand.u32 (!%p304_p8), 1, %s1150_s18   ;;  %s364_s10 = smul.u32 (!%p304_p8), 48, %s1158_s20 }
  0x1b   : > { %307 = sbr.rel (%p304_p8) target bundleno = 320 (0x140), region = 62  ;;  %p956_p10 = scmp.ne.s32.totalorder (!%p304_p8), %s1158_s20, 0 }
  0x1c   : > { %s1054_s11 = smul.u32 (!%p304_p8), 48, %s310_s9  ;;  %p365_p9 = scmp.lt.s32.totalorder (!%p304_p8), %s364_s10, 143 }
  0x1e   : > { %s1251_s16 = scalar_lea.vmem (!%p304_p8), [#allocation3], %s1054_s11 }
  0x22   : > { %s1343_s10 = smov (!%p365_p9, %s364_s10), 143  ;;  %401 = sbr.rel (%p956_p10) target bundleno = 41 (0x29), region = 70 }
  0x23   : > { %s955_s12 = sshll.u32 %s1343_s10, 2  ;;  %v1168_v8 = vmov (!%p956_p10), 0.0  }
  0x24   : > { %s1249_s15 = scalar_lea.vmem %s1331_s1, %s955_s12  ;;  %402 = vst [vmem:[#allocation2] sm:$0xff] (!%p956_p10), %v1168_v8  ;;  %403 = vst [vmem:[#allocation2 + $0x8] sm:$0xff] (!%p956_p10), %v1168_v8 }
  0x25   : > { %404 = vst [vmem:[#allocation2 + $0x10] sm:$0xff] (!%p956_p10), %v1168_v8  ;;  %405 = vst [vmem:[#allocation2 + $0x18] sm:$0xff] (!%p956_p10), %v1168_v8 }
  0x29 PF: > { %v1096_v9 = vld [vmem:[%s1249_s15 + $0x40] sm:$0xff]   ;;  %v1099_v12 = vld [vmem:[%s1249_s15 + $0x48] sm:$0xff]   ;;  %v1102_v15 = vld [vmem:[%s1249_s15 + $0x50] sm:$0xff]   ;;  %p987_p11 = scmp.ne.s32.totalorder %s1158_s20, 2 }
  0x2a   : > { %v1097_v10 = vld [vmem:[%s1249_s15] sm:$0xff]   ;;  %995 = vmatprep.subr.bf16.mxu0 %v1096_v9  ;;  %v1100_v13 = vld [vmem:[%s1249_s15 + $0x8] sm:$0xff]   ;;  %v1103_v16 = vld [vmem:[%s1249_s15 + $0x10] sm:$0xff]  }
  0x2b   : > { %v1098_v11 = vld [vmem:[%s1249_s15 + $0x80] sm:$0xff]   ;;  %996 = vmatpush3.bf16.msra.mxu0 %v1097_v10  ;;  %v1101_v14 = vld [vmem:[%s1249_s15 + $0x88] sm:$0xff]   ;;  %v1104_v17 = vld [vmem:[%s1249_s15 + $0x90] sm:$0xff]  }
  0x2c   : > { %1033 = vmatprep.subr.bf16.mxu1 %v1098_v11  ;;  %997 = vmatprep.subr.bf16.mxu0 %v1099_v12  ;;  %v1105_v18 = vld [vmem:[%s1249_s15 + $0x58] sm:$0xff]   ;;  %v1108_v21 = vld [vmem:[%s1249_s15 + $0x60] sm:$0xff]   ;;  %v1111_v24 = vld [vmem:[%s1249_s15 + $0x68] sm:$0xff]  }
  0x2d   : > { %1034 = vmatpush3.bf16.msra.mxu1 %v1098_v11  ;;  %v1106_v19 = vld [vmem:[%s1249_s15 + $0x18] sm:$0xff]   ;;  %v1110_v22 = vld [vmem:[%s1249_s15 + $0xa0] sm:$0xff]   ;;  %v1113_v25 = vld [vmem:[%s1249_s15 + $0xa8] sm:$0xff]  }
  0x2e   : > { %1035 = vmatprep.subr.bf16.mxu1 %v1101_v14  ;;  %v1107_v20 = vld [vmem:[%s1249_s15 + $0x98] sm:$0xff]   ;;  %v1109_v23 = vld [vmem:[%s1249_s15 + $0x20] sm:$0xff]   ;;  %v1112_v26 = vld [vmem:[%s1249_s15 + $0x28] sm:$0xff]  }
  0x2f   : > { %998 = vmatpush3.bf16.msra.mxu0 %v1100_v13  ;;  %v1114_v27 = vld [vmem:[%s1249_s15 + $0x70] sm:$0xff]   ;;  %v1117_v30 = vld [vmem:[%s1249_s15 + $0x78] sm:$0xff]   ;;  %v406_v45 = vld [vmem:[#allocation2] sm:$0xff] }
  0x30   : > { %999 = vmatprep.subr.bf16.mxu0 %v1102_v15  ;;  %v1115_v28 = vld [vmem:[%s1249_s15 + $0x30] sm:$0xff]   ;;  %v1119_v31 = vld [vmem:[%s1249_s15 + $0xb8] sm:$0xff]   ;;  %v407_v50 = vld [vmem:[#allocation2 + $0x8] sm:$0xff] }
  0x31   : > { %1036 = vmatpush3.bf16.msra.mxu1 %v1101_v14  ;;  %v1116_v29 = vld [vmem:[%s1249_s15 + $0xb0] sm:$0xff]   ;;  %v1118_v34 = vld [vmem:[%s1249_s15 + $0x38] sm:$0xff]   ;;  %v988_v4 = vld [vmem:[%s1332_s2] ss:$0 sm:$0xff] (!%p987_p11) }
  0x32   : > { %1037 = vmatprep.subr.bf16.mxu1 %v1104_v17  ;;  %v1122_v32 = vld [vmem:[%s1251_s16 + $0x4] ss:$12 sps:$4 sm:$0xff]   ;;  %v1123_v33 = vld [vmem:[%s1251_s16 + $0x8] ss:$12 sps:$4 sm:$0xff]   ;;  %v1120_v35 = vld [vmem:[%s1251_s16] ss:$12 sps:$4 sm:$0xff]  }
  0x33   : > { %1000 = vmatpush3.bf16.msra.mxu0 %v1103_v16  ;;  %674 = vmatprep.mubr.bf16.mxu0 %v1122_v32  ;;  %v1125_v36 = vld [vmem:[%s1251_s16 + $0x1c] ss:$12 sps:$4 sm:$0xff]   ;;  %v1124_v37 = vld [vmem:[%s1251_s16 + $0x20] ss:$12 sps:$4 sm:$0xff]   ;;  %v1127_v38 = vld [vmem:[%s1251_s16 + $0x18] ss:$12 sps:$4 sm:$0xff]  }
  0x34   : > { %1001 = vmatprep.subr.bf16.mxu0 %v1105_v18  ;;  %1049 = vmatprep.mubr.bf16.mxu1 %v1123_v33  ;;  %v408_v59 = vld [vmem:[#allocation2 + $0x10] sm:$0xff]  ;;  %v409_v63 = vld [vmem:[#allocation2 + $0x18] sm:$0xff]  ;;  %v989_v5 = vld [vmem:[%s1333_s3] ss:$0 sm:$0xff] (!%p987_p11) }
  0x35   : > { %1038 = vmatpush3.bf16.msra.mxu1 %v1104_v17  ;;  %v778_v8 = vld [vmem:[%s1334_s4] sm:$0xff] (!%p987_p11)  ;;  %v779_v13 = vld [vmem:[%s1334_s4 + $0x8] sm:$0xff] (!%p987_p11)  ;;  %v780_v17 = vld [vmem:[%s1334_s4 + $0x10] sm:$0xff] (!%p987_p11) }
  0x36   : > { %1039 = vmatprep.subr.bf16.mxu1 %v1107_v20  ;;  %v781_v18 = vld [vmem:[%s1334_s4 + $0x18] sm:$0xff] (!%p987_p11) }
  0x37   : > { %1002 = vmatpush3.bf16.msra.mxu0 %v1106_v19 }
  0x38   : > { %1003 = vmatprep.subr.bf16.mxu0 %v1108_v21 }
  0x39   : > { %1040 = vmatpush3.bf16.msra.mxu1 %v1107_v20 }
  0x3a   : > { %1041 = vmatprep.subr.bf16.mxu1 %v1110_v22 }
  0x3b   : > { %1004 = vmatpush3.bf16.msra.mxu0 %v1109_v23 }
  0x3c   : > { %1005 = vmatprep.subr.bf16.mxu0 %v1111_v24 }
  0x3d   : > { %1042 = vmatpush3.bf16.msra.mxu1 %v1110_v22 }
  0x3e   : > { %1043 = vmatprep.subr.bf16.mxu1 %v1113_v25 }
  0x3f   : > { %1006 = vmatpush3.bf16.msra.mxu0 %v1112_v26 }
  0x40   : > { %1007 = vmatprep.subr.bf16.mxu0 %v1114_v27 }
  0x41   : > { %1044 = vmatpush3.bf16.msra.mxu1 %v1113_v25 }
  0x42   : > { %1045 = vmatprep.subr.bf16.mxu1 %v1116_v29 }
  0x43   : > { %1008 = vmatpush3.bf16.msra.mxu0 %v1115_v28 }
  0x44   : > { %1009 = vmatprep.subr.bf16.mxu0 %v1117_v30 }
  0x45   : > { %1046 = vmatpush3.bf16.msra.mxu1 %v1116_v29 }
  0x46   : > { %1047 = vmatprep.subr.bf16.mxu1 %v1119_v31 }
  0x47   : > { %1010 = vmatpush3.bf16.msra.mxu0 %v1118_v34 }
  0x49   : > { %1048 = vmatpush3.bf16.msra.mxu1 %v1119_v31 }
  0x4a   : > { %675 = vmatmul.mubr.bf16.vlgmr.msra.gmra.mrb[0].mxu0 %v1120_v35 }
  0x4b   : > { %682 = vmatprep.mubr.bf16.mxu0 %v1125_v36 }
  0x4c   : > { %1050 = vmatmul.mubr.bf16.vlgmr.msra.gmra.mrb[0].mxu1 %v1124_v37 }
  0x52   : > { %683 = vmatmul.mubr.bf16.gmra.mrb[4].mxu0 %v1127_v38 }
 0x11d   : > { %v1011_v39 = vpop.f32.mrb[0].mxu0 }
 0x11e   : > { %v1012_v40 = vpop.f32.mrb[1].mxu0 }
 0x11f   : > { %v1013_v41 = vadd.f32 %v1012_v40, %v1011_v39  ;;  %v1014_v42 = vpop.f32.mrb[2].mxu0  ;;  %v1051_v43 = vpop.f32.mrb[0].mxu1 }
 0x120   : > { %v1015_v44 = vpop.f32.mrb[3].mxu0  ;;  %v725_v46 = vpop.f32.mrb[1].mxu1 }
 0x121   : > { %v1016_v47 = vadd.f32 %v1015_v44, %v1014_v42  ;;  %v726_v48 = vadd.f32 %v1013_v41, %v725_v46  ;;  %v1052_v49 = vpop.f32.mrb[2].mxu1 }
 0x122   : > { %v728_v51 = vpop.f32.mrb[3].mxu1 }
 0x123   : > { %v740_v52 = vadd.f32 %v726_v48, %v406_v45  ;;  %v729_v53 = vadd.f32 %v1016_v47, %v728_v51 }
 0x125   : > { %744 = vst [vmem:[#allocation2] sm:$0xff] %v740_v52  ;;  %v741_v54 = vadd.f32 %v729_v53, %v407_v50  ;;  %v1017_v55 = vpop.f32.mrb[4].mxu0 }
 0x126   : > { %v1018_v56 = vpop.f32.mrb[5].mxu0 }
 0x127   : > { %745 = vst [vmem:[#allocation2 + $0x8] sm:$0xff] %v741_v54  ;;  %v1019_v57 = vadd.f32 %v1018_v56, %v1017_v55  ;;  %v1020_v58 = vpop.f32.mrb[6].mxu0 }
 0x128   : > { %v1021_v60 = vpop.f32.mrb[7].mxu0 }
 0x129   : > { %v734_v61 = vadd.f32 %v1051_v43, %v1019_v57  ;;  %v1022_v62 = vadd.f32 %v1021_v60, %v1020_v58  ;;  %751 = sbr.rel (%p987_p11) target bundleno = 320 (0x140), region = 74 }
 0x12b   : > { %v742_v0 = vadd.f32 %v734_v61, %v408_v59  ;;  %v737_v1 = vadd.f32 %v1052_v49, %v1022_v62 }
 0x12c   : > { %v752_v3 = vld [vmem:[#allocation2] sm:$0xff] (!%p987_p11) }
 0x12d   : > { %746 = vst [vmem:[#allocation2 + $0x10] sm:$0xff] %v742_v0  ;;  %v743_v2 = vadd.f32 %v737_v1, %v409_v63  ;;  %v763_v6 = vmul.f32 (!%p987_p11), %v988_v4, %v752_v3 }
 0x12e   : > { %v753_v7 = vld [vmem:[#allocation2 + $0x8] sm:$0xff] (!%p987_p11) }
 0x12f   : > { %747 = vst [vmem:[#allocation2 + $0x18] sm:$0xff] %v743_v2  ;;  %v764_v9 = vmul.f32 (!%p987_p11), %v988_v4, %v753_v7  ;;  %v774_v12 = vadd.f32 (!%p987_p11), %v989_v5, %v763_v6 }
 0x131   : > { %v775_v16 = vadd.f32 %v989_v5, %v764_v9  ;;  %v782_v19 = vadd.f32 %v778_v8, %v774_v12 }
 0x133   : > { %v783_v22 = vadd.f32 %v779_v13, %v775_v16  ;;  %v786_v23 = vmax.f32 %v782_v19, 0.0 }
 0x134   : > { %v754_v10 = vld [vmem:[#allocation2 + $0x10] sm:$0xff] }
 0x135   : > { %v765_v14 = vmul.f32 %v988_v4, %v754_v10  ;;  %v787_v26 = vmax.f32 %v783_v22, 0.0  ;;  %790 = vst [vmem:[%s1335_s5] sm:$0xff] %v786_v23 }
 0x136   : > { %v755_v11 = vld [vmem:[#allocation2 + $0x18] sm:$0xff] }
 0x137   : > { %v766_v15 = vmul.f32 %v988_v4, %v755_v11  ;;  %v776_v20 = vadd.f32 %v989_v5, %v765_v14  ;;  %791 = vst [vmem:[%s1335_s5 + $0x8] sm:$0xff] %v787_v26 }
 0x139   : > { %v777_v21 = vadd.f32 %v989_v5, %v766_v15  ;;  %v784_v24 = vadd.f32 %v780_v17, %v776_v20 }
 0x13b   : > { %v785_v25 = vadd.f32 %v781_v18, %v777_v21  ;;  %v788_v27 = vmax.f32 %v784_v24, 0.0 }
 0x13d   : > { %v789_v28 = vmax.f32 %v785_v25, 0.0  ;;  %792 = vst [vmem:[%s1335_s5 + $0x10] sm:$0xff] %v788_v27 }
 0x13f   : > { %793 = vst [vmem:[%s1335_s5 + $0x18] sm:$0xff] %v789_v28 }
 0x140 PF: > { %s15_s22 = sadd.s32 1, %s1166_s22   ;;  %s1336_s18 = smov %s1154_s19 }
 0x141   : > { %p12_p12 = scmp.ge.s32.totalorder %s15_s22, 5   ;;  %s1337_s19 = smov %s1234_s26 }
 0x142   : > { %s1338_s20 = smov %s1162_s21  ;;  %s1339_s21 = smov %s1341_s23 }
 0x143   :  { %14 = sbr.rel (!%p12_p12) target bundleno = 3 (0x3), region = 127 }

// kernel: resnet18_forward.34
= control target key start
LH: loop header
LB: loop body
LE: loop exit
PB: predicated region body
PF: predicated region fallthrough
CT: control target
= control target key end

     0   :  { %s1105_s15 = smov 0   ;;  %s1107_s16 = smov 0   ;;  %s1210_s0 = inlined_call_operand.vmem [shape: bf16[8,1152], index: 0, kind: input, shape index: {}]   ;;  %s1211_s1 = inlined_call_operand.vmem [shape: bf16[1152,256], index: 1, kind: input, shape index: {}]   ;;  %s1212_s2 = inlined_call_operand.vmem [shape: f32[1,256], index: 2, kind: input, shape index: {}]   ;;  %s1213_s3 = inlined_call_operand.vmem [shape: f32[1,256], index: 3, kind: input, shape index: {}]   ;;  %s1214_s4 = inlined_call_operand.vmem [shape: f32[8,256], index: 4, kind: output, shape index: {}]  }
   0x1   :  { %s1109_s17 = smov 0  }
   0x2 LB: > { %s26_s18 = sadd.s32 1, %s1072_s16  ;;  %p891_p0 = scmp.ge.s32.totalorder %s1076_s17, 1  ;;  %s1076_s17 = sphi %s1109_s17, %s14_s17   ;;  %s1072_s16 = sphi %s1107_s16, %s1216_s16   ;;  %s1068_s15 = sphi %s1105_s15, %s1215_s15  }
   0x3   : > { %p27_p1 = scmp.ge.s32.totalorder %s26_s18, 3  ;;  %p229_p2 = scmp.lt.s32.totalorder %s1076_s17, 4 }
   0x5   : > { %s1218_s18 = smov (%p27_p1, %s26_s18), 0  ;;  %p230_p3 = pnand %p891_p0, %p229_p2 }
   0x6   : > { %s281_s19 = smul.u32 (!%p230_p3), 3, %s1068_s15  ;;  %p895_p6 = scmp.ne.s32.totalorder (!%p230_p3), %s1068_s15, 0 }
   0x7   : > { %233 = sbr.rel (%p230_p3) target bundleno = 321 (0x141), region = 36 }
   0x8   : > { %s291_s20 = smul.u32 (!%p230_p3), 48, %s1068_s15  ;;  %p284_p4 = scmp.lt.s32.totalorder (!%p230_p3), %s281_s19, 8 }
   0xa   : > { %p293_p5 = scmp.lt.s32.totalorder (!%p230_p3), %s291_s20, 143 }
   0xe   : > { %s1220_s19 = smov (!%p284_p4, %s281_s19), 8  ;;  %s1222_s20 = smov (!%p293_p5, %s291_s20), 143 }
   0xf   : > { %s892_s21 = sshll.u32 %s1220_s19, 2  ;;  %s952_s25 = sshll.u32 %s1222_s20, 3  ;;  %v1078_v0 = vmov (!%p895_p6), 0.0  }
  0x10   : > { %s1130_s24 = scalar_lea.vmem %s1210_s0, %s892_s21  ;;  %s1135_s28 = scalar_lea.vmem %s1211_s1, %s952_s25  ;;  %328 = vst [vmem:[#allocation2] sm:$0xff] (!%p895_p6), %v1078_v0  ;;  %329 = vst [vmem:[#allocation2 + $0x8] sm:$0xff] (!%p895_p6), %v1078_v0 }
  0x11   : > { %327 = sbr.rel (%p895_p6) target bundleno = 24 (0x18), region = 40 }
  0x18 PF: > { %v979_v1 = vld [vmem:[%s1135_s28 + $0x4] ss:$8 sps:$4 sm:$0xff]   ;;  %v981_v2 = vld [vmem:[%s1135_s28] ss:$8 sps:$4 sm:$0xff]   ;;  %v1079_v3 = vmov 0   ;;  %p947_p7 = scmp.ne.s32.totalorder %s1068_s15, 2 }
  0x19   : > { %706 = vmatprep.mubr.bf16.mxu1 %v1079_v3  ;;  %633 = vmatprep.subr.bf16.mxu0 %v979_v1  ;;  %v982_v4 = vld [vmem:[%s1135_s28 + $0x14] ss:$8 sps:$4 sm:$0xff]   ;;  %v984_v5 = vld [vmem:[%s1135_s28 + $0x10] ss:$8 sps:$4 sm:$0xff]   ;;  %v985_v6 = vld [vmem:[%s1135_s28 + $0x24] ss:$8 sps:$4 sm:$0xff]  }
  0x1a   : > { %634 = vmatpush1.bf16.msra.mxu0 %v981_v2  ;;  %v987_v7 = vld [vmem:[%s1135_s28 + $0x20] ss:$8 sps:$4 sm:$0xff]   ;;  %v988_v8 = vld [vmem:[%s1135_s28 + $0x34] ss:$8 sps:$4 sm:$0xff]   ;;  %v990_v9 = vld [vmem:[%s1135_s28 + $0x30] ss:$8 sps:$4 sm:$0xff]  }
  0x1b   : > { %635 = vmatprep.subr.bf16.mxu0 %v982_v4  ;;  %v1003_v10 = vld [vmem:[%s1135_s28 + $0x104] ss:$8 sps:$4 sm:$0xff]   ;;  %v1005_v11 = vld [vmem:[%s1135_s28 + $0x100] ss:$8 sps:$4 sm:$0xff]   ;;  %v1009_v13 = vld [vmem:[%s1135_s28 + $0x114] ss:$8 sps:$4 sm:$0xff]   ;;  %v727_v4 = vlaneseq (!%p947_p7) }
  0x1c   : > { %v991_v12 = vld [vmem:[%s1135_s28 + $0x44] ss:$8 sps:$4 sm:$0xff]   ;;  %674 = vmatprep.subr.bf16.mxu1 %v1003_v10  ;;  %v1011_v14 = vld [vmem:[%s1135_s28 + $0x110] ss:$8 sps:$4 sm:$0xff]   ;;  %v993_v15 = vld [vmem:[%s1135_s28 + $0x40] ss:$8 sps:$4 sm:$0xff]  }
  0x1d   : > { %675 = vmatpush1.bf16.msra.mxu1 %v1005_v11  ;;  %v994_v16 = vld [vmem:[%s1135_s28 + $0x54] ss:$8 sps:$4 sm:$0xff]   ;;  %v1015_v17 = vld [vmem:[%s1135_s28 + $0x124] ss:$8 sps:$4 sm:$0xff]   ;;  %v1017_v18 = vld [vmem:[%s1135_s28 + $0x120] ss:$8 sps:$4 sm:$0xff]  }
  0x1e   : > { %636 = vmatpush1.bf16.msra.mxu0 %v984_v5  ;;  %676 = vmatprep.subr.bf16.mxu1 %v1009_v13  ;;  %v996_v19 = vld [vmem:[%s1135_s28 + $0x50] ss:$8 sps:$4 sm:$0xff]   ;;  %v1021_v20 = vld [vmem:[%s1135_s28 + $0x134] ss:$8 sps:$4 sm:$0xff]   ;;  %v997_v21 = vld [vmem:[%s1135_s28 + $0x64] ss:$8 sps:$4 sm:$0xff]  }
  0x1f   : > { %637 = vmatprep.subr.bf16.mxu0 %v985_v6  ;;  %v1023_v22 = vld [vmem:[%s1135_s28 + $0x130] ss:$8 sps:$4 sm:$0xff]   ;;  %v999_v23 = vld [vmem:[%s1135_s28 + $0x60] ss:$8 sps:$4 sm:$0xff]   ;;  %v1027_v24 = vld [vmem:[%s1135_s28 + $0x144] ss:$8 sps:$4 sm:$0xff]  }
  0x20   : > { %v1000_v25 = vld [vmem:[%s1135_s28 + $0x74] ss:$8 sps:$4 sm:$0xff]   ;;  %v1029_v26 = vld [vmem:[%s1135_s28 + $0x140] ss:$8 sps:$4 sm:$0xff]   ;;  %v1002_v27 = vld [vmem:[%s1135_s28 + $0x70] ss:$8 sps:$4 sm:$0xff]  }
  0x21   : > { %677 = vmatpush1.bf16.msra.mxu1 %v1011_v14  ;;  %v1033_v28 = vld [vmem:[%s1135_s28 + $0x154] ss:$8 sps:$4 sm:$0xff]   ;;  %v1006_v29 = vld [vmem:[%s1135_s28 + $0x84] ss:$8 sps:$4 sm:$0xff]   ;;  %v1035_v30 = vld [vmem:[%s1135_s28 + $0x150] ss:$8 sps:$4 sm:$0xff]  }
  0x22   : > { %638 = vmatpush1.bf16.msra.mxu0 %v987_v7  ;;  %678 = vmatprep.subr.bf16.mxu1 %v1015_v17  ;;  %v1008_v31 = vld [vmem:[%s1135_s28 + $0x80] ss:$8 sps:$4 sm:$0xff]   ;;  %v1039_v32 = vld [vmem:[%s1135_s28 + $0x164] ss:$8 sps:$4 sm:$0xff]   ;;  %v1012_v33 = vld [vmem:[%s1135_s28 + $0x94] ss:$8 sps:$4 sm:$0xff]  }
  0x23   : > { %639 = vmatprep.subr.bf16.mxu0 %v988_v8  ;;  %v332_v34 = vld [vmem:[%s1130_s24] sm:$0xff]  ;;  %v1014_v37 = vld [vmem:[%s1135_s28 + $0x90] ss:$8 sps:$4 sm:$0xff]   ;;  %v1045_v38 = vld [vmem:[%s1135_s28 + $0x174] ss:$8 sps:$4 sm:$0xff]   ;;  %v728_v5 = vshrl.u32 (!%p947_p7), %v727_v4, 7 }
  0x24   : > { %v897_v35 = vcombine.high %v332_v34, %v332_v34  ;;  %v1041_v36 = vld [vmem:[%s1135_s28 + $0x160] ss:$8 sps:$4 sm:$0xff]   ;;  %v1018_v39 = vld [vmem:[%s1135_s28 + $0xa4] ss:$8 sps:$4 sm:$0xff]   ;;  %v1047_v40 = vld [vmem:[%s1135_s28 + $0x170] ss:$8 sps:$4 sm:$0xff]   ;;  %v896_v53 = vcombine.low %v332_v34, %v332_v34 }
  0x25   : > { %679 = vmatpush1.bf16.msra.mxu1 %v1017_v18  ;;  %v1020_v41 = vld [vmem:[%s1135_s28 + $0xa0] ss:$8 sps:$4 sm:$0xff]   ;;  %v1024_v42 = vld [vmem:[%s1135_s28 + $0xb4] ss:$8 sps:$4 sm:$0xff]   ;;  %v1026_v44 = vld [vmem:[%s1135_s28 + $0xb0] ss:$8 sps:$4 sm:$0xff]  }
  0x26   : > { %640 = vmatpush1.bf16.msra.mxu0 %v990_v9  ;;  %680 = vmatprep.subr.bf16.mxu1 %v1021_v20  ;;  %v1051_v43 = vld [vmem:[%s1130_s24 + $0x8] ss:$0 sps:$4 sm:$0xff]   ;;  %v1030_v45 = vld [vmem:[%s1135_s28 + $0xc4] ss:$8 sps:$4 sm:$0xff]   ;;  %v1036_v47 = vld [vmem:[%s1135_s28 + $0xd4] ss:$8 sps:$4 sm:$0xff]  }
  0x27   : > { %641 = vmatprep.subr.bf16.mxu0 %v991_v12  ;;  %665 = vmatprep.mubr.bf16.mxu0 %v897_v35  ;;  %v1032_v46 = vld [vmem:[%s1135_s28 + $0xc0] ss:$8 sps:$4 sm:$0xff]   ;;  %v1038_v48 = vld [vmem:[%s1135_s28 + $0xd0] ss:$8 sps:$4 sm:$0xff]   ;;  %v1042_v49 = vld [vmem:[%s1135_s28 + $0xe4] ss:$8 sps:$4 sm:$0xff]  }
  0x28   : > { %v1044_v50 = vld [vmem:[%s1135_s28 + $0xe0] ss:$8 sps:$4 sm:$0xff]   ;;  %v1048_v51 = vld [vmem:[%s1135_s28 + $0xf4] ss:$8 sps:$4 sm:$0xff]   ;;  %v1050_v52 = vld [vmem:[%s1135_s28 + $0xf0] ss:$8 sps:$4 sm:$0xff]  }
  0x29   : > { %681 = vmatpush1.bf16.msra.mxu1 %v1023_v22  ;;  %v330_v58 = vld [vmem:[#allocation2] sm:$0xff]  ;;  %v331_v61 = vld [vmem:[#allocation2 + $0x8] sm:$0xff]  ;;  %v729_v8 = vsub.s32 (!%p947_p7), 0, %v728_v5  ;;  %v733_v9 = vsub.s32 (!%p947_p7), 1, %v728_v5 }
  0x2a   : > { %642 = vmatpush1.bf16.msra.mxu0 %v993_v15  ;;  %682 = vmatprep.subr.bf16.mxu1 %v1027_v24  ;;  %v725_v6 = vld [vmem:[%s1212_s2] sm:$0x3] (!%p947_p7) }
  0x2b   : > { %643 = vmatprep.subr.bf16.mxu0 %v994_v16  ;;  %v739_v7 = vld [vmem:[%s1213_s3] sm:$0x3] (!%p947_p7)  ;;  %v730_v12 = vrot.slane (!%p947_p7), %v725_v6, %v729_v8  ;;  %v734_v14 = vrot.slane (!%p947_p7), %v725_v6, %v733_v9 }
  0x2c   : > { %v744_v13 = vrot.slane (!%p947_p7), %v739_v7, %v729_v8  ;;  %v748_v15 = vrot.slane (!%p947_p7), %v739_v7, %v733_v9 }
  0x2d   : > { %683 = vmatpush1.bf16.msra.mxu1 %v1029_v26 }
  0x2e   : > { %644 = vmatpush1.bf16.msra.mxu0 %v996_v19  ;;  %684 = vmatprep.subr.bf16.mxu1 %v1033_v28 }
  0x2f   : > { %645 = vmatprep.subr.bf16.mxu0 %v997_v21 }
  0x31   : > { %685 = vmatpush1.bf16.msra.mxu1 %v1035_v30 }
  0x32   : > { %646 = vmatpush1.bf16.msra.mxu0 %v999_v23  ;;  %686 = vmatprep.subr.bf16.mxu1 %v1039_v32 }
  0x33   : > { %647 = vmatprep.subr.bf16.mxu0 %v1000_v25 }
  0x35   : > { %687 = vmatpush1.bf16.msra.mxu1 %v1041_v36 }
  0x36   : > { %648 = vmatpush1.bf16.msra.mxu0 %v1002_v27  ;;  %688 = vmatprep.subr.bf16.mxu1 %v1045_v38 }
  0x37   : > { %649 = vmatprep.subr.bf16.mxu0 %v1006_v29 }
  0x39   : > { %689 = vmatpush1.bf16.msra.mxu1 %v1047_v40 }
  0x3a   : > { %650 = vmatpush1.bf16.msra.mxu0 %v1008_v31 }
  0x3b   : > { %651 = vmatprep.subr.bf16.mxu0 %v1012_v33 }
  0x3c   : > { %707 = vmatmul.mubr.bf16.vlgmr.msra.gmra.mrb[0].mxu1 %v1051_v43 }
  0x3e   : > { %652 = vmatpush1.bf16.msra.mxu0 %v1014_v37 }
  0x3f   : > { %653 = vmatprep.subr.bf16.mxu0 %v1018_v39 }
  0x42   : > { %654 = vmatpush1.bf16.msra.mxu0 %v1020_v41 }
  0x43   : > { %655 = vmatprep.subr.bf16.mxu0 %v1024_v42 }
  0x46   : > { %656 = vmatpush1.bf16.msra.mxu0 %v1026_v44 }
  0x47   : > { %657 = vmatprep.subr.bf16.mxu0 %v1030_v45 }
  0x4a   : > { %658 = vmatpush1.bf16.msra.mxu0 %v1032_v46 }
  0x4b   : > { %659 = vmatprep.subr.bf16.mxu0 %v1036_v47 }
  0x4e   : > { %660 = vmatpush1.bf16.msra.mxu0 %v1038_v48 }
  0x4f   : > { %661 = vmatprep.subr.bf16.mxu0 %v1042_v49 }
  0x52   : > { %662 = vmatpush1.bf16.msra.mxu0 %v1044_v50 }
  0x53   : > { %663 = vmatprep.subr.bf16.mxu0 %v1048_v51 }
  0x56   : > { %664 = vmatpush1.bf16.msra.mxu0 %v1050_v52 }
  0x59   : > { %666 = vmatmul.mubr.bf16.vlgmr.msra.gmra.mrb[0].mxu0 %v896_v53 }
 0x10f   : > { %v708_v54 = vpop.f32.mrb[0].mxu1 }
 0x110   : > { %v710_v55 = vpop.f32.mrb[1].mxu1 }
 0x111   : > { %v712_v56 = vpop.f32.mrb[2].mxu1 }
 0x112   : > { %v713_v57 = vpop.f32.mrb[3].mxu1 }
 0x12c   : > { %v667_v59 = vpop.f32.mrb[0].mxu0  ;;  %722 = sbr.rel (%p947_p7) target bundleno = 321 (0x141), region = 44 }
 0x12d   : > { %v709_v60 = vadd.f32 %v708_v54, %v667_v59  ;;  %v669_v62 = vpop.f32.mrb[1].mxu0 }
 0x12e   : > { %v711_v63 = vadd.f32 %v710_v55, %v669_v62  ;;  %v671_v0 = vpop.f32.mrb[2].mxu0 }
 0x12f   : > { %v715_v1 = vadd.f32 %v709_v60, %v330_v58  ;;  %v672_v2 = vpop.f32.mrb[3].mxu0 }
 0x130   : > { %v716_v3 = vadd.f32 %v711_v63, %v331_v61 }
 0x131   : > { %717 = vst [vmem:[#allocation2] sm:$0xff] %v715_v1 }
 0x132   : > { %718 = vst [vmem:[#allocation2 + $0x8] sm:$0xff] %v716_v3 }
 0x138   : > { %v723_v10 = vld [vmem:[#allocation2] sm:$0xff] }
 0x139   : > { %v724_v11 = vld [vmem:[#allocation2 + $0x8] sm:$0xff]  ;;  %v737_v16 = vmul.f32 %v730_v12, %v723_v10 }
 0x13a   : > { %v738_v17 = vmul.f32 %v734_v14, %v724_v11 }
 0x13b   : > { %v751_v18 = vadd.f32 %v744_v13, %v737_v16 }
 0x13c   : > { %v752_v19 = vadd.f32 %v748_v15, %v738_v17 }
 0x13d   : > { %v753_v20 = vmax.f32 %v751_v18, 0.0 }
 0x13e   : > { %v754_v21 = vmax.f32 %v752_v19, 0.0 }
 0x13f   : > { %755 = vst [vmem:[%s1214_s4] sm:$0xff] %v753_v20 }
 0x140   : > { %756 = vst [vmem:[%s1214_s4 + $0x8] sm:$0xff] %v754_v21 }
 0x141 PF: > { %s14_s17 = sadd.s32 1, %s1076_s17   ;;  %s1215_s15 = smov %s1072_s16 }
 0x142   : > { %p11_p8 = scmp.ge.s32.totalorder %s14_s17, 5   ;;  %s1216_s16 = smov %s1218_s18 }
 0x144   :  { %13 = sbr.rel (!%p11_p8) target bundleno = 2 (0x2), region = 83 }

// kernel: resnet18_forward.35
= control target key start
LH: loop header
LB: loop body
LE: loop exit
PB: predicated region body
PF: predicated region fallthrough
CT: control target
= control target key end

     0   :  { %v248_v1 = vmov 0   ;;  %v175_v18 = vlaneseq  ;;  %s337_s1 = inlined_call_operand.vmem [shape: bf16[128,256], index: 1, kind: input, shape index: {}]   ;;  %s338_s0 = inlined_call_operand.vmem [shape: bf16[8,128], index: 0, kind: input, shape index: {}]   ;;  %s339_s2 = inlined_call_operand.vmem [shape: f32[1,256], index: 2, kind: input, shape index: {}]   ;;  %s340_s3 = inlined_call_operand.vmem [shape: f32[1,256], index: 3, kind: input, shape index: {}]   ;;  %s341_s4 = inlined_call_operand.vmem [shape: f32[8,256], index: 4, kind: output, shape index: {}]  }
   0x1   :  { %v224_v0 = vld [vmem:[%s337_s1 + $0x4] ss:$8 sps:$4 sm:$0xff]   ;;  %155 = vmatprep.mubr.bf16.mxu0 %v248_v1  ;;  %v226_v2 = vld [vmem:[%s337_s1] ss:$8 sps:$4 sm:$0xff]   ;;  %v227_v3 = vld [vmem:[%s337_s1 + $0x14] ss:$8 sps:$4 sm:$0xff]  }
   0x2   :  { %123 = vmatprep.subr.bf16.mxu0 %v224_v0  ;;  %v229_v4 = vld [vmem:[%s337_s1 + $0x10] ss:$8 sps:$4 sm:$0xff]   ;;  %v230_v5 = vld [vmem:[%s337_s1 + $0x24] ss:$8 sps:$4 sm:$0xff]   ;;  %v232_v6 = vld [vmem:[%s337_s1 + $0x20] ss:$8 sps:$4 sm:$0xff]  }
   0x3   :  { %124 = vmatpush1.bf16.msra.mxu0 %v226_v2  ;;  %v233_v7 = vld [vmem:[%s337_s1 + $0x34] ss:$8 sps:$4 sm:$0xff]   ;;  %v235_v8 = vld [vmem:[%s337_s1 + $0x30] ss:$8 sps:$4 sm:$0xff]   ;;  %v236_v9 = vld [vmem:[%s337_s1 + $0x44] ss:$8 sps:$4 sm:$0xff]  }
   0x4   :  { %125 = vmatprep.subr.bf16.mxu0 %v227_v3  ;;  %v238_v10 = vld [vmem:[%s337_s1 + $0x40] ss:$8 sps:$4 sm:$0xff]   ;;  %v239_v11 = vld [vmem:[%s337_s1 + $0x54] ss:$8 sps:$4 sm:$0xff]   ;;  %v241_v12 = vld [vmem:[%s337_s1 + $0x50] ss:$8 sps:$4 sm:$0xff]  }
   0x5   :  { %v242_v13 = vld [vmem:[%s337_s1 + $0x64] ss:$8 sps:$4 sm:$0xff]   ;;  %v244_v14 = vld [vmem:[%s337_s1 + $0x60] ss:$8 sps:$4 sm:$0xff]   ;;  %v245_v15 = vld [vmem:[%s337_s1 + $0x74] ss:$8 sps:$4 sm:$0xff]  }
   0x6   :  { %v247_v16 = vld [vmem:[%s337_s1 + $0x70] ss:$8 sps:$4 sm:$0xff]   ;;  %v26_v17 = vld [vmem:[%s338_s0] sm:$0xf]  ;;  %v176_v19 = vshrl.u32 %v175_v18, 7 }
   0x7   :  { %126 = vmatpush1.bf16.msra.mxu0 %v229_v4  ;;  %v173_v21 = vld [vmem:[%s339_s2] sm:$0x3] }
   0x8   :  { %127 = vmatprep.subr.bf16.mxu0 %v230_v5  ;;  %v177_v20 = vsub.s32 0, %v176_v19  ;;  %v181_v22 = vsub.s32 1, %v176_v19  ;;  %v187_v23 = vld [vmem:[%s340_s3] sm:$0x3] }
   0xa   :  { %v178_v24 = vrot.slane %v173_v21, %v177_v20  ;;  %v182_v25 = vrot.slane %v173_v21, %v181_v22  ;;  %v192_v26 = vrot.slane %v187_v23, %v177_v20  ;;  %v196_v28 = vrot.slane %v187_v23, %v181_v22 }
   0xb   :  { %128 = vmatpush1.bf16.msra.mxu0 %v232_v6 }
   0xc   :  { %129 = vmatprep.subr.bf16.mxu0 %v233_v7 }
   0xf   :  { %130 = vmatpush1.bf16.msra.mxu0 %v235_v8 }
  0x10   :  { %131 = vmatprep.subr.bf16.mxu0 %v236_v9 }
  0x13   :  { %132 = vmatpush1.bf16.msra.mxu0 %v238_v10 }
  0x14   :  { %133 = vmatprep.subr.bf16.mxu0 %v239_v11 }
  0x17   :  { %134 = vmatpush1.bf16.msra.mxu0 %v241_v12 }
  0x18   :  { %135 = vmatprep.subr.bf16.mxu0 %v242_v13 }
  0x1b   :  { %136 = vmatpush1.bf16.msra.mxu0 %v244_v14 }
  0x1c   :  { %137 = vmatprep.subr.bf16.mxu0 %v245_v15 }
  0x1f   :  { %138 = vmatpush1.bf16.msra.mxu0 %v247_v16 }
  0x22   :  { %156 = vmatmul.mubr.bf16.vlgmr.msra.gmra.mrb[0].mxu0 %v26_v17 }
  0xf5   :  { %v157_v27 = vpop.f32.mrb[0].mxu0 }
  0xf6   :  { %v185_v29 = vmul.f32 %v178_v24, %v157_v27  ;;  %v159_v30 = vpop.f32.mrb[1].mxu0 }
  0xf7   :  { %v186_v31 = vmul.f32 %v182_v25, %v159_v30  ;;  %v161_v32 = vpop.f32.mrb[2].mxu0 }
  0xf8   :  { %v199_v33 = vadd.f32 %v192_v26, %v185_v29  ;;  %v162_v34 = vpop.f32.mrb[3].mxu0 }
  0xf9   :  { %v200_v35 = vadd.f32 %v196_v28, %v186_v31 }
  0xfa   :  { %201 = vst [vmem:[%s341_s4] sm:$0xff] %v199_v33 }
  0xfb   :  { %202 = vst [vmem:[%s341_s4 + $0x8] sm:$0xff] %v200_v35 }

// kernel: resnet18_forward.36
= control target key start
LH: loop header
LB: loop body
LE: loop exit
PB: predicated region body
PF: predicated region fallthrough
CT: control target
= control target key end

     0   :  { %s1199_s18 = smov 0   ;;  %s1201_s19 = smov 0   ;;  %s1310_s0 = inlined_call_operand.vmem [shape: bf16[8,2304], index: 0, kind: input, shape index: {}]   ;;  %s1311_s1 = inlined_call_operand.vmem [shape: bf16[2304,256], index: 1, kind: input, shape index: {}]   ;;  %s1312_s2 = inlined_call_operand.vmem [shape: f32[1,256], index: 2, kind: input, shape index: {}]   ;;  %s1313_s3 = inlined_call_operand.vmem [shape: f32[1,256], index: 3, kind: input, shape index: {}]   ;;  %s1314_s4 = inlined_call_operand.vmem [shape: f32[8,256], index: 4, kind: input, shape index: {}]   ;;  %s1315_s5 = inlined_call_operand.vmem [shape: f32[8,256], index: 5, kind: output, shape index: {}]  }
   0x1   :  { %s1203_s20 = smov 0  }
   0x2 LB: > { %s27_s21 = sadd.s32 1, %s1161_s19  ;;  %p980_p0 = scmp.ge.s32.totalorder %s1165_s20, 1  ;;  %s1165_s20 = sphi %s1203_s20, %s15_s20   ;;  %s1161_s19 = sphi %s1201_s19, %s1317_s19   ;;  %s1157_s18 = sphi %s1199_s18, %s1316_s18  }
   0x3   : > { %p28_p1 = scmp.ge.s32.totalorder %s27_s21, 6  ;;  %p271_p2 = scmp.lt.s32.totalorder %s1165_s20, 7 }
   0x5   : > { %s1319_s21 = smov (%p28_p1, %s27_s21), 0  ;;  %p272_p3 = pnand %p980_p0, %p271_p2 }
   0x6   : > { %s334_s22 = smul.u32 (!%p272_p3), 3, %s1157_s18  ;;  %p984_p6 = scmp.ne.s32.totalorder (!%p272_p3), %s1157_s18, 0 }
   0x7   : > { %275 = sbr.rel (%p272_p3) target bundleno = 323 (0x143), region = 40 }
   0x8   : > { %s344_s23 = smul.u32 (!%p272_p3), 48, %s1157_s18  ;;  %p337_p4 = scmp.lt.s32.totalorder (!%p272_p3), %s334_s22, 17 }
   0xa   : > { %p346_p5 = scmp.lt.s32.totalorder (!%p272_p3), %s344_s23, 287 }
   0xe   : > { %s1321_s22 = smov (!%p337_p4, %s334_s22), 17  ;;  %s1323_s23 = smov (!%p346_p5, %s344_s23), 287 }
   0xf   : > { %s981_s24 = sshll.u32 %s1321_s22, 2  ;;  %s1041_s28 = sshll.u32 %s1323_s23, 3  ;;  %v1167_v0 = vmov (!%p984_p6), 0.0  }
  0x10   : > { %s1224_s27 = scalar_lea.vmem %s1310_s0, %s981_s24  ;;  %s1229_s6 = scalar_lea.vmem %s1311_s1, %s1041_s28  ;;  %391 = vst [vmem:[#allocation2] sm:$0xff] (!%p984_p6), %v1167_v0  ;;  %392 = vst [vmem:[#allocation2 + $0x8] sm:$0xff] (!%p984_p6), %v1167_v0 }
  0x11   : > { %390 = sbr.rel (%p984_p6) target bundleno = 24 (0x18), region = 44 }
  0x18 PF: > { %v1068_v1 = vld [vmem:[%s1229_s6 + $0x4] ss:$8 sps:$4 sm:$0xff]   ;;  %v1070_v2 = vld [vmem:[%s1229_s6] ss:$8 sps:$4 sm:$0xff]   ;;  %v1168_v3 = vmov 0   ;;  %p1036_p7 = scmp.ne.s32.totalorder %s1157_s18, 5 }
  0x19   : > { %769 = vmatprep.mubr.bf16.mxu1 %v1168_v3  ;;  %696 = vmatprep.subr.bf16.mxu0 %v1068_v1  ;;  %v1071_v4 = vld [vmem:[%s1229_s6 + $0x14] ss:$8 sps:$4 sm:$0xff]   ;;  %v1073_v5 = vld [vmem:[%s1229_s6 + $0x10] ss:$8 sps:$4 sm:$0xff]   ;;  %v1074_v6 = vld [vmem:[%s1229_s6 + $0x24] ss:$8 sps:$4 sm:$0xff]  }
  0x1a   : > { %697 = vmatpush1.bf16.msra.mxu0 %v1070_v2  ;;  %v1076_v7 = vld [vmem:[%s1229_s6 + $0x20] ss:$8 sps:$4 sm:$0xff]   ;;  %v1077_v8 = vld [vmem:[%s1229_s6 + $0x34] ss:$8 sps:$4 sm:$0xff]   ;;  %v1079_v9 = vld [vmem:[%s1229_s6 + $0x30] ss:$8 sps:$4 sm:$0xff]  }
  0x1b   : > { %698 = vmatprep.subr.bf16.mxu0 %v1071_v4  ;;  %v1092_v10 = vld [vmem:[%s1229_s6 + $0x104] ss:$8 sps:$4 sm:$0xff]   ;;  %v1094_v11 = vld [vmem:[%s1229_s6 + $0x100] ss:$8 sps:$4 sm:$0xff]   ;;  %v1098_v13 = vld [vmem:[%s1229_s6 + $0x114] ss:$8 sps:$4 sm:$0xff]   ;;  %v790_v4 = vlaneseq (!%p1036_p7) }
  0x1c   : > { %v1080_v12 = vld [vmem:[%s1229_s6 + $0x44] ss:$8 sps:$4 sm:$0xff]   ;;  %737 = vmatprep.subr.bf16.mxu1 %v1092_v10  ;;  %v1100_v14 = vld [vmem:[%s1229_s6 + $0x110] ss:$8 sps:$4 sm:$0xff]   ;;  %v1082_v15 = vld [vmem:[%s1229_s6 + $0x40] ss:$8 sps:$4 sm:$0xff]  }
  0x1d   : > { %738 = vmatpush1.bf16.msra.mxu1 %v1094_v11  ;;  %v1083_v16 = vld [vmem:[%s1229_s6 + $0x54] ss:$8 sps:$4 sm:$0xff]   ;;  %v1104_v17 = vld [vmem:[%s1229_s6 + $0x124] ss:$8 sps:$4 sm:$0xff]   ;;  %v1106_v18 = vld [vmem:[%s1229_s6 + $0x120] ss:$8 sps:$4 sm:$0xff]  }
  0x1e   : > { %699 = vmatpush1.bf16.msra.mxu0 %v1073_v5  ;;  %739 = vmatprep.subr.bf16.mxu1 %v1098_v13  ;;  %v1085_v19 = vld [vmem:[%s1229_s6 + $0x50] ss:$8 sps:$4 sm:$0xff]   ;;  %v1110_v20 = vld [vmem:[%s1229_s6 + $0x134] ss:$8 sps:$4 sm:$0xff]   ;;  %v1086_v21 = vld [vmem:[%s1229_s6 + $0x64] ss:$8 sps:$4 sm:$0xff]  }
  0x1f   : > { %700 = vmatprep.subr.bf16.mxu0 %v1074_v6  ;;  %v1112_v22 = vld [vmem:[%s1229_s6 + $0x130] ss:$8 sps:$4 sm:$0xff]   ;;  %v1088_v23 = vld [vmem:[%s1229_s6 + $0x60] ss:$8 sps:$4 sm:$0xff]   ;;  %v1116_v24 = vld [vmem:[%s1229_s6 + $0x144] ss:$8 sps:$4 sm:$0xff]  }
  0x20   : > { %v1089_v25 = vld [vmem:[%s1229_s6 + $0x74] ss:$8 sps:$4 sm:$0xff]   ;;  %v1118_v26 = vld [vmem:[%s1229_s6 + $0x140] ss:$8 sps:$4 sm:$0xff]   ;;  %v1091_v27 = vld [vmem:[%s1229_s6 + $0x70] ss:$8 sps:$4 sm:$0xff]  }
  0x21   : > { %740 = vmatpush1.bf16.msra.mxu1 %v1100_v14  ;;  %v1122_v28 = vld [vmem:[%s1229_s6 + $0x154] ss:$8 sps:$4 sm:$0xff]   ;;  %v1095_v29 = vld [vmem:[%s1229_s6 + $0x84] ss:$8 sps:$4 sm:$0xff]   ;;  %v1124_v30 = vld [vmem:[%s1229_s6 + $0x150] ss:$8 sps:$4 sm:$0xff]  }
  0x22   : > { %701 = vmatpush1.bf16.msra.mxu0 %v1076_v7  ;;  %741 = vmatprep.subr.bf16.mxu1 %v1104_v17  ;;  %v1097_v31 = vld [vmem:[%s1229_s6 + $0x80] ss:$8 sps:$4 sm:$0xff]   ;;  %v1128_v32 = vld [vmem:[%s1229_s6 + $0x164] ss:$8 sps:$4 sm:$0xff]   ;;  %v1101_v33 = vld [vmem:[%s1229_s6 + $0x94] ss:$8 sps:$4 sm:$0xff]  }
  0x23   : > { %702 = vmatprep.subr.bf16.mxu0 %v1077_v8  ;;  %v395_v34 = vld [vmem:[%s1224_s27] sm:$0xff]  ;;  %v1103_v37 = vld [vmem:[%s1229_s6 + $0x90] ss:$8 sps:$4 sm:$0xff]   ;;  %v1134_v38 = vld [vmem:[%s1229_s6 + $0x174] ss:$8 sps:$4 sm:$0xff]   ;;  %v791_v5 = vshrl.u32 (!%p1036_p7), %v790_v4, 7 }
  0x24   : > { %v986_v35 = vcombine.high %v395_v34, %v395_v34  ;;  %v1130_v36 = vld [vmem:[%s1229_s6 + $0x160] ss:$8 sps:$4 sm:$0xff]   ;;  %v1107_v39 = vld [vmem:[%s1229_s6 + $0xa4] ss:$8 sps:$4 sm:$0xff]   ;;  %v1136_v40 = vld [vmem:[%s1229_s6 + $0x170] ss:$8 sps:$4 sm:$0xff]   ;;  %v985_v53 = vcombine.low %v395_v34, %v395_v34 }
  0x25   : > { %742 = vmatpush1.bf16.msra.mxu1 %v1106_v18  ;;  %v1109_v41 = vld [vmem:[%s1229_s6 + $0xa0] ss:$8 sps:$4 sm:$0xff]   ;;  %v1113_v42 = vld [vmem:[%s1229_s6 + $0xb4] ss:$8 sps:$4 sm:$0xff]   ;;  %v1115_v44 = vld [vmem:[%s1229_s6 + $0xb0] ss:$8 sps:$4 sm:$0xff]  }
  0x26   : > { %703 = vmatpush1.bf16.msra.mxu0 %v1079_v9  ;;  %743 = vmatprep.subr.bf16.mxu1 %v1110_v20  ;;  %v1140_v43 = vld [vmem:[%s1224_s27 + $0x8] ss:$0 sps:$4 sm:$0xff]   ;;  %v1119_v45 = vld [vmem:[%s1229_s6 + $0xc4] ss:$8 sps:$4 sm:$0xff]   ;;  %v1125_v47 = vld [vmem:[%s1229_s6 + $0xd4] ss:$8 sps:$4 sm:$0xff]  }
  0x27   : > { %704 = vmatprep.subr.bf16.mxu0 %v1080_v12  ;;  %728 = vmatprep.mubr.bf16.mxu0 %v986_v35  ;;  %v1121_v46 = vld [vmem:[%s1229_s6 + $0xc0] ss:$8 sps:$4 sm:$0xff]   ;;  %v1127_v48 = vld [vmem:[%s1229_s6 + $0xd0] ss:$8 sps:$4 sm:$0xff]   ;;  %v1131_v49 = vld [vmem:[%s1229_s6 + $0xe4] ss:$8 sps:$4 sm:$0xff]  }
  0x28   : > { %v1133_v50 = vld [vmem:[%s1229_s6 + $0xe0] ss:$8 sps:$4 sm:$0xff]   ;;  %v1137_v51 = vld [vmem:[%s1229_s6 + $0xf4] ss:$8 sps:$4 sm:$0xff]   ;;  %v1139_v52 = vld [vmem:[%s1229_s6 + $0xf0] ss:$8 sps:$4 sm:$0xff]  }
  0x29   : > { %744 = vmatpush1.bf16.msra.mxu1 %v1112_v22  ;;  %v393_v58 = vld [vmem:[#allocation2] sm:$0xff]  ;;  %v394_v61 = vld [vmem:[#allocation2 + $0x8] sm:$0xff]  ;;  %v792_v8 = vsub.s32 (!%p1036_p7), 0, %v791_v5  ;;  %v796_v9 = vsub.s32 (!%p1036_p7), 1, %v791_v5 }
  0x2a   : > { %705 = vmatpush1.bf16.msra.mxu0 %v1082_v15  ;;  %745 = vmatprep.subr.bf16.mxu1 %v1116_v24  ;;  %v788_v6 = vld [vmem:[%s1312_s2] sm:$0x3] (!%p1036_p7) }
  0x2b   : > { %706 = vmatprep.subr.bf16.mxu0 %v1083_v16  ;;  %v802_v7 = vld [vmem:[%s1313_s3] sm:$0x3] (!%p1036_p7)  ;;  %v793_v12 = vrot.slane (!%p1036_p7), %v788_v6, %v792_v8  ;;  %v797_v14 = vrot.slane (!%p1036_p7), %v788_v6, %v796_v9 }
  0x2c   : > { %v807_v13 = vrot.slane (!%p1036_p7), %v802_v7, %v792_v8  ;;  %v811_v15 = vrot.slane (!%p1036_p7), %v802_v7, %v796_v9  ;;  %v816_v18 = vld [vmem:[%s1314_s4] sm:$0xff] (!%p1036_p7) }
  0x2d   : > { %746 = vmatpush1.bf16.msra.mxu1 %v1118_v26 }
  0x2e   : > { %707 = vmatpush1.bf16.msra.mxu0 %v1085_v19  ;;  %747 = vmatprep.subr.bf16.mxu1 %v1122_v28  ;;  %v817_v19 = vld [vmem:[%s1314_s4 + $0x8] sm:$0xff] (!%p1036_p7) }
  0x2f   : > { %708 = vmatprep.subr.bf16.mxu0 %v1086_v21 }
  0x31   : > { %748 = vmatpush1.bf16.msra.mxu1 %v1124_v30 }
  0x32   : > { %709 = vmatpush1.bf16.msra.mxu0 %v1088_v23  ;;  %749 = vmatprep.subr.bf16.mxu1 %v1128_v32 }
  0x33   : > { %710 = vmatprep.subr.bf16.mxu0 %v1089_v25 }
  0x35   : > { %750 = vmatpush1.bf16.msra.mxu1 %v1130_v36 }
  0x36   : > { %711 = vmatpush1.bf16.msra.mxu0 %v1091_v27  ;;  %751 = vmatprep.subr.bf16.mxu1 %v1134_v38 }
  0x37   : > { %712 = vmatprep.subr.bf16.mxu0 %v1095_v29 }
  0x39   : > { %752 = vmatpush1.bf16.msra.mxu1 %v1136_v40 }
  0x3a   : > { %713 = vmatpush1.bf16.msra.mxu0 %v1097_v31 }
  0x3b   : > { %714 = vmatprep.subr.bf16.mxu0 %v1101_v33 }
  0x3c   : > { %770 = vmatmul.mubr.bf16.vlgmr.msra.gmra.mrb[0].mxu1 %v1140_v43 }
  0x3e   : > { %715 = vmatpush1.bf16.msra.mxu0 %v1103_v37 }
  0x3f   : > { %716 = vmatprep.subr.bf16.mxu0 %v1107_v39 }
  0x42   : > { %717 = vmatpush1.bf16.msra.mxu0 %v1109_v41 }
  0x43   : > { %718 = vmatprep.subr.bf16.mxu0 %v1113_v42 }
  0x46   : > { %719 = vmatpush1.bf16.msra.mxu0 %v1115_v44 }
  0x47   : > { %720 = vmatprep.subr.bf16.mxu0 %v1119_v45 }
  0x4a   : > { %721 = vmatpush1.bf16.msra.mxu0 %v1121_v46 }
  0x4b   : > { %722 = vmatprep.subr.bf16.mxu0 %v1125_v47 }
  0x4e   : > { %723 = vmatpush1.bf16.msra.mxu0 %v1127_v48 }
  0x4f   : > { %724 = vmatprep.subr.bf16.mxu0 %v1131_v49 }
  0x52   : > { %725 = vmatpush1.bf16.msra.mxu0 %v1133_v50 }
  0x53   : > { %726 = vmatprep.subr.bf16.mxu0 %v1137_v51 }
  0x56   : > { %727 = vmatpush1.bf16.msra.mxu0 %v1139_v52 }
  0x59   : > { %729 = vmatmul.mubr.bf16.vlgmr.msra.gmra.mrb[0].mxu0 %v985_v53 }
 0x10f   : > { %v771_v54 = vpop.f32.mrb[0].mxu1 }
 0x110   : > { %v773_v55 = vpop.f32.mrb[1].mxu1 }
 0x111   : > { %v775_v56 = vpop.f32.mrb[2].mxu1 }
 0x112   : > { %v776_v57 = vpop.f32.mrb[3].mxu1 }
 0x12c   : > { %v730_v59 = vpop.f32.mrb[0].mxu0  ;;  %785 = sbr.rel (%p1036_p7) target bundleno = 323 (0x143), region = 48 }
 0x12d   : > { %v772_v60 = vadd.f32 %v771_v54, %v730_v59  ;;  %v732_v62 = vpop.f32.mrb[1].mxu0 }
 0x12e   : > { %v774_v63 = vadd.f32 %v773_v55, %v732_v62  ;;  %v734_v0 = vpop.f32.mrb[2].mxu0 }
 0x12f   : > { %v778_v1 = vadd.f32 %v772_v60, %v393_v58  ;;  %v735_v2 = vpop.f32.mrb[3].mxu0 }
 0x130   : > { %v779_v3 = vadd.f32 %v774_v63, %v394_v61 }
 0x131   : > { %780 = vst [vmem:[#allocation2] sm:$0xff] %v778_v1 }
 0x132   : > { %781 = vst [vmem:[#allocation2 + $0x8] sm:$0xff] %v779_v3 }
 0x138   : > { %v786_v10 = vld [vmem:[#allocation2] sm:$0xff] }
 0x139   : > { %v787_v11 = vld [vmem:[#allocation2 + $0x8] sm:$0xff]  ;;  %v800_v16 = vmul.f32 %v793_v12, %v786_v10 }
 0x13a   : > { %v801_v17 = vmul.f32 %v797_v14, %v787_v11 }
 0x13b   : > { %v814_v20 = vadd.f32 %v807_v13, %v800_v16 }
 0x13c   : > { %v815_v21 = vadd.f32 %v811_v15, %v801_v17 }
 0x13d   : > { %v818_v22 = vadd.f32 %v816_v18, %v814_v20 }
 0x13e   : > { %v819_v23 = vadd.f32 %v817_v19, %v815_v21 }
 0x13f   : > { %v820_v24 = vmax.f32 %v818_v22, 0.0 }
 0x140   : > { %v821_v25 = vmax.f32 %v819_v23, 0.0 }
 0x141   : > { %822 = vst [vmem:[%s1315_s5] sm:$0xff] %v820_v24 }
 0x142   : > { %823 = vst [vmem:[%s1315_s5 + $0x8] sm:$0xff] %v821_v25 }
 0x143 PF: > { %s15_s20 = sadd.s32 1, %s1165_s20   ;;  %s1316_s18 = smov %s1161_s19 }
 0x144   : > { %p12_p8 = scmp.ge.s32.totalorder %s15_s20, 8   ;;  %s1317_s19 = smov %s1319_s21 }
 0x146   :  { %14 = sbr.rel (!%p12_p8) target bundleno = 2 (0x2), region = 90 }

// kernel: resnet18_forward.37
= control target key start
LH: loop header
LB: loop body
LE: loop exit
PB: predicated region body
PF: predicated region fallthrough
CT: control target
= control target key end

     0   :  { %s1105_s15 = smov 0   ;;  %s1107_s16 = smov 0   ;;  %s1210_s0 = inlined_call_operand.vmem [shape: bf16[8,2304], index: 0, kind: input, shape index: {}]   ;;  %s1211_s1 = inlined_call_operand.vmem [shape: bf16[2304,256], index: 1, kind: input, shape index: {}]   ;;  %s1212_s2 = inlined_call_operand.vmem [shape: f32[1,256], index: 2, kind: input, shape index: {}]   ;;  %s1213_s3 = inlined_call_operand.vmem [shape: f32[1,256], index: 3, kind: input, shape index: {}]   ;;  %s1214_s4 = inlined_call_operand.vmem [shape: f32[8,256], index: 4, kind: output, shape index: {}]  }
   0x1   :  { %s1109_s17 = smov 0  }
   0x2 LB: > { %s26_s18 = sadd.s32 1, %s1072_s16  ;;  %p891_p0 = scmp.ge.s32.totalorder %s1076_s17, 1  ;;  %s1076_s17 = sphi %s1109_s17, %s14_s17   ;;  %s1072_s16 = sphi %s1107_s16, %s1216_s16   ;;  %s1068_s15 = sphi %s1105_s15, %s1215_s15  }
   0x3   : > { %p27_p1 = scmp.ge.s32.totalorder %s26_s18, 6  ;;  %p229_p2 = scmp.lt.s32.totalorder %s1076_s17, 7 }
   0x5   : > { %s1218_s18 = smov (%p27_p1, %s26_s18), 0  ;;  %p230_p3 = pnand %p891_p0, %p229_p2 }
   0x6   : > { %s281_s19 = smul.u32 (!%p230_p3), 3, %s1068_s15  ;;  %p895_p6 = scmp.ne.s32.totalorder (!%p230_p3), %s1068_s15, 0 }
   0x7   : > { %233 = sbr.rel (%p230_p3) target bundleno = 321 (0x141), region = 36 }
   0x8   : > { %s291_s20 = smul.u32 (!%p230_p3), 48, %s1068_s15  ;;  %p284_p4 = scmp.lt.s32.totalorder (!%p230_p3), %s281_s19, 17 }
   0xa   : > { %p293_p5 = scmp.lt.s32.totalorder (!%p230_p3), %s291_s20, 287 }
   0xe   : > { %s1220_s19 = smov (!%p284_p4, %s281_s19), 17  ;;  %s1222_s20 = smov (!%p293_p5, %s291_s20), 287 }
   0xf   : > { %s892_s21 = sshll.u32 %s1220_s19, 2  ;;  %s952_s25 = sshll.u32 %s1222_s20, 3  ;;  %v1078_v0 = vmov (!%p895_p6), 0.0  }
  0x10   : > { %s1130_s24 = scalar_lea.vmem %s1210_s0, %s892_s21  ;;  %s1135_s28 = scalar_lea.vmem %s1211_s1, %s952_s25  ;;  %328 = vst [vmem:[#allocation2] sm:$0xff] (!%p895_p6), %v1078_v0  ;;  %329 = vst [vmem:[#allocation2 + $0x8] sm:$0xff] (!%p895_p6), %v1078_v0 }
  0x11   : > { %327 = sbr.rel (%p895_p6) target bundleno = 24 (0x18), region = 40 }
  0x18 PF: > { %v979_v1 = vld [vmem:[%s1135_s28 + $0x4] ss:$8 sps:$4 sm:$0xff]   ;;  %v981_v2 = vld [vmem:[%s1135_s28] ss:$8 sps:$4 sm:$0xff]   ;;  %v1079_v3 = vmov 0   ;;  %p947_p7 = scmp.ne.s32.totalorder %s1068_s15, 5 }
  0x19   : > { %706 = vmatprep.mubr.bf16.mxu1 %v1079_v3  ;;  %633 = vmatprep.subr.bf16.mxu0 %v979_v1  ;;  %v982_v4 = vld [vmem:[%s1135_s28 + $0x14] ss:$8 sps:$4 sm:$0xff]   ;;  %v984_v5 = vld [vmem:[%s1135_s28 + $0x10] ss:$8 sps:$4 sm:$0xff]   ;;  %v985_v6 = vld [vmem:[%s1135_s28 + $0x24] ss:$8 sps:$4 sm:$0xff]  }
  0x1a   : > { %634 = vmatpush1.bf16.msra.mxu0 %v981_v2  ;;  %v987_v7 = vld [vmem:[%s1135_s28 + $0x20] ss:$8 sps:$4 sm:$0xff]   ;;  %v988_v8 = vld [vmem:[%s1135_s28 + $0x34] ss:$8 sps:$4 sm:$0xff]   ;;  %v990_v9 = vld [vmem:[%s1135_s28 + $0x30] ss:$8 sps:$4 sm:$0xff]  }
  0x1b   : > { %635 = vmatprep.subr.bf16.mxu0 %v982_v4  ;;  %v1003_v10 = vld [vmem:[%s1135_s28 + $0x104] ss:$8 sps:$4 sm:$0xff]   ;;  %v1005_v11 = vld [vmem:[%s1135_s28 + $0x100] ss:$8 sps:$4 sm:$0xff]   ;;  %v1009_v13 = vld [vmem:[%s1135_s28 + $0x114] ss:$8 sps:$4 sm:$0xff]   ;;  %v727_v4 = vlaneseq (!%p947_p7) }
  0x1c   : > { %v991_v12 = vld [vmem:[%s1135_s28 + $0x44] ss:$8 sps:$4 sm:$0xff]   ;;  %674 = vmatprep.subr.bf16.mxu1 %v1003_v10  ;;  %v1011_v14 = vld [vmem:[%s1135_s28 + $0x110] ss:$8 sps:$4 sm:$0xff]   ;;  %v993_v15 = vld [vmem:[%s1135_s28 + $0x40] ss:$8 sps:$4 sm:$0xff]  }
  0x1d   : > { %675 = vmatpush1.bf16.msra.mxu1 %v1005_v11  ;;  %v994_v16 = vld [vmem:[%s1135_s28 + $0x54] ss:$8 sps:$4 sm:$0xff]   ;;  %v1015_v17 = vld [vmem:[%s1135_s28 + $0x124] ss:$8 sps:$4 sm:$0xff]   ;;  %v1017_v18 = vld [vmem:[%s1135_s28 + $0x120] ss:$8 sps:$4 sm:$0xff]  }
  0x1e   : > { %636 = vmatpush1.bf16.msra.mxu0 %v984_v5  ;;  %676 = vmatprep.subr.bf16.mxu1 %v1009_v13  ;;  %v996_v19 = vld [vmem:[%s1135_s28 + $0x50] ss:$8 sps:$4 sm:$0xff]   ;;  %v1021_v20 = vld [vmem:[%s1135_s28 + $0x134] ss:$8 sps:$4 sm:$0xff]   ;;  %v997_v21 = vld [vmem:[%s1135_s28 + $0x64] ss:$8 sps:$4 sm:$0xff]  }
  0x1f   : > { %637 = vmatprep.subr.bf16.mxu0 %v985_v6  ;;  %v1023_v22 = vld [vmem:[%s1135_s28 + $0x130] ss:$8 sps:$4 sm:$0xff]   ;;  %v999_v23 = vld [vmem:[%s1135_s28 + $0x60] ss:$8 sps:$4 sm:$0xff]   ;;  %v1027_v24 = vld [vmem:[%s1135_s28 + $0x144] ss:$8 sps:$4 sm:$0xff]  }
  0x20   : > { %v1000_v25 = vld [vmem:[%s1135_s28 + $0x74] ss:$8 sps:$4 sm:$0xff]   ;;  %v1029_v26 = vld [vmem:[%s1135_s28 + $0x140] ss:$8 sps:$4 sm:$0xff]   ;;  %v1002_v27 = vld [vmem:[%s1135_s28 + $0x70] ss:$8 sps:$4 sm:$0xff]  }
  0x21   : > { %677 = vmatpush1.bf16.msra.mxu1 %v1011_v14  ;;  %v1033_v28 = vld [vmem:[%s1135_s28 + $0x154] ss:$8 sps:$4 sm:$0xff]   ;;  %v1006_v29 = vld [vmem:[%s1135_s28 + $0x84] ss:$8 sps:$4 sm:$0xff]   ;;  %v1035_v30 = vld [vmem:[%s1135_s28 + $0x150] ss:$8 sps:$4 sm:$0xff]  }
  0x22   : > { %638 = vmatpush1.bf16.msra.mxu0 %v987_v7  ;;  %678 = vmatprep.subr.bf16.mxu1 %v1015_v17  ;;  %v1008_v31 = vld [vmem:[%s1135_s28 + $0x80] ss:$8 sps:$4 sm:$0xff]   ;;  %v1039_v32 = vld [vmem:[%s1135_s28 + $0x164] ss:$8 sps:$4 sm:$0xff]   ;;  %v1012_v33 = vld [vmem:[%s1135_s28 + $0x94] ss:$8 sps:$4 sm:$0xff]  }
  0x23   : > { %639 = vmatprep.subr.bf16.mxu0 %v988_v8  ;;  %v332_v34 = vld [vmem:[%s1130_s24] sm:$0xff]  ;;  %v1014_v37 = vld [vmem:[%s1135_s28 + $0x90] ss:$8 sps:$4 sm:$0xff]   ;;  %v1045_v38 = vld [vmem:[%s1135_s28 + $0x174] ss:$8 sps:$4 sm:$0xff]   ;;  %v728_v5 = vshrl.u32 (!%p947_p7), %v727_v4, 7 }
  0x24   : > { %v897_v35 = vcombine.high %v332_v34, %v332_v34  ;;  %v1041_v36 = vld [vmem:[%s1135_s28 + $0x160] ss:$8 sps:$4 sm:$0xff]   ;;  %v1018_v39 = vld [vmem:[%s1135_s28 + $0xa4] ss:$8 sps:$4 sm:$0xff]   ;;  %v1047_v40 = vld [vmem:[%s1135_s28 + $0x170] ss:$8 sps:$4 sm:$0xff]   ;;  %v896_v53 = vcombine.low %v332_v34, %v332_v34 }
  0x25   : > { %679 = vmatpush1.bf16.msra.mxu1 %v1017_v18  ;;  %v1020_v41 = vld [vmem:[%s1135_s28 + $0xa0] ss:$8 sps:$4 sm:$0xff]   ;;  %v1024_v42 = vld [vmem:[%s1135_s28 + $0xb4] ss:$8 sps:$4 sm:$0xff]   ;;  %v1026_v44 = vld [vmem:[%s1135_s28 + $0xb0] ss:$8 sps:$4 sm:$0xff]  }
  0x26   : > { %640 = vmatpush1.bf16.msra.mxu0 %v990_v9  ;;  %680 = vmatprep.subr.bf16.mxu1 %v1021_v20  ;;  %v1051_v43 = vld [vmem:[%s1130_s24 + $0x8] ss:$0 sps:$4 sm:$0xff]   ;;  %v1030_v45 = vld [vmem:[%s1135_s28 + $0xc4] ss:$8 sps:$4 sm:$0xff]   ;;  %v1036_v47 = vld [vmem:[%s1135_s28 + $0xd4] ss:$8 sps:$4 sm:$0xff]  }
  0x27   : > { %641 = vmatprep.subr.bf16.mxu0 %v991_v12  ;;  %665 = vmatprep.mubr.bf16.mxu0 %v897_v35  ;;  %v1032_v46 = vld [vmem:[%s1135_s28 + $0xc0] ss:$8 sps:$4 sm:$0xff]   ;;  %v1038_v48 = vld [vmem:[%s1135_s28 + $0xd0] ss:$8 sps:$4 sm:$0xff]   ;;  %v1042_v49 = vld [vmem:[%s1135_s28 + $0xe4] ss:$8 sps:$4 sm:$0xff]  }
  0x28   : > { %v1044_v50 = vld [vmem:[%s1135_s28 + $0xe0] ss:$8 sps:$4 sm:$0xff]   ;;  %v1048_v51 = vld [vmem:[%s1135_s28 + $0xf4] ss:$8 sps:$4 sm:$0xff]   ;;  %v1050_v52 = vld [vmem:[%s1135_s28 + $0xf0] ss:$8 sps:$4 sm:$0xff]  }
  0x29   : > { %681 = vmatpush1.bf16.msra.mxu1 %v1023_v22  ;;  %v330_v58 = vld [vmem:[#allocation2] sm:$0xff]  ;;  %v331_v61 = vld [vmem:[#allocation2 + $0x8] sm:$0xff]  ;;  %v729_v8 = vsub.s32 (!%p947_p7), 0, %v728_v5  ;;  %v733_v9 = vsub.s32 (!%p947_p7), 1, %v728_v5 }
  0x2a   : > { %642 = vmatpush1.bf16.msra.mxu0 %v993_v15  ;;  %682 = vmatprep.subr.bf16.mxu1 %v1027_v24  ;;  %v725_v6 = vld [vmem:[%s1212_s2] sm:$0x3] (!%p947_p7) }
  0x2b   : > { %643 = vmatprep.subr.bf16.mxu0 %v994_v16  ;;  %v739_v7 = vld [vmem:[%s1213_s3] sm:$0x3] (!%p947_p7)  ;;  %v730_v12 = vrot.slane (!%p947_p7), %v725_v6, %v729_v8  ;;  %v734_v14 = vrot.slane (!%p947_p7), %v725_v6, %v733_v9 }
  0x2c   : > { %v744_v13 = vrot.slane (!%p947_p7), %v739_v7, %v729_v8  ;;  %v748_v15 = vrot.slane (!%p947_p7), %v739_v7, %v733_v9 }
  0x2d   : > { %683 = vmatpush1.bf16.msra.mxu1 %v1029_v26 }
  0x2e   : > { %644 = vmatpush1.bf16.msra.mxu0 %v996_v19  ;;  %684 = vmatprep.subr.bf16.mxu1 %v1033_v28 }
  0x2f   : > { %645 = vmatprep.subr.bf16.mxu0 %v997_v21 }
  0x31   : > { %685 = vmatpush1.bf16.msra.mxu1 %v1035_v30 }
  0x32   : > { %646 = vmatpush1.bf16.msra.mxu0 %v999_v23  ;;  %686 = vmatprep.subr.bf16.mxu1 %v1039_v32 }
  0x33   : > { %647 = vmatprep.subr.bf16.mxu0 %v1000_v25 }
  0x35   : > { %687 = vmatpush1.bf16.msra.mxu1 %v1041_v36 }
  0x36   : > { %648 = vmatpush1.bf16.msra.mxu0 %v1002_v27  ;;  %688 = vmatprep.subr.bf16.mxu1 %v1045_v38 }
  0x37   : > { %649 = vmatprep.subr.bf16.mxu0 %v1006_v29 }
  0x39   : > { %689 = vmatpush1.bf16.msra.mxu1 %v1047_v40 }
  0x3a   : > { %650 = vmatpush1.bf16.msra.mxu0 %v1008_v31 }
  0x3b   : > { %651 = vmatprep.subr.bf16.mxu0 %v1012_v33 }
  0x3c   : > { %707 = vmatmul.mubr.bf16.vlgmr.msra.gmra.mrb[0].mxu1 %v1051_v43 }
  0x3e   : > { %652 = vmatpush1.bf16.msra.mxu0 %v1014_v37 }
  0x3f   : > { %653 = vmatprep.subr.bf16.mxu0 %v1018_v39 }
  0x42   : > { %654 = vmatpush1.bf16.msra.mxu0 %v1020_v41 }
  0x43   : > { %655 = vmatprep.subr.bf16.mxu0 %v1024_v42 }
  0x46   : > { %656 = vmatpush1.bf16.msra.mxu0 %v1026_v44 }
  0x47   : > { %657 = vmatprep.subr.bf16.mxu0 %v1030_v45 }
  0x4a   : > { %658 = vmatpush1.bf16.msra.mxu0 %v1032_v46 }
  0x4b   : > { %659 = vmatprep.subr.bf16.mxu0 %v1036_v47 }
  0x4e   : > { %660 = vmatpush1.bf16.msra.mxu0 %v1038_v48 }
  0x4f   : > { %661 = vmatprep.subr.bf16.mxu0 %v1042_v49 }
  0x52   : > { %662 = vmatpush1.bf16.msra.mxu0 %v1044_v50 }
  0x53   : > { %663 = vmatprep.subr.bf16.mxu0 %v1048_v51 }
  0x56   : > { %664 = vmatpush1.bf16.msra.mxu0 %v1050_v52 }
  0x59   : > { %666 = vmatmul.mubr.bf16.vlgmr.msra.gmra.mrb[0].mxu0 %v896_v53 }
 0x10f   : > { %v708_v54 = vpop.f32.mrb[0].mxu1 }
 0x110   : > { %v710_v55 = vpop.f32.mrb[1].mxu1 }
 0x111   : > { %v712_v56 = vpop.f32.mrb[2].mxu1 }
 0x112   : > { %v713_v57 = vpop.f32.mrb[3].mxu1 }
 0x12c   : > { %v667_v59 = vpop.f32.mrb[0].mxu0  ;;  %722 = sbr.rel (%p947_p7) target bundleno = 321 (0x141), region = 44 }
 0x12d   : > { %v709_v60 = vadd.f32 %v708_v54, %v667_v59  ;;  %v669_v62 = vpop.f32.mrb[1].mxu0 }
 0x12e   : > { %v711_v63 = vadd.f32 %v710_v55, %v669_v62  ;;  %v671_v0 = vpop.f32.mrb[2].mxu0 }
 0x12f   : > { %v715_v1 = vadd.f32 %v709_v60, %v330_v58  ;;  %v672_v2 = vpop.f32.mrb[3].mxu0 }
 0x130   : > { %v716_v3 = vadd.f32 %v711_v63, %v331_v61 }
 0x131   : > { %717 = vst [vmem:[#allocation2] sm:$0xff] %v715_v1 }
 0x132   : > { %718 = vst [vmem:[#allocation2 + $0x8] sm:$0xff] %v716_v3 }
 0x138   : > { %v723_v10 = vld [vmem:[#allocation2] sm:$0xff] }
 0x139   : > { %v724_v11 = vld [vmem:[#allocation2 + $0x8] sm:$0xff]  ;;  %v737_v16 = vmul.f32 %v730_v12, %v723_v10 }
 0x13a   : > { %v738_v17 = vmul.f32 %v734_v14, %v724_v11 }
 0x13b   : > { %v751_v18 = vadd.f32 %v744_v13, %v737_v16 }
 0x13c   : > { %v752_v19 = vadd.f32 %v748_v15, %v738_v17 }
 0x13d   : > { %v753_v20 = vmax.f32 %v751_v18, 0.0 }
 0x13e   : > { %v754_v21 = vmax.f32 %v752_v19, 0.0 }
 0x13f   : > { %755 = vst [vmem:[%s1214_s4] sm:$0xff] %v753_v20 }
 0x140   : > { %756 = vst [vmem:[%s1214_s4 + $0x8] sm:$0xff] %v754_v21 }
 0x141 PF: > { %s14_s17 = sadd.s32 1, %s1076_s17   ;;  %s1215_s15 = smov %s1072_s16 }
 0x142   : > { %p11_p8 = scmp.ge.s32.totalorder %s14_s17, 8   ;;  %s1216_s16 = smov %s1218_s18 }
 0x144   :  { %13 = sbr.rel (!%p11_p8) target bundleno = 2 (0x2), region = 83 }

// kernel: resnet18_forward.39
= control target key start
LH: loop header
LB: loop body
LE: loop exit
PB: predicated region body
PF: predicated region fallthrough
CT: control target
= control target key end

     0   :  { %s1385_s15 = smov 0   ;;  %s1387_s16 = smov 0   ;;  %s1658_s0 = inlined_call_operand.vmem [shape: bf16[8,2304], index: 0, kind: input, shape index: {}]   ;;  %s1659_s1 = inlined_call_operand.vmem [shape: bf16[2304,512], index: 1, kind: input, shape index: {}]   ;;  %s1660_s2 = inlined_call_operand.vmem [shape: f32[1,512], index: 2, kind: input, shape index: {}]   ;;  %s1661_s3 = inlined_call_operand.vmem [shape: f32[1,512], index: 3, kind: input, shape index: {}]   ;;  %s1662_s4 = inlined_call_operand.vmem [shape: f32[8,512], index: 4, kind: output, shape index: {}]  }
   0x1   :  { %s1389_s17 = smov 0   ;;  %s1391_s18 = smov 0  }
   0x2   :  { %s1393_s19 = smov 0   ;;  %s1395_s20 = smov 0  }
   0x3   :  { %s1397_s21 = smov 0  }
   0x4 LB: > { %s26_s22 = sadd.s32 1, %s1348_s19  ;;  %s29_s23 = sadd.s32 1, %s1352_s20  ;;  %s1356_s21 = sphi %s1397_s21, %s14_s21   ;;  %s1352_s20 = sphi %s1395_s20, %s1668_s20   ;;  %s1348_s19 = sphi %s1393_s19, %s1667_s19   ;;  %s1344_s18 = sphi %s1391_s18, %s1666_s18   ;;  %s1340_s17 = sphi %s1389_s17, %s1665_s17   ;;  %s1336_s16 = sphi %s1387_s16, %s1664_s16   ;;  %s1332_s15 = sphi %s1385_s15, %s1663_s15  }
   0x5   : > { %p27_p0 = scmp.ge.s32.totalorder %s26_s22, 6  ;;  %p77_p1 = scmp.ne.s32.totalorder %s1336_s16, %s1332_s15 }
   0x6   : > { %p78_p2 = scmp.eq.s32.totalorder %s1356_s21, 0  ;;  %s70_s27 = sadd.s32 1, %s1336_s16 }
   0x7   : > { %s1670_s22 = smov (%p27_p0, %s26_s22), 0  ;;  %s1672_s23 = smov (!%p27_p0, %s29_s23), %s1352_s20 }
   0x8   : > { %p79_p3 = por %p78_p2, %p77_p1  ;;  %p31_p4 = scmp.ge.s32.totalorder %s1672_s23, 2 }
   0x9   : > { %s65_s24 = ssub.s32 %s1348_s19, %s1670_s22  ;;  %p1101_p6 = scmp.ge.s32.totalorder %s1356_s21, 12 }
   0xa   : > { %s1674_s23 = smov (%p31_p4, %s1672_s23), 0 }
   0xb   : > { %s66_s25 = ssub.s32 %s1352_s20, %s1674_s23  ;;  %183 = sbr.rel (%p1101_p6) target bundleno = 50 (0x32), region = 16 }
   0xc   : > { %s67_s26 = sor.u32 %s66_s25, %s65_s24 }
   0xd   : > { %p68_p5 = scmp.eq.s32.totalorder %s67_s26, 0 }
   0xf   : > { %s1436_s28 = scalar_select %p68_p5, %s1336_s16, %s70_s27  }
  0x12   : > { %199 = sbr.rel (!%p79_p3) target bundleno = 50 (0x32), region = 24  ;;  %s201_s29 = sand.u32 (%p79_p3), 1, %s1336_s16  }
  0x13   : > { %s1167_s30 = smul.u32 (%p79_p3), 384, %s201_s29  ;;  %s1102_s5 = sshll.u32 (%p79_p3), %s1352_s20, 1 }
  0x14   : > { %s1166_s6 = smul.u32 (%p79_p3), 192, %s1348_s19 }
  0x15   : > { %s1450_s12 = scalar_lea.vmem (%p79_p3), [#allocation3], %s1167_s30 }
  0x16   : > { %s207_s7 = sadd.s32 (%p79_p3), %s1166_s6, %s1102_s5 }
  0x17   : > { %s1104_s8 = sshll.u32 (%p79_p3), %s207_s7, 2 }
  0x18   : > { %s1445_s11 = scalar_lea.vmem (%p79_p3), %s1659_s1, %s1104_s8 }
  0x19   : > { %v331_v0 = vld [vmem:[%s1445_s11] sm:$0xff]  ;;  %v333_v1 = vld [vmem:[%s1445_s11 + $0x10] sm:$0xff] }
  0x1a   : > { %v335_v2 = vld [vmem:[%s1445_s11 + $0x20] sm:$0xff]  ;;  %332 = vst [vmem:[%s1450_s12] sm:$0xff] %v331_v0  ;;  %334 = vst [vmem:[%s1450_s12 + $0x8] sm:$0xff] %v333_v1  ;;  %v337_v3 = vld [vmem:[%s1445_s11 + $0x30] sm:$0xff] }
  0x1b   : > { %336 = vst [vmem:[%s1450_s12 + $0x10] sm:$0xff] %v335_v2  ;;  %v339_v4 = vld [vmem:[%s1445_s11 + $0x40] sm:$0xff]  ;;  %v341_v5 = vld [vmem:[%s1445_s11 + $0x50] sm:$0xff]  ;;  %338 = vst [vmem:[%s1450_s12 + $0x18] sm:$0xff] %v337_v3 }
  0x1c   : > { %340 = vst [vmem:[%s1450_s12 + $0x20] sm:$0xff] %v339_v4  ;;  %342 = vst [vmem:[%s1450_s12 + $0x28] sm:$0xff] %v341_v5  ;;  %v343_v6 = vld [vmem:[%s1445_s11 + $0x60] sm:$0xff]  ;;  %v345_v7 = vld [vmem:[%s1445_s11 + $0x70] sm:$0xff] }
  0x1d   : > { %v347_v8 = vld [vmem:[%s1445_s11 + $0x80] sm:$0xff]  ;;  %344 = vst [vmem:[%s1450_s12 + $0x30] sm:$0xff] %v343_v6  ;;  %346 = vst [vmem:[%s1450_s12 + $0x38] sm:$0xff] %v345_v7  ;;  %v349_v9 = vld [vmem:[%s1445_s11 + $0x90] sm:$0xff] }
  0x1e   : > { %348 = vst [vmem:[%s1450_s12 + $0x40] sm:$0xff] %v347_v8  ;;  %v351_v10 = vld [vmem:[%s1445_s11 + $0xa0] sm:$0xff]  ;;  %v353_v11 = vld [vmem:[%s1445_s11 + $0xb0] sm:$0xff]  ;;  %350 = vst [vmem:[%s1450_s12 + $0x48] sm:$0xff] %v349_v9 }
  0x1f   : > { %352 = vst [vmem:[%s1450_s12 + $0x50] sm:$0xff] %v351_v10  ;;  %354 = vst [vmem:[%s1450_s12 + $0x58] sm:$0xff] %v353_v11  ;;  %v355_v12 = vld [vmem:[%s1445_s11 + $0xc0] sm:$0xff]  ;;  %v357_v13 = vld [vmem:[%s1445_s11 + $0xd0] sm:$0xff] }
  0x20   : > { %v359_v14 = vld [vmem:[%s1445_s11 + $0xe0] sm:$0xff]  ;;  %356 = vst [vmem:[%s1450_s12 + $0x60] sm:$0xff] %v355_v12  ;;  %358 = vst [vmem:[%s1450_s12 + $0x68] sm:$0xff] %v357_v13  ;;  %v361_v15 = vld [vmem:[%s1445_s11 + $0xf0] sm:$0xff] }
  0x21   : > { %360 = vst [vmem:[%s1450_s12 + $0x70] sm:$0xff] %v359_v14  ;;  %v363_v16 = vld [vmem:[%s1445_s11 + $0x100] sm:$0xff]  ;;  %v365_v17 = vld [vmem:[%s1445_s11 + $0x110] sm:$0xff]  ;;  %362 = vst [vmem:[%s1450_s12 + $0x78] sm:$0xff] %v361_v15 }
  0x22   : > { %364 = vst [vmem:[%s1450_s12 + $0x80] sm:$0xff] %v363_v16  ;;  %366 = vst [vmem:[%s1450_s12 + $0x88] sm:$0xff] %v365_v17  ;;  %v367_v18 = vld [vmem:[%s1445_s11 + $0x120] sm:$0xff]  ;;  %v369_v19 = vld [vmem:[%s1445_s11 + $0x130] sm:$0xff] }
  0x23   : > { %v371_v20 = vld [vmem:[%s1445_s11 + $0x140] sm:$0xff]  ;;  %368 = vst [vmem:[%s1450_s12 + $0x90] sm:$0xff] %v367_v18  ;;  %370 = vst [vmem:[%s1450_s12 + $0x98] sm:$0xff] %v369_v19  ;;  %v373_v21 = vld [vmem:[%s1445_s11 + $0x150] sm:$0xff] }
  0x24   : > { %372 = vst [vmem:[%s1450_s12 + $0xa0] sm:$0xff] %v371_v20  ;;  %v375_v22 = vld [vmem:[%s1445_s11 + $0x160] sm:$0xff]  ;;  %v377_v23 = vld [vmem:[%s1445_s11 + $0x170] sm:$0xff]  ;;  %374 = vst [vmem:[%s1450_s12 + $0xa8] sm:$0xff] %v373_v21 }
  0x25   : > { %376 = vst [vmem:[%s1450_s12 + $0xb0] sm:$0xff] %v375_v22  ;;  %378 = vst [vmem:[%s1450_s12 + $0xb8] sm:$0xff] %v377_v23  ;;  %v379_v24 = vld [vmem:[%s1445_s11 + $0x180] sm:$0xff]  ;;  %v381_v25 = vld [vmem:[%s1445_s11 + $0x190] sm:$0xff] }
  0x26   : > { %v383_v26 = vld [vmem:[%s1445_s11 + $0x1a0] sm:$0xff]  ;;  %380 = vst [vmem:[%s1450_s12 + $0xc0] sm:$0xff] %v379_v24  ;;  %382 = vst [vmem:[%s1450_s12 + $0xc8] sm:$0xff] %v381_v25  ;;  %v385_v27 = vld [vmem:[%s1445_s11 + $0x1b0] sm:$0xff] }
  0x27   : > { %384 = vst [vmem:[%s1450_s12 + $0xd0] sm:$0xff] %v383_v26  ;;  %v387_v28 = vld [vmem:[%s1445_s11 + $0x1c0] sm:$0xff]  ;;  %v389_v29 = vld [vmem:[%s1445_s11 + $0x1d0] sm:$0xff]  ;;  %386 = vst [vmem:[%s1450_s12 + $0xd8] sm:$0xff] %v385_v27 }
  0x28   : > { %388 = vst [vmem:[%s1450_s12 + $0xe0] sm:$0xff] %v387_v28  ;;  %390 = vst [vmem:[%s1450_s12 + $0xe8] sm:$0xff] %v389_v29  ;;  %v391_v30 = vld [vmem:[%s1445_s11 + $0x1e0] sm:$0xff]  ;;  %v393_v31 = vld [vmem:[%s1445_s11 + $0x1f0] sm:$0xff] }
  0x29   : > { %v395_v32 = vld [vmem:[%s1445_s11 + $0x200] sm:$0xff]  ;;  %392 = vst [vmem:[%s1450_s12 + $0xf0] sm:$0xff] %v391_v30  ;;  %394 = vst [vmem:[%s1450_s12 + $0xf8] sm:$0xff] %v393_v31  ;;  %v397_v33 = vld [vmem:[%s1445_s11 + $0x210] sm:$0xff] }
  0x2a   : > { %396 = vst [vmem:[%s1450_s12 + $0x100] sm:$0xff] %v395_v32  ;;  %v399_v34 = vld [vmem:[%s1445_s11 + $0x220] sm:$0xff]  ;;  %v401_v35 = vld [vmem:[%s1445_s11 + $0x230] sm:$0xff]  ;;  %398 = vst [vmem:[%s1450_s12 + $0x108] sm:$0xff] %v397_v33 }
  0x2b   : > { %400 = vst [vmem:[%s1450_s12 + $0x110] sm:$0xff] %v399_v34  ;;  %402 = vst [vmem:[%s1450_s12 + $0x118] sm:$0xff] %v401_v35  ;;  %v403_v36 = vld [vmem:[%s1445_s11 + $0x240] sm:$0xff]  ;;  %v405_v37 = vld [vmem:[%s1445_s11 + $0x250] sm:$0xff] }
  0x2c   : > { %v407_v38 = vld [vmem:[%s1445_s11 + $0x260] sm:$0xff]  ;;  %404 = vst [vmem:[%s1450_s12 + $0x120] sm:$0xff] %v403_v36  ;;  %406 = vst [vmem:[%s1450_s12 + $0x128] sm:$0xff] %v405_v37  ;;  %v409_v39 = vld [vmem:[%s1445_s11 + $0x270] sm:$0xff] }
  0x2d   : > { %408 = vst [vmem:[%s1450_s12 + $0x130] sm:$0xff] %v407_v38  ;;  %v411_v40 = vld [vmem:[%s1445_s11 + $0x280] sm:$0xff]  ;;  %v413_v41 = vld [vmem:[%s1445_s11 + $0x290] sm:$0xff]  ;;  %410 = vst [vmem:[%s1450_s12 + $0x138] sm:$0xff] %v409_v39 }
  0x2e   : > { %412 = vst [vmem:[%s1450_s12 + $0x140] sm:$0xff] %v411_v40  ;;  %414 = vst [vmem:[%s1450_s12 + $0x148] sm:$0xff] %v413_v41  ;;  %v415_v42 = vld [vmem:[%s1445_s11 + $0x2a0] sm:$0xff]  ;;  %v417_v43 = vld [vmem:[%s1445_s11 + $0x2b0] sm:$0xff] }
  0x2f   : > { %v419_v44 = vld [vmem:[%s1445_s11 + $0x2c0] sm:$0xff]  ;;  %416 = vst [vmem:[%s1450_s12 + $0x150] sm:$0xff] %v415_v42  ;;  %418 = vst [vmem:[%s1450_s12 + $0x158] sm:$0xff] %v417_v43  ;;  %v421_v45 = vld [vmem:[%s1445_s11 + $0x2d0] sm:$0xff] }
  0x30   : > { %420 = vst [vmem:[%s1450_s12 + $0x160] sm:$0xff] %v419_v44  ;;  %v423_v46 = vld [vmem:[%s1445_s11 + $0x2e0] sm:$0xff]  ;;  %v425_v47 = vld [vmem:[%s1445_s11 + $0x2f0] sm:$0xff]  ;;  %422 = vst [vmem:[%s1450_s12 + $0x168] sm:$0xff] %v421_v45 }
  0x31   : > { %424 = vst [vmem:[%s1450_s12 + $0x170] sm:$0xff] %v423_v46  ;;  %426 = vst [vmem:[%s1450_s12 + $0x178] sm:$0xff] %v425_v47 }
  0x32 PF: > { %p1105_p7 = scmp.ge.s32.totalorder %s1356_s21, 1  ;;  %p447_p8 = scmp.lt.s32.totalorder %s1356_s21, 13 }
  0x34   : > { %p448_p9 = pnand %p1105_p7, %p447_p8 }
  0x35   : > { %s454_s13 = sand.u32 (!%p448_p9), 1, %s1332_s15   ;;  %s500_s14 = smul.u32 (!%p448_p9), 3, %s1340_s17 }
  0x36   : > { %451 = sbr.rel (%p448_p9) target bundleno = 368 (0x170), region = 70  ;;  %s1107_s25 = sshll.u32 (!%p448_p9), %s1344_s18, 1 }
  0x37   : > { %s1168_s24 = smul.u32 (!%p448_p9), 384, %s454_s13  ;;  %p503_p10 = scmp.lt.s32.totalorder (!%p448_p9), %s500_s14, 17 }
  0x38   : > { %p513_p11 = scmp.lt.s32.totalorder (!%p448_p9), %s1107_s25, 3  ;;  %p1111_p12 = scmp.ne.s32.totalorder (!%p448_p9), %s1340_s17, 0 }
  0x39   : > { %s1571_s13 = scalar_lea.vmem (!%p448_p9), [#allocation3], %s1168_s24 }
  0x3d   : > { %s1676_s14 = smov (!%p503_p10, %s500_s14), 17  ;;  %s1678_s25 = smov (!%p513_p11, %s1107_s25), 3 }
  0x3e   : > { %s1106_s26 = sshll.u32 %s1676_s14, 2  ;;  %s515_s15 = scalar_lea.vmem %s1660_s2, %s1678_s25  ;;  %v1358_v48 = vmov (!%p1111_p12), 0.0  }
  0x3f   : > { %s1555_s30 = scalar_lea.vmem %s1658_s0, %s1106_s26  ;;  %s520_s8 = scalar_lea.vmem %s1661_s3, %s1678_s25  ;;  %537 = vst [vmem:[#allocation2] sm:$0xff] (!%p1111_p12), %v1358_v48  ;;  %538 = vst [vmem:[#allocation2 + $0x8] sm:$0xff] (!%p1111_p12), %v1358_v48 }
  0x40   : > { %s1110_s9 = sshll.u32 %s1678_s25, 3  ;;  %536 = sbr.rel (%p1111_p12) target bundleno = 71 (0x47), region = 78 }
  0x41   : > { %s1569_s12 = scalar_lea.vmem %s1662_s4, %s1110_s9 }
  0x47 PF: > { %v1227_v49 = vld [vmem:[%s1571_s13 + $0x4] ss:$8 sps:$4 sm:$0xff]   ;;  %v1229_v50 = vld [vmem:[%s1571_s13] ss:$8 sps:$4 sm:$0xff]   ;;  %v1359_v51 = vmov 0   ;;  %v541_v18 = vld [vmem:[%s1555_s30] sm:$0xff] }
  0x48   : > { %915 = vmatprep.mubr.bf16.mxu1 %v1359_v51  ;;  %842 = vmatprep.subr.bf16.mxu0 %v1227_v49  ;;  %v1230_v52 = vld [vmem:[%s1571_s13 + $0x14] ss:$8 sps:$4 sm:$0xff]   ;;  %v1232_v53 = vld [vmem:[%s1571_s13 + $0x10] ss:$8 sps:$4 sm:$0xff]   ;;  %v1233_v54 = vld [vmem:[%s1571_s13 + $0x24] ss:$8 sps:$4 sm:$0xff]   ;;  %v1113_v19 = vcombine.high %v541_v18, %v541_v18  ;;  %v1112_v37 = vcombine.low %v541_v18, %v541_v18 }
  0x49   : > { %843 = vmatpush1.bf16.msra.mxu0 %v1229_v50  ;;  %v1235_v55 = vld [vmem:[%s1571_s13 + $0x20] ss:$8 sps:$4 sm:$0xff]   ;;  %v1236_v56 = vld [vmem:[%s1571_s13 + $0x34] ss:$8 sps:$4 sm:$0xff]   ;;  %v1238_v57 = vld [vmem:[%s1571_s13 + $0x30] ss:$8 sps:$4 sm:$0xff]  }
  0x4a   : > { %844 = vmatprep.subr.bf16.mxu0 %v1230_v52  ;;  %v1251_v58 = vld [vmem:[%s1571_s13 + $0x104] ss:$8 sps:$4 sm:$0xff]   ;;  %v1253_v59 = vld [vmem:[%s1571_s13 + $0x100] ss:$8 sps:$4 sm:$0xff]   ;;  %v1257_v61 = vld [vmem:[%s1571_s13 + $0x114] ss:$8 sps:$4 sm:$0xff]   ;;  %874 = vmatprep.mubr.bf16.mxu0 %v1113_v19 }
  0x4b   : > { %v1239_v60 = vld [vmem:[%s1571_s13 + $0x44] ss:$8 sps:$4 sm:$0xff]   ;;  %883 = vmatprep.subr.bf16.mxu1 %v1251_v58  ;;  %v1259_v62 = vld [vmem:[%s1571_s13 + $0x110] ss:$8 sps:$4 sm:$0xff]   ;;  %v1241_v63 = vld [vmem:[%s1571_s13 + $0x40] ss:$8 sps:$4 sm:$0xff]  }
  0x4c   : > { %884 = vmatpush1.bf16.msra.mxu1 %v1253_v59  ;;  %v1242_v0 = vld [vmem:[%s1571_s13 + $0x54] ss:$8 sps:$4 sm:$0xff]   ;;  %v1263_v1 = vld [vmem:[%s1571_s13 + $0x124] ss:$8 sps:$4 sm:$0xff]   ;;  %v1265_v2 = vld [vmem:[%s1571_s13 + $0x120] ss:$8 sps:$4 sm:$0xff]  }
  0x4d   : > { %845 = vmatpush1.bf16.msra.mxu0 %v1232_v53  ;;  %885 = vmatprep.subr.bf16.mxu1 %v1257_v61  ;;  %v1244_v3 = vld [vmem:[%s1571_s13 + $0x50] ss:$8 sps:$4 sm:$0xff]   ;;  %v1269_v4 = vld [vmem:[%s1571_s13 + $0x134] ss:$8 sps:$4 sm:$0xff]   ;;  %v1245_v5 = vld [vmem:[%s1571_s13 + $0x64] ss:$8 sps:$4 sm:$0xff]  }
  0x4e   : > { %846 = vmatprep.subr.bf16.mxu0 %v1233_v54  ;;  %v1271_v6 = vld [vmem:[%s1571_s13 + $0x130] ss:$8 sps:$4 sm:$0xff]   ;;  %v1247_v7 = vld [vmem:[%s1571_s13 + $0x60] ss:$8 sps:$4 sm:$0xff]   ;;  %v1275_v8 = vld [vmem:[%s1571_s13 + $0x144] ss:$8 sps:$4 sm:$0xff]  }
  0x4f   : > { %v1248_v9 = vld [vmem:[%s1571_s13 + $0x74] ss:$8 sps:$4 sm:$0xff]   ;;  %v1277_v10 = vld [vmem:[%s1571_s13 + $0x140] ss:$8 sps:$4 sm:$0xff]   ;;  %v1250_v11 = vld [vmem:[%s1571_s13 + $0x70] ss:$8 sps:$4 sm:$0xff]  }
  0x50   : > { %886 = vmatpush1.bf16.msra.mxu1 %v1259_v62  ;;  %v1281_v12 = vld [vmem:[%s1571_s13 + $0x154] ss:$8 sps:$4 sm:$0xff]   ;;  %v1254_v13 = vld [vmem:[%s1571_s13 + $0x84] ss:$8 sps:$4 sm:$0xff]   ;;  %v1283_v14 = vld [vmem:[%s1571_s13 + $0x150] ss:$8 sps:$4 sm:$0xff]  }
  0x51   : > { %847 = vmatpush1.bf16.msra.mxu0 %v1235_v55  ;;  %887 = vmatprep.subr.bf16.mxu1 %v1263_v1  ;;  %v1256_v15 = vld [vmem:[%s1571_s13 + $0x80] ss:$8 sps:$4 sm:$0xff]   ;;  %v1287_v16 = vld [vmem:[%s1571_s13 + $0x164] ss:$8 sps:$4 sm:$0xff]   ;;  %v1260_v17 = vld [vmem:[%s1571_s13 + $0x94] ss:$8 sps:$4 sm:$0xff]  }
  0x52   : > { %848 = vmatprep.subr.bf16.mxu0 %v1236_v56  ;;  %v1289_v20 = vld [vmem:[%s1571_s13 + $0x160] ss:$8 sps:$4 sm:$0xff]   ;;  %v1262_v21 = vld [vmem:[%s1571_s13 + $0x90] ss:$8 sps:$4 sm:$0xff]   ;;  %v1293_v22 = vld [vmem:[%s1571_s13 + $0x174] ss:$8 sps:$4 sm:$0xff]  }
  0x53   : > { %v1266_v23 = vld [vmem:[%s1571_s13 + $0xa4] ss:$8 sps:$4 sm:$0xff]   ;;  %v1295_v24 = vld [vmem:[%s1571_s13 + $0x170] ss:$8 sps:$4 sm:$0xff]   ;;  %v1268_v25 = vld [vmem:[%s1571_s13 + $0xa0] ss:$8 sps:$4 sm:$0xff]  }
  0x54   : > { %888 = vmatpush1.bf16.msra.mxu1 %v1265_v2  ;;  %v1272_v26 = vld [vmem:[%s1571_s13 + $0xb4] ss:$8 sps:$4 sm:$0xff]   ;;  %v1299_v27 = vld [vmem:[%s1555_s30 + $0x8] ss:$0 sps:$4 sm:$0xff]   ;;  %v1278_v29 = vld [vmem:[%s1571_s13 + $0xc4] ss:$8 sps:$4 sm:$0xff]  }
  0x55   : > { %849 = vmatpush1.bf16.msra.mxu0 %v1238_v57  ;;  %889 = vmatprep.subr.bf16.mxu1 %v1269_v4  ;;  %v1274_v28 = vld [vmem:[%s1571_s13 + $0xb0] ss:$8 sps:$4 sm:$0xff]   ;;  %v1280_v30 = vld [vmem:[%s1571_s13 + $0xc0] ss:$8 sps:$4 sm:$0xff]   ;;  %v1284_v31 = vld [vmem:[%s1571_s13 + $0xd4] ss:$8 sps:$4 sm:$0xff]  }
  0x56   : > { %850 = vmatprep.subr.bf16.mxu0 %v1239_v60  ;;  %v1286_v32 = vld [vmem:[%s1571_s13 + $0xd0] ss:$8 sps:$4 sm:$0xff]   ;;  %v1290_v33 = vld [vmem:[%s1571_s13 + $0xe4] ss:$8 sps:$4 sm:$0xff]   ;;  %v1292_v34 = vld [vmem:[%s1571_s13 + $0xe0] ss:$8 sps:$4 sm:$0xff]  }
  0x57   : > { %v1296_v35 = vld [vmem:[%s1571_s13 + $0xf4] ss:$8 sps:$4 sm:$0xff]   ;;  %v1298_v36 = vld [vmem:[%s1571_s13 + $0xf0] ss:$8 sps:$4 sm:$0xff]   ;;  %p1163_p13 = scmp.ne.s32.totalorder %s1340_s17, 5 }
  0x58   : > { %890 = vmatpush1.bf16.msra.mxu1 %v1271_v6  ;;  %v539_v42 = vld [vmem:[#allocation2] sm:$0xff]  ;;  %v540_v45 = vld [vmem:[#allocation2 + $0x8] sm:$0xff]  ;;  %v936_v52 = vlaneseq (!%p1163_p13) }
  0x59   : > { %851 = vmatpush1.bf16.msra.mxu0 %v1241_v63  ;;  %891 = vmatprep.subr.bf16.mxu1 %v1275_v8  ;;  %v934_v54 = vld [vmem:[%s515_s15] sm:$0x3] (!%p1163_p13) }
  0x5a   : > { %852 = vmatprep.subr.bf16.mxu0 %v1242_v0  ;;  %v937_v53 = vshrl.u32 (!%p1163_p13), %v936_v52, 7  ;;  %v948_v55 = vld [vmem:[%s520_s8] sm:$0x3] (!%p1163_p13) }
  0x5c   : > { %892 = vmatpush1.bf16.msra.mxu1 %v1277_v10  ;;  %v938_v56 = vsub.s32 (!%p1163_p13), 0, %v937_v53  ;;  %v942_v57 = vsub.s32 (!%p1163_p13), 1, %v937_v53 }
  0x5d   : > { %853 = vmatpush1.bf16.msra.mxu0 %v1244_v3  ;;  %893 = vmatprep.subr.bf16.mxu1 %v1281_v12 }
  0x5e   : > { %854 = vmatprep.subr.bf16.mxu0 %v1245_v5  ;;  %v939_v60 = vrot.slane (!%p1163_p13), %v934_v54, %v938_v56  ;;  %v953_v61 = vrot.slane (!%p1163_p13), %v948_v55, %v938_v56  ;;  %v943_v62 = vrot.slane (!%p1163_p13), %v934_v54, %v942_v57  ;;  %v957_v63 = vrot.slane (!%p1163_p13), %v948_v55, %v942_v57 }
  0x60   : > { %894 = vmatpush1.bf16.msra.mxu1 %v1283_v14 }
  0x61   : > { %855 = vmatpush1.bf16.msra.mxu0 %v1247_v7  ;;  %895 = vmatprep.subr.bf16.mxu1 %v1287_v16 }
  0x62   : > { %856 = vmatprep.subr.bf16.mxu0 %v1248_v9 }
  0x64   : > { %896 = vmatpush1.bf16.msra.mxu1 %v1289_v20 }
  0x65   : > { %857 = vmatpush1.bf16.msra.mxu0 %v1250_v11  ;;  %897 = vmatprep.subr.bf16.mxu1 %v1293_v22 }
  0x66   : > { %858 = vmatprep.subr.bf16.mxu0 %v1254_v13 }
  0x68   : > { %898 = vmatpush1.bf16.msra.mxu1 %v1295_v24 }
  0x69   : > { %859 = vmatpush1.bf16.msra.mxu0 %v1256_v15 }
  0x6a   : > { %860 = vmatprep.subr.bf16.mxu0 %v1260_v17 }
  0x6b   : > { %916 = vmatmul.mubr.bf16.vlgmr.msra.gmra.mrb[0].mxu1 %v1299_v27 }
  0x6d   : > { %861 = vmatpush1.bf16.msra.mxu0 %v1262_v21 }
  0x6e   : > { %862 = vmatprep.subr.bf16.mxu0 %v1266_v23 }
  0x71   : > { %863 = vmatpush1.bf16.msra.mxu0 %v1268_v25 }
  0x72   : > { %864 = vmatprep.subr.bf16.mxu0 %v1272_v26 }
  0x75   : > { %865 = vmatpush1.bf16.msra.mxu0 %v1274_v28 }
  0x76   : > { %866 = vmatprep.subr.bf16.mxu0 %v1278_v29 }
  0x79   : > { %867 = vmatpush1.bf16.msra.mxu0 %v1280_v30 }
  0x7a   : > { %868 = vmatprep.subr.bf16.mxu0 %v1284_v31 }
  0x7d   : > { %869 = vmatpush1.bf16.msra.mxu0 %v1286_v32 }
  0x7e   : > { %870 = vmatprep.subr.bf16.mxu0 %v1290_v33 }
  0x81   : > { %871 = vmatpush1.bf16.msra.mxu0 %v1292_v34 }
  0x82   : > { %872 = vmatprep.subr.bf16.mxu0 %v1296_v35 }
  0x85   : > { %873 = vmatpush1.bf16.msra.mxu0 %v1298_v36 }
  0x88   : > { %875 = vmatmul.mubr.bf16.vlgmr.msra.gmra.mrb[0].mxu0 %v1112_v37 }
 0x13e   : > { %v917_v38 = vpop.f32.mrb[0].mxu1 }
 0x13f   : > { %v919_v39 = vpop.f32.mrb[1].mxu1 }
 0x140   : > { %v921_v40 = vpop.f32.mrb[2].mxu1 }
 0x141   : > { %v922_v41 = vpop.f32.mrb[3].mxu1 }
 0x15b   : > { %v876_v43 = vpop.f32.mrb[0].mxu0  ;;  %931 = sbr.rel (%p1163_p13) target bundleno = 368 (0x170), region = 82 }
 0x15c   : > { %v918_v44 = vadd.f32 %v917_v38, %v876_v43  ;;  %v878_v46 = vpop.f32.mrb[1].mxu0 }
 0x15d   : > { %v920_v47 = vadd.f32 %v919_v39, %v878_v46  ;;  %v880_v48 = vpop.f32.mrb[2].mxu0 }
 0x15e   : > { %v924_v49 = vadd.f32 %v918_v44, %v539_v42  ;;  %v881_v50 = vpop.f32.mrb[3].mxu0 }
 0x15f   : > { %v925_v51 = vadd.f32 %v920_v47, %v540_v45 }
 0x160   : > { %926 = vst [vmem:[#allocation2] sm:$0xff] %v924_v49 }
 0x161   : > { %927 = vst [vmem:[#allocation2 + $0x8] sm:$0xff] %v925_v51 }
 0x167   : > { %v932_v58 = vld [vmem:[#allocation2] sm:$0xff] }
 0x168   : > { %v933_v59 = vld [vmem:[#allocation2 + $0x8] sm:$0xff]  ;;  %v946_v0 = vmul.f32 %v939_v60, %v932_v58 }
 0x169   : > { %v947_v1 = vmul.f32 %v943_v62, %v933_v59 }
 0x16a   : > { %v960_v2 = vadd.f32 %v953_v61, %v946_v0 }
 0x16b   : > { %v961_v3 = vadd.f32 %v957_v63, %v947_v1 }
 0x16c   : > { %v962_v4 = vmax.f32 %v960_v2, 0.0 }
 0x16d   : > { %v963_v5 = vmax.f32 %v961_v3, 0.0 }
 0x16e   : > { %964 = vst [vmem:[%s1569_s12] sm:$0xff] %v962_v4 }
 0x16f   : > { %965 = vst [vmem:[%s1569_s12 + $0x8] sm:$0xff] %v963_v5 }
 0x170 PF: > { %s14_s21 = sadd.s32 1, %s1356_s21   ;;  %s1663_s15 = smov %s1336_s16 }
 0x171   : > { %p11_p0 = scmp.ge.s32.totalorder %s14_s21, 14   ;;  %s1664_s16 = smov %s1436_s28 }
 0x172   : > { %s1665_s17 = smov %s1348_s19  ;;  %s1666_s18 = smov %s1352_s20 }
 0x173   : > { %s1667_s19 = smov %s1670_s22  ;;  %s1668_s20 = smov %s1674_s23 }
 0x174   :  { %13 = sbr.rel (!%p11_p0) target bundleno = 4 (0x4), region = 126 }

// kernel: resnet18_forward.40
= control target key start
LH: loop header
LB: loop body
LE: loop exit
PB: predicated region body
PF: predicated region fallthrough
CT: control target
= control target key end

     0   :  { %s1094_s15 = smov 0   ;;  %s1096_s16 = smov 0   ;;  %s1276_s0 = inlined_call_operand.vmem [shape: bf16[8,256], index: 0, kind: input, shape index: {}]   ;;  %s1277_s1 = inlined_call_operand.vmem [shape: bf16[256,512], index: 1, kind: input, shape index: {}]   ;;  %s1278_s2 = inlined_call_operand.vmem [shape: f32[1,512], index: 2, kind: input, shape index: {}]   ;;  %s1279_s3 = inlined_call_operand.vmem [shape: f32[1,512], index: 3, kind: input, shape index: {}]   ;;  %s1280_s4 = inlined_call_operand.vmem [shape: f32[8,512], index: 4, kind: output, shape index: {}]  }
   0x1   :  { %s1098_s17 = smov 0   ;;  %s1100_s18 = smov 0  }
   0x2   :  { %s1102_s19 = smov 0  }
   0x3 LB: > { %s29_s20 = sadd.s32 1, %s1063_s18  ;;  %p77_p1 = scmp.ne.s32.totalorder %s1055_s16, %s1051_s15  ;;  %s1067_s19 = sphi %s1102_s19, %s14_s19   ;;  %s1063_s18 = sphi %s1100_s18, %s1284_s18   ;;  %s1059_s17 = sphi %s1098_s17, %s1283_s17   ;;  %s1055_s16 = sphi %s1096_s16, %s1282_s16   ;;  %s1051_s15 = sphi %s1094_s15, %s1281_s15  }
   0x4   : > { %p31_p0 = scmp.ge.s32.totalorder %s29_s20, 2  ;;  %p78_p2 = scmp.eq.s32.totalorder %s1067_s19, 0 }
   0x5   : > { %s70_s22 = sadd.s32 1, %s1055_s16  ;;  %p892_p5 = scmp.ge.s32.totalorder %s1067_s19, 2 }
   0x6   : > { %s1286_s20 = smov (%p31_p0, %s29_s20), 0  ;;  %p79_p3 = por %p78_p2, %p77_p1 }
   0x7   : > { %s66_s21 = ssub.s32 %s1063_s18, %s1286_s20  ;;  %196 = sbr.rel (%p892_p5) target bundleno = 34 (0x22), region = 20 }
   0x8   : > { %p68_p4 = scmp.eq.s32.totalorder %s66_s21, 0 }
   0xa   : > { %s1129_s23 = scalar_select %p68_p4, %s1055_s16, %s70_s22  }
   0xe   : > { %199 = sbr.rel (!%p79_p3) target bundleno = 34 (0x22), region = 24  ;;  %s201_s24 = sand.u32 (%p79_p3), 1, %s1055_s16  }
   0xf   : > { %s938_s25 = sshll.u32 (%p79_p3), %s1063_s18, 3  ;;  %s893_s26 = sshll.u32 (%p79_p3), %s201_s24, 8 }
  0x10   : > { %s1137_s29 = scalar_lea.vmem (%p79_p3), %s1277_s1, %s938_s25  ;;  %s1142_s30 = scalar_lea.vmem (%p79_p3), [#allocation3], %s893_s26 }
  0x11   : > { %v299_v0 = vld [vmem:[%s1137_s29] sm:$0xff] (%p79_p3)  ;;  %v301_v1 = vld [vmem:[%s1137_s29 + $0x10] sm:$0xff] (%p79_p3) }
  0x12   : > { %v303_v2 = vld [vmem:[%s1137_s29 + $0x20] sm:$0xff] (%p79_p3)  ;;  %300 = vst [vmem:[%s1142_s30] sm:$0xff] (%p79_p3), %v299_v0  ;;  %302 = vst [vmem:[%s1142_s30 + $0x8] sm:$0xff] (%p79_p3), %v301_v1  ;;  %v305_v3 = vld [vmem:[%s1137_s29 + $0x30] sm:$0xff] (%p79_p3) }
  0x13   : > { %304 = vst [vmem:[%s1142_s30 + $0x10] sm:$0xff] (%p79_p3), %v303_v2  ;;  %v307_v4 = vld [vmem:[%s1137_s29 + $0x40] sm:$0xff] (%p79_p3)  ;;  %v309_v5 = vld [vmem:[%s1137_s29 + $0x50] sm:$0xff] (%p79_p3)  ;;  %306 = vst [vmem:[%s1142_s30 + $0x18] sm:$0xff] (%p79_p3), %v305_v3 }
  0x14   : > { %308 = vst [vmem:[%s1142_s30 + $0x20] sm:$0xff] (%p79_p3), %v307_v4  ;;  %310 = vst [vmem:[%s1142_s30 + $0x28] sm:$0xff] (%p79_p3), %v309_v5  ;;  %v311_v6 = vld [vmem:[%s1137_s29 + $0x60] sm:$0xff] (%p79_p3)  ;;  %v313_v7 = vld [vmem:[%s1137_s29 + $0x70] sm:$0xff] (%p79_p3) }
  0x15   : > { %v315_v8 = vld [vmem:[%s1137_s29 + $0x80] sm:$0xff]  ;;  %312 = vst [vmem:[%s1142_s30 + $0x30] sm:$0xff] %v311_v6  ;;  %314 = vst [vmem:[%s1142_s30 + $0x38] sm:$0xff] %v313_v7  ;;  %v317_v9 = vld [vmem:[%s1137_s29 + $0x90] sm:$0xff] }
  0x16   : > { %316 = vst [vmem:[%s1142_s30 + $0x40] sm:$0xff] %v315_v8  ;;  %v319_v10 = vld [vmem:[%s1137_s29 + $0xa0] sm:$0xff]  ;;  %v321_v11 = vld [vmem:[%s1137_s29 + $0xb0] sm:$0xff]  ;;  %318 = vst [vmem:[%s1142_s30 + $0x48] sm:$0xff] %v317_v9 }
  0x17   : > { %320 = vst [vmem:[%s1142_s30 + $0x50] sm:$0xff] %v319_v10  ;;  %322 = vst [vmem:[%s1142_s30 + $0x58] sm:$0xff] %v321_v11  ;;  %v323_v12 = vld [vmem:[%s1137_s29 + $0xc0] sm:$0xff]  ;;  %v325_v13 = vld [vmem:[%s1137_s29 + $0xd0] sm:$0xff] }
  0x18   : > { %v327_v14 = vld [vmem:[%s1137_s29 + $0xe0] sm:$0xff]  ;;  %324 = vst [vmem:[%s1142_s30 + $0x60] sm:$0xff] %v323_v12  ;;  %326 = vst [vmem:[%s1142_s30 + $0x68] sm:$0xff] %v325_v13  ;;  %v329_v15 = vld [vmem:[%s1137_s29 + $0xf0] sm:$0xff] }
  0x19   : > { %328 = vst [vmem:[%s1142_s30 + $0x70] sm:$0xff] %v327_v14  ;;  %v331_v16 = vld [vmem:[%s1137_s29 + $0x100] sm:$0xff]  ;;  %v333_v17 = vld [vmem:[%s1137_s29 + $0x110] sm:$0xff]  ;;  %330 = vst [vmem:[%s1142_s30 + $0x78] sm:$0xff] %v329_v15 }
  0x1a   : > { %332 = vst [vmem:[%s1142_s30 + $0x80] sm:$0xff] %v331_v16  ;;  %334 = vst [vmem:[%s1142_s30 + $0x88] sm:$0xff] %v333_v17  ;;  %v335_v18 = vld [vmem:[%s1137_s29 + $0x120] sm:$0xff]  ;;  %v337_v19 = vld [vmem:[%s1137_s29 + $0x130] sm:$0xff] }
  0x1b   : > { %v339_v20 = vld [vmem:[%s1137_s29 + $0x140] sm:$0xff]  ;;  %336 = vst [vmem:[%s1142_s30 + $0x90] sm:$0xff] %v335_v18  ;;  %338 = vst [vmem:[%s1142_s30 + $0x98] sm:$0xff] %v337_v19  ;;  %v341_v21 = vld [vmem:[%s1137_s29 + $0x150] sm:$0xff] }
  0x1c   : > { %340 = vst [vmem:[%s1142_s30 + $0xa0] sm:$0xff] %v339_v20  ;;  %v343_v22 = vld [vmem:[%s1137_s29 + $0x160] sm:$0xff]  ;;  %v345_v23 = vld [vmem:[%s1137_s29 + $0x170] sm:$0xff]  ;;  %342 = vst [vmem:[%s1142_s30 + $0xa8] sm:$0xff] %v341_v21 }
  0x1d   : > { %344 = vst [vmem:[%s1142_s30 + $0xb0] sm:$0xff] %v343_v22  ;;  %346 = vst [vmem:[%s1142_s30 + $0xb8] sm:$0xff] %v345_v23  ;;  %v347_v24 = vld [vmem:[%s1137_s29 + $0x180] sm:$0xff]  ;;  %v349_v25 = vld [vmem:[%s1137_s29 + $0x190] sm:$0xff] }
  0x1e   : > { %v351_v26 = vld [vmem:[%s1137_s29 + $0x1a0] sm:$0xff]  ;;  %348 = vst [vmem:[%s1142_s30 + $0xc0] sm:$0xff] %v347_v24  ;;  %350 = vst [vmem:[%s1142_s30 + $0xc8] sm:$0xff] %v349_v25  ;;  %v353_v27 = vld [vmem:[%s1137_s29 + $0x1b0] sm:$0xff] }
  0x1f   : > { %352 = vst [vmem:[%s1142_s30 + $0xd0] sm:$0xff] %v351_v26  ;;  %v355_v28 = vld [vmem:[%s1137_s29 + $0x1c0] sm:$0xff]  ;;  %v357_v29 = vld [vmem:[%s1137_s29 + $0x1d0] sm:$0xff]  ;;  %354 = vst [vmem:[%s1142_s30 + $0xd8] sm:$0xff] %v353_v27 }
  0x20   : > { %356 = vst [vmem:[%s1142_s30 + $0xe0] sm:$0xff] %v355_v28  ;;  %358 = vst [vmem:[%s1142_s30 + $0xe8] sm:$0xff] %v357_v29  ;;  %v359_v30 = vld [vmem:[%s1137_s29 + $0x1e0] sm:$0xff]  ;;  %v361_v31 = vld [vmem:[%s1137_s29 + $0x1f0] sm:$0xff] }
  0x21   : > { %360 = vst [vmem:[%s1142_s30 + $0xf0] sm:$0xff] %v359_v30  ;;  %362 = vst [vmem:[%s1142_s30 + $0xf8] sm:$0xff] %v361_v31 }
  0x22 PF: > { %p896_p6 = scmp.ge.s32.totalorder %s1067_s19, 1  ;;  %p383_p7 = scmp.lt.s32.totalorder %s1067_s19, 3 }
  0x24   : > { %p384_p8 = pnand %p896_p6, %p383_p7 }
  0x25   : > { %s390_s5 = sand.u32 (!%p384_p8), 1, %s1051_s15   ;;  %v1211_v32 = vld [vmem:[%s1276_s0] sm:$0xff] (!%p384_p8)  ;;  %s898_s10 = sshll.u32 (!%p384_p8), %s1059_s17, 1  ;;  %v728_v3 = vlaneseq (!%p384_p8) }
  0x26   : > { %387 = sbr.rel (%p384_p8) target bundleno = 323 (0x143), region = 70  ;;  %s897_s8 = sshll.u32 (!%p384_p8), %s390_s5, 8  ;;  %v903_v33 = vcombine.high (!%p384_p8), %v1211_v32, %v1211_v32  ;;  %v902_v2 = vcombine.low (!%p384_p8), %v1211_v32, %v1211_v32 }
  0x27   : > { %s1215_s9 = scalar_lea.vmem (!%p384_p8), [#allocation3], %s897_s8  ;;  %p449_p9 = scmp.lt.s32.totalorder (!%p384_p8), %s898_s10, 3  ;;  %v729_v4 = vshrl.u32 (!%p384_p8), %v728_v3, 7 }
  0x28   : > { %v979_v34 = vld [vmem:[%s1215_s9 + $0x4] ss:$8 sps:$4 sm:$0xff] (!%p384_p8)   ;;  %708 = vmatprep.mubr.bf16.mxu0 (!%p384_p8), %v903_v33  ;;  %v981_v35 = vld [vmem:[%s1215_s9] ss:$8 sps:$4 sm:$0xff] (!%p384_p8)   ;;  %v982_v36 = vld [vmem:[%s1215_s9 + $0x14] ss:$8 sps:$4 sm:$0xff] (!%p384_p8)  }
  0x29   : > { %676 = vmatprep.subr.bf16.mxu0 (!%p384_p8), %v979_v34  ;;  %v984_v37 = vld [vmem:[%s1215_s9 + $0x10] ss:$8 sps:$4 sm:$0xff] (!%p384_p8)   ;;  %v985_v38 = vld [vmem:[%s1215_s9 + $0x24] ss:$8 sps:$4 sm:$0xff] (!%p384_p8)   ;;  %v987_v39 = vld [vmem:[%s1215_s9 + $0x20] ss:$8 sps:$4 sm:$0xff] (!%p384_p8)  }
  0x2a   : > { %677 = vmatpush1.bf16.msra.mxu0 (!%p384_p8), %v981_v35  ;;  %v988_v40 = vld [vmem:[%s1215_s9 + $0x34] ss:$8 sps:$4 sm:$0xff] (!%p384_p8)   ;;  %v990_v41 = vld [vmem:[%s1215_s9 + $0x30] ss:$8 sps:$4 sm:$0xff] (!%p384_p8)   ;;  %v991_v42 = vld [vmem:[%s1215_s9 + $0x44] ss:$8 sps:$4 sm:$0xff] (!%p384_p8)  }
  0x2b   : > { %678 = vmatprep.subr.bf16.mxu0 (!%p384_p8), %v982_v36  ;;  %v993_v43 = vld [vmem:[%s1215_s9 + $0x40] ss:$8 sps:$4 sm:$0xff] (!%p384_p8)   ;;  %v994_v44 = vld [vmem:[%s1215_s9 + $0x54] ss:$8 sps:$4 sm:$0xff] (!%p384_p8)   ;;  %v996_v45 = vld [vmem:[%s1215_s9 + $0x50] ss:$8 sps:$4 sm:$0xff] (!%p384_p8)  }
  0x2c   : > { %v997_v46 = vld [vmem:[%s1215_s9 + $0x64] ss:$8 sps:$4 sm:$0xff] (!%p384_p8)   ;;  %v999_v47 = vld [vmem:[%s1215_s9 + $0x60] ss:$8 sps:$4 sm:$0xff] (!%p384_p8)   ;;  %v1000_v48 = vld [vmem:[%s1215_s9 + $0x74] ss:$8 sps:$4 sm:$0xff] (!%p384_p8)  }
  0x2d   : > { %v1002_v49 = vld [vmem:[%s1215_s9 + $0x70] ss:$8 sps:$4 sm:$0xff]   ;;  %v1003_v50 = vld [vmem:[%s1215_s9 + $0x84] ss:$8 sps:$4 sm:$0xff]   ;;  %v1005_v51 = vld [vmem:[%s1215_s9 + $0x80] ss:$8 sps:$4 sm:$0xff]  }
  0x2e   : > { %679 = vmatpush1.bf16.msra.mxu0 %v984_v37  ;;  %v1006_v52 = vld [vmem:[%s1215_s9 + $0x94] ss:$8 sps:$4 sm:$0xff]   ;;  %v1008_v53 = vld [vmem:[%s1215_s9 + $0x90] ss:$8 sps:$4 sm:$0xff]   ;;  %v1009_v54 = vld [vmem:[%s1215_s9 + $0xa4] ss:$8 sps:$4 sm:$0xff]  }
  0x2f   : > { %680 = vmatprep.subr.bf16.mxu0 %v985_v38  ;;  %v1011_v55 = vld [vmem:[%s1215_s9 + $0xa0] ss:$8 sps:$4 sm:$0xff]   ;;  %v1012_v56 = vld [vmem:[%s1215_s9 + $0xb4] ss:$8 sps:$4 sm:$0xff]   ;;  %v1014_v57 = vld [vmem:[%s1215_s9 + $0xb0] ss:$8 sps:$4 sm:$0xff]  }
  0x30   : > { %v1015_v58 = vld [vmem:[%s1215_s9 + $0xc4] ss:$8 sps:$4 sm:$0xff]   ;;  %v1017_v59 = vld [vmem:[%s1215_s9 + $0xc0] ss:$8 sps:$4 sm:$0xff]   ;;  %v1018_v60 = vld [vmem:[%s1215_s9 + $0xd4] ss:$8 sps:$4 sm:$0xff]  }
  0x31   : > { %v1020_v61 = vld [vmem:[%s1215_s9 + $0xd0] ss:$8 sps:$4 sm:$0xff]   ;;  %v1021_v62 = vld [vmem:[%s1215_s9 + $0xe4] ss:$8 sps:$4 sm:$0xff]   ;;  %v1023_v63 = vld [vmem:[%s1215_s9 + $0xe0] ss:$8 sps:$4 sm:$0xff]  }
  0x32   : > { %681 = vmatpush1.bf16.msra.mxu0 %v987_v39  ;;  %v1024_v0 = vld [vmem:[%s1215_s9 + $0xf4] ss:$8 sps:$4 sm:$0xff]   ;;  %v1026_v1 = vld [vmem:[%s1215_s9 + $0xf0] ss:$8 sps:$4 sm:$0xff]   ;;  %s1288_s10 = smov (!%p449_p9, %s898_s10), 3  ;;  %v730_v5 = vsub.s32 0, %v729_v4 }
  0x33   : > { %682 = vmatprep.subr.bf16.mxu0 %v988_v40  ;;  %s451_s13 = scalar_lea.vmem %s1278_s2, %s1288_s10  ;;  %s456_s21 = scalar_lea.vmem %s1279_s3, %s1288_s10  ;;  %v734_v7 = vsub.s32 1, %v729_v4 }
  0x34   : > { %v726_v6 = vld [vmem:[%s451_s13] sm:$0x3]  ;;  %s901_s22 = sshll.u32 %s1288_s10, 3 }
  0x35   : > { %v740_v8 = vld [vmem:[%s456_s21] sm:$0x3]  ;;  %v731_v9 = vrot.slane %v726_v6, %v730_v5  ;;  %v735_v10 = vrot.slane %v726_v6, %v734_v7  ;;  %s466_s25 = scalar_lea.vmem %s1280_s4, %s901_s22 }
  0x36   : > { %683 = vmatpush1.bf16.msra.mxu0 %v990_v41  ;;  %v745_v11 = vrot.slane %v740_v8, %v730_v5  ;;  %v749_v13 = vrot.slane %v740_v8, %v734_v7 }
  0x37   : > { %684 = vmatprep.subr.bf16.mxu0 %v991_v42 }
  0x3a   : > { %685 = vmatpush1.bf16.msra.mxu0 %v993_v43 }
  0x3b   : > { %686 = vmatprep.subr.bf16.mxu0 %v994_v44 }
  0x3e   : > { %687 = vmatpush1.bf16.msra.mxu0 %v996_v45 }
  0x3f   : > { %688 = vmatprep.subr.bf16.mxu0 %v997_v46 }
  0x42   : > { %689 = vmatpush1.bf16.msra.mxu0 %v999_v47 }
  0x43   : > { %690 = vmatprep.subr.bf16.mxu0 %v1000_v48 }
  0x46   : > { %691 = vmatpush1.bf16.msra.mxu0 %v1002_v49 }
  0x47   : > { %692 = vmatprep.subr.bf16.mxu0 %v1003_v50 }
  0x4a   : > { %693 = vmatpush1.bf16.msra.mxu0 %v1005_v51 }
  0x4b   : > { %694 = vmatprep.subr.bf16.mxu0 %v1006_v52 }
  0x4e   : > { %695 = vmatpush1.bf16.msra.mxu0 %v1008_v53 }
  0x4f   : > { %696 = vmatprep.subr.bf16.mxu0 %v1009_v54 }
  0x52   : > { %697 = vmatpush1.bf16.msra.mxu0 %v1011_v55 }
  0x53   : > { %698 = vmatprep.subr.bf16.mxu0 %v1012_v56 }
  0x56   : > { %699 = vmatpush1.bf16.msra.mxu0 %v1014_v57 }
  0x57   : > { %700 = vmatprep.subr.bf16.mxu0 %v1015_v58 }
  0x5a   : > { %701 = vmatpush1.bf16.msra.mxu0 %v1017_v59 }
  0x5b   : > { %702 = vmatprep.subr.bf16.mxu0 %v1018_v60 }
  0x5e   : > { %703 = vmatpush1.bf16.msra.mxu0 %v1020_v61 }
  0x5f   : > { %704 = vmatprep.subr.bf16.mxu0 %v1021_v62 }
  0x62   : > { %705 = vmatpush1.bf16.msra.mxu0 %v1023_v63 }
  0x63   : > { %706 = vmatprep.subr.bf16.mxu0 %v1024_v0 }
  0x66   : > { %707 = vmatpush1.bf16.msra.mxu0 %v1026_v1 }
  0x69   : > { %709 = vmatmul.mubr.bf16.vlgmr.msra.gmra.mrb[0].mxu0 %v902_v2 }
 0x13c   : > { %v710_v12 = vpop.f32.mrb[0].mxu0 }
 0x13d   : > { %v738_v14 = vmul.f32 %v731_v9, %v710_v12  ;;  %v712_v15 = vpop.f32.mrb[1].mxu0 }
 0x13e   : > { %v739_v16 = vmul.f32 %v735_v10, %v712_v15  ;;  %v714_v17 = vpop.f32.mrb[2].mxu0 }
 0x13f   : > { %v752_v18 = vadd.f32 %v745_v11, %v738_v14  ;;  %v715_v19 = vpop.f32.mrb[3].mxu0 }
 0x140   : > { %v753_v20 = vadd.f32 %v749_v13, %v739_v16 }
 0x141   : > { %754 = vst [vmem:[%s466_s25] sm:$0xff] %v752_v18 }
 0x142   : > { %755 = vst [vmem:[%s466_s25 + $0x8] sm:$0xff] %v753_v20 }
 0x143 PF: > { %s14_s19 = sadd.s32 1, %s1067_s19   ;;  %s1281_s15 = smov %s1055_s16 }
 0x144   : > { %p11_p10 = scmp.ge.s32.totalorder %s14_s19, 4   ;;  %s1282_s16 = smov %s1129_s23 }
 0x145   : > { %s1283_s17 = smov %s1063_s18  ;;  %s1284_s18 = smov %s1286_s20 }
 0x146   :  { %13 = sbr.rel (!%p11_p10) target bundleno = 3 (0x3), region = 126 }

// kernel: resnet18_forward.41
= control target key start
LH: loop header
LB: loop body
LE: loop exit
PB: predicated region body
PF: predicated region fallthrough
CT: control target
= control target key end

     0   :  { %s1681_s18 = smov 0   ;;  %s1683_s19 = smov 0   ;;  %s2009_s0 = inlined_call_operand.vmem [shape: bf16[8,4608], index: 0, kind: input, shape index: {}]   ;;  %s2010_s1 = inlined_call_operand.vmem [shape: bf16[4608,512], index: 1, kind: input, shape index: {}]   ;;  %s2011_s2 = inlined_call_operand.vmem [shape: f32[1,512], index: 2, kind: input, shape index: {}]   ;;  %s2012_s3 = inlined_call_operand.vmem [shape: f32[1,512], index: 3, kind: input, shape index: {}]   ;;  %s2013_s4 = inlined_call_operand.vmem [shape: f32[8,512], index: 4, kind: input, shape index: {}]   ;;  %s2014_s5 = inlined_call_operand.vmem [shape: f32[8,512], index: 5, kind: output, shape index: {}]  }
   0x1   :  { %s1685_s20 = smov 0   ;;  %s1687_s21 = smov 0  }
   0x2   :  { %s1689_s22 = smov 0   ;;  %s1691_s23 = smov 0  }
   0x3   :  { %s1693_s24 = smov 0  }
   0x4 LB: > { %s27_s25 = sadd.s32 1, %s1640_s22  ;;  %s30_s26 = sadd.s32 1, %s1644_s23  ;;  %s1648_s24 = sphi %s1693_s24, %s15_s24   ;;  %s1644_s23 = sphi %s1691_s23, %s2020_s23   ;;  %s1640_s22 = sphi %s1689_s22, %s2019_s22   ;;  %s1636_s21 = sphi %s1687_s21, %s2018_s21   ;;  %s1632_s20 = sphi %s1685_s20, %s2017_s20   ;;  %s1628_s19 = sphi %s1683_s19, %s2016_s19   ;;  %s1624_s18 = sphi %s1681_s18, %s2015_s18  }
   0x5   : > { %p28_p0 = scmp.ge.s32.totalorder %s27_s25, 9  ;;  %p78_p1 = scmp.ne.s32.totalorder %s1628_s19, %s1624_s18 }
   0x6   : > { %p79_p2 = scmp.eq.s32.totalorder %s1648_s24, 0  ;;  %s71_s30 = sadd.s32 1, %s1628_s19 }
   0x7   : > { %s2022_s25 = smov (%p28_p0, %s27_s25), 0  ;;  %s2024_s26 = smov (!%p28_p0, %s30_s26), %s1644_s23 }
   0x8   : > { %p80_p3 = por %p79_p2, %p78_p1  ;;  %p32_p4 = scmp.ge.s32.totalorder %s2024_s26, 2 }
   0x9   : > { %s66_s27 = ssub.s32 %s1640_s22, %s2022_s25  ;;  %p1348_p6 = scmp.ge.s32.totalorder %s1648_s24, 18 }
   0xa   : > { %s2026_s26 = smov (%p32_p4, %s2024_s26), 0 }
   0xb   : > { %s67_s28 = ssub.s32 %s1644_s23, %s2026_s26  ;;  %212 = sbr.rel (%p1348_p6) target bundleno = 57 (0x39), region = 16 }
   0xc   : > { %s68_s29 = sor.u32 %s67_s28, %s66_s27 }
   0xd   : > { %p69_p5 = scmp.eq.s32.totalorder %s68_s29, 0 }
   0xf   : > { %s1732_s6 = scalar_select %p69_p5, %s1628_s19, %s71_s30  }
  0x12   : > { %228 = sbr.rel (!%p80_p3) target bundleno = 57 (0x39), region = 24  ;;  %s230_s7 = sand.u32 (%p80_p3), 1, %s1628_s19  }
  0x13   : > { %s1351_s8 = sshll.u32 (%p80_p3), %s1644_s23, 1  ;;  %s1349_s9 = sshll.u32 (%p80_p3), %s230_s7, 9 }
  0x14   : > { %s1436_s10 = sshll.u32 (%p80_p3), %s1640_s22, 8  ;;  %s1746_s16 = scalar_lea.vmem (%p80_p3), [#allocation3], %s1349_s9 }
  0x15   : > { %s236_s11 = sadd.s32 (%p80_p3), %s1436_s10, %s1351_s8 }
  0x16   : > { %s1353_s12 = sshll.u32 (%p80_p3), %s236_s11, 2 }
  0x17   : > { %s1741_s15 = scalar_lea.vmem (%p80_p3), %s2010_s1, %s1353_s12 }
  0x18   : > { %v392_v0 = vld [vmem:[%s1741_s15] sm:$0xff] (%p80_p3)  ;;  %v394_v1 = vld [vmem:[%s1741_s15 + $0x10] sm:$0xff] (%p80_p3) }
  0x19   : > { %v396_v2 = vld [vmem:[%s1741_s15 + $0x20] sm:$0xff]  ;;  %393 = vst [vmem:[%s1746_s16] sm:$0xff] %v392_v0  ;;  %395 = vst [vmem:[%s1746_s16 + $0x8] sm:$0xff] %v394_v1  ;;  %v398_v3 = vld [vmem:[%s1741_s15 + $0x30] sm:$0xff] }
  0x1a   : > { %397 = vst [vmem:[%s1746_s16 + $0x10] sm:$0xff] %v396_v2  ;;  %v400_v4 = vld [vmem:[%s1741_s15 + $0x40] sm:$0xff]  ;;  %v402_v5 = vld [vmem:[%s1741_s15 + $0x50] sm:$0xff]  ;;  %399 = vst [vmem:[%s1746_s16 + $0x18] sm:$0xff] %v398_v3 }
  0x1b   : > { %401 = vst [vmem:[%s1746_s16 + $0x20] sm:$0xff] %v400_v4  ;;  %403 = vst [vmem:[%s1746_s16 + $0x28] sm:$0xff] %v402_v5  ;;  %v404_v6 = vld [vmem:[%s1741_s15 + $0x60] sm:$0xff]  ;;  %v406_v7 = vld [vmem:[%s1741_s15 + $0x70] sm:$0xff] }
  0x1c   : > { %v408_v8 = vld [vmem:[%s1741_s15 + $0x80] sm:$0xff]  ;;  %405 = vst [vmem:[%s1746_s16 + $0x30] sm:$0xff] %v404_v6  ;;  %407 = vst [vmem:[%s1746_s16 + $0x38] sm:$0xff] %v406_v7  ;;  %v410_v9 = vld [vmem:[%s1741_s15 + $0x90] sm:$0xff] }
  0x1d   : > { %409 = vst [vmem:[%s1746_s16 + $0x40] sm:$0xff] %v408_v8  ;;  %v412_v10 = vld [vmem:[%s1741_s15 + $0xa0] sm:$0xff]  ;;  %v414_v11 = vld [vmem:[%s1741_s15 + $0xb0] sm:$0xff]  ;;  %411 = vst [vmem:[%s1746_s16 + $0x48] sm:$0xff] %v410_v9 }
  0x1e   : > { %413 = vst [vmem:[%s1746_s16 + $0x50] sm:$0xff] %v412_v10  ;;  %415 = vst [vmem:[%s1746_s16 + $0x58] sm:$0xff] %v414_v11  ;;  %v416_v12 = vld [vmem:[%s1741_s15 + $0xc0] sm:$0xff]  ;;  %v418_v13 = vld [vmem:[%s1741_s15 + $0xd0] sm:$0xff] }
  0x1f   : > { %v420_v14 = vld [vmem:[%s1741_s15 + $0xe0] sm:$0xff]  ;;  %417 = vst [vmem:[%s1746_s16 + $0x60] sm:$0xff] %v416_v12  ;;  %419 = vst [vmem:[%s1746_s16 + $0x68] sm:$0xff] %v418_v13  ;;  %v422_v15 = vld [vmem:[%s1741_s15 + $0xf0] sm:$0xff] }
  0x20   : > { %421 = vst [vmem:[%s1746_s16 + $0x70] sm:$0xff] %v420_v14  ;;  %v424_v16 = vld [vmem:[%s1741_s15 + $0x100] sm:$0xff]  ;;  %v426_v17 = vld [vmem:[%s1741_s15 + $0x110] sm:$0xff]  ;;  %423 = vst [vmem:[%s1746_s16 + $0x78] sm:$0xff] %v422_v15 }
  0x21   : > { %425 = vst [vmem:[%s1746_s16 + $0x80] sm:$0xff] %v424_v16  ;;  %427 = vst [vmem:[%s1746_s16 + $0x88] sm:$0xff] %v426_v17  ;;  %v428_v18 = vld [vmem:[%s1741_s15 + $0x120] sm:$0xff]  ;;  %v430_v19 = vld [vmem:[%s1741_s15 + $0x130] sm:$0xff] }
  0x22   : > { %v432_v20 = vld [vmem:[%s1741_s15 + $0x140] sm:$0xff]  ;;  %429 = vst [vmem:[%s1746_s16 + $0x90] sm:$0xff] %v428_v18  ;;  %431 = vst [vmem:[%s1746_s16 + $0x98] sm:$0xff] %v430_v19  ;;  %v434_v21 = vld [vmem:[%s1741_s15 + $0x150] sm:$0xff] }
  0x23   : > { %433 = vst [vmem:[%s1746_s16 + $0xa0] sm:$0xff] %v432_v20  ;;  %v436_v22 = vld [vmem:[%s1741_s15 + $0x160] sm:$0xff]  ;;  %v438_v23 = vld [vmem:[%s1741_s15 + $0x170] sm:$0xff]  ;;  %435 = vst [vmem:[%s1746_s16 + $0xa8] sm:$0xff] %v434_v21 }
  0x24   : > { %437 = vst [vmem:[%s1746_s16 + $0xb0] sm:$0xff] %v436_v22  ;;  %439 = vst [vmem:[%s1746_s16 + $0xb8] sm:$0xff] %v438_v23  ;;  %v440_v24 = vld [vmem:[%s1741_s15 + $0x180] sm:$0xff]  ;;  %v442_v25 = vld [vmem:[%s1741_s15 + $0x190] sm:$0xff] }
  0x25   : > { %v444_v26 = vld [vmem:[%s1741_s15 + $0x1a0] sm:$0xff]  ;;  %441 = vst [vmem:[%s1746_s16 + $0xc0] sm:$0xff] %v440_v24  ;;  %443 = vst [vmem:[%s1746_s16 + $0xc8] sm:$0xff] %v442_v25  ;;  %v446_v27 = vld [vmem:[%s1741_s15 + $0x1b0] sm:$0xff] }
  0x26   : > { %445 = vst [vmem:[%s1746_s16 + $0xd0] sm:$0xff] %v444_v26  ;;  %v448_v28 = vld [vmem:[%s1741_s15 + $0x1c0] sm:$0xff]  ;;  %v450_v29 = vld [vmem:[%s1741_s15 + $0x1d0] sm:$0xff]  ;;  %447 = vst [vmem:[%s1746_s16 + $0xd8] sm:$0xff] %v446_v27 }
  0x27   : > { %449 = vst [vmem:[%s1746_s16 + $0xe0] sm:$0xff] %v448_v28  ;;  %451 = vst [vmem:[%s1746_s16 + $0xe8] sm:$0xff] %v450_v29  ;;  %v452_v30 = vld [vmem:[%s1741_s15 + $0x1e0] sm:$0xff]  ;;  %v454_v31 = vld [vmem:[%s1741_s15 + $0x1f0] sm:$0xff] }
  0x28   : > { %v456_v32 = vld [vmem:[%s1741_s15 + $0x200] sm:$0xff]  ;;  %453 = vst [vmem:[%s1746_s16 + $0xf0] sm:$0xff] %v452_v30  ;;  %455 = vst [vmem:[%s1746_s16 + $0xf8] sm:$0xff] %v454_v31  ;;  %v458_v33 = vld [vmem:[%s1741_s15 + $0x210] sm:$0xff] }
  0x29   : > { %457 = vst [vmem:[%s1746_s16 + $0x100] sm:$0xff] %v456_v32  ;;  %v460_v34 = vld [vmem:[%s1741_s15 + $0x220] sm:$0xff]  ;;  %v462_v35 = vld [vmem:[%s1741_s15 + $0x230] sm:$0xff]  ;;  %459 = vst [vmem:[%s1746_s16 + $0x108] sm:$0xff] %v458_v33 }
  0x2a   : > { %461 = vst [vmem:[%s1746_s16 + $0x110] sm:$0xff] %v460_v34  ;;  %463 = vst [vmem:[%s1746_s16 + $0x118] sm:$0xff] %v462_v35  ;;  %v464_v36 = vld [vmem:[%s1741_s15 + $0x240] sm:$0xff]  ;;  %v466_v37 = vld [vmem:[%s1741_s15 + $0x250] sm:$0xff] }
  0x2b   : > { %v468_v38 = vld [vmem:[%s1741_s15 + $0x260] sm:$0xff]  ;;  %465 = vst [vmem:[%s1746_s16 + $0x120] sm:$0xff] %v464_v36  ;;  %467 = vst [vmem:[%s1746_s16 + $0x128] sm:$0xff] %v466_v37  ;;  %v470_v39 = vld [vmem:[%s1741_s15 + $0x270] sm:$0xff] }
  0x2c   : > { %469 = vst [vmem:[%s1746_s16 + $0x130] sm:$0xff] %v468_v38  ;;  %v472_v40 = vld [vmem:[%s1741_s15 + $0x280] sm:$0xff]  ;;  %v474_v41 = vld [vmem:[%s1741_s15 + $0x290] sm:$0xff]  ;;  %471 = vst [vmem:[%s1746_s16 + $0x138] sm:$0xff] %v470_v39 }
  0x2d   : > { %473 = vst [vmem:[%s1746_s16 + $0x140] sm:$0xff] %v472_v40  ;;  %475 = vst [vmem:[%s1746_s16 + $0x148] sm:$0xff] %v474_v41  ;;  %v476_v42 = vld [vmem:[%s1741_s15 + $0x2a0] sm:$0xff]  ;;  %v478_v43 = vld [vmem:[%s1741_s15 + $0x2b0] sm:$0xff] }
  0x2e   : > { %v480_v44 = vld [vmem:[%s1741_s15 + $0x2c0] sm:$0xff]  ;;  %477 = vst [vmem:[%s1746_s16 + $0x150] sm:$0xff] %v476_v42  ;;  %479 = vst [vmem:[%s1746_s16 + $0x158] sm:$0xff] %v478_v43  ;;  %v482_v45 = vld [vmem:[%s1741_s15 + $0x2d0] sm:$0xff] }
  0x2f   : > { %481 = vst [vmem:[%s1746_s16 + $0x160] sm:$0xff] %v480_v44  ;;  %v484_v46 = vld [vmem:[%s1741_s15 + $0x2e0] sm:$0xff]  ;;  %v486_v47 = vld [vmem:[%s1741_s15 + $0x2f0] sm:$0xff]  ;;  %483 = vst [vmem:[%s1746_s16 + $0x168] sm:$0xff] %v482_v45 }
  0x30   : > { %485 = vst [vmem:[%s1746_s16 + $0x170] sm:$0xff] %v484_v46  ;;  %487 = vst [vmem:[%s1746_s16 + $0x178] sm:$0xff] %v486_v47  ;;  %v488_v48 = vld [vmem:[%s1741_s15 + $0x300] sm:$0xff]  ;;  %v490_v49 = vld [vmem:[%s1741_s15 + $0x310] sm:$0xff] }
  0x31   : > { %v492_v50 = vld [vmem:[%s1741_s15 + $0x320] sm:$0xff]  ;;  %489 = vst [vmem:[%s1746_s16 + $0x180] sm:$0xff] %v488_v48  ;;  %491 = vst [vmem:[%s1746_s16 + $0x188] sm:$0xff] %v490_v49  ;;  %v494_v51 = vld [vmem:[%s1741_s15 + $0x330] sm:$0xff] }
  0x32   : > { %493 = vst [vmem:[%s1746_s16 + $0x190] sm:$0xff] %v492_v50  ;;  %v496_v52 = vld [vmem:[%s1741_s15 + $0x340] sm:$0xff]  ;;  %v498_v53 = vld [vmem:[%s1741_s15 + $0x350] sm:$0xff]  ;;  %495 = vst [vmem:[%s1746_s16 + $0x198] sm:$0xff] %v494_v51 }
  0x33   : > { %497 = vst [vmem:[%s1746_s16 + $0x1a0] sm:$0xff] %v496_v52  ;;  %499 = vst [vmem:[%s1746_s16 + $0x1a8] sm:$0xff] %v498_v53  ;;  %v500_v54 = vld [vmem:[%s1741_s15 + $0x360] sm:$0xff]  ;;  %v502_v55 = vld [vmem:[%s1741_s15 + $0x370] sm:$0xff] }
  0x34   : > { %v504_v56 = vld [vmem:[%s1741_s15 + $0x380] sm:$0xff]  ;;  %501 = vst [vmem:[%s1746_s16 + $0x1b0] sm:$0xff] %v500_v54  ;;  %503 = vst [vmem:[%s1746_s16 + $0x1b8] sm:$0xff] %v502_v55  ;;  %v506_v57 = vld [vmem:[%s1741_s15 + $0x390] sm:$0xff] }
  0x35   : > { %505 = vst [vmem:[%s1746_s16 + $0x1c0] sm:$0xff] %v504_v56  ;;  %v508_v58 = vld [vmem:[%s1741_s15 + $0x3a0] sm:$0xff]  ;;  %v510_v59 = vld [vmem:[%s1741_s15 + $0x3b0] sm:$0xff]  ;;  %507 = vst [vmem:[%s1746_s16 + $0x1c8] sm:$0xff] %v506_v57 }
  0x36   : > { %509 = vst [vmem:[%s1746_s16 + $0x1d0] sm:$0xff] %v508_v58  ;;  %511 = vst [vmem:[%s1746_s16 + $0x1d8] sm:$0xff] %v510_v59  ;;  %v512_v60 = vld [vmem:[%s1741_s15 + $0x3c0] sm:$0xff]  ;;  %v514_v61 = vld [vmem:[%s1741_s15 + $0x3d0] sm:$0xff] }
  0x37   : > { %v516_v62 = vld [vmem:[%s1741_s15 + $0x3e0] sm:$0xff]  ;;  %513 = vst [vmem:[%s1746_s16 + $0x1e0] sm:$0xff] %v512_v60  ;;  %515 = vst [vmem:[%s1746_s16 + $0x1e8] sm:$0xff] %v514_v61  ;;  %v518_v63 = vld [vmem:[%s1741_s15 + $0x3f0] sm:$0xff] }
  0x38   : > { %517 = vst [vmem:[%s1746_s16 + $0x1f0] sm:$0xff] %v516_v62  ;;  %519 = vst [vmem:[%s1746_s16 + $0x1f8] sm:$0xff] %v518_v63 }
  0x39 PF: > { %p1354_p7 = scmp.ge.s32.totalorder %s1648_s24, 1  ;;  %p553_p8 = scmp.lt.s32.totalorder %s1648_s24, 19 }
  0x3b   : > { %p554_p9 = pnand %p1354_p7, %p553_p8 }
  0x3c   : > { %s560_s17 = sand.u32 (!%p554_p9), 1, %s1624_s18   ;;  %s1356_s27 = sshll.u32 (!%p554_p9), %s1632_s20, 2 }
  0x3d   : > { %557 = sbr.rel (%p554_p9) target bundleno = 378 (0x17a), region = 74  ;;  %s1355_s28 = sshll.u32 (!%p554_p9), %s560_s17, 9 }
  0x3e   : > { %p620_p10 = scmp.lt.s32.totalorder (!%p554_p9), %s1356_s27, 35  ;;  %s1358_s29 = sshll.u32 (!%p554_p9), %s1636_s21, 1 }
  0x3f   : > { %p630_p11 = scmp.lt.s32.totalorder (!%p554_p9), %s1358_s29, 3  ;;  %s1904_s8 = scalar_lea.vmem (!%p554_p9), [#allocation3], %s1355_s28 }
  0x40   : > { %p1364_p12 = scmp.ne.s32.totalorder (!%p554_p9), %s1632_s20, 0 }
  0x44   : > { %s2028_s27 = smov (!%p620_p10, %s1356_s27), 35  ;;  %s2030_s29 = smov (!%p630_p11, %s1358_s29), 3 }
  0x45   : > { %s1357_s30 = sshll.u32 %s2028_s27, 2  ;;  %s632_s18 = scalar_lea.vmem %s2011_s2, %s2030_s29  ;;  %v1650_v0 = vmov (!%p1364_p12), 0.0  }
  0x46   : > { %s1881_s9 = scalar_lea.vmem %s2009_s0, %s1357_s30  ;;  %s637_s21 = scalar_lea.vmem %s2012_s3, %s2030_s29  ;;  %663 = vst [vmem:[#allocation2] sm:$0xff] (!%p1364_p12), %v1650_v0  ;;  %664 = vst [vmem:[#allocation2 + $0x8] sm:$0xff] (!%p1364_p12), %v1650_v0 }
  0x47   : > { %s1361_s14 = sshll.u32 %s2030_s29, 3  ;;  %662 = sbr.rel (%p1364_p12) target bundleno = 78 (0x4e), region = 82 }
  0x48   : > { %s1897_s17 = scalar_lea.vmem %s2013_s4, %s1361_s14  ;;  %s1902_s7 = scalar_lea.vmem %s2014_s5, %s1361_s14 }
  0x4e PF: > { %v1494_v1 = vld [vmem:[%s1904_s8 + $0x4] ss:$8 sps:$4 sm:$0xff]   ;;  %v1498_v3 = vld [vmem:[%s1904_s8] ss:$8 sps:$4 sm:$0xff]   ;;  %v1500_v5 = vld [vmem:[%s1904_s8 + $0x14] ss:$8 sps:$4 sm:$0xff]  }
  0x4f   : > { %v1496_v2 = vld [vmem:[%s1904_s8 + $0x104] ss:$8 sps:$4 sm:$0xff]   ;;  %1067 = vmatprep.subr.bf16.mxu0 %v1494_v1  ;;  %v1499_v4 = vld [vmem:[%s1904_s8 + $0x100] ss:$8 sps:$4 sm:$0xff]   ;;  %v1502_v6 = vld [vmem:[%s1904_s8 + $0x114] ss:$8 sps:$4 sm:$0xff]  }
  0x50   : > { %1108 = vmatprep.subr.bf16.mxu1 %v1496_v2  ;;  %1068 = vmatpush1.bf16.msra.mxu0 %v1498_v3  ;;  %v1504_v7 = vld [vmem:[%s1904_s8 + $0x10] ss:$8 sps:$4 sm:$0xff]   ;;  %v1506_v9 = vld [vmem:[%s1904_s8 + $0x24] ss:$8 sps:$4 sm:$0xff]   ;;  %v1510_v11 = vld [vmem:[%s1904_s8 + $0x20] ss:$8 sps:$4 sm:$0xff]  }
  0x51   : > { %1109 = vmatpush1.bf16.msra.mxu1 %v1499_v4  ;;  %1069 = vmatprep.subr.bf16.mxu0 %v1500_v5  ;;  %v1505_v8 = vld [vmem:[%s1904_s8 + $0x110] ss:$8 sps:$4 sm:$0xff]   ;;  %v1508_v10 = vld [vmem:[%s1904_s8 + $0x124] ss:$8 sps:$4 sm:$0xff]   ;;  %v1511_v12 = vld [vmem:[%s1904_s8 + $0x120] ss:$8 sps:$4 sm:$0xff]  }
  0x52   : > { %1110 = vmatprep.subr.bf16.mxu1 %v1502_v6  ;;  %v1512_v13 = vld [vmem:[%s1904_s8 + $0x34] ss:$8 sps:$4 sm:$0xff]   ;;  %v1516_v15 = vld [vmem:[%s1904_s8 + $0x30] ss:$8 sps:$4 sm:$0xff]   ;;  %v1518_v17 = vld [vmem:[%s1904_s8 + $0x44] ss:$8 sps:$4 sm:$0xff]  }
  0x53   : > { %v1514_v14 = vld [vmem:[%s1904_s8 + $0x134] ss:$8 sps:$4 sm:$0xff]   ;;  %v1517_v16 = vld [vmem:[%s1904_s8 + $0x130] ss:$8 sps:$4 sm:$0xff]   ;;  %v1520_v18 = vld [vmem:[%s1904_s8 + $0x144] ss:$8 sps:$4 sm:$0xff]  }
  0x54   : > { %1070 = vmatpush1.bf16.msra.mxu0 %v1504_v7  ;;  %v1522_v19 = vld [vmem:[%s1904_s8 + $0x40] ss:$8 sps:$4 sm:$0xff]   ;;  %v1524_v21 = vld [vmem:[%s1904_s8 + $0x54] ss:$8 sps:$4 sm:$0xff]   ;;  %v1528_v23 = vld [vmem:[%s1904_s8 + $0x50] ss:$8 sps:$4 sm:$0xff]  }
  0x55   : > { %1111 = vmatpush1.bf16.msra.mxu1 %v1505_v8  ;;  %1071 = vmatprep.subr.bf16.mxu0 %v1506_v9  ;;  %v1523_v20 = vld [vmem:[%s1904_s8 + $0x140] ss:$8 sps:$4 sm:$0xff]   ;;  %v1526_v22 = vld [vmem:[%s1904_s8 + $0x154] ss:$8 sps:$4 sm:$0xff]   ;;  %v1529_v24 = vld [vmem:[%s1904_s8 + $0x150] ss:$8 sps:$4 sm:$0xff]  }
  0x56   : > { %1112 = vmatprep.subr.bf16.mxu1 %v1508_v10  ;;  %v1530_v25 = vld [vmem:[%s1904_s8 + $0x64] ss:$8 sps:$4 sm:$0xff]   ;;  %v1534_v27 = vld [vmem:[%s1904_s8 + $0x60] ss:$8 sps:$4 sm:$0xff]   ;;  %v1536_v29 = vld [vmem:[%s1904_s8 + $0x74] ss:$8 sps:$4 sm:$0xff]  }
  0x57   : > { %v1532_v26 = vld [vmem:[%s1904_s8 + $0x164] ss:$8 sps:$4 sm:$0xff]   ;;  %v1535_v28 = vld [vmem:[%s1904_s8 + $0x160] ss:$8 sps:$4 sm:$0xff]   ;;  %v1538_v30 = vld [vmem:[%s1904_s8 + $0x174] ss:$8 sps:$4 sm:$0xff]  }
  0x58   : > { %1072 = vmatpush1.bf16.msra.mxu0 %v1510_v11  ;;  %v1540_v31 = vld [vmem:[%s1904_s8 + $0x70] ss:$8 sps:$4 sm:$0xff]   ;;  %v1542_v33 = vld [vmem:[%s1904_s8 + $0x84] ss:$8 sps:$4 sm:$0xff]   ;;  %v1546_v35 = vld [vmem:[%s1904_s8 + $0x80] ss:$8 sps:$4 sm:$0xff]  }
  0x59   : > { %1113 = vmatpush1.bf16.msra.mxu1 %v1511_v12  ;;  %1073 = vmatprep.subr.bf16.mxu0 %v1512_v13  ;;  %v1541_v32 = vld [vmem:[%s1904_s8 + $0x170] ss:$8 sps:$4 sm:$0xff]   ;;  %v1544_v34 = vld [vmem:[%s1904_s8 + $0x184] ss:$8 sps:$4 sm:$0xff]   ;;  %v1547_v36 = vld [vmem:[%s1904_s8 + $0x180] ss:$8 sps:$4 sm:$0xff]  }
  0x5a   : > { %1114 = vmatprep.subr.bf16.mxu1 %v1514_v14  ;;  %v1548_v37 = vld [vmem:[%s1904_s8 + $0x94] ss:$8 sps:$4 sm:$0xff]   ;;  %v1552_v39 = vld [vmem:[%s1904_s8 + $0x90] ss:$8 sps:$4 sm:$0xff]   ;;  %v1554_v41 = vld [vmem:[%s1904_s8 + $0xa4] ss:$8 sps:$4 sm:$0xff]  }
  0x5b   : > { %v1550_v38 = vld [vmem:[%s1904_s8 + $0x194] ss:$8 sps:$4 sm:$0xff]   ;;  %v1553_v40 = vld [vmem:[%s1904_s8 + $0x190] ss:$8 sps:$4 sm:$0xff]   ;;  %v1556_v42 = vld [vmem:[%s1904_s8 + $0x1a4] ss:$8 sps:$4 sm:$0xff]  }
  0x5c   : > { %1074 = vmatpush1.bf16.msra.mxu0 %v1516_v15  ;;  %v1558_v43 = vld [vmem:[%s1904_s8 + $0xa0] ss:$8 sps:$4 sm:$0xff]   ;;  %v1560_v45 = vld [vmem:[%s1904_s8 + $0xb4] ss:$8 sps:$4 sm:$0xff]   ;;  %v1564_v50 = vld [vmem:[%s1904_s8 + $0xb0] ss:$8 sps:$4 sm:$0xff]  }
  0x5d   : > { %1115 = vmatpush1.bf16.msra.mxu1 %v1517_v16  ;;  %1075 = vmatprep.subr.bf16.mxu0 %v1518_v17  ;;  %v1559_v44 = vld [vmem:[%s1904_s8 + $0x1a0] ss:$8 sps:$4 sm:$0xff]   ;;  %v1562_v46 = vld [vmem:[%s1904_s8 + $0x1b4] ss:$8 sps:$4 sm:$0xff]   ;;  %v1565_v51 = vld [vmem:[%s1904_s8 + $0x1b0] ss:$8 sps:$4 sm:$0xff]  }
  0x5e   : > { %1116 = vmatprep.subr.bf16.mxu1 %v1520_v18  ;;  %v667_v47 = vld [vmem:[%s1881_s9] sm:$0xff]  ;;  %v668_v49 = vld [vmem:[%s1881_s9 + $0x8] sm:$0xff]  ;;  %v1566_v53 = vld [vmem:[%s1904_s8 + $0xc4] ss:$8 sps:$4 sm:$0xff]   ;;  %p1433_p13 = scmp.ne.s32.totalorder %s1632_s20, 8 }
  0x5f   : > { %v1366_v48 = vcombine.high %v667_v47, %v667_v47  ;;  %v1368_v52 = vcombine.high %v668_v49, %v668_v49  ;;  %v1568_v54 = vld [vmem:[%s1904_s8 + $0x1c4] ss:$8 sps:$4 sm:$0xff]   ;;  %v1570_v55 = vld [vmem:[%s1904_s8 + $0xc0] ss:$8 sps:$4 sm:$0xff]   ;;  %v1572_v57 = vld [vmem:[%s1904_s8 + $0xd4] ss:$8 sps:$4 sm:$0xff]   ;;  %v1365_v5 = vcombine.low %v667_v47, %v667_v47  ;;  %v1367_v6 = vcombine.low %v668_v49, %v668_v49 }
  0x60   : > { %1076 = vmatpush1.bf16.msra.mxu0 %v1522_v19  ;;  %v1571_v56 = vld [vmem:[%s1904_s8 + $0x1c0] ss:$8 sps:$4 sm:$0xff]   ;;  %v1574_v58 = vld [vmem:[%s1904_s8 + $0x1d4] ss:$8 sps:$4 sm:$0xff]   ;;  %v1576_v59 = vld [vmem:[%s1904_s8 + $0xd0] ss:$8 sps:$4 sm:$0xff]  }
  0x61   : > { %1117 = vmatpush1.bf16.msra.mxu1 %v1523_v20  ;;  %1077 = vmatprep.subr.bf16.mxu0 %v1524_v21  ;;  %v1577_v60 = vld [vmem:[%s1904_s8 + $0x1d0] ss:$8 sps:$4 sm:$0xff]   ;;  %v1578_v61 = vld [vmem:[%s1904_s8 + $0xe4] ss:$8 sps:$4 sm:$0xff]   ;;  %v1582_v63 = vld [vmem:[%s1904_s8 + $0xe0] ss:$8 sps:$4 sm:$0xff]   ;;  %v1161_v21 = vlaneseq (!%p1433_p13) }
  0x62   : > { %1118 = vmatprep.subr.bf16.mxu1 %v1526_v22  ;;  %1099 = vmatprep.mubr.bf16.mxu0 %v1366_v48  ;;  %v1580_v62 = vld [vmem:[%s1904_s8 + $0x1e4] ss:$8 sps:$4 sm:$0xff]   ;;  %v1583_v0 = vld [vmem:[%s1904_s8 + $0x1e0] ss:$8 sps:$4 sm:$0xff]   ;;  %v1584_v1 = vld [vmem:[%s1904_s8 + $0xf4] ss:$8 sps:$4 sm:$0xff]  }
  0x63   : > { %1140 = vmatprep.mubr.bf16.mxu1 %v1368_v52  ;;  %v1586_v2 = vld [vmem:[%s1904_s8 + $0x1f4] ss:$8 sps:$4 sm:$0xff]   ;;  %v1588_v3 = vld [vmem:[%s1904_s8 + $0xf0] ss:$8 sps:$4 sm:$0xff]   ;;  %v1162_v22 = vshrl.u32 (!%p1433_p13), %v1161_v21, 7 }
  0x64   : > { %1078 = vmatpush1.bf16.msra.mxu0 %v1528_v23  ;;  %v1589_v4 = vld [vmem:[%s1904_s8 + $0x1f0] ss:$8 sps:$4 sm:$0xff]  }
  0x65   : > { %1119 = vmatpush1.bf16.msra.mxu1 %v1529_v24  ;;  %1079 = vmatprep.subr.bf16.mxu0 %v1530_v25  ;;  %v665_v8 = vld [vmem:[#allocation2] sm:$0xff]  ;;  %v666_v12 = vld [vmem:[#allocation2 + $0x8] sm:$0xff]  ;;  %v1163_v25 = vsub.s32 (!%p1433_p13), 0, %v1162_v22 }
  0x66   : > { %1120 = vmatprep.subr.bf16.mxu1 %v1532_v26  ;;  %v1159_v23 = vld [vmem:[%s632_s18] sm:$0x3] (!%p1433_p13)  ;;  %v1167_v26 = vsub.s32 (!%p1433_p13), 1, %v1162_v22 }
  0x67   : > { %v1173_v24 = vld [vmem:[%s637_s21] sm:$0x3] (!%p1433_p13) }
  0x68   : > { %1080 = vmatpush1.bf16.msra.mxu0 %v1534_v27 }
  0x69   : > { %1121 = vmatpush1.bf16.msra.mxu1 %v1535_v28  ;;  %1081 = vmatprep.subr.bf16.mxu0 %v1536_v29  ;;  %v1164_v29 = vrot.slane (!%p1433_p13), %v1159_v23, %v1163_v25 }
  0x6a   : > { %1122 = vmatprep.subr.bf16.mxu1 %v1538_v30  ;;  %v1178_v30 = vrot.slane (!%p1433_p13), %v1173_v24, %v1163_v25 }
  0x6c   : > { %1082 = vmatpush1.bf16.msra.mxu0 %v1540_v31  ;;  %v1168_v31 = vrot.slane (!%p1433_p13), %v1159_v23, %v1167_v26 }
  0x6d   : > { %1123 = vmatpush1.bf16.msra.mxu1 %v1541_v32  ;;  %1083 = vmatprep.subr.bf16.mxu0 %v1542_v33  ;;  %v1182_v32 = vrot.slane (!%p1433_p13), %v1173_v24, %v1167_v26 }
  0x6e   : > { %1124 = vmatprep.subr.bf16.mxu1 %v1544_v34 }
  0x70   : > { %1084 = vmatpush1.bf16.msra.mxu0 %v1546_v35  ;;  %v1187_v35 = vld [vmem:[%s1897_s17] sm:$0xff] (!%p1433_p13) }
  0x71   : > { %1125 = vmatpush1.bf16.msra.mxu1 %v1547_v36  ;;  %1085 = vmatprep.subr.bf16.mxu0 %v1548_v37  ;;  %v1188_v36 = vld [vmem:[%s1897_s17 + $0x8] sm:$0xff] (!%p1433_p13) }
  0x72   : > { %1126 = vmatprep.subr.bf16.mxu1 %v1550_v38 }
  0x74   : > { %1086 = vmatpush1.bf16.msra.mxu0 %v1552_v39 }
  0x75   : > { %1127 = vmatpush1.bf16.msra.mxu1 %v1553_v40  ;;  %1087 = vmatprep.subr.bf16.mxu0 %v1554_v41 }
  0x76   : > { %1128 = vmatprep.subr.bf16.mxu1 %v1556_v42 }
  0x78   : > { %1088 = vmatpush1.bf16.msra.mxu0 %v1558_v43 }
  0x79   : > { %1129 = vmatpush1.bf16.msra.mxu1 %v1559_v44  ;;  %1089 = vmatprep.subr.bf16.mxu0 %v1560_v45 }
  0x7a   : > { %1130 = vmatprep.subr.bf16.mxu1 %v1562_v46 }
  0x7c   : > { %1090 = vmatpush1.bf16.msra.mxu0 %v1564_v50 }
  0x7d   : > { %1131 = vmatpush1.bf16.msra.mxu1 %v1565_v51  ;;  %1091 = vmatprep.subr.bf16.mxu0 %v1566_v53 }
  0x7e   : > { %1132 = vmatprep.subr.bf16.mxu1 %v1568_v54 }
  0x80   : > { %1092 = vmatpush1.bf16.msra.mxu0 %v1570_v55 }
  0x81   : > { %1133 = vmatpush1.bf16.msra.mxu1 %v1571_v56  ;;  %1093 = vmatprep.subr.bf16.mxu0 %v1572_v57 }
  0x82   : > { %1134 = vmatprep.subr.bf16.mxu1 %v1574_v58 }
  0x84   : > { %1094 = vmatpush1.bf16.msra.mxu0 %v1576_v59 }
  0x85   : > { %1135 = vmatpush1.bf16.msra.mxu1 %v1577_v60  ;;  %1095 = vmatprep.subr.bf16.mxu0 %v1578_v61 }
  0x86   : > { %1136 = vmatprep.subr.bf16.mxu1 %v1580_v62 }
  0x88   : > { %1096 = vmatpush1.bf16.msra.mxu0 %v1582_v63 }
  0x89   : > { %1137 = vmatpush1.bf16.msra.mxu1 %v1583_v0  ;;  %1097 = vmatprep.subr.bf16.mxu0 %v1584_v1 }
  0x8a   : > { %1138 = vmatprep.subr.bf16.mxu1 %v1586_v2 }
  0x8c   : > { %1098 = vmatpush1.bf16.msra.mxu0 %v1588_v3 }
  0x8d   : > { %1139 = vmatpush1.bf16.msra.mxu1 %v1589_v4 }
  0x8f   : > { %1100 = vmatmul.mubr.bf16.vlgmr.msra.gmra.mrb[0].mxu0 %v1365_v5 }
  0x90   : > { %1141 = vmatmul.mubr.bf16.vlgmr.msra.gmra.mrb[0].mxu1 %v1367_v6 }
 0x162   : > { %v1101_v7 = vpop.f32.mrb[0].mxu0 }
 0x163   : > { %v1142_v9 = vpop.f32.mrb[0].mxu1  ;;  %v1103_v11 = vpop.f32.mrb[1].mxu0  ;;  %1156 = sbr.rel (%p1433_p13) target bundleno = 378 (0x17a), region = 86 }
 0x164   : > { %v1143_v10 = vadd.f32 %v1142_v9, %v1101_v7  ;;  %v1144_v13 = vpop.f32.mrb[1].mxu1  ;;  %v1105_v15 = vpop.f32.mrb[2].mxu0 }
 0x165   : > { %v1145_v14 = vadd.f32 %v1144_v13, %v1103_v11  ;;  %v1146_v16 = vpop.f32.mrb[2].mxu1  ;;  %v1106_v18 = vpop.f32.mrb[3].mxu0 }
 0x166   : > { %v1149_v17 = vadd.f32 %v1143_v10, %v665_v8  ;;  %v1147_v19 = vpop.f32.mrb[3].mxu1 }
 0x167   : > { %v1150_v20 = vadd.f32 %v1145_v14, %v666_v12 }
 0x168   : > { %1151 = vst [vmem:[#allocation2] sm:$0xff] %v1149_v17 }
 0x169   : > { %1152 = vst [vmem:[#allocation2 + $0x8] sm:$0xff] %v1150_v20 }
 0x16f   : > { %v1157_v27 = vld [vmem:[#allocation2] sm:$0xff] }
 0x170   : > { %v1158_v28 = vld [vmem:[#allocation2 + $0x8] sm:$0xff]  ;;  %v1171_v33 = vmul.f32 %v1164_v29, %v1157_v27 }
 0x171   : > { %v1172_v34 = vmul.f32 %v1168_v31, %v1158_v28 }
 0x172   : > { %v1185_v37 = vadd.f32 %v1178_v30, %v1171_v33 }
 0x173   : > { %v1186_v38 = vadd.f32 %v1182_v32, %v1172_v34 }
 0x174   : > { %v1189_v39 = vadd.f32 %v1187_v35, %v1185_v37 }
 0x175   : > { %v1190_v40 = vadd.f32 %v1188_v36, %v1186_v38 }
 0x176   : > { %v1191_v41 = vmax.f32 %v1189_v39, 0.0 }
 0x177   : > { %v1192_v42 = vmax.f32 %v1190_v40, 0.0 }
 0x178   : > { %1193 = vst [vmem:[%s1902_s7] sm:$0xff] %v1191_v41 }
 0x179   : > { %1194 = vst [vmem:[%s1902_s7 + $0x8] sm:$0xff] %v1192_v42 }
 0x17a PF: > { %s15_s24 = sadd.s32 1, %s1648_s24   ;;  %s2015_s18 = smov %s1628_s19 }
 0x17b   : > { %p12_p0 = scmp.ge.s32.totalorder %s15_s24, 20   ;;  %s2016_s19 = smov %s1732_s6 }
 0x17c   : > { %s2017_s20 = smov %s1640_s22  ;;  %s2018_s21 = smov %s1644_s23 }
 0x17d   : > { %s2019_s22 = smov %s2022_s25  ;;  %s2020_s23 = smov %s2026_s26 }
 0x17e   :  { %14 = sbr.rel (!%p12_p0) target bundleno = 4 (0x4), region = 133 }

// kernel: resnet18_forward.42
= control target key start
LH: loop header
LB: loop body
LE: loop exit
PB: predicated region body
PF: predicated region fallthrough
CT: control target
= control target key end

     0   :  { %s1589_s15 = smov 0   ;;  %s1591_s16 = smov 0   ;;  %s1910_s0 = inlined_call_operand.vmem [shape: bf16[8,4608], index: 0, kind: input, shape index: {}]   ;;  %s1911_s1 = inlined_call_operand.vmem [shape: bf16[4608,512], index: 1, kind: input, shape index: {}]   ;;  %s1912_s2 = inlined_call_operand.vmem [shape: f32[1,512], index: 2, kind: input, shape index: {}]   ;;  %s1913_s3 = inlined_call_operand.vmem [shape: f32[1,512], index: 3, kind: input, shape index: {}]   ;;  %s1914_s4 = inlined_call_operand.vmem [shape: f32[8,512], index: 4, kind: output, shape index: {}]  }
   0x1   :  { %s1593_s17 = smov 0   ;;  %s1595_s18 = smov 0  }
   0x2   :  { %s1597_s19 = smov 0   ;;  %s1599_s20 = smov 0  }
   0x3   :  { %s1601_s21 = smov 0  }
   0x4 LB: > { %s26_s22 = sadd.s32 1, %s1553_s19  ;;  %s29_s23 = sadd.s32 1, %s1557_s20  ;;  %s1561_s21 = sphi %s1601_s21, %s14_s21   ;;  %s1557_s20 = sphi %s1599_s20, %s1920_s20   ;;  %s1553_s19 = sphi %s1597_s19, %s1919_s19   ;;  %s1549_s18 = sphi %s1595_s18, %s1918_s18   ;;  %s1545_s17 = sphi %s1593_s17, %s1917_s17   ;;  %s1541_s16 = sphi %s1591_s16, %s1916_s16   ;;  %s1537_s15 = sphi %s1589_s15, %s1915_s15  }
   0x5   : > { %p27_p0 = scmp.ge.s32.totalorder %s26_s22, 9  ;;  %p77_p1 = scmp.ne.s32.totalorder %s1541_s16, %s1537_s15 }
   0x6   : > { %p78_p2 = scmp.eq.s32.totalorder %s1561_s21, 0  ;;  %s70_s27 = sadd.s32 1, %s1541_s16 }
   0x7   : > { %s1922_s22 = smov (%p27_p0, %s26_s22), 0  ;;  %s1924_s23 = smov (!%p27_p0, %s29_s23), %s1557_s20 }
   0x8   : > { %p79_p3 = por %p78_p2, %p77_p1  ;;  %p31_p4 = scmp.ge.s32.totalorder %s1924_s23, 2 }
   0x9   : > { %s65_s24 = ssub.s32 %s1553_s19, %s1922_s22  ;;  %p1263_p6 = scmp.ge.s32.totalorder %s1561_s21, 18 }
   0xa   : > { %s1926_s23 = smov (%p31_p4, %s1924_s23), 0 }
   0xb   : > { %s66_s25 = ssub.s32 %s1557_s20, %s1926_s23  ;;  %183 = sbr.rel (%p1263_p6) target bundleno = 57 (0x39), region = 16 }
   0xc   : > { %s67_s26 = sor.u32 %s66_s25, %s65_s24 }
   0xd   : > { %p68_p5 = scmp.eq.s32.totalorder %s67_s26, 0 }
   0xf   : > { %s1640_s28 = scalar_select %p68_p5, %s1541_s16, %s70_s27  }
  0x12   : > { %199 = sbr.rel (!%p79_p3) target bundleno = 57 (0x39), region = 24  ;;  %s201_s29 = sand.u32 (%p79_p3), 1, %s1541_s16  }
  0x13   : > { %s1266_s30 = sshll.u32 (%p79_p3), %s1557_s20, 1  ;;  %s1264_s5 = sshll.u32 (%p79_p3), %s201_s29, 9 }
  0x14   : > { %s1349_s6 = sshll.u32 (%p79_p3), %s1553_s19, 8  ;;  %s1654_s12 = scalar_lea.vmem (%p79_p3), [#allocation3], %s1264_s5 }
  0x15   : > { %s207_s7 = sadd.s32 (%p79_p3), %s1349_s6, %s1266_s30 }
  0x16   : > { %s1268_s8 = sshll.u32 (%p79_p3), %s207_s7, 2 }
  0x17   : > { %s1649_s11 = scalar_lea.vmem (%p79_p3), %s1911_s1, %s1268_s8 }
  0x18   : > { %v363_v0 = vld [vmem:[%s1649_s11] sm:$0xff] (%p79_p3)  ;;  %v365_v1 = vld [vmem:[%s1649_s11 + $0x10] sm:$0xff] (%p79_p3) }
  0x19   : > { %v367_v2 = vld [vmem:[%s1649_s11 + $0x20] sm:$0xff]  ;;  %364 = vst [vmem:[%s1654_s12] sm:$0xff] %v363_v0  ;;  %366 = vst [vmem:[%s1654_s12 + $0x8] sm:$0xff] %v365_v1  ;;  %v369_v3 = vld [vmem:[%s1649_s11 + $0x30] sm:$0xff] }
  0x1a   : > { %368 = vst [vmem:[%s1654_s12 + $0x10] sm:$0xff] %v367_v2  ;;  %v371_v4 = vld [vmem:[%s1649_s11 + $0x40] sm:$0xff]  ;;  %v373_v5 = vld [vmem:[%s1649_s11 + $0x50] sm:$0xff]  ;;  %370 = vst [vmem:[%s1654_s12 + $0x18] sm:$0xff] %v369_v3 }
  0x1b   : > { %372 = vst [vmem:[%s1654_s12 + $0x20] sm:$0xff] %v371_v4  ;;  %374 = vst [vmem:[%s1654_s12 + $0x28] sm:$0xff] %v373_v5  ;;  %v375_v6 = vld [vmem:[%s1649_s11 + $0x60] sm:$0xff]  ;;  %v377_v7 = vld [vmem:[%s1649_s11 + $0x70] sm:$0xff] }
  0x1c   : > { %v379_v8 = vld [vmem:[%s1649_s11 + $0x80] sm:$0xff]  ;;  %376 = vst [vmem:[%s1654_s12 + $0x30] sm:$0xff] %v375_v6  ;;  %378 = vst [vmem:[%s1654_s12 + $0x38] sm:$0xff] %v377_v7  ;;  %v381_v9 = vld [vmem:[%s1649_s11 + $0x90] sm:$0xff] }
  0x1d   : > { %380 = vst [vmem:[%s1654_s12 + $0x40] sm:$0xff] %v379_v8  ;;  %v383_v10 = vld [vmem:[%s1649_s11 + $0xa0] sm:$0xff]  ;;  %v385_v11 = vld [vmem:[%s1649_s11 + $0xb0] sm:$0xff]  ;;  %382 = vst [vmem:[%s1654_s12 + $0x48] sm:$0xff] %v381_v9 }
  0x1e   : > { %384 = vst [vmem:[%s1654_s12 + $0x50] sm:$0xff] %v383_v10  ;;  %386 = vst [vmem:[%s1654_s12 + $0x58] sm:$0xff] %v385_v11  ;;  %v387_v12 = vld [vmem:[%s1649_s11 + $0xc0] sm:$0xff]  ;;  %v389_v13 = vld [vmem:[%s1649_s11 + $0xd0] sm:$0xff] }
  0x1f   : > { %v391_v14 = vld [vmem:[%s1649_s11 + $0xe0] sm:$0xff]  ;;  %388 = vst [vmem:[%s1654_s12 + $0x60] sm:$0xff] %v387_v12  ;;  %390 = vst [vmem:[%s1654_s12 + $0x68] sm:$0xff] %v389_v13  ;;  %v393_v15 = vld [vmem:[%s1649_s11 + $0xf0] sm:$0xff] }
  0x20   : > { %392 = vst [vmem:[%s1654_s12 + $0x70] sm:$0xff] %v391_v14  ;;  %v395_v16 = vld [vmem:[%s1649_s11 + $0x100] sm:$0xff]  ;;  %v397_v17 = vld [vmem:[%s1649_s11 + $0x110] sm:$0xff]  ;;  %394 = vst [vmem:[%s1654_s12 + $0x78] sm:$0xff] %v393_v15 }
  0x21   : > { %396 = vst [vmem:[%s1654_s12 + $0x80] sm:$0xff] %v395_v16  ;;  %398 = vst [vmem:[%s1654_s12 + $0x88] sm:$0xff] %v397_v17  ;;  %v399_v18 = vld [vmem:[%s1649_s11 + $0x120] sm:$0xff]  ;;  %v401_v19 = vld [vmem:[%s1649_s11 + $0x130] sm:$0xff] }
  0x22   : > { %v403_v20 = vld [vmem:[%s1649_s11 + $0x140] sm:$0xff]  ;;  %400 = vst [vmem:[%s1654_s12 + $0x90] sm:$0xff] %v399_v18  ;;  %402 = vst [vmem:[%s1654_s12 + $0x98] sm:$0xff] %v401_v19  ;;  %v405_v21 = vld [vmem:[%s1649_s11 + $0x150] sm:$0xff] }
  0x23   : > { %404 = vst [vmem:[%s1654_s12 + $0xa0] sm:$0xff] %v403_v20  ;;  %v407_v22 = vld [vmem:[%s1649_s11 + $0x160] sm:$0xff]  ;;  %v409_v23 = vld [vmem:[%s1649_s11 + $0x170] sm:$0xff]  ;;  %406 = vst [vmem:[%s1654_s12 + $0xa8] sm:$0xff] %v405_v21 }
  0x24   : > { %408 = vst [vmem:[%s1654_s12 + $0xb0] sm:$0xff] %v407_v22  ;;  %410 = vst [vmem:[%s1654_s12 + $0xb8] sm:$0xff] %v409_v23  ;;  %v411_v24 = vld [vmem:[%s1649_s11 + $0x180] sm:$0xff]  ;;  %v413_v25 = vld [vmem:[%s1649_s11 + $0x190] sm:$0xff] }
  0x25   : > { %v415_v26 = vld [vmem:[%s1649_s11 + $0x1a0] sm:$0xff]  ;;  %412 = vst [vmem:[%s1654_s12 + $0xc0] sm:$0xff] %v411_v24  ;;  %414 = vst [vmem:[%s1654_s12 + $0xc8] sm:$0xff] %v413_v25  ;;  %v417_v27 = vld [vmem:[%s1649_s11 + $0x1b0] sm:$0xff] }
  0x26   : > { %416 = vst [vmem:[%s1654_s12 + $0xd0] sm:$0xff] %v415_v26  ;;  %v419_v28 = vld [vmem:[%s1649_s11 + $0x1c0] sm:$0xff]  ;;  %v421_v29 = vld [vmem:[%s1649_s11 + $0x1d0] sm:$0xff]  ;;  %418 = vst [vmem:[%s1654_s12 + $0xd8] sm:$0xff] %v417_v27 }
  0x27   : > { %420 = vst [vmem:[%s1654_s12 + $0xe0] sm:$0xff] %v419_v28  ;;  %422 = vst [vmem:[%s1654_s12 + $0xe8] sm:$0xff] %v421_v29  ;;  %v423_v30 = vld [vmem:[%s1649_s11 + $0x1e0] sm:$0xff]  ;;  %v425_v31 = vld [vmem:[%s1649_s11 + $0x1f0] sm:$0xff] }
  0x28   : > { %v427_v32 = vld [vmem:[%s1649_s11 + $0x200] sm:$0xff]  ;;  %424 = vst [vmem:[%s1654_s12 + $0xf0] sm:$0xff] %v423_v30  ;;  %426 = vst [vmem:[%s1654_s12 + $0xf8] sm:$0xff] %v425_v31  ;;  %v429_v33 = vld [vmem:[%s1649_s11 + $0x210] sm:$0xff] }
  0x29   : > { %428 = vst [vmem:[%s1654_s12 + $0x100] sm:$0xff] %v427_v32  ;;  %v431_v34 = vld [vmem:[%s1649_s11 + $0x220] sm:$0xff]  ;;  %v433_v35 = vld [vmem:[%s1649_s11 + $0x230] sm:$0xff]  ;;  %430 = vst [vmem:[%s1654_s12 + $0x108] sm:$0xff] %v429_v33 }
  0x2a   : > { %432 = vst [vmem:[%s1654_s12 + $0x110] sm:$0xff] %v431_v34  ;;  %434 = vst [vmem:[%s1654_s12 + $0x118] sm:$0xff] %v433_v35  ;;  %v435_v36 = vld [vmem:[%s1649_s11 + $0x240] sm:$0xff]  ;;  %v437_v37 = vld [vmem:[%s1649_s11 + $0x250] sm:$0xff] }
  0x2b   : > { %v439_v38 = vld [vmem:[%s1649_s11 + $0x260] sm:$0xff]  ;;  %436 = vst [vmem:[%s1654_s12 + $0x120] sm:$0xff] %v435_v36  ;;  %438 = vst [vmem:[%s1654_s12 + $0x128] sm:$0xff] %v437_v37  ;;  %v441_v39 = vld [vmem:[%s1649_s11 + $0x270] sm:$0xff] }
  0x2c   : > { %440 = vst [vmem:[%s1654_s12 + $0x130] sm:$0xff] %v439_v38  ;;  %v443_v40 = vld [vmem:[%s1649_s11 + $0x280] sm:$0xff]  ;;  %v445_v41 = vld [vmem:[%s1649_s11 + $0x290] sm:$0xff]  ;;  %442 = vst [vmem:[%s1654_s12 + $0x138] sm:$0xff] %v441_v39 }
  0x2d   : > { %444 = vst [vmem:[%s1654_s12 + $0x140] sm:$0xff] %v443_v40  ;;  %446 = vst [vmem:[%s1654_s12 + $0x148] sm:$0xff] %v445_v41  ;;  %v447_v42 = vld [vmem:[%s1649_s11 + $0x2a0] sm:$0xff]  ;;  %v449_v43 = vld [vmem:[%s1649_s11 + $0x2b0] sm:$0xff] }
  0x2e   : > { %v451_v44 = vld [vmem:[%s1649_s11 + $0x2c0] sm:$0xff]  ;;  %448 = vst [vmem:[%s1654_s12 + $0x150] sm:$0xff] %v447_v42  ;;  %450 = vst [vmem:[%s1654_s12 + $0x158] sm:$0xff] %v449_v43  ;;  %v453_v45 = vld [vmem:[%s1649_s11 + $0x2d0] sm:$0xff] }
  0x2f   : > { %452 = vst [vmem:[%s1654_s12 + $0x160] sm:$0xff] %v451_v44  ;;  %v455_v46 = vld [vmem:[%s1649_s11 + $0x2e0] sm:$0xff]  ;;  %v457_v47 = vld [vmem:[%s1649_s11 + $0x2f0] sm:$0xff]  ;;  %454 = vst [vmem:[%s1654_s12 + $0x168] sm:$0xff] %v453_v45 }
  0x30   : > { %456 = vst [vmem:[%s1654_s12 + $0x170] sm:$0xff] %v455_v46  ;;  %458 = vst [vmem:[%s1654_s12 + $0x178] sm:$0xff] %v457_v47  ;;  %v459_v48 = vld [vmem:[%s1649_s11 + $0x300] sm:$0xff]  ;;  %v461_v49 = vld [vmem:[%s1649_s11 + $0x310] sm:$0xff] }
  0x31   : > { %v463_v50 = vld [vmem:[%s1649_s11 + $0x320] sm:$0xff]  ;;  %460 = vst [vmem:[%s1654_s12 + $0x180] sm:$0xff] %v459_v48  ;;  %462 = vst [vmem:[%s1654_s12 + $0x188] sm:$0xff] %v461_v49  ;;  %v465_v51 = vld [vmem:[%s1649_s11 + $0x330] sm:$0xff] }
  0x32   : > { %464 = vst [vmem:[%s1654_s12 + $0x190] sm:$0xff] %v463_v50  ;;  %v467_v52 = vld [vmem:[%s1649_s11 + $0x340] sm:$0xff]  ;;  %v469_v53 = vld [vmem:[%s1649_s11 + $0x350] sm:$0xff]  ;;  %466 = vst [vmem:[%s1654_s12 + $0x198] sm:$0xff] %v465_v51 }
  0x33   : > { %468 = vst [vmem:[%s1654_s12 + $0x1a0] sm:$0xff] %v467_v52  ;;  %470 = vst [vmem:[%s1654_s12 + $0x1a8] sm:$0xff] %v469_v53  ;;  %v471_v54 = vld [vmem:[%s1649_s11 + $0x360] sm:$0xff]  ;;  %v473_v55 = vld [vmem:[%s1649_s11 + $0x370] sm:$0xff] }
  0x34   : > { %v475_v56 = vld [vmem:[%s1649_s11 + $0x380] sm:$0xff]  ;;  %472 = vst [vmem:[%s1654_s12 + $0x1b0] sm:$0xff] %v471_v54  ;;  %474 = vst [vmem:[%s1654_s12 + $0x1b8] sm:$0xff] %v473_v55  ;;  %v477_v57 = vld [vmem:[%s1649_s11 + $0x390] sm:$0xff] }
  0x35   : > { %476 = vst [vmem:[%s1654_s12 + $0x1c0] sm:$0xff] %v475_v56  ;;  %v479_v58 = vld [vmem:[%s1649_s11 + $0x3a0] sm:$0xff]  ;;  %v481_v59 = vld [vmem:[%s1649_s11 + $0x3b0] sm:$0xff]  ;;  %478 = vst [vmem:[%s1654_s12 + $0x1c8] sm:$0xff] %v477_v57 }
  0x36   : > { %480 = vst [vmem:[%s1654_s12 + $0x1d0] sm:$0xff] %v479_v58  ;;  %482 = vst [vmem:[%s1654_s12 + $0x1d8] sm:$0xff] %v481_v59  ;;  %v483_v60 = vld [vmem:[%s1649_s11 + $0x3c0] sm:$0xff]  ;;  %v485_v61 = vld [vmem:[%s1649_s11 + $0x3d0] sm:$0xff] }
  0x37   : > { %v487_v62 = vld [vmem:[%s1649_s11 + $0x3e0] sm:$0xff]  ;;  %484 = vst [vmem:[%s1654_s12 + $0x1e0] sm:$0xff] %v483_v60  ;;  %486 = vst [vmem:[%s1654_s12 + $0x1e8] sm:$0xff] %v485_v61  ;;  %v489_v63 = vld [vmem:[%s1649_s11 + $0x3f0] sm:$0xff] }
  0x38   : > { %488 = vst [vmem:[%s1654_s12 + $0x1f0] sm:$0xff] %v487_v62  ;;  %490 = vst [vmem:[%s1654_s12 + $0x1f8] sm:$0xff] %v489_v63 }
  0x39 PF: > { %p1269_p7 = scmp.ge.s32.totalorder %s1561_s21, 1  ;;  %p511_p8 = scmp.lt.s32.totalorder %s1561_s21, 19 }
  0x3b   : > { %p512_p9 = pnand %p1269_p7, %p511_p8 }
  0x3c   : > { %s518_s13 = sand.u32 (!%p512_p9), 1, %s1537_s15   ;;  %s1271_s14 = sshll.u32 (!%p512_p9), %s1545_s17, 2 }
  0x3d   : > { %515 = sbr.rel (%p512_p9) target bundleno = 376 (0x178), region = 70  ;;  %s1270_s24 = sshll.u32 (!%p512_p9), %s518_s13, 9 }
  0x3e   : > { %p567_p10 = scmp.lt.s32.totalorder (!%p512_p9), %s1271_s14, 35  ;;  %s1273_s25 = sshll.u32 (!%p512_p9), %s1549_s18, 1 }
  0x3f   : > { %p577_p11 = scmp.lt.s32.totalorder (!%p512_p9), %s1273_s25, 3  ;;  %s1807_s13 = scalar_lea.vmem (!%p512_p9), [#allocation3], %s1270_s24 }
  0x40   : > { %p1277_p12 = scmp.ne.s32.totalorder (!%p512_p9), %s1545_s17, 0 }
  0x44   : > { %s1928_s14 = smov (!%p567_p10, %s1271_s14), 35  ;;  %s1930_s25 = smov (!%p577_p11, %s1273_s25), 3 }
  0x45   : > { %s1272_s26 = sshll.u32 %s1928_s14, 2  ;;  %s579_s15 = scalar_lea.vmem %s1912_s2, %s1930_s25  ;;  %v1563_v0 = vmov (!%p1277_p12), 0.0  }
  0x46   : > { %s1789_s30 = scalar_lea.vmem %s1910_s0, %s1272_s26  ;;  %s584_s18 = scalar_lea.vmem %s1913_s3, %s1930_s25  ;;  %600 = vst [vmem:[#allocation2] sm:$0xff] (!%p1277_p12), %v1563_v0  ;;  %601 = vst [vmem:[#allocation2 + $0x8] sm:$0xff] (!%p1277_p12), %v1563_v0 }
  0x47   : > { %s1276_s9 = sshll.u32 %s1930_s25, 3  ;;  %599 = sbr.rel (%p1277_p12) target bundleno = 78 (0x4e), region = 78 }
  0x48   : > { %s1805_s12 = scalar_lea.vmem %s1914_s4, %s1276_s9 }
  0x4e PF: > { %v1407_v1 = vld [vmem:[%s1807_s13 + $0x4] ss:$8 sps:$4 sm:$0xff]   ;;  %v1411_v3 = vld [vmem:[%s1807_s13] ss:$8 sps:$4 sm:$0xff]   ;;  %v1413_v5 = vld [vmem:[%s1807_s13 + $0x14] ss:$8 sps:$4 sm:$0xff]  }
  0x4f   : > { %v1409_v2 = vld [vmem:[%s1807_s13 + $0x104] ss:$8 sps:$4 sm:$0xff]   ;;  %1004 = vmatprep.subr.bf16.mxu0 %v1407_v1  ;;  %v1412_v4 = vld [vmem:[%s1807_s13 + $0x100] ss:$8 sps:$4 sm:$0xff]   ;;  %v1415_v6 = vld [vmem:[%s1807_s13 + $0x114] ss:$8 sps:$4 sm:$0xff]  }
  0x50   : > { %1045 = vmatprep.subr.bf16.mxu1 %v1409_v2  ;;  %1005 = vmatpush1.bf16.msra.mxu0 %v1411_v3  ;;  %v1417_v7 = vld [vmem:[%s1807_s13 + $0x10] ss:$8 sps:$4 sm:$0xff]   ;;  %v1419_v9 = vld [vmem:[%s1807_s13 + $0x24] ss:$8 sps:$4 sm:$0xff]   ;;  %v1423_v11 = vld [vmem:[%s1807_s13 + $0x20] ss:$8 sps:$4 sm:$0xff]  }
  0x51   : > { %1046 = vmatpush1.bf16.msra.mxu1 %v1412_v4  ;;  %1006 = vmatprep.subr.bf16.mxu0 %v1413_v5  ;;  %v1418_v8 = vld [vmem:[%s1807_s13 + $0x110] ss:$8 sps:$4 sm:$0xff]   ;;  %v1421_v10 = vld [vmem:[%s1807_s13 + $0x124] ss:$8 sps:$4 sm:$0xff]   ;;  %v1424_v12 = vld [vmem:[%s1807_s13 + $0x120] ss:$8 sps:$4 sm:$0xff]  }
  0x52   : > { %1047 = vmatprep.subr.bf16.mxu1 %v1415_v6  ;;  %v1425_v13 = vld [vmem:[%s1807_s13 + $0x34] ss:$8 sps:$4 sm:$0xff]   ;;  %v1429_v15 = vld [vmem:[%s1807_s13 + $0x30] ss:$8 sps:$4 sm:$0xff]   ;;  %v1431_v17 = vld [vmem:[%s1807_s13 + $0x44] ss:$8 sps:$4 sm:$0xff]  }
  0x53   : > { %v1427_v14 = vld [vmem:[%s1807_s13 + $0x134] ss:$8 sps:$4 sm:$0xff]   ;;  %v1430_v16 = vld [vmem:[%s1807_s13 + $0x130] ss:$8 sps:$4 sm:$0xff]   ;;  %v1433_v18 = vld [vmem:[%s1807_s13 + $0x144] ss:$8 sps:$4 sm:$0xff]  }
  0x54   : > { %1007 = vmatpush1.bf16.msra.mxu0 %v1417_v7  ;;  %v1435_v19 = vld [vmem:[%s1807_s13 + $0x40] ss:$8 sps:$4 sm:$0xff]   ;;  %v1437_v21 = vld [vmem:[%s1807_s13 + $0x54] ss:$8 sps:$4 sm:$0xff]   ;;  %v1441_v23 = vld [vmem:[%s1807_s13 + $0x50] ss:$8 sps:$4 sm:$0xff]  }
  0x55   : > { %1048 = vmatpush1.bf16.msra.mxu1 %v1418_v8  ;;  %1008 = vmatprep.subr.bf16.mxu0 %v1419_v9  ;;  %v1436_v20 = vld [vmem:[%s1807_s13 + $0x140] ss:$8 sps:$4 sm:$0xff]   ;;  %v1439_v22 = vld [vmem:[%s1807_s13 + $0x154] ss:$8 sps:$4 sm:$0xff]   ;;  %v1442_v24 = vld [vmem:[%s1807_s13 + $0x150] ss:$8 sps:$4 sm:$0xff]  }
  0x56   : > { %1049 = vmatprep.subr.bf16.mxu1 %v1421_v10  ;;  %v1443_v25 = vld [vmem:[%s1807_s13 + $0x64] ss:$8 sps:$4 sm:$0xff]   ;;  %v1447_v27 = vld [vmem:[%s1807_s13 + $0x60] ss:$8 sps:$4 sm:$0xff]   ;;  %v1449_v29 = vld [vmem:[%s1807_s13 + $0x74] ss:$8 sps:$4 sm:$0xff]  }
  0x57   : > { %v1445_v26 = vld [vmem:[%s1807_s13 + $0x164] ss:$8 sps:$4 sm:$0xff]   ;;  %v1448_v28 = vld [vmem:[%s1807_s13 + $0x160] ss:$8 sps:$4 sm:$0xff]   ;;  %v1451_v30 = vld [vmem:[%s1807_s13 + $0x174] ss:$8 sps:$4 sm:$0xff]  }
  0x58   : > { %1009 = vmatpush1.bf16.msra.mxu0 %v1423_v11  ;;  %v1453_v31 = vld [vmem:[%s1807_s13 + $0x70] ss:$8 sps:$4 sm:$0xff]   ;;  %v1455_v33 = vld [vmem:[%s1807_s13 + $0x84] ss:$8 sps:$4 sm:$0xff]   ;;  %v1459_v35 = vld [vmem:[%s1807_s13 + $0x80] ss:$8 sps:$4 sm:$0xff]  }
  0x59   : > { %1050 = vmatpush1.bf16.msra.mxu1 %v1424_v12  ;;  %1010 = vmatprep.subr.bf16.mxu0 %v1425_v13  ;;  %v1454_v32 = vld [vmem:[%s1807_s13 + $0x170] ss:$8 sps:$4 sm:$0xff]   ;;  %v1457_v34 = vld [vmem:[%s1807_s13 + $0x184] ss:$8 sps:$4 sm:$0xff]   ;;  %v1460_v36 = vld [vmem:[%s1807_s13 + $0x180] ss:$8 sps:$4 sm:$0xff]  }
  0x5a   : > { %1051 = vmatprep.subr.bf16.mxu1 %v1427_v14  ;;  %v1461_v37 = vld [vmem:[%s1807_s13 + $0x94] ss:$8 sps:$4 sm:$0xff]   ;;  %v1465_v39 = vld [vmem:[%s1807_s13 + $0x90] ss:$8 sps:$4 sm:$0xff]   ;;  %v1467_v41 = vld [vmem:[%s1807_s13 + $0xa4] ss:$8 sps:$4 sm:$0xff]  }
  0x5b   : > { %v1463_v38 = vld [vmem:[%s1807_s13 + $0x194] ss:$8 sps:$4 sm:$0xff]   ;;  %v1466_v40 = vld [vmem:[%s1807_s13 + $0x190] ss:$8 sps:$4 sm:$0xff]   ;;  %v1469_v42 = vld [vmem:[%s1807_s13 + $0x1a4] ss:$8 sps:$4 sm:$0xff]  }
  0x5c   : > { %1011 = vmatpush1.bf16.msra.mxu0 %v1429_v15  ;;  %v1471_v43 = vld [vmem:[%s1807_s13 + $0xa0] ss:$8 sps:$4 sm:$0xff]   ;;  %v1473_v45 = vld [vmem:[%s1807_s13 + $0xb4] ss:$8 sps:$4 sm:$0xff]   ;;  %v1477_v50 = vld [vmem:[%s1807_s13 + $0xb0] ss:$8 sps:$4 sm:$0xff]  }
  0x5d   : > { %1052 = vmatpush1.bf16.msra.mxu1 %v1430_v16  ;;  %1012 = vmatprep.subr.bf16.mxu0 %v1431_v17  ;;  %v1472_v44 = vld [vmem:[%s1807_s13 + $0x1a0] ss:$8 sps:$4 sm:$0xff]   ;;  %v1475_v46 = vld [vmem:[%s1807_s13 + $0x1b4] ss:$8 sps:$4 sm:$0xff]   ;;  %v1478_v51 = vld [vmem:[%s1807_s13 + $0x1b0] ss:$8 sps:$4 sm:$0xff]  }
  0x5e   : > { %1053 = vmatprep.subr.bf16.mxu1 %v1433_v18  ;;  %v604_v47 = vld [vmem:[%s1789_s30] sm:$0xff]  ;;  %v605_v49 = vld [vmem:[%s1789_s30 + $0x8] sm:$0xff]  ;;  %v1479_v53 = vld [vmem:[%s1807_s13 + $0xc4] ss:$8 sps:$4 sm:$0xff]   ;;  %p1346_p13 = scmp.ne.s32.totalorder %s1545_s17, 8 }
  0x5f   : > { %v1279_v48 = vcombine.high %v604_v47, %v604_v47  ;;  %v1281_v52 = vcombine.high %v605_v49, %v605_v49  ;;  %v1481_v54 = vld [vmem:[%s1807_s13 + $0x1c4] ss:$8 sps:$4 sm:$0xff]   ;;  %v1483_v55 = vld [vmem:[%s1807_s13 + $0xc0] ss:$8 sps:$4 sm:$0xff]   ;;  %v1485_v57 = vld [vmem:[%s1807_s13 + $0xd4] ss:$8 sps:$4 sm:$0xff]   ;;  %v1278_v5 = vcombine.low %v604_v47, %v604_v47  ;;  %v1280_v6 = vcombine.low %v605_v49, %v605_v49 }
  0x60   : > { %1013 = vmatpush1.bf16.msra.mxu0 %v1435_v19  ;;  %v1484_v56 = vld [vmem:[%s1807_s13 + $0x1c0] ss:$8 sps:$4 sm:$0xff]   ;;  %v1487_v58 = vld [vmem:[%s1807_s13 + $0x1d4] ss:$8 sps:$4 sm:$0xff]   ;;  %v1489_v59 = vld [vmem:[%s1807_s13 + $0xd0] ss:$8 sps:$4 sm:$0xff]  }
  0x61   : > { %1054 = vmatpush1.bf16.msra.mxu1 %v1436_v20  ;;  %1014 = vmatprep.subr.bf16.mxu0 %v1437_v21  ;;  %v1490_v60 = vld [vmem:[%s1807_s13 + $0x1d0] ss:$8 sps:$4 sm:$0xff]   ;;  %v1491_v61 = vld [vmem:[%s1807_s13 + $0xe4] ss:$8 sps:$4 sm:$0xff]   ;;  %v1495_v63 = vld [vmem:[%s1807_s13 + $0xe0] ss:$8 sps:$4 sm:$0xff]   ;;  %v1098_v21 = vlaneseq (!%p1346_p13) }
  0x62   : > { %1055 = vmatprep.subr.bf16.mxu1 %v1439_v22  ;;  %1036 = vmatprep.mubr.bf16.mxu0 %v1279_v48  ;;  %v1493_v62 = vld [vmem:[%s1807_s13 + $0x1e4] ss:$8 sps:$4 sm:$0xff]   ;;  %v1496_v0 = vld [vmem:[%s1807_s13 + $0x1e0] ss:$8 sps:$4 sm:$0xff]   ;;  %v1497_v1 = vld [vmem:[%s1807_s13 + $0xf4] ss:$8 sps:$4 sm:$0xff]  }
  0x63   : > { %1077 = vmatprep.mubr.bf16.mxu1 %v1281_v52  ;;  %v1499_v2 = vld [vmem:[%s1807_s13 + $0x1f4] ss:$8 sps:$4 sm:$0xff]   ;;  %v1501_v3 = vld [vmem:[%s1807_s13 + $0xf0] ss:$8 sps:$4 sm:$0xff]   ;;  %v1099_v22 = vshrl.u32 (!%p1346_p13), %v1098_v21, 7 }
  0x64   : > { %1015 = vmatpush1.bf16.msra.mxu0 %v1441_v23  ;;  %v1502_v4 = vld [vmem:[%s1807_s13 + $0x1f0] ss:$8 sps:$4 sm:$0xff]  }
  0x65   : > { %1056 = vmatpush1.bf16.msra.mxu1 %v1442_v24  ;;  %1016 = vmatprep.subr.bf16.mxu0 %v1443_v25  ;;  %v602_v8 = vld [vmem:[#allocation2] sm:$0xff]  ;;  %v603_v12 = vld [vmem:[#allocation2 + $0x8] sm:$0xff]  ;;  %v1100_v25 = vsub.s32 (!%p1346_p13), 0, %v1099_v22 }
  0x66   : > { %1057 = vmatprep.subr.bf16.mxu1 %v1445_v26  ;;  %v1096_v23 = vld [vmem:[%s579_s15] sm:$0x3] (!%p1346_p13)  ;;  %v1104_v26 = vsub.s32 (!%p1346_p13), 1, %v1099_v22 }
  0x67   : > { %v1110_v24 = vld [vmem:[%s584_s18] sm:$0x3] (!%p1346_p13) }
  0x68   : > { %1017 = vmatpush1.bf16.msra.mxu0 %v1447_v27 }
  0x69   : > { %1058 = vmatpush1.bf16.msra.mxu1 %v1448_v28  ;;  %1018 = vmatprep.subr.bf16.mxu0 %v1449_v29  ;;  %v1101_v29 = vrot.slane (!%p1346_p13), %v1096_v23, %v1100_v25 }
  0x6a   : > { %1059 = vmatprep.subr.bf16.mxu1 %v1451_v30  ;;  %v1115_v30 = vrot.slane (!%p1346_p13), %v1110_v24, %v1100_v25 }
  0x6c   : > { %1019 = vmatpush1.bf16.msra.mxu0 %v1453_v31  ;;  %v1105_v31 = vrot.slane (!%p1346_p13), %v1096_v23, %v1104_v26 }
  0x6d   : > { %1060 = vmatpush1.bf16.msra.mxu1 %v1454_v32  ;;  %1020 = vmatprep.subr.bf16.mxu0 %v1455_v33  ;;  %v1119_v32 = vrot.slane (!%p1346_p13), %v1110_v24, %v1104_v26 }
  0x6e   : > { %1061 = vmatprep.subr.bf16.mxu1 %v1457_v34 }
  0x70   : > { %1021 = vmatpush1.bf16.msra.mxu0 %v1459_v35 }
  0x71   : > { %1062 = vmatpush1.bf16.msra.mxu1 %v1460_v36  ;;  %1022 = vmatprep.subr.bf16.mxu0 %v1461_v37 }
  0x72   : > { %1063 = vmatprep.subr.bf16.mxu1 %v1463_v38 }
  0x74   : > { %1023 = vmatpush1.bf16.msra.mxu0 %v1465_v39 }
  0x75   : > { %1064 = vmatpush1.bf16.msra.mxu1 %v1466_v40  ;;  %1024 = vmatprep.subr.bf16.mxu0 %v1467_v41 }
  0x76   : > { %1065 = vmatprep.subr.bf16.mxu1 %v1469_v42 }
  0x78   : > { %1025 = vmatpush1.bf16.msra.mxu0 %v1471_v43 }
  0x79   : > { %1066 = vmatpush1.bf16.msra.mxu1 %v1472_v44  ;;  %1026 = vmatprep.subr.bf16.mxu0 %v1473_v45 }
  0x7a   : > { %1067 = vmatprep.subr.bf16.mxu1 %v1475_v46 }
  0x7c   : > { %1027 = vmatpush1.bf16.msra.mxu0 %v1477_v50 }
  0x7d   : > { %1068 = vmatpush1.bf16.msra.mxu1 %v1478_v51  ;;  %1028 = vmatprep.subr.bf16.mxu0 %v1479_v53 }
  0x7e   : > { %1069 = vmatprep.subr.bf16.mxu1 %v1481_v54 }
  0x80   : > { %1029 = vmatpush1.bf16.msra.mxu0 %v1483_v55 }
  0x81   : > { %1070 = vmatpush1.bf16.msra.mxu1 %v1484_v56  ;;  %1030 = vmatprep.subr.bf16.mxu0 %v1485_v57 }
  0x82   : > { %1071 = vmatprep.subr.bf16.mxu1 %v1487_v58 }
  0x84   : > { %1031 = vmatpush1.bf16.msra.mxu0 %v1489_v59 }
  0x85   : > { %1072 = vmatpush1.bf16.msra.mxu1 %v1490_v60  ;;  %1032 = vmatprep.subr.bf16.mxu0 %v1491_v61 }
  0x86   : > { %1073 = vmatprep.subr.bf16.mxu1 %v1493_v62 }
  0x88   : > { %1033 = vmatpush1.bf16.msra.mxu0 %v1495_v63 }
  0x89   : > { %1074 = vmatpush1.bf16.msra.mxu1 %v1496_v0  ;;  %1034 = vmatprep.subr.bf16.mxu0 %v1497_v1 }
  0x8a   : > { %1075 = vmatprep.subr.bf16.mxu1 %v1499_v2 }
  0x8c   : > { %1035 = vmatpush1.bf16.msra.mxu0 %v1501_v3 }
  0x8d   : > { %1076 = vmatpush1.bf16.msra.mxu1 %v1502_v4 }
  0x8f   : > { %1037 = vmatmul.mubr.bf16.vlgmr.msra.gmra.mrb[0].mxu0 %v1278_v5 }
  0x90   : > { %1078 = vmatmul.mubr.bf16.vlgmr.msra.gmra.mrb[0].mxu1 %v1280_v6 }
 0x162   : > { %v1038_v7 = vpop.f32.mrb[0].mxu0 }
 0x163   : > { %v1079_v9 = vpop.f32.mrb[0].mxu1  ;;  %v1040_v11 = vpop.f32.mrb[1].mxu0  ;;  %1093 = sbr.rel (%p1346_p13) target bundleno = 376 (0x178), region = 82 }
 0x164   : > { %v1080_v10 = vadd.f32 %v1079_v9, %v1038_v7  ;;  %v1081_v13 = vpop.f32.mrb[1].mxu1  ;;  %v1042_v15 = vpop.f32.mrb[2].mxu0 }
 0x165   : > { %v1082_v14 = vadd.f32 %v1081_v13, %v1040_v11  ;;  %v1083_v16 = vpop.f32.mrb[2].mxu1  ;;  %v1043_v18 = vpop.f32.mrb[3].mxu0 }
 0x166   : > { %v1086_v17 = vadd.f32 %v1080_v10, %v602_v8  ;;  %v1084_v19 = vpop.f32.mrb[3].mxu1 }
 0x167   : > { %v1087_v20 = vadd.f32 %v1082_v14, %v603_v12 }
 0x168   : > { %1088 = vst [vmem:[#allocation2] sm:$0xff] %v1086_v17 }
 0x169   : > { %1089 = vst [vmem:[#allocation2 + $0x8] sm:$0xff] %v1087_v20 }
 0x16f   : > { %v1094_v27 = vld [vmem:[#allocation2] sm:$0xff] }
 0x170   : > { %v1095_v28 = vld [vmem:[#allocation2 + $0x8] sm:$0xff]  ;;  %v1108_v33 = vmul.f32 %v1101_v29, %v1094_v27 }
 0x171   : > { %v1109_v34 = vmul.f32 %v1105_v31, %v1095_v28 }
 0x172   : > { %v1122_v35 = vadd.f32 %v1115_v30, %v1108_v33 }
 0x173   : > { %v1123_v36 = vadd.f32 %v1119_v32, %v1109_v34 }
 0x174   : > { %v1124_v37 = vmax.f32 %v1122_v35, 0.0 }
 0x175   : > { %v1125_v38 = vmax.f32 %v1123_v36, 0.0 }
 0x176   : > { %1126 = vst [vmem:[%s1805_s12] sm:$0xff] %v1124_v37 }
 0x177   : > { %1127 = vst [vmem:[%s1805_s12 + $0x8] sm:$0xff] %v1125_v38 }
 0x178 PF: > { %s14_s21 = sadd.s32 1, %s1561_s21   ;;  %s1915_s15 = smov %s1541_s16 }
 0x179   : > { %p11_p0 = scmp.ge.s32.totalorder %s14_s21, 20   ;;  %s1916_s16 = smov %s1640_s28 }
 0x17a   : > { %s1917_s17 = smov %s1553_s19  ;;  %s1918_s18 = smov %s1557_s20 }
 0x17b   : > { %s1919_s19 = smov %s1922_s22  ;;  %s1920_s20 = smov %s1926_s23 }
 0x17c   :  { %13 = sbr.rel (!%p11_p0) target bundleno = 4 (0x4), region = 126 }

// kernel: resnet18_forward.44
= control target key start
LH: loop header
LB: loop body
LE: loop exit
PB: predicated region body
PF: predicated region fallthrough
CT: control target
= control target key end

     0   :  { %s46_s0 = inlined_call_operand.vmem [shape: f32[2,1,512], index: 0, kind: input, shape index: {}]   ;;  %s47_s1 = inlined_call_operand.vmem [shape: f32[2,512], index: 1, kind: output, shape index: {}]  }
   0x1   :  { %v29_v0 = vld [vmem:[%s46_s0] sm:$0xff]  }
   0x2   :  { %28 = vst.sshfl [vmem:[%s47_s1] sm:$0xff pattern:$0x75316420] %v29_v0 }

// kernel: resnet18_forward.45
= control target key start
LH: loop header
LB: loop body
LE: loop exit
PB: predicated region body
PF: predicated region fallthrough
CT: control target
= control target key end

     0   :  { %s657_s1 = inlined_call_operand.vmem [shape: bf16[512,128], index: 1, kind: input, shape index: {}]   ;;  %s658_s0 = inlined_call_operand.vmem [shape: bf16[8,512], index: 0, kind: input, shape index: {}]   ;;  %s659_s2 = inlined_call_operand.vmem [shape: f32[1,128], index: 2, kind: input, shape index: {}]   ;;  %s660_s3 = inlined_call_operand.vmem [shape: f32[1,128], index: 3, kind: input, shape index: {}]   ;;  %s661_s4 = inlined_call_operand.vmem [shape: f32[8,128], index: 4, kind: output, shape index: {}]  }
   0x1   :  { %v485_v0 = vld [vmem:[%s657_s1 + $0x40] sm:$0xff]   ;;  %v489_v4 = vld [vmem:[%s657_s1 + $0x48] sm:$0xff]   ;;  %v493_v8 = vld [vmem:[%s657_s1 + $0x50] sm:$0xff]  }
   0x2   :  { %v486_v1 = vld [vmem:[%s657_s1 + $0xc0] sm:$0xff]   ;;  %441 = vmatprep.subr.bf16.mxu0 %v485_v0  ;;  %v490_v5 = vld [vmem:[%s657_s1 + $0xc8] sm:$0xff]   ;;  %v494_v9 = vld [vmem:[%s657_s1 + $0xd0] sm:$0xff]  }
   0x3   :  { %v487_v2 = vld [vmem:[%s657_s1] sm:$0xff]   ;;  %463 = vmatprep.subr.bf16.mxu1 %v486_v1  ;;  %v491_v6 = vld [vmem:[%s657_s1 + $0x8] sm:$0xff]   ;;  %v495_v10 = vld [vmem:[%s657_s1 + $0x10] sm:$0xff]  }
   0x4   :  { %v488_v3 = vld [vmem:[%s657_s1 + $0x80] sm:$0xff]   ;;  %442 = vmatpush3.bf16.msra.mxu0 %v487_v2  ;;  %v492_v7 = vld [vmem:[%s657_s1 + $0x88] sm:$0xff]   ;;  %v496_v11 = vld [vmem:[%s657_s1 + $0x90] sm:$0xff]  }
   0x5   :  { %464 = vmatpush3.bf16.msra.mxu1 %v488_v3  ;;  %443 = vmatprep.subr.bf16.mxu0 %v489_v4  ;;  %v497_v12 = vld [vmem:[%s657_s1 + $0x58] sm:$0xff]   ;;  %v501_v16 = vld [vmem:[%s657_s1 + $0x60] sm:$0xff]   ;;  %v505_v20 = vld [vmem:[%s657_s1 + $0x68] sm:$0xff]  }
   0x6   :  { %465 = vmatprep.subr.bf16.mxu1 %v490_v5  ;;  %v498_v13 = vld [vmem:[%s657_s1 + $0xd8] sm:$0xff]   ;;  %v502_v17 = vld [vmem:[%s657_s1 + $0xe0] sm:$0xff]   ;;  %v506_v21 = vld [vmem:[%s657_s1 + $0xe8] sm:$0xff]  }
   0x7   :  { %v499_v14 = vld [vmem:[%s657_s1 + $0x18] sm:$0xff]   ;;  %v503_v18 = vld [vmem:[%s657_s1 + $0x20] sm:$0xff]   ;;  %v507_v22 = vld [vmem:[%s657_s1 + $0x28] sm:$0xff]  }
   0x8   :  { %444 = vmatpush3.bf16.msra.mxu0 %v491_v6  ;;  %v500_v15 = vld [vmem:[%s657_s1 + $0x98] sm:$0xff]   ;;  %v504_v19 = vld [vmem:[%s657_s1 + $0xa0] sm:$0xff]   ;;  %v508_v23 = vld [vmem:[%s657_s1 + $0xa8] sm:$0xff]  }
   0x9   :  { %466 = vmatpush3.bf16.msra.mxu1 %v492_v7  ;;  %445 = vmatprep.subr.bf16.mxu0 %v493_v8  ;;  %v509_v24 = vld [vmem:[%s657_s1 + $0x70] sm:$0xff]   ;;  %v513_v28 = vld [vmem:[%s657_s1 + $0x78] sm:$0xff]   ;;  %v24_v32 = vld [vmem:[%s658_s0] sm:$0xff] }
   0xa   :  { %467 = vmatprep.subr.bf16.mxu1 %v494_v9  ;;  %v510_v25 = vld [vmem:[%s657_s1 + $0xf0] sm:$0xff]   ;;  %v514_v29 = vld [vmem:[%s657_s1 + $0xf8] sm:$0xff]   ;;  %v25_v33 = vld [vmem:[%s658_s0 + $0x8] sm:$0xff]  ;;  %v403_v34 = vcombine.low %v24_v32, %v24_v32  ;;  %v404_v35 = vcombine.high %v24_v32, %v24_v32 }
   0xb   :  { %v511_v26 = vld [vmem:[%s657_s1 + $0x30] sm:$0xff]   ;;  %v515_v30 = vld [vmem:[%s657_s1 + $0x38] sm:$0xff]   ;;  %v405_v36 = vcombine.low %v25_v33, %v25_v33  ;;  %v406_v37 = vcombine.high %v25_v33, %v25_v33  ;;  %v439_v46 = vld [vmem:[%s659_s2] ss:$0 sm:$0xff] }
   0xc   :  { %446 = vmatpush3.bf16.msra.mxu0 %v495_v10  ;;  %v512_v27 = vld [vmem:[%s657_s1 + $0xb0] sm:$0xff]   ;;  %v516_v31 = vld [vmem:[%s657_s1 + $0xb8] sm:$0xff]   ;;  %328 = vmatprep.mubr.bf16.mxu0 %v404_v35  ;;  %v440_v50 = vld [vmem:[%s660_s3] ss:$0 sm:$0xff] }
   0xd   :  { %468 = vmatpush3.bf16.msra.mxu1 %v496_v11  ;;  %447 = vmatprep.subr.bf16.mxu0 %v497_v12 }
   0xe   :  { %469 = vmatprep.subr.bf16.mxu1 %v498_v13  ;;  %368 = vmatprep.mubr.bf16.mxu1 %v406_v37 }
  0x10   :  { %448 = vmatpush3.bf16.msra.mxu0 %v499_v14 }
  0x11   :  { %470 = vmatpush3.bf16.msra.mxu1 %v500_v15  ;;  %449 = vmatprep.subr.bf16.mxu0 %v501_v16 }
  0x12   :  { %471 = vmatprep.subr.bf16.mxu1 %v502_v17 }
  0x14   :  { %450 = vmatpush3.bf16.msra.mxu0 %v503_v18 }
  0x15   :  { %472 = vmatpush3.bf16.msra.mxu1 %v504_v19  ;;  %451 = vmatprep.subr.bf16.mxu0 %v505_v20 }
  0x16   :  { %473 = vmatprep.subr.bf16.mxu1 %v506_v21 }
  0x18   :  { %452 = vmatpush3.bf16.msra.mxu0 %v507_v22 }
  0x19   :  { %474 = vmatpush3.bf16.msra.mxu1 %v508_v23  ;;  %453 = vmatprep.subr.bf16.mxu0 %v509_v24 }
  0x1a   :  { %475 = vmatprep.subr.bf16.mxu1 %v510_v25 }
  0x1c   :  { %454 = vmatpush3.bf16.msra.mxu0 %v511_v26 }
  0x1d   :  { %476 = vmatpush3.bf16.msra.mxu1 %v512_v27  ;;  %455 = vmatprep.subr.bf16.mxu0 %v513_v28 }
  0x1e   :  { %477 = vmatprep.subr.bf16.mxu1 %v514_v29 }
  0x20   :  { %456 = vmatpush3.bf16.msra.mxu0 %v515_v30 }
  0x21   :  { %478 = vmatpush3.bf16.msra.mxu1 %v516_v31 }
  0x23   :  { %329 = vmatmul.mubr.bf16.vlgmr.msra.gmra.mrb[0].mxu0 %v403_v34 }
  0x24   :  { %369 = vmatmul.mubr.bf16.vlgmr.msra.gmra.mrb[0].mxu1 %v405_v36 }
  0xf6   :  { %v457_v38 = vpop.f32.mrb[0].mxu0 }
  0xf7   :  { %v479_v39 = vpop.f32.mrb[0].mxu1  ;;  %v458_v40 = vpop.f32.mrb[1].mxu0 }
  0xf8   :  { %v480_v41 = vpop.f32.mrb[1].mxu1  ;;  %v459_v42 = vadd.f32 %v458_v40, %v457_v38  ;;  %v460_v44 = vpop.f32.mrb[2].mxu0 }
  0xf9   :  { %v481_v43 = vadd.f32 %v480_v41, %v479_v39  ;;  %v482_v45 = vpop.f32.mrb[2].mxu1  ;;  %v461_v47 = vpop.f32.mrb[3].mxu0 }
  0xfa   :  { %v483_v48 = vpop.f32.mrb[3].mxu1 }
  0xfb   :  { %v371_v49 = vadd.f32 %v481_v43, %v459_v42 }
  0xfd   :  { %v389_v51 = vmul.f32 %v439_v46, %v371_v49 }
  0xff   :  { %v397_v52 = vadd.f32 %v440_v50, %v389_v51 }
 0x101   :  { %398 = vst [vmem:[%s661_s4] sm:$0xff] %v397_v52 }

</bundles_post_ra>
